<compile_context>
chip_gen: v7x
topology: tpu7x:2x2x1
jax: 0.10.0
libtpu: 0.0.40
codegen_flags: <defaults>
</compile_context>

<pallas_src>
import jax
import jax.numpy as jnp
from jax.experimental import pallas as pl
from jax.experimental.pallas import tpu as pltpu

D = 768        # model dim (fixed by the module's Linear(768, 768))
H = 12         # heads
HD = 64        # head dim
FF = 3072      # MLP hidden (Linear(768, 3072))
FT = 1536      # in-kernel MLP hidden chunk (FF // FT chunks per Q-tile)
EPS = 1e-5     # torch.nn.LayerNorm default eps


def _layernorm(x, g, b):
    # x: (T, D), g/b: (1, D); all f32
    mu = jnp.mean(x, axis=-1, keepdims=True)
    var = jnp.mean((x - mu) ** 2, axis=-1, keepdims=True)
    return (x - mu) * jax.lax.rsqrt(var + EPS) * g + b


def _erf(x):
    # Abramowitz & Stegun 7.1.26 (max abs err ~1.5e-7); only exp/abs/where/mul.
    a1, a2, a3, a4, a5 = 0.254829592, -0.284496736, 1.421413741, -1.453152027, 1.061405429
    p = 0.3275911
    ax = jnp.abs(x)
    t = 1.0 / (1.0 + p * ax)
    poly = t * (a1 + t * (a2 + t * (a3 + t * (a4 + t * a5))))
    y = 1.0 - poly * jnp.exp(-ax * ax)
    return jnp.where(x >= 0, y, -y)


def _gelu_exact(x):
    # matches torch.nn.GELU() (erf formulation)
    return 0.5 * x * (1.0 + _erf(x * 0.7071067811865476))


# ---------------------------------------------------------------------------
# Kernel 1: qkv = LayerNorm(x) @ Wqkv + bqkv   (q part pre-scaled by 0.125)
# grid = (B, S_pad // Tq)
# ---------------------------------------------------------------------------
def qkv_kernel(x_ref, lnw_ref, lnb_ref, wqkv_ref, bqkv_ref, qkv_ref):
    ln = _layernorm(x_ref[0], lnw_ref[...], lnb_ref[...])            # (Tq, D) f32
    qkv = jnp.dot(ln.astype(jnp.bfloat16), wqkv_ref[...],
                  preferred_element_type=jnp.float32) + bqkv_ref[...]
    qkv_ref[0] = qkv.astype(jnp.bfloat16)                            # (Tq, 3D)


# ---------------------------------------------------------------------------
# Kernel 2: attention, all 12 heads per step; K/V are full (S_pad, D) blocks
# whose index depends only on b, so they are DMA'd once per batch element.
# grid = (B, S_pad // Tqa)
# ---------------------------------------------------------------------------
def make_attn_kernel(s_real, s_pad):
    need_mask = s_pad != s_real   # padded key positions must not attend

    def attn_kernel(q_ref, k_ref, v_ref, o_ref):
        q = q_ref[0]              # (Tqa, D)   bf16 (already scaled by 0.125)
        k = k_ref[0]              # (S_pad, D) bf16
        v = v_ref[0]              # (S_pad, D) bf16
        if need_mask:
            kbias = jnp.where(
                jax.lax.broadcasted_iota(jnp.int32, (1, s_pad), 1) < s_real,
                0.0, -1e30).astype(jnp.float32)                      # (1, S_pad)
        outs = []
        for h in range(H):        # static unrolled head loop, 64-wide slices
            sl = slice(h * HD, (h + 1) * HD)
            qh, kh, vh = q[:, sl], k[:, sl], v[:, sl]
            s = jax.lax.dot_general(qh, kh, (((1,), (1,)), ((), ())),
                                    preferred_element_type=jnp.float32)  # (Tqa,S)
            if need_mask:
                s = s + kbias
            s = s - jnp.max(s, axis=-1, keepdims=True)
            p = jnp.exp(s)                                           # unnormalized
            denom = jnp.sum(p, axis=-1, keepdims=True)               # (Tqa, 1)
            oh = jnp.dot(p.astype(jnp.bfloat16), vh,
                         preferred_element_type=jnp.float32)         # (Tqa, 64)
            outs.append(oh * pl.reciprocal(denom, approx=True))      # deferred norm
        o_ref[0] = jnp.concatenate(outs, axis=-1).astype(jnp.bfloat16)   # (Tqa, D)

    return attn_kernel


# ---------------------------------------------------------------------------
# Kernel 3: x1 = attn @ Wo + bo + x ;  y = GELU(LN2(x1) @ W1 + b1) @ W2 + b2 + x1
# grid = (B, S_pad // Tq). W1/W2 are full resident blocks; FF chunked in-kernel.
# ---------------------------------------------------------------------------
def out_mlp_kernel(attn_ref, x_ref, wo_ref, bo_ref, ln2w_ref, ln2b_ref,
                   w1_ref, b1_ref, w2_ref, b2_ref, o_ref):
    x1 = (jnp.dot(attn_ref[0], wo_ref[...],
                  preferred_element_type=jnp.float32)
          + bo_ref[...] + x_ref[0])                                  # (Tq, D) f32
    h2 = _layernorm(x1, ln2w_ref[...], ln2b_ref[...]).astype(jnp.bfloat16)
    acc = x1 + b2_ref[...]                                           # residual + b2
    for f in range(FF // FT):                                        # 128-aligned static slices
        lo = f * FT
        hidden = jnp.dot(h2, w1_ref[:, lo:lo + FT],
                         preferred_element_type=jnp.float32) + b1_ref[:, lo:lo + FT]
        act = _gelu_exact(hidden).astype(jnp.bfloat16)
        acc = acc + jnp.dot(act, w2_ref[lo:lo + FT, :],
                            preferred_element_type=jnp.float32)
    o_ref[0] = acc                                                   # single lane-dense store


# ---------------------------------------------------------------------------
# Wrapper
# ---------------------------------------------------------------------------
def _vmem_limit_bytes():
    # Per-generation scoped-VMEM budget: ~3/4 of physical, capped at 100 MiB.
    # v5e/v6e (128 MiB) -> ~96 MiB; v7x (64 MiB) -> 48 MiB; safe fallback 48 MiB.
    try:
        cap = int(pltpu.get_tpu_info().vmem_capacity_bytes)
    except Exception:
        cap = 64 * 1024 * 1024
    return min(cap * 3 // 4, 100 * 1024 * 1024)


def layer_forward(x, p):
    B, S, d = x.shape
    assert d == D and D == H * HD
    s_pad = ((S + 127) // 128) * 128

    vmem_limit = _vmem_limit_bytes()
    big_vmem = vmem_limit >= 80 * 1024 * 1024

    # Q-tile for K1/K3: biggest that divides s_pad within the VMEM budget; on
    # small-VMEM (2-TensorCore) chips prefer enough grid steps for megacore.
    tq = 128
    for cand in ((512, 256) if big_vmem else (256,)):
        if s_pad % cand == 0:
            tq = cand
            break
    if not big_vmem:
        while tq > 128 and B * (s_pad // tq) < 8:
            tq //= 2
    nq = s_pad // tq

    tqa = 128                      # attention q-tile: keeps live f32 scores small
    nqa = s_pad // tqa

    x_p = jnp.pad(x, ((0, 0), (0, s_pad - S), (0, 0))) if s_pad != S else x

    # Host-side prep: fuse Q/K/V into one (D,3D) weight, pre-scale q by 1/8,
    # k has no bias; cast matmul weights to bf16 (f32 accumulation in-kernel).
    wqkv = jnp.concatenate([p["wq"] * 0.125, p["wk"], p["wv"]],
                           axis=1).astype(jnp.bfloat16)               # (D, 3D)
    bqkv = jnp.concatenate([p["bq"] * 0.125, jnp.zeros_like(p["bq"]), p["bv"]],
                           axis=1)                                    # (1, 3D) f32
    wo = p["wo"].astype(jnp.bfloat16)
    w1 = p["w1"].astype(jnp.bfloat16)
    w2 = p["w2"].astype(jnp.bfloat16)

    # --- K1: ln1 + fused QKV projection -----------------------------------
    qkv = pl.pallas_call(
        qkv_kernel,
        out_shape=jax.ShapeDtypeStruct((B, s_pad, 3 * D), jnp.bfloat16),
        grid_spec=pltpu.PrefetchScalarGridSpec(
            num_scalar_prefetch=0,
            grid=(B, nq),
            in_specs=[
                pl.BlockSpec((1, tq, D), lambda b, i: (b, i, 0)),     # x
                pl.BlockSpec((1, D), lambda b, i: (0, 0)),            # ln1 gamma
                pl.BlockSpec((1, D), lambda b, i: (0, 0)),            # ln1 beta
                pl.BlockSpec((D, 3 * D), lambda b, i: (0, 0)),        # Wqkv (resident)
                pl.BlockSpec((1, 3 * D), lambda b, i: (0, 0)),        # bqkv
            ],
            out_specs=pl.BlockSpec((1, tq, 3 * D), lambda b, i: (b, i, 0)),
        ),
        compiler_params=pltpu.CompilerParams(
            dimension_semantics=("parallel", "parallel"),
            vmem_limit_bytes=vmem_limit),
    )(x_p, p["ln1_w"], p["ln1_b"], wqkv, bqkv)

    # --- K2: attention, all heads per step, K/V DMA'd once per batch -------
    attn = pl.pallas_call(
        make_attn_kernel(S, s_pad),
        out_shape=jax.ShapeDtypeStruct((B, s_pad, D), jnp.bfloat16),
        grid_spec=pltpu.PrefetchScalarGridSpec(
            num_scalar_prefetch=0,
            grid=(B, nqa),
            in_specs=[
                pl.BlockSpec((1, tqa, D), lambda b, i: (b, i, 0)),    # q tile
                pl.BlockSpec((1, s_pad, D), lambda b, i: (b, 0, 1)),  # K (full, per-b)
                pl.BlockSpec((1, s_pad, D), lambda b, i: (b, 0, 2)),  # V (full, per-b)
            ],
            out_specs=pl.BlockSpec((1, tqa, D), lambda b, i: (b, i, 0)),
        ),
        compiler_params=pltpu.CompilerParams(
            dimension_semantics=("parallel", "parallel"),
            vmem_limit_bytes=vmem_limit),
    )(qkv, qkv, qkv)

    # --- K3: out projection + residual + ln2 + MLP + residual --------------
    y = pl.pallas_call(
        out_mlp_kernel,
        out_shape=jax.ShapeDtypeStruct((B, s_pad, D), jnp.float32),
        grid_spec=pltpu.PrefetchScalarGridSpec(
            num_scalar_prefetch=0,
            grid=(B, nq),
            in_specs=[
                pl.BlockSpec((1, tq, D), lambda b, i: (b, i, 0)),     # attn
                pl.BlockSpec((1, tq, D), lambda b, i: (b, i, 0)),     # x (residual)
                pl.BlockSpec((D, D), lambda b, i: (0, 0)),            # Wo (resident)
                pl.BlockSpec((1, D), lambda b, i: (0, 0)),            # bo
                pl.BlockSpec((1, D), lambda b, i: (0, 0)),            # ln2 gamma
                pl.BlockSpec((1, D), lambda b, i: (0, 0)),            # ln2 beta
                pl.BlockSpec((D, FF), lambda b, i: (0, 0)),           # W1 (resident)
                pl.BlockSpec((1, FF), lambda b, i: (0, 0)),           # b1
                pl.BlockSpec((FF, D), lambda b, i: (0, 0)),           # W2 (resident)
                pl.BlockSpec((1, D), lambda b, i: (0, 0)),            # b2
            ],
            out_specs=pl.BlockSpec((1, tq, D), lambda b, i: (b, i, 0)),
        ),
        compiler_params=pltpu.CompilerParams(
            dimension_semantics=("parallel", "parallel"),
            vmem_limit_bytes=vmem_limit),
    )(attn, x_p, wo, p["bo"], p["ln2_w"], p["ln2_b"], w1, p["b1"], w2, p["b2"])

    return y[:, :S, :] if s_pad != S else y


# ---------------------------------------------------------------------------
# Pure-JAX reference (f32, highest precision) for correctness check
# ---------------------------------------------------------------------------
def layer_ref(x, p):
    hp = jax.lax.Precision.HIGHEST

    def ln(z, g, b):
        mu = z.mean(-1, keepdims=True)
        var = ((z - mu) ** 2).mean(-1, keepdims=True)
        return (z - mu) / jnp.sqrt(var + EPS) * g + b

    B, S, _ = x.shape
    h = ln(x, p["ln1_w"], p["ln1_b"])
    q = (jnp.dot(h, p["wq"], precision=hp) + p["bq"]) * 0.125
    k = jnp.dot(h, p["wk"], precision=hp)
    v = jnp.dot(h, p["wv"], precision=hp) + p["bv"]
    qh = q.reshape(B, S, H, HD).transpose(0, 2, 1, 3)
    kh = k.reshape(B, S, H, HD).transpose(0, 2, 1, 3)
    vh = v.reshape(B, S, H, HD).transpose(0, 2, 1, 3)
    s = jnp.einsum("bhsd,bhtd->bhst", qh, kh, precision=hp)
    a = jax.nn.softmax(s, axis=-1)
    o = jnp.einsum("bhst,bhtd->bhsd", a, vh,
                   precision=hp).transpose(0, 2, 1, 3).reshape(B, S, D)
    x1 = jnp.dot(o, p["wo"], precision=hp) + p["bo"] + x
    h2 = ln(x1, p["ln2_w"], p["ln2_b"])
    m = jax.nn.gelu(jnp.dot(h2, p["w1"], precision=hp) + p["b1"], approximate=False)
    return jnp.dot(m, p["w2"], precision=hp) + p["b2"] + x1


def make_params(key):
    ks = jax.random.split(key, 12)
    n = lambda k, shape, s: (s * jax.random.normal(k, shape)).astype(jnp.float32)
    return {
        "ln1_w": 1.0 + n(ks[0], (1, D), 0.01),
        "ln1_b": n(ks[1], (1, D), 0.01),
        "wq": n(ks[2], (D, D), 0.02), "bq": n(ks[3], (1, D), 0.02),
        "wk": n(ks[4], (D, D), 0.02),
        "wv": n(ks[5], (D, D), 0.02), "bv": n(ks[6], (1, D), 0.02),
        "wo": n(ks[7], (D, D), 0.02), "bo": n(ks[8], (1, D), 0.02),
        "ln2_w": 1.0 + n(ks[9], (1, D), 0.01),
        "ln2_b": n(ks[10], (1, D), 0.01),
        "w1": n(ks[11], (D, FF), 0.02),
        "b1": n(jax.random.fold_in(key, 100), (1, FF), 0.02),
        "w2": n(jax.random.fold_in(key, 101), (FF, D), 0.02),
        "b2": n(jax.random.fold_in(key, 102), (1, D), 0.02),
    }


if __name__ == "__main__":
    key = jax.random.PRNGKey(0)
    kx, kp = jax.random.split(key)
    B, S = 2, 256   # small sequence (module hardcodes 1500; kernels are seq-agnostic)
    x = jax.random.normal(kx, (B, S, D), dtype=jnp.float32)
    params = make_params(kp)

    out = jax.block_until_ready(layer_forward(x, params))
    ref = jax.block_until_ready(layer_ref(x, params))

    assert out.shape == (B, S, D) and out.dtype == jnp.float32
    max_err = float(jnp.max(jnp.abs(out - ref)))
    # bf16 matmul inputs with f32 accumulation + approx reciprocal -> modest tolerance
    assert jnp.allclose(out, ref, rtol=3e-2, atol=3e-2), max_err
    print("KERNEL_OK")
</pallas_src>

<mosaic_0001>
module attributes {stable_mosaic.version = 11 : i64} {
  func.func @qkv_kernel(%arg0: i32, %arg1: i32, %arg2: memref<1x128x768xf32, #tpu.memory_space<vmem>>, %arg3: memref<1x768xf32, #tpu.memory_space<vmem>>, %arg4: memref<1x768xf32, #tpu.memory_space<vmem>>, %arg5: memref<768x2304xbf16, #tpu.memory_space<vmem>>, %arg6: memref<1x2304xf32, #tpu.memory_space<vmem>>, %arg7: memref<1x128x2304xbf16, #tpu.memory_space<vmem>>) attributes {dimension_semantics = [#tpu.dimension_semantics<parallel>, #tpu.dimension_semantics<parallel>], iteration_bounds = array<i64: 2, 2>, scalar_prefetch = 0 : i64, scratch_operands = 0 : i64, tpu.core_type = #tpu.core_type<tc>, window_params = [{transform_indices = @transform_0, window_bounds = array<i64: 1, 128, 768>}, {pipeline_mode = #tpu.pipeline_mode<synchronous>, transform_indices = @transform_1, window_bounds = array<i64: 1, 768>}, {pipeline_mode = #tpu.pipeline_mode<synchronous>, transform_indices = @transform_2, window_bounds = array<i64: 1, 768>}, {pipeline_mode = #tpu.pipeline_mode<synchronous>, transform_indices = @transform_3, window_bounds = array<i64: 768, 2304>}, {pipeline_mode = #tpu.pipeline_mode<synchronous>, transform_indices = @transform_4, window_bounds = array<i64: 1, 2304>}, {transform_indices = @transform_5, window_bounds = array<i64: 1, 128, 2304>}]} {
    %c0 = arith.constant 0 : index
    %c0_0 = arith.constant 0 : index
    %c0_1 = arith.constant 0 : index
    %0 = vector.load %arg2[%c0, %c0_0, %c0_1] : memref<1x128x768xf32, #tpu.memory_space<vmem>>, vector<1x128x768xf32>
    %1 = vector.shape_cast %0 : vector<1x128x768xf32> to vector<128x768xf32>
    %c0_2 = arith.constant 0 : index
    %c0_3 = arith.constant 0 : index
    %2 = vector.load %arg3[%c0_2, %c0_3] : memref<1x768xf32, #tpu.memory_space<vmem>>, vector<1x768xf32>
    %c0_4 = arith.constant 0 : index
    %c0_5 = arith.constant 0 : index
    %3 = vector.load %arg4[%c0_4, %c0_5] : memref<1x768xf32, #tpu.memory_space<vmem>>, vector<1x768xf32>
    %cst = arith.constant dense<0.000000e+00> : vector<128xf32>
    %4 = vector.multi_reduction <add>, %1, %cst [1] : vector<128x768xf32> to vector<128xf32>
    %5 = vector.shape_cast %4 : vector<128xf32> to vector<128x1xf32>
    %cst_6 = arith.constant 7.680000e+02 : f32
    %6 = vector.broadcast %cst_6 : f32 to vector<128x1xf32>
    %7 = arith.divf %5, %6 : vector<128x1xf32>
    %8 = vector.broadcast %7 : vector<128x1xf32> to vector<128x768xf32>
    %9 = arith.subf %1, %8 : vector<128x768xf32>
    %10 = arith.mulf %9, %9 : vector<128x768xf32>
    %cst_7 = arith.constant dense<0.000000e+00> : vector<128xf32>
    %11 = vector.multi_reduction <add>, %10, %cst_7 [1] : vector<128x768xf32> to vector<128xf32>
    %12 = vector.shape_cast %11 : vector<128xf32> to vector<128x1xf32>
    %cst_8 = arith.constant 7.680000e+02 : f32
    %13 = vector.broadcast %cst_8 : f32 to vector<128x1xf32>
    %14 = arith.divf %12, %13 : vector<128x1xf32>
    %15 = vector.broadcast %7 : vector<128x1xf32> to vector<128x768xf32>
    %16 = arith.subf %1, %15 : vector<128x768xf32>
    %cst_9 = arith.constant 9.99999974E-6 : f32
    %17 = vector.broadcast %cst_9 : f32 to vector<128x1xf32>
    %18 = arith.addf %14, %17 : vector<128x1xf32>
    %19 = math.rsqrt %18 : vector<128x1xf32>
    %20 = vector.broadcast %19 : vector<128x1xf32> to vector<128x768xf32>
    %21 = arith.mulf %16, %20 : vector<128x768xf32>
    %22 = vector.broadcast %2 : vector<1x768xf32> to vector<128x768xf32>
    %23 = arith.mulf %21, %22 : vector<128x768xf32>
    %24 = vector.broadcast %3 : vector<1x768xf32> to vector<128x768xf32>
    %25 = arith.addf %23, %24 : vector<128x768xf32>
    %26 = arith.truncf %25 : vector<128x768xf32> to vector<128x768xbf16>
    %c0_10 = arith.constant 0 : index
    %c0_11 = arith.constant 0 : index
    %27 = vector.load %arg5[%c0_10, %c0_11] : memref<768x2304xbf16, #tpu.memory_space<vmem>>, vector<768x2304xbf16>
    %cst_12 = arith.constant dense<0.000000e+00> : vector<128x2304xf32>
    %28 = tpu.matmul %26, %27, %cst_12 {dimension_numbers = #tpu.dot_dimension_numbers<[1], [0], [0], [1], [0, 0, 1, 1], [], []>} : vector<128x768xbf16>, vector<768x2304xbf16>, vector<128x2304xf32> -> vector<128x2304xf32>
    %c0_13 = arith.constant 0 : index
    %c0_14 = arith.constant 0 : index
    %29 = vector.load %arg6[%c0_13, %c0_14] : memref<1x2304xf32, #tpu.memory_space<vmem>>, vector<1x2304xf32>
    %30 = vector.broadcast %29 : vector<1x2304xf32> to vector<128x2304xf32>
    %31 = arith.addf %28, %30 : vector<128x2304xf32>
    %32 = arith.truncf %31 : vector<128x2304xf32> to vector<128x2304xbf16>
    %c0_15 = arith.constant 0 : index
    %c0_16 = arith.constant 0 : index
    %c0_17 = arith.constant 0 : index
    %33 = vector.load %arg7[%c0_15, %c0_16, %c0_17] : memref<1x128x2304xbf16, #tpu.memory_space<vmem>>, vector<1x128x2304xbf16>
    %34 = vector.shape_cast %33 : vector<1x128x2304xbf16> to vector<128x2304xbf16>
    %35 = vector.shape_cast %32 : vector<128x2304xbf16> to vector<1x128x2304xbf16>
    tpu.vector_store %arg7[%c0_15, %c0_16, %c0_17], %35 {strides = array<i32>} : memref<1x128x2304xbf16, #tpu.memory_space<vmem>>, vector<1x128x2304xbf16>,
    return
  }
  func.func @transform_0(%arg0: i32, %arg1: i32) -> (i32, i32, i32) {
    %c0_i32 = arith.constant 0 : i32
    %c0_i32_0 = arith.constant 0 : i32
    return %arg0, %arg1, %c0_i32 : i32, i32, i32
  }
  func.func @transform_1(%arg0: i32, %arg1: i32) -> (i32, i32) {
    %c0_i32 = arith.constant 0 : i32
    %c0_i32_0 = arith.constant 0 : i32
    %c0_i32_1 = arith.constant 0 : i32
    return %c0_i32, %c0_i32_0 : i32, i32
  }
  func.func @transform_2(%arg0: i32, %arg1: i32) -> (i32, i32) {
    %c0_i32 = arith.constant 0 : i32
    %c0_i32_0 = arith.constant 0 : i32
    %c0_i32_1 = arith.constant 0 : i32
    return %c0_i32, %c0_i32_0 : i32, i32
  }
  func.func @transform_3(%arg0: i32, %arg1: i32) -> (i32, i32) {
    %c0_i32 = arith.constant 0 : i32
    %c0_i32_0 = arith.constant 0 : i32
    %c0_i32_1 = arith.constant 0 : i32
    return %c0_i32, %c0_i32_0 : i32, i32
  }
  func.func @transform_4(%arg0: i32, %arg1: i32) -> (i32, i32) {
    %c0_i32 = arith.constant 0 : i32
    %c0_i32_0 = arith.constant 0 : i32
    %c0_i32_1 = arith.constant 0 : i32
    return %c0_i32, %c0_i32_0 : i32, i32
  }
  func.func @transform_5(%arg0: i32, %arg1: i32) -> (i32, i32, i32) {
    %c0_i32 = arith.constant 0 : i32
    %c0_i32_0 = arith.constant 0 : i32
    return %arg0, %arg1, %c0_i32 : i32, i32, i32
  }
}

</mosaic_0001>

<bundles_post_ra>
// kernel: tpu_custom_call.1
= control target key start
LH: loop header
LB: loop body
LE: loop exit
PB: predicated region body
PF: predicated region fallthrough
CT: control target
= control target key end

     0   :  { %s17343_s0 = inlined_call_operand.hbm [shape: f32[2,256,768], index: 0, kind: input, shape index: {}]   ;;  %s17344_s1 = inlined_call_operand.hbm [shape: f32[1,768], index: 1, kind: input, shape index: {}]   ;;  %s17345_s2 = inlined_call_operand.hbm [shape: f32[1,768], index: 2, kind: input, shape index: {}]   ;;  %s17346_s3 = inlined_call_operand.hbm [shape: bf16[768,2304], index: 3, kind: input, shape index: {}]   ;;  %s17347_s4 = inlined_call_operand.hbm [shape: f32[1,2304], index: 4, kind: input, shape index: {}]   ;;  %s17348_s5 = inlined_call_operand.hbm [shape: bf16[2,256,2304], index: 5, kind: output, shape index: {}]  }
   0x1   :  { %17516 = sst [smem:[#allocation100_spill]] %s17344_s1 }
   0x2   :  { %17517 = sst [smem:[#allocation101_spill]] %s17345_s2 }
   0x3   :  { %17518 = sst [smem:[#allocation102_spill]] %s17346_s3 }
   0x4   :  { %17519 = sst [smem:[#allocation103_spill]] %s17347_s4 }
   0x5   :  { %10 = vsyncpa [#allocation3], 0 }
   0x6   :  { %12 = vsyncpa [#allocation3 + $0x1], 0 }
   0x7   :  { %13 = vsyncpa [#allocation6], 0 }
   0x8   :  { %14 = vsyncpa [#allocation9], 0 }
   0x9   :  { %15 = vsyncpa [#allocation4], 0 }
   0xa   :  { %17 = vsyncpa [#allocation4 + $0x1], 0  ;;  %s14696_s18 = smov 0   ;;  %s14698_s19 = smov 0  }
   0xb   :  { %s14700_s20 = smov 0   ;;  %s14702_s21 = smov 0  }
   0xc   :  { %s14704_s22 = smov 0   ;;  %s14706_s23 = smov 0  }
   0xd   :  { %s14708_s24 = smov 0   ;;  %s14710_s25 = smov 0  }
   0xe LB: > { %17520 = sst [smem:[#allocation16_spill]] %s14624_s18  ;;  %s10777_s26 = sadd.s32 4294967295, %s14652_s25   ;;  %s14652_s25 = sphi %s14710_s25, %s23_s25   ;;  %s14648_s24 = sphi %s14708_s24, %s17793_s24   ;;  %s14644_s23 = sphi %s14706_s23, %s17792_s23   ;;  %s14640_s22 = sphi %s14704_s22, %s17791_s22   ;;  %s14636_s21 = sphi %s14702_s21, %s17790_s21   ;;  %s14632_s20 = sphi %s14700_s20, %s17789_s20   ;;  %s14628_s19 = sphi %s14698_s19, %s17788_s19   ;;  %s14624_s18 = sphi %s14696_s18, %s17787_s18  }
   0xf   : > { %s10778_s27 = sadd.s32 4294967294, %s14652_s25   ;;  %p57_p0 = scmp.ne.s32.totalorder %s14628_s19, %s14624_s18 }
  0x10   : > { %p14740_p1 = scmp.eq.s32.totalorder %s10777_s26, 0  ;;  %p14744_p2 = scmp.eq.s32.totalorder %s10777_s26, 3 }
  0x11   : > { %p173_p3 = scmp.eq.s32.totalorder %s10778_s27, 3  ;;  %p10779_p5 = scmp.ge.s32.totalorder %s14652_s25, 1 }
  0x12   : > { %s17521_s28 = scalar_select %p14740_p1, 1, 0 }
  0x13   : > { %s17522_s29 = scalar_select %p14744_p2, 1, 0 }
  0x14   : > { %p14750_p4 = por %p14740_p1, %p57_p0  ;;  %p14755_p6 = por %p173_p3, %p57_p0 }
  0x15   : > { %p180_p7 = scmp.lt.s32.totalorder %s14652_s25, 5  ;;  %s14654_s8 = smov [#allocation5]  }
  0x16   : > { %s17523_s30 = scalar_select %p14750_p4, 1, 0 }
  0x17   : > { %s17524_s6 = scalar_select %p14755_p6, 1, 0 }
  0x18   : > { %p14760_p8 = pnand %p10779_p5, %p180_p7  ;;  %s193_s9 = sshll.u32 %s14654_s8, 4  ;;  %s194_s9 = int_to_ptr.vmem [resolvable:$true] %s193_s9 }
  0x19   : > { %17525 = sst [smem:[#allocation17_spill]] %s17524_s6  ;;  %s14655_s10 = smov [#allocation8]  }
  0x1a   : > { %s17526_s7 = scalar_select %p14760_p8, 1, 0 }
  0x1b   : > { %p12873_p9 = pneg %p14760_p8  ;;  %s214_s11 = sshll.u32 %s14655_s10, 4  ;;  %s14772_s11 = int_to_ptr.vmem [resolvable:$true] %s214_s11 }
  0x1c   : > { %s14656_s13 = smov [#allocation7]   ;;  %s17528_s1 = sld [smem:[#allocation100_spill]] }
  0x1d   : > { %p14768_p10 = pnand %p12873_p9, %p14740_p1  ;;  %s14774_s14 = sshll.u32 %s14656_s13, 4  ;;  %s205_s14 = int_to_ptr.vmem [resolvable:$true] %s14774_s14 }
  0x1f   : > { %p14784_p12 = pneg %p14768_p10 }
  0x22   : > { %s14404_s17 = scalar_lea.hbm %s17528_s1, 96 }
  0x23   : > { %p14405_p11 = scmp.ne.s32.totalorder %s17528_s1, %s14404_s17  ;;  %p14411_p3 = scmp.lt.u32.totalorder %s14404_s17, %s17528_s1 }
  0x25   : > { %p14407_p13 = pnand %p14784_p12, %p14405_p11 }
  0x27   : > { %p14408_p0 = pneg %p14407_p13 }
  0x29   : > { %p14413_p5 = pnand %p14411_p3, %p14408_p0 }
  0x2b   : > { %14416 = shalt.err (!%p14413_p5)
}
  0x2c   : > { %s14417_s15 = scalar_lea.vmem %s194_s9, 96  ;;  %p14425_p1 = scmp.lt.s32.totalorder %s194_s9, %s194_s9 }
  0x2d   : > { %p14418_p7 = scmp.ne.s32.totalorder %s194_s9, %s14417_s15  ;;  %p14426_p4 = scmp.lt.s32.totalorder %s14417_s15, %s14417_s15 }
  0x2f   : > { %p14420_p9 = pnand %p14418_p7, %p14784_p12  ;;  %p14427_p8 = por %p14426_p4, %p14425_p1 }
  0x31   : > { %p14421_p6 = pneg %p14420_p9 }
  0x33   : > { %p14428_p2 = pnand %p14427_p8, %p14421_p6 }
  0x35   : > { %14431 = shalt.err (!%p14428_p2)
}
  0x36   : > { %12876 = dma.hbm_to_vmem [thread:$0]  (!%p14768_p10), %s17528_s1, 96, %s194_s9, [#allocation6]  }
  0x37   : > { %s17530_s3 = sld [smem:[#allocation102_spill]] }
  0x3d   : > { %s14432_s10 = scalar_lea.hbm %s17530_s3, 110592 }
  0x3e   : > { %p14433_p11 = scmp.ne.s32.totalorder %s17530_s3, %s14432_s10  ;;  %p14439_p2 = scmp.lt.u32.totalorder %s14432_s10, %s17530_s3 }
  0x40   : > { %p14435_p13 = pnand %p14433_p11, %p14784_p12 }
  0x42   : > { %p14436_p1 = pneg %p14435_p13 }
  0x44   : > { %p14441_p4 = pnand %p14439_p2, %p14436_p1 }
  0x46   : > { %14444 = shalt.err (!%p14441_p4)
}
  0x47   : > { %s14445_s9 = scalar_lea.vmem %s14772_s11, 110592  ;;  %p14453_p3 = scmp.lt.s32.totalorder %s14772_s11, %s14772_s11 }
  0x48   : > { %p14446_p6 = scmp.ne.s32.totalorder %s14772_s11, %s14445_s9  ;;  %p14454_p5 = scmp.lt.s32.totalorder %s14445_s9, %s14445_s9 }
  0x4a   : > { %p14448_p8 = pnand %p14446_p6, %p14784_p12  ;;  %p14455_p7 = por %p14454_p5, %p14453_p3 }
  0x4c   : > { %p14449_p0 = pneg %p14448_p8 }
  0x4e   : > { %p14456_p9 = pnand %p14455_p7, %p14449_p0 }
  0x50   : > { %14459 = shalt.err (!%p14456_p9)
}
  0x51   : > { %s14657_s6 = smov 1152   ;;  %s14658_s18 = smov 72  }
  0x52   : > { %12882 = dma.hbm_to_vmem [thread:$0]  (!%p14768_p10), %s17530_s3, 110592, %s14772_s11, [#allocation9], %s14657_s6, %s14657_s6, %s14658_s18  }
  0x53   : > { %s17531_s2 = sld [smem:[#allocation101_spill]] }
  0x59   : > { %s14460_s10 = scalar_lea.hbm %s17531_s2, 96 }
  0x5a   : > { %p14461_p11 = scmp.ne.s32.totalorder %s17531_s2, %s14460_s10  ;;  %p14467_p2 = scmp.lt.u32.totalorder %s14460_s10, %s17531_s2 }
  0x5c   : > { %p14463_p13 = pnand %p14461_p11, %p14784_p12 }
  0x5e   : > { %p14464_p1 = pneg %p14463_p13 }
  0x60   : > { %p14469_p4 = pnand %p14467_p2, %p14464_p1 }
  0x62   : > { %14472 = shalt.err (!%p14469_p4)
}
  0x63   : > { %s14473_s16 = scalar_lea.vmem %s205_s14, 96  ;;  %p14481_p3 = scmp.lt.s32.totalorder %s205_s14, %s205_s14 }
  0x64   : > { %p14474_p6 = scmp.ne.s32.totalorder %s205_s14, %s14473_s16  ;;  %p14482_p5 = scmp.lt.s32.totalorder %s14473_s16, %s14473_s16 }
  0x66   : > { %p14476_p8 = pnand %p14474_p6, %p14784_p12  ;;  %p14483_p7 = por %p14482_p5, %p14481_p3 }
  0x68   : > { %p14477_p0 = pneg %p14476_p8 }
  0x6a   : > { %p14484_p9 = pnand %p14483_p7, %p14477_p0 }
  0x6c   : > { %14487 = shalt.err (!%p14484_p9)
}
  0x6d   : > { %12879 = dma.hbm_to_vmem [thread:$0]  (!%p14768_p10), %s17531_s2, 96, %s205_s14, [#allocation6]  }
  0x6e   : > { %s14659_s1 = smov [#allocation10]   ;;  %s17532_s4 = sld [smem:[#allocation103_spill]] }
  0x6f   : > { %s228_s18 = sshll.u32 %s14659_s1, 4  ;;  %s229_s18 = int_to_ptr.vmem [resolvable:$true] %s228_s18 }
  0x74   : > { %s14488_s27 = scalar_lea.hbm %s17532_s4, 288 }
  0x75   : > { %p14489_p11 = scmp.ne.s32.totalorder %s17532_s4, %s14488_s27  ;;  %p14495_p2 = scmp.lt.u32.totalorder %s14488_s27, %s17532_s4 }
  0x77   : > { %p14491_p13 = pnand %p14489_p11, %p14784_p12 }
  0x79   : > { %p14492_p1 = pneg %p14491_p13 }
  0x7b   : > { %p14497_p4 = pnand %p14495_p2, %p14492_p1 }
  0x7d   : > { %14500 = shalt.err (!%p14497_p4)
}
  0x7e   : > { %s14501_s14 = scalar_lea.vmem %s229_s18, 288  ;;  %p14509_p3 = scmp.lt.s32.totalorder %s229_s18, %s229_s18 }
  0x7f   : > { %p14502_p6 = scmp.ne.s32.totalorder %s229_s18, %s14501_s14  ;;  %p14510_p5 = scmp.lt.s32.totalorder %s14501_s14, %s14501_s14 }
  0x81   : > { %p14504_p8 = pnand %p14502_p6, %p14784_p12  ;;  %p14511_p7 = por %p14510_p5, %p14509_p3 }
  0x83   : > { %p14505_p0 = pneg %p14504_p8 }
  0x85   : > { %p14512_p9 = pnand %p14511_p7, %p14505_p0 }
  0x87   : > { %14515 = shalt.err (!%p14512_p9)
}
  0x88   : > { %12885 = dma.hbm_to_vmem [thread:$0]  (!%p14768_p10), %s17532_s4, 288, %s229_s18, [#allocation9]  }
  0x89   : > { %s32_s8 = sadd.s32 1, %s14644_s23  ;;  %s35_s6 = sadd.s32 1, %s14648_s24 }
  0x8a   : > { %p33_p12 = scmp.ge.s32.totalorder %s32_s8, 2  ;;  %s44_s12 = sadd.s32 1, %s14632_s20 }
  0x8b   : > { %p51_p11 = scmp.ne.s32.totalorder %s14632_s20, %s14628_s19  ;;  %p52_p13 = scmp.eq.s32.totalorder %s14652_s25, 0 }
  0x8c   : > { %s17795_s8 = smov (%p33_p12, %s32_s8), 0  ;;  %s17797_s6 = smov (!%p33_p12, %s35_s6), %s14648_s24 }
  0x8d   : > { %s40_s1 = ssub.s32 %s14644_s23, %s17795_s8  ;;  %p14871_p1 = por %p52_p13, %p51_p11 }
  0x8e   : > { %p37_p10 = scmp.ge.s32.totalorder %s17797_s6, 2  ;;  %p17534_p2 = scmp.ne.s32.totalorder %s17522_s29, 0 }
  0x8f   : > { %p12898_p6 = scmp.lt.s32.totalorder %s14652_s25, 4  ;;  %s239_s17 = sand.u32 1, %s14632_s20  }
  0x90   : > { %p14877_p4 = por %p17534_p2, %p51_p11  ;;  %s17799_s6 = smov (%p37_p10, %s17797_s6), 0 }
  0x91   : > { %17536 = sst [smem:[#allocation18_spill]] %s17799_s6  ;;  %s12846_s27 = smul.u32 768, %s239_s17 }
  0x92   : > { %s39_s10 = ssub.s32 %s14648_s24, %s17799_s6  ;;  %s12847_s13 = smul.u32 96, %s14644_s23 }
  0x93   : > { %s41_s15 = sor.u32 %s40_s1, %s39_s10  ;;  %s12848_s9 = smul.u32 192, %s14648_s24 }
  0x94   : > { %p42_p8 = scmp.eq.s32.totalorder %s41_s15, 0  ;;  %s243_s14 = scalar_lea.vmem [#allocation2], %s12846_s27 }
  0x95   : > { %s253_s16 = sshll.u32 %s243_s14, 4  ;;  %p14891_p0 = pnand %p12898_p6, %p14871_p1  ;;  %s14898_s16 = int_to_ptr.vmem [resolvable:$true] %s253_s16 }
  0x96   : > { %s14896_s11 = scalar_select %p42_p8, %s14632_s20, %s44_s12  }
  0x97   : > { %s250_s2 = sadd.s32 %s12848_s9, %s12847_s13  ;;  %s14905_s26 = scalar_lea.sflag [#allocation3], %s239_s17 }
  0x98   : > { %s10787_s3 = sshll.u32 %s250_s2, 7  ;;  %p14518_p5 = pneg %p14891_p0 }
  0x99   : > { %s14903_s1 = scalar_lea.hbm %s17343_s0, %s10787_s3  ;;  %s14521_s4 = scalar_lea.hbm %s17343_s0, 49152 }
  0x9a   : > { %s14516_s27 = scalar_lea.hbm %s14903_s1, 12288  ;;  %p14522_p12 = scmp.lt.u32.totalorder %s14903_s1, %s17343_s0 }
  0x9b   : > { %p14517_p3 = scmp.ne.s32.totalorder %s14903_s1, %s14516_s27  ;;  %p14523_p11 = scmp.lt.u32.totalorder %s14521_s4, %s14516_s27 }
  0x9c   : > { %p14525_p1 = scmp.lt.u32.totalorder %s14516_s27, %s14903_s1 }
  0x9d   : > { %p14519_p7 = pnand %p14518_p5, %p14517_p3  ;;  %p14524_p13 = por %p14523_p11, %p14522_p12 }
  0x9f   : > { %p14520_p9 = pneg %p14519_p7  ;;  %p14526_p10 = por %p14525_p1, %p14524_p13 }
  0xa1   : > { %p14527_p2 = pnand %p14526_p10, %p14520_p9 }
  0xa3   : > { %14530 = shalt.err (!%p14527_p2)
}
  0xa4   : > { %s14531_s17 = scalar_lea.vmem %s14898_s16, 12288  ;;  %s14660_s10 = smov [#allocation2]  }
  0xa5   : > { %p14532_p6 = scmp.ne.s32.totalorder %s14898_s16, %s14531_s17  ;;  %s14536_s13 = sshll.u32 %s14660_s10, 4  ;;  %s14537_s13 = int_to_ptr.vmem [resolvable:$false] %s14536_s13 }
  0xa6   : > { %s14538_s15 = scalar_lea.vmem %s14537_s13, 24576  ;;  %p14539_p7 = scmp.lt.s32.totalorder %s14898_s16, %s14537_s13 }
  0xa7   : > { %p14534_p8 = pnand %p14532_p6, %p14518_p5  ;;  %p14540_p12 = scmp.lt.s32.totalorder %s14538_s15, %s14531_s17 }
  0xa9   : > { %p14535_p3 = pneg %p14534_p8  ;;  %p14541_p11 = por %p14540_p12, %p14539_p7 }
  0xab   : > { %p14542_p13 = pnand %p14541_p11, %p14535_p3 }
  0xad   : > { %14545 = shalt.err (!%p14542_p13)
}
  0xae   : > { %s14661_s9 = smov 768   ;;  %s14662_s14 = smov 48  }
  0xaf   : > { %12889 = dma.hbm_to_vmem [thread:$0]  (!%p14891_p0), %s14903_s1, 12288, %s14898_s16, %s14905_s26, %s14661_s9, %s14661_s9, %s14662_s14  }
  0xb0   : > { %p17538_p5 = scmp.ne.s32.totalorder %s17526_s7, 0 }
  0xb2   : > { %265 = sbr.rel (%p17538_p5) target bundleno = 1639 (0x667), region = 40 }
  0xb9   : > { %s14936_s27 = sand.u32 1, %s14628_s19   ;;  %p17539_p9 = scmp.ne.s32.totalorder %s17523_s30, 0 }
  0xba   : > { %s12849_s2 = smul.u32 768, %s14936_s27  ;;  %s268_s12 = scalar_lea.sflag [#allocation3], %s14936_s27 }
  0xbc   : > { %s14940_s4 = scalar_lea.vmem [#allocation2], %s12849_s2 }
  0xbd   : > { %14607 = dma.done.wait (%p17539_p9), %s268_s12, 12288  }
  0xbe   : > { %14609 = vsyncadd (%p17539_p9), %s268_s12, 4294955008  ;;  %p17540_p0 = scmp.ne.s32.totalorder %s17521_s28, 0 }
  0xc0   : > { %14611 = dma.done.wait (%p17540_p0), [#allocation6], 192  }
  0xc1   : > { %14613 = vsyncadd (%p17540_p0), [#allocation6], 4294967104 }
  0xc2   : > { %14615 = dma.done.wait (%p17540_p0), [#allocation9], 110880  }
  0xc3   : > { %14617 = vsyncadd (%p17540_p0), [#allocation9], 4294856416  ;;  %v328_v0 = vld [vmem:[%s14940_s4 + $0x60] sm:$0xff]  ;;  %v329_v1 = vld [vmem:[%s14940_s4 + $0x68] sm:$0xff]  ;;  %s12850_s28 = smul.u32 1152, %s14936_s27  ;;  %s10633_s6 = scalar_lea.sflag [#allocation4], %s14936_s27 }
  0xc4   : > { %v330_v2 = vld [vmem:[%s14940_s4 + $0x70] sm:$0xff]  ;;  %v331_v3 = vld [vmem:[%s14940_s4 + $0x78] sm:$0xff]  ;;  %v428_v4 = vadd.f32 %v329_v1, %v328_v0  ;;  %v316_v5 = vld [vmem:[%s14940_s4] sm:$0xff]  ;;  %s12851_s7 = smul.u32 288, %s14636_s21  ;;  %s14663_s10 = smov [#allocation11]  }
  0xc5   : > { %v317_v6 = vld [vmem:[%s14940_s4 + $0x8] sm:$0xff]  ;;  %v318_v7 = vld [vmem:[%s14940_s4 + $0x10] sm:$0xff]  ;;  %v332_v8 = vld [vmem:[%s14940_s4 + $0x80] sm:$0xff]  ;;  %s16423_s30 = scalar_lea.vmem [#allocation11], %s12850_s28  ;;  %s12852_s16 = smul.u32 576, %s14640_s22 }
  0xc6   : > { %v429_v9 = vadd.f32 %v428_v4, %v330_v2  ;;  %v319_v10 = vld [vmem:[%s14940_s4 + $0x18] sm:$0xff]  ;;  %v414_v11 = vadd.f32 %v317_v6, %v316_v5  ;;  %v334_v12 = vld [vmem:[%s14940_s4 + $0x90] sm:$0xff]  ;;  %v336_v14 = vld [vmem:[%s14940_s4 + $0xa0] sm:$0xff]  ;;  %s10649_s22 = sshll.u32 %s16423_s30, 4  ;;  %s14550_s13 = sshll.u32 %s14663_s10, 4  ;;  %s17281_s22 = int_to_ptr.vmem [resolvable:$true] %s10649_s22  ;;  %s14551_s13 = int_to_ptr.vmem [resolvable:$false] %s14550_s13 }
  0xc7   : > { %v335_v13 = vld [vmem:[%s14940_s4 + $0x98] sm:$0xff]  ;;  %v333_v15 = vld [vmem:[%s14940_s4 + $0x88] sm:$0xff]  ;;  %v320_v17 = vld [vmem:[%s14940_s4 + $0x20] sm:$0xff]  ;;  %s10646_s21 = sadd.s32 %s12852_s16, %s12851_s7  ;;  %s14546_s17 = scalar_lea.vmem %s17281_s22, 18432 }
  0xc8   : > { %v430_v16 = vadd.f32 %v429_v9, %v331_v3  ;;  %v415_v18 = vadd.f32 %v414_v11, %v318_v7  ;;  %v337_v19 = vld [vmem:[%s14940_s4 + $0xa8] sm:$0xff]  ;;  %v435_v20 = vadd.f32 %v335_v13, %v334_v12  ;;  %v322_v21 = vld [vmem:[%s14940_s4 + $0x30] sm:$0xff]  ;;  %v323_v22 = vld [vmem:[%s14940_s4 + $0x38] sm:$0xff]  ;;  %s11803_s29 = sshll.u32 %s10646_s21, 6  ;;  %p14547_p1 = scmp.ne.s32.totalorder %s17281_s22, %s14546_s17 }
  0xc9   : > { %v324_v23 = vld [vmem:[%s14940_s4 + $0x40] sm:$0xff]  ;;  %v321_v25 = vld [vmem:[%s14940_s4 + $0x28] sm:$0xff]  ;;  %v338_v27 = vld [vmem:[%s14940_s4 + $0xb0] sm:$0xff]  ;;  %v421_v29 = vadd.f32 %v323_v22, %v322_v21  ;;  %s17288_s3 = scalar_lea.hbm %s17348_s5, %s11803_s29  ;;  %s14552_s15 = scalar_lea.vmem %s14551_s13, 36864 }
  0xca   : > { %v431_v24 = vadd.f32 %v430_v16, %v332_v8  ;;  %v416_v26 = vadd.f32 %v415_v18, %v319_v10  ;;  %v436_v28 = vadd.f32 %v435_v20, %v336_v14  ;;  %v325_v30 = vld [vmem:[%s14940_s4 + $0x48] sm:$0xff]  ;;  %v340_v31 = vld [vmem:[%s14940_s4 + $0xc0] sm:$0xff]  ;;  %v339_v35 = vld [vmem:[%s14940_s4 + $0xb8] sm:$0xff]  ;;  %p14548_p10 = pnand %p14547_p1, %p14877_p4  ;;  %p14553_p6 = scmp.lt.s32.totalorder %s17281_s22, %s14551_s13 }
  0xcb   : > { %v341_v32 = vld [vmem:[%s14940_s4 + $0xc8] sm:$0xff]  ;;  %v326_v37 = vld [vmem:[%s14940_s4 + $0x50] sm:$0xff]  ;;  %v422_v38 = vadd.f32 %v421_v29, %v324_v23  ;;  %v327_v40 = vld [vmem:[%s14940_s4 + $0x58] sm:$0xff]  ;;  %p14554_p8 = scmp.lt.s32.totalorder %s14552_s15, %s14546_s17 }
  0xcc   : > { %v432_v33 = vadd.f32 %v431_v24, %v333_v15  ;;  %v417_v34 = vadd.f32 %v416_v26, %v320_v17  ;;  %v437_v36 = vadd.f32 %v436_v28, %v337_v19  ;;  %v342_v39 = vld [vmem:[%s14940_s4 + $0xd0] sm:$0xff]  ;;  %v442_v41 = vadd.f32 %v341_v32, %v340_v31  ;;  %v347_v43 = vld [vmem:[%s14940_s4 + $0xf8] sm:$0xff]  ;;  %v348_v44 = vld [vmem:[%s14940_s4 + $0x100] sm:$0xff]  ;;  %p14549_p2 = pneg %p14548_p10 }
  0xcd   : > { %v346_v42 = vld [vmem:[%s14940_s4 + $0xf0] sm:$0xff]  ;;  %v423_v47 = vadd.f32 %v422_v38, %v325_v30  ;;  %v343_v48 = vld [vmem:[%s14940_s4 + $0xd8] sm:$0xff]  ;;  %v344_v49 = vld [vmem:[%s14940_s4 + $0xe0] sm:$0xff]  ;;  %p14555_p3 = por %p14554_p8, %p14553_p6 }
  0xce   : > { %433 = vadd.xlane.f32.xlu1 %v432_v33  ;;  %v418_v45 = vadd.f32 %v417_v34, %v321_v25  ;;  %v438_v46 = vadd.f32 %v437_v36, %v338_v27  ;;  %v349_v50 = vld [vmem:[%s14940_s4 + $0x108] sm:$0xff]  ;;  %v449_v51 = vadd.f32 %v347_v43, %v346_v42  ;;  %v443_v52 = vadd.f32 %v442_v41, %v342_v39  ;;  %v352_v53 = vld [vmem:[%s14940_s4 + $0x120] sm:$0xff]  ;;  %v354_v55 = vld [vmem:[%s14940_s4 + $0x130] sm:$0xff] }
  0xcf   : > { %v353_v54 = vld [vmem:[%s14940_s4 + $0x128] sm:$0xff]  ;;  %v424_v57 = vadd.f32 %v423_v47, %v326_v37  ;;  %v350_v59 = vld [vmem:[%s14940_s4 + $0x110] sm:$0xff]  ;;  %v355_v61 = vld [vmem:[%s14940_s4 + $0x138] sm:$0xff]  ;;  %p14556_p7 = pnand %p14555_p3, %p14549_p2 }
  0xd0   : > { %419 = vadd.xlane.f32.xlu0 %v418_v45  ;;  %v439_v56 = vadd.f32 %v438_v46, %v339_v35  ;;  %v345_v58 = vld [vmem:[%s14940_s4 + $0xe8] sm:$0xff]  ;;  %v450_v60 = vadd.f32 %v449_v51, %v348_v44  ;;  %v456_v62 = vadd.f32 %v353_v54, %v352_v53  ;;  %v444_v63 = vadd.f32 %v443_v52, %v343_v48  ;;  %v358_v0 = vld [vmem:[%s14940_s4 + $0x150] sm:$0xff]  ;;  %v359_v1 = vld [vmem:[%s14940_s4 + $0x158] sm:$0xff] }
  0xd1   : > { %v360_v2 = vld [vmem:[%s14940_s4 + $0x160] sm:$0xff]  ;;  %v425_v3 = vadd.f32 %v424_v57, %v327_v40  ;;  %v351_v4 = vld [vmem:[%s14940_s4 + $0x118] sm:$0xff]  ;;  %v361_v8 = vld [vmem:[%s14940_s4 + $0x168] sm:$0xff]  ;;  %v463_v9 = vadd.f32 %v359_v1, %v358_v0 }
  0xd2   : > { %440 = vadd.xlane.f32.xlu1 %v439_v56  ;;  %v451_v5 = vadd.f32 %v450_v60, %v349_v50  ;;  %v356_v6 = vld [vmem:[%s14940_s4 + $0x140] sm:$0xff]  ;;  %v457_v7 = vadd.f32 %v456_v62, %v354_v55  ;;  %v445_v10 = vadd.f32 %v444_v63, %v344_v49  ;;  %v365_v12 = vld [vmem:[%s14940_s4 + $0x188] sm:$0xff]  ;;  %v366_v13 = vld [vmem:[%s14940_s4 + $0x190] sm:$0xff] }
  0xd3   : > { %v364_v11 = vld [vmem:[%s14940_s4 + $0x180] sm:$0xff]  ;;  %v357_v15 = vld [vmem:[%s14940_s4 + $0x148] sm:$0xff]  ;;  %v362_v17 = vld [vmem:[%s14940_s4 + $0x170] sm:$0xff]  ;;  %v464_v18 = vadd.f32 %v463_v9, %v360_v2 }
  0xd4   : > { %426 = vadd.xlane.f32.xlu0 %v425_v3  ;;  %v452_v14 = vadd.f32 %v451_v5, %v350_v59  ;;  %v458_v16 = vadd.f32 %v457_v7, %v355_v61  ;;  %v470_v19 = vadd.f32 %v365_v12, %v364_v11  ;;  %v446_v20 = vadd.f32 %v445_v10, %v345_v58  ;;  %v367_v21 = vld [vmem:[%s14940_s4 + $0x198] sm:$0xff]  ;;  %v370_v22 = vld [vmem:[%s14940_s4 + $0x1b0] sm:$0xff]  ;;  %v368_v28 = vld [vmem:[%s14940_s4 + $0x1a0] sm:$0xff] }
  0xd5   : > { %v371_v23 = vld [vmem:[%s14940_s4 + $0x1b8] sm:$0xff]  ;;  %v465_v27 = vadd.f32 %v464_v18, %v361_v8  ;;  %v372_v30 = vld [vmem:[%s14940_s4 + $0x1c0] sm:$0xff]  ;;  %v369_v31 = vld [vmem:[%s14940_s4 + $0x1a8] sm:$0xff] }
  0xd6   : > { %v453_v24 = vadd.f32 %v452_v14, %v351_v4  ;;  %v459_v25 = vadd.f32 %v458_v16, %v356_v6  ;;  %v363_v26 = vld [vmem:[%s14940_s4 + $0x178] sm:$0xff]  ;;  %v471_v29 = vadd.f32 %v470_v19, %v366_v13  ;;  %v477_v32 = vadd.f32 %v371_v23, %v370_v22  ;;  %v376_v33 = vld [vmem:[%s14940_s4 + $0x1e0] sm:$0xff]  ;;  %v377_v34 = vld [vmem:[%s14940_s4 + $0x1e8] sm:$0xff] }
  0xd7   : > { %v466_v36 = vadd.f32 %v465_v27, %v362_v17  ;;  %v373_v38 = vld [vmem:[%s14940_s4 + $0x1c8] sm:$0xff]  ;;  %v374_v39 = vld [vmem:[%s14940_s4 + $0x1d0] sm:$0xff]  ;;  %v484_v42 = vadd.f32 %v377_v34, %v376_v33  ;;  %v383_v44 = vld [vmem:[%s14940_s4 + $0x218] sm:$0xff] }
  0xd8   : > { %447 = vadd.xlane.f32.xlu0 %v446_v20  ;;  %454 = vadd.xlane.f32.xlu1 %v453_v24  ;;  %v460_v35 = vadd.f32 %v459_v25, %v357_v15  ;;  %v472_v37 = vadd.f32 %v471_v29, %v367_v21  ;;  %v378_v40 = vld [vmem:[%s14940_s4 + $0x1f0] sm:$0xff]  ;;  %v478_v41 = vadd.f32 %v477_v32, %v372_v30  ;;  %v384_v45 = vld [vmem:[%s14940_s4 + $0x220] sm:$0xff]  ;;  %v375_v48 = vld [vmem:[%s14940_s4 + $0x1d8] sm:$0xff] }
  0xd9   : > { %v382_v43 = vld [vmem:[%s14940_s4 + $0x210] sm:$0xff]  ;;  %v467_v46 = vadd.f32 %v466_v36, %v363_v26  ;;  %v379_v49 = vld [vmem:[%s14940_s4 + $0x1f8] sm:$0xff]  ;;  %v380_v50 = vld [vmem:[%s14940_s4 + $0x200] sm:$0xff]  ;;  %v485_v54 = vadd.f32 %v484_v42, %v378_v40 }
  0xda   : > { %v473_v47 = vadd.f32 %v472_v37, %v368_v28  ;;  %v385_v51 = vld [vmem:[%s14940_s4 + $0x228] sm:$0xff]  ;;  %v491_v52 = vadd.f32 %v383_v44, %v382_v43  ;;  %v479_v53 = vadd.f32 %v478_v41, %v373_v38  ;;  %v388_v55 = vld [vmem:[%s14940_s4 + $0x240] sm:$0xff]  ;;  %v390_v57 = vld [vmem:[%s14940_s4 + $0x250] sm:$0xff] }
  0xdb   : > { %v389_v56 = vld [vmem:[%s14940_s4 + $0x248] sm:$0xff]  ;;  %v386_v60 = vld [vmem:[%s14940_s4 + $0x230] sm:$0xff]  ;;  %v391_v62 = vld [vmem:[%s14940_s4 + $0x258] sm:$0xff]  ;;  %v486_v1 = vadd.f32 %v485_v54, %v379_v49 }
  0xdc   : > { %461 = vadd.xlane.f32.xlu0 %v460_v35  ;;  %468 = vadd.xlane.f32.xlu1 %v467_v46  ;;  %v474_v58 = vadd.f32 %v473_v47, %v369_v31  ;;  %v381_v59 = vld [vmem:[%s14940_s4 + $0x208] sm:$0xff]  ;;  %v492_v61 = vadd.f32 %v491_v52, %v384_v45  ;;  %v498_v63 = vadd.f32 %v389_v56, %v388_v55  ;;  %v394_v2 = vld [vmem:[%s14940_s4 + $0x270] sm:$0xff]  ;;  %v395_v3 = vld [vmem:[%s14940_s4 + $0x278] sm:$0xff] }
  0xdd   : > { %v480_v0 = vadd.f32 %v479_v53, %v374_v39  ;;  %v396_v4 = vld [vmem:[%s14940_s4 + $0x280] sm:$0xff]  ;;  %v387_v5 = vld [vmem:[%s14940_s4 + $0x238] sm:$0xff]  ;;  %v397_v9 = vld [vmem:[%s14940_s4 + $0x288] sm:$0xff]  ;;  %v505_v10 = vadd.f32 %v395_v3, %v394_v2  ;;  %v487_v12 = vadd.f32 %v486_v1, %v380_v50 }
  0xde   : > { %v493_v6 = vadd.f32 %v492_v61, %v385_v51  ;;  %v392_v7 = vld [vmem:[%s14940_s4 + $0x260] sm:$0xff]  ;;  %v499_v8 = vadd.f32 %v498_v63, %v390_v57  ;;  %v401_v14 = vld [vmem:[%s14940_s4 + $0x2a8] sm:$0xff]  ;;  %v402_v15 = vld [vmem:[%s14940_s4 + $0x2b0] sm:$0xff] }
  0xdf   : > { %v481_v11 = vadd.f32 %v480_v0, %v375_v48  ;;  %v400_v13 = vld [vmem:[%s14940_s4 + $0x2a0] sm:$0xff]  ;;  %v393_v17 = vld [vmem:[%s14940_s4 + $0x268] sm:$0xff]  ;;  %v398_v19 = vld [vmem:[%s14940_s4 + $0x290] sm:$0xff]  ;;  %v506_v20 = vadd.f32 %v505_v10, %v396_v4  ;;  %v488_v22 = vadd.f32 %v487_v12, %v381_v59 }
  0xe0   : > { %475 = vadd.xlane.f32.xlu0 %v474_v58  ;;  %v494_v16 = vadd.f32 %v493_v6, %v386_v60  ;;  %v500_v18 = vadd.f32 %v499_v8, %v391_v62  ;;  %v512_v21 = vadd.f32 %v401_v14, %v400_v13  ;;  %v399_v23 = vld [vmem:[%s14940_s4 + $0x298] sm:$0xff]  ;;  %v406_v25 = vld [vmem:[%s14940_s4 + $0x2d0] sm:$0xff]  ;;  %v404_v30 = vld [vmem:[%s14940_s4 + $0x2c0] sm:$0xff] }
  0xe1   : > { %482 = vadd.xlane.f32.xlu1 %v481_v11  ;;  %v403_v24 = vld [vmem:[%s14940_s4 + $0x2b8] sm:$0xff]  ;;  %v507_v29 = vadd.f32 %v506_v20, %v397_v9  ;;  %v408_v32 = vld [vmem:[%s14940_s4 + $0x2e0] sm:$0xff]  ;;  %v409_v33 = vld [vmem:[%s14940_s4 + $0x2e8] sm:$0xff] }
  0xe2   : > { %v407_v26 = vld [vmem:[%s14940_s4 + $0x2d8] sm:$0xff]  ;;  %v495_v27 = vadd.f32 %v494_v16, %v387_v5  ;;  %v501_v28 = vadd.f32 %v500_v18, %v392_v7  ;;  %v513_v31 = vadd.f32 %v512_v21, %v402_v15  ;;  %v405_v34 = vld [vmem:[%s14940_s4 + $0x2c8] sm:$0xff]  ;;  %v410_v39 = vld [vmem:[%s14940_s4 + $0x2f0] sm:$0xff] }
  0xe3   : > { %v519_v35 = vadd.f32 %v407_v26, %v406_v25  ;;  %v508_v37 = vadd.f32 %v507_v29, %v398_v19  ;;  %v411_v43 = vld [vmem:[%s14940_s4 + $0x2f8] sm:$0xff]  ;;  %v12982_v50 = vld [vmem:[#allocation8] ss:$72 sps:$4 sm:$0xff]   ;;  %v12984_v52 = vld [vmem:[#allocation8 + $0x94] ss:$72 sps:$4 sm:$0xff]  }
  0xe4   : > { %489 = vadd.xlane.f32.xlu0 %v488_v22  ;;  %v502_v36 = vadd.f32 %v501_v28, %v393_v17  ;;  %v514_v38 = vadd.f32 %v513_v31, %v403_v24  ;;  %v12978_v48 = vld [vmem:[#allocation8 + $0x4] ss:$72 sps:$4 sm:$0xff]   ;;  %v12983_v51 = vld [vmem:[#allocation8 + $0x900] ss:$72 sps:$4 sm:$0xff]   ;;  %v12986_v53 = vld [vmem:[#allocation8 + $0x994] ss:$72 sps:$4 sm:$0xff]  }
  0xe5   : > { %496 = vadd.xlane.f32.xlu1 %v495_v27  ;;  %v520_v40 = vadd.f32 %v519_v35, %v408_v32  ;;  %v509_v41 = vadd.f32 %v508_v37, %v399_v23  ;;  %v12980_v49 = vld [vmem:[#allocation8 + $0x904] ss:$72 sps:$4 sm:$0xff]   ;;  %6573 = vmatprep.subr.bf16.mxu1 %v12978_v48  ;;  %v12988_v54 = vld [vmem:[#allocation8 + $0x90] ss:$72 sps:$4 sm:$0xff]   ;;  %v12994_v58 = vld [vmem:[#allocation8 + $0x120] ss:$72 sps:$4 sm:$0xff]  }
  0xe6   : > { %v515_v42 = vadd.f32 %v514_v38, %v404_v30  ;;  %6686 = vmatprep.subr.bf16.mxu0 %v12980_v49  ;;  %6574 = vmatpush1.bf16.msra.mxu1 %v12982_v50  ;;  %v12989_v55 = vld [vmem:[#allocation8 + $0x990] ss:$72 sps:$4 sm:$0xff]   ;;  %v12990_v56 = vld [vmem:[#allocation8 + $0x124] ss:$72 sps:$4 sm:$0xff]   ;;  %v12995_v59 = vld [vmem:[#allocation8 + $0xa20] ss:$72 sps:$4 sm:$0xff]  }
  0xe7   : > { %v521_v44 = vadd.f32 %v520_v40, %v409_v33  ;;  %6687 = vmatpush1.bf16.msra.mxu0 %v12983_v51  ;;  %6575 = vmatprep.subr.bf16.mxu1 %v12984_v52  ;;  %v12992_v57 = vld [vmem:[#allocation8 + $0xa24] ss:$72 sps:$4 sm:$0xff]   ;;  %v12996_v60 = vld [vmem:[#allocation8 + $0x1b4] ss:$72 sps:$4 sm:$0xff]   ;;  %v13000_v62 = vld [vmem:[#allocation8 + $0x1b0] ss:$72 sps:$4 sm:$0xff]  }
  0xe8   : > { %503 = vadd.xlane.f32.xlu0 %v502_v36  ;;  %v516_v45 = vadd.f32 %v515_v42, %v405_v34  ;;  %6688 = vmatprep.subr.bf16.mxu0 %v12986_v53  ;;  %v12998_v61 = vld [vmem:[#allocation8 + $0xab4] ss:$72 sps:$4 sm:$0xff]   ;;  %v13001_v63 = vld [vmem:[#allocation8 + $0xab0] ss:$72 sps:$4 sm:$0xff]   ;;  %v13002_v0 = vld [vmem:[#allocation8 + $0x244] ss:$72 sps:$4 sm:$0xff]  }
  0xe9   : > { %510 = vadd.xlane.f32.xlu1 %v509_v41  ;;  %v522_v46 = vadd.f32 %v521_v44, %v410_v39  ;;  %v13004_v1 = vld [vmem:[#allocation8 + $0xb44] ss:$72 sps:$4 sm:$0xff]   ;;  %v13006_v2 = vld [vmem:[#allocation8 + $0x240] ss:$72 sps:$4 sm:$0xff]   ;;  %v13008_v4 = vld [vmem:[#allocation8 + $0x2d4] ss:$72 sps:$4 sm:$0xff]  }
  0xea   : > { %6576 = vmatpush1.bf16.msra.mxu1 %v12988_v54  ;;  %v13007_v3 = vld [vmem:[#allocation8 + $0xb40] ss:$72 sps:$4 sm:$0xff]   ;;  %v13010_v5 = vld [vmem:[#allocation8 + $0xbd4] ss:$72 sps:$4 sm:$0xff]   ;;  %v13012_v6 = vld [vmem:[#allocation8 + $0x2d0] ss:$72 sps:$4 sm:$0xff]  }
  0xeb   : > { %v523_v47 = vadd.f32 %v522_v46, %v411_v43  ;;  %6689 = vmatpush1.bf16.msra.mxu0 %v12989_v55  ;;  %6577 = vmatprep.subr.bf16.mxu1 %v12990_v56  ;;  %v13013_v7 = vld [vmem:[#allocation8 + $0xbd0] ss:$72 sps:$4 sm:$0xff]   ;;  %v13014_v8 = vld [vmem:[#allocation8 + $0x364] ss:$72 sps:$4 sm:$0xff]   ;;  %v13018_v10 = vld [vmem:[#allocation8 + $0x360] ss:$72 sps:$4 sm:$0xff]  }
  0xec   : > { %517 = vadd.xlane.f32.xlu0 %v516_v45  ;;  %6690 = vmatprep.subr.bf16.mxu0 %v12992_v57  ;;  %v13016_v9 = vld [vmem:[#allocation8 + $0xc64] ss:$72 sps:$4 sm:$0xff]   ;;  %v13019_v11 = vld [vmem:[#allocation8 + $0xc60] ss:$72 sps:$4 sm:$0xff]   ;;  %v13020_v12 = vld [vmem:[#allocation8 + $0x3f4] ss:$72 sps:$4 sm:$0xff]  }
  0xed   : > { %524 = vadd.xlane.f32.xlu1 %v523_v47  ;;  %v13022_v13 = vld [vmem:[#allocation8 + $0xcf4] ss:$72 sps:$4 sm:$0xff]   ;;  %v13024_v14 = vld [vmem:[#allocation8 + $0x3f0] ss:$72 sps:$4 sm:$0xff]   ;;  %v13026_v16 = vld [vmem:[#allocation8 + $0x484] ss:$72 sps:$4 sm:$0xff]  }
  0xee   : > { %6578 = vmatpush1.bf16.msra.mxu1 %v12994_v58  ;;  %v13025_v15 = vld [vmem:[#allocation8 + $0xcf0] ss:$72 sps:$4 sm:$0xff]   ;;  %v13028_v17 = vld [vmem:[#allocation8 + $0xd84] ss:$72 sps:$4 sm:$0xff]   ;;  %v13030_v18 = vld [vmem:[#allocation8 + $0x480] ss:$72 sps:$4 sm:$0xff]  }
  0xef   : > { %6691 = vmatpush1.bf16.msra.mxu0 %v12995_v59  ;;  %6579 = vmatprep.subr.bf16.mxu1 %v12996_v60  ;;  %v13031_v19 = vld [vmem:[#allocation8 + $0xd80] ss:$72 sps:$4 sm:$0xff]   ;;  %v13032_v20 = vld [vmem:[#allocation8 + $0x514] ss:$72 sps:$4 sm:$0xff]   ;;  %v14309_v32 = vld [vmem:[%s14940_s4 + $0x78] sm:$0xff] }
  0xf0   : > { %6692 = vmatprep.subr.bf16.mxu0 %v12998_v61  ;;  %v13034_v21 = vld [vmem:[#allocation8 + $0xe14] ss:$72 sps:$4 sm:$0xff]   ;;  %v14308_v30 = vld [vmem:[%s14940_s4 + $0x70] sm:$0xff]  ;;  %v14314_v44 = vld [vmem:[%s14940_s4 + $0x18] sm:$0xff] }
  0xf1   : > { %v14306_v26 = vld [vmem:[%s14940_s4 + $0x60] sm:$0xff]  ;;  %v14307_v28 = vld [vmem:[%s14940_s4 + $0x68] sm:$0xff]  ;;  %v14312_v39 = vld [vmem:[%s14940_s4 + $0x10] sm:$0xff] }
  0xf2   : > { %6580 = vmatpush1.bf16.msra.mxu1 %v13000_v62  ;;  %v14310_v35 = vld [vmem:[%s14940_s4] sm:$0xff]  ;;  %v14311_v37 = vld [vmem:[%s14940_s4 + $0x8] sm:$0xff] }
  0xf3   : > { %6693 = vmatpush1.bf16.msra.mxu0 %v13001_v63  ;;  %6581 = vmatprep.subr.bf16.mxu1 %v13002_v0  ;;  %v14313_v41 = vld [vmem:[%s14940_s4 + $0x80] sm:$0xff]  ;;  %v14316_v48 = vld [vmem:[%s14940_s4 + $0x28] sm:$0xff] }
  0xf4   : > { %6694 = vmatprep.subr.bf16.mxu0 %v13004_v1  ;;  %v14315_v46 = vld [vmem:[%s14940_s4 + $0x20] sm:$0xff]  ;;  %v14317_v54 = vld [vmem:[%s14940_s4 + $0x88] sm:$0xff] }
  0xf6   : > { %6582 = vmatpush1.bf16.msra.mxu1 %v13006_v2 }
  0xf7   : > { %6695 = vmatpush1.bf16.msra.mxu0 %v13007_v3  ;;  %6583 = vmatprep.subr.bf16.mxu1 %v13008_v4  ;;  %v14318_v4 = vld [vmem:[%s14940_s4 + $0x30] sm:$0xff] }
  0xf8   : > { %6696 = vmatprep.subr.bf16.mxu0 %v13010_v5 }
  0xfa   : > { %6584 = vmatpush1.bf16.msra.mxu1 %v13012_v6  ;;  %v14319_v6 = vld [vmem:[%s14940_s4 + $0x38] sm:$0xff] }
  0xfb   : > { %6697 = vmatpush1.bf16.msra.mxu0 %v13013_v7  ;;  %6585 = vmatprep.subr.bf16.mxu1 %v13014_v8 }
  0xfc   : > { %6698 = vmatprep.subr.bf16.mxu0 %v13016_v9 }
  0xfe   : > { %6586 = vmatpush1.bf16.msra.mxu1 %v13018_v10 }
  0xff   : > { %6699 = vmatpush1.bf16.msra.mxu0 %v13019_v11  ;;  %6587 = vmatprep.subr.bf16.mxu1 %v13020_v12  ;;  %v14320_v11 = vld [vmem:[%s14940_s4 + $0x40] sm:$0xff] }
 0x100   : > { %6700 = vmatprep.subr.bf16.mxu0 %v13022_v13 }
 0x102   : > { %6588 = vmatpush1.bf16.msra.mxu1 %v13024_v14  ;;  %v14321_v14 = vld [vmem:[%s14940_s4 + $0x48] sm:$0xff] }
 0x103   : > { %6701 = vmatpush1.bf16.msra.mxu0 %v13025_v15  ;;  %6589 = vmatprep.subr.bf16.mxu1 %v13026_v16  ;;  %v14322_v16 = vld [vmem:[%s14940_s4 + $0x50] sm:$0xff] }
 0x104   : > { %6702 = vmatprep.subr.bf16.mxu0 %v13028_v17 }
 0x106   : > { %6590 = vmatpush1.bf16.msra.mxu1 %v13030_v18  ;;  %v14323_v18 = vld [vmem:[%s14940_s4 + $0x58] sm:$0xff] }
 0x107   : > { %6703 = vmatpush1.bf16.msra.mxu0 %v13031_v19  ;;  %6591 = vmatprep.subr.bf16.mxu1 %v13032_v20 }
 0x108   : > { %6704 = vmatprep.subr.bf16.mxu0 %v13034_v21 }
 0x15b   : > { %v434_v22 = vpop.xlane.xlu1 %433 }
 0x15c   : > { %v529_v23 = vmul.f32 0.0013020834, %v434_v22 }
 0x15d   : > { %v420_v24 = vpop.xlane.xlu0 %419 }
 0x15e   : > { %v527_v25 = vmul.f32 0.0013020834, %v420_v24  ;;  %v15051_v27 = vsub.f32 %v14306_v26, %v529_v23  ;;  %v15054_v29 = vsub.f32 %v14307_v28, %v529_v23  ;;  %v15057_v31 = vsub.f32 %v14308_v30, %v529_v23 }
 0x15f   : > { %v15060_v33 = vsub.f32 %v14309_v32, %v529_v23  ;;  %v441_v34 = vpop.xlane.xlu1 %440  ;;  %v15072_v42 = vsub.f32 %v14313_v41, %v529_v23  ;;  %v15090_v55 = vsub.f32 %v14317_v54, %v529_v23 }
 0x160   : > { %v15063_v36 = vsub.f32 %v14310_v35, %v527_v25  ;;  %v15066_v38 = vsub.f32 %v14311_v37, %v527_v25  ;;  %v15069_v40 = vsub.f32 %v14312_v39, %v527_v25  ;;  %v15075_v45 = vsub.f32 %v14314_v44, %v527_v25 }
 0x161   : > { %17541 = vst [vmem:[#allocation19_spill] sm:$0xff] %v15072_v42  ;;  %v427_v43 = vpop.xlane.xlu0 %426  ;;  %v15078_v47 = vsub.f32 %v14315_v46, %v527_v25  ;;  %v15081_v49 = vsub.f32 %v14316_v48, %v527_v25  ;;  %v651_v50 = vmul.f32 %v15051_v27, %v15051_v27  ;;  %17542 = vst [vmem:[#allocation20_spill] sm:$0xff] %v15090_v55  ;;  %v15092_v56 = vmul.f32 0.0013020834, %v441_v34  ;;  %v14325_v46 = vld [vmem:[%s14940_s4 + $0x98] sm:$0xff] }
 0x162   : > { %v528_v51 = vmul.f32 0.0013020834, %v427_v43  ;;  %v639_v52 = vmul.f32 %v15063_v36, %v15063_v36  ;;  %v640_v53 = vmul.f32 %v15066_v38, %v15066_v38  ;;  %v641_v57 = vmul.f32 %v15069_v40, %v15069_v40  ;;  %v14324_v43 = vld [vmem:[%s14940_s4 + $0x90] sm:$0xff] }
 0x163   : > { %v642_v58 = vmul.f32 %v15075_v45, %v15075_v45  ;;  %v652_v59 = vmul.f32 %v15054_v29, %v15054_v29  ;;  %v643_v60 = vmul.f32 %v15078_v47, %v15078_v47  ;;  %v644_v61 = vmul.f32 %v15081_v49, %v15081_v49 }
 0x164   : > { %v735_v62 = vadd.f32 %v640_v53, %v639_v52  ;;  %v653_v63 = vmul.f32 %v15057_v31, %v15057_v31  ;;  %v654_v2 = vmul.f32 %v15060_v33, %v15060_v33  ;;  %v15109_v5 = vsub.f32 %v14318_v4, %v528_v51 }
 0x165   : > { %v448_v0 = vpop.xlane.xlu0 %447  ;;  %v455_v1 = vpop.xlane.xlu1 %454  ;;  %v749_v3 = vadd.f32 %v652_v59, %v651_v50  ;;  %v15112_v7 = vsub.f32 %v14319_v6, %v528_v51  ;;  %v655_v9 = vmul.f32 %v15072_v42, %v15072_v42  ;;  %v656_v10 = vmul.f32 %v15090_v55, %v15090_v55  ;;  %v14326_v50 = vld [vmem:[%s14940_s4 + $0xa0] sm:$0xff]  ;;  %v13040_v55 = vld [vmem:[#allocation8 + $0xea4] ss:$72 sps:$4 sm:$0xff]  }
 0x166   : > { %v736_v8 = vadd.f32 %v735_v62, %v641_v57  ;;  %v15119_v12 = vsub.f32 %v14320_v11, %v528_v51  ;;  %v15122_v15 = vsub.f32 %v14321_v14, %v528_v51  ;;  %v15125_v17 = vsub.f32 %v14322_v16, %v528_v51  ;;  %v14327_v57 = vld [vmem:[%s14940_s4 + $0xa8] sm:$0xff]  ;;  %v14328_v62 = vld [vmem:[%s14940_s4 + $0xb0] sm:$0xff] }
 0x167   : > { %v750_v13 = vadd.f32 %v749_v3, %v653_v63  ;;  %v15128_v19 = vsub.f32 %v14323_v18, %v528_v51  ;;  %v531_v20 = vmul.f32 0.0013020834, %v448_v0  ;;  %v645_v22 = vmul.f32 %v15109_v5, %v15109_v5  ;;  %v14330_v18 = vld [vmem:[%s14940_s4 + $0xc0] sm:$0xff] }
 0x168   : > { %17543 = vst [vmem:[#allocation21_spill] sm:$0xff] %v15125_v17  ;;  %v737_v21 = vadd.f32 %v736_v8, %v642_v58  ;;  %v646_v23 = vmul.f32 %v15112_v7, %v15112_v7  ;;  %v15134_v24 = vmul.f32 0.0013020834, %v455_v1  ;;  %v647_v30 = vmul.f32 %v15119_v12, %v15119_v12 }
 0x169   : > { %17544 = vst [vmem:[#allocation22_spill] sm:$0xff] %v15128_v19  ;;  %v462_v25 = vpop.xlane.xlu0 %461  ;;  %v469_v26 = vpop.xlane.xlu1 %468  ;;  %v751_v28 = vadd.f32 %v750_v13, %v654_v2  ;;  %v648_v32 = vmul.f32 %v15122_v15, %v15122_v15  ;;  %v649_v35 = vmul.f32 %v15125_v17, %v15125_v17  ;;  %v650_v37 = vmul.f32 %v15128_v19, %v15128_v19 }
 0x16a   : > { %v738_v34 = vadd.f32 %v737_v21, %v643_v60  ;;  %v742_v39 = vadd.f32 %v646_v23, %v645_v22  ;;  %v15146_v44 = vsub.f32 %v14324_v43, %v15092_v56  ;;  %v15150_v48 = vsub.f32 %v14325_v46, %v15092_v56  ;;  %v14331_v21 = vld [vmem:[%s14940_s4 + $0xc8] sm:$0xff]  ;;  %v14332_v23 = vld [vmem:[%s14940_s4 + $0xd0] sm:$0xff] }
 0x16b   : > { %v752_v41 = vadd.f32 %v751_v28, %v655_v9  ;;  %v15154_v51 = vsub.f32 %v14326_v50, %v15092_v56  ;;  %v15156_v52 = vmul.f32 0.0013020834, %v462_v25  ;;  %v15160_v58 = vsub.f32 %v14327_v57, %v15092_v56  ;;  %v14329_v9 = vld [vmem:[%s14940_s4 + $0xb8] sm:$0xff]  ;;  %v14335_v43 = vld [vmem:[%s14940_s4 + $0xe8] sm:$0xff] }
 0x16c   : > { %v739_v53 = vadd.f32 %v738_v34, %v644_v61  ;;  %v743_v54 = vadd.f32 %v742_v39, %v647_v30  ;;  %v15162_v59 = vmul.f32 0.0013020834, %v469_v26  ;;  %v15166_v63 = vsub.f32 %v14328_v62, %v15092_v56  ;;  %v14333_v30 = vld [vmem:[%s14940_s4 + $0xd8] sm:$0xff]  ;;  %v14334_v34 = vld [vmem:[%s14940_s4 + $0xe0] sm:$0xff] }
 0x16d   : > { %v476_v60 = vpop.xlane.xlu0 %475  ;;  %v657_v0 = vmul.f32 %v15146_v44, %v15146_v44  ;;  %v658_v61 = vmul.f32 %v15150_v48, %v15150_v48  ;;  %v753_v3 = vadd.f32 %v752_v41, %v656_v10  ;;  %v659_v6 = vmul.f32 %v15154_v51, %v15154_v51 }
 0x16e   : > { %17545 = vst [vmem:[#allocation23_spill] sm:$0xff] %v15166_v63  ;;  %v15172_v1 = vmul.f32 0.0013020834, %v476_v60  ;;  %740 = vadd.xlane.f32.xlu0 %v739_v53  ;;  %v483_v2 = vpop.xlane.xlu1 %482  ;;  %v744_v4 = vadd.f32 %v743_v54, %v648_v32  ;;  %v15180_v11 = vsub.f32 %v14329_v9, %v15092_v56  ;;  %v660_v13 = vmul.f32 %v15160_v58, %v15160_v58 }
 0x16f   : > { %v15176_v8 = vmul.f32 0.0013020834, %v483_v2  ;;  %v756_v14 = vadd.f32 %v658_v61, %v657_v0  ;;  %v15185_v10 = vsub.f32 %v14330_v18, %v531_v20  ;;  %v15188_v22 = vsub.f32 %v14331_v21, %v531_v20  ;;  %v14336_v61 = vld [vmem:[%s14940_s4 + $0xf0] sm:$0xff] }
 0x170   : > { %17546 = vst [vmem:[#allocation24_spill] sm:$0xff] %v15180_v11  ;;  %v745_v16 = vadd.f32 %v744_v4, %v649_v35  ;;  %v15191_v25 = vsub.f32 %v14332_v23, %v531_v20  ;;  %v661_v56 = vmul.f32 %v15166_v63, %v15166_v63  ;;  %v15196_v32 = vsub.f32 %v14333_v30, %v531_v20 }
 0x171   : > { %v490_v26 = vpop.xlane.xlu0 %489  ;;  %v757_v28 = vadd.f32 %v756_v14, %v659_v6  ;;  %v15199_v35 = vsub.f32 %v14334_v34, %v531_v20  ;;  %v15202_v46 = vsub.f32 %v14335_v43, %v531_v20  ;;  %v663_v50 = vmul.f32 %v15185_v10, %v15185_v10  ;;  %v14337_v6 = vld [vmem:[%s14940_s4 + $0xf8] sm:$0xff] }
 0x172   : > { %754 = vadd.xlane.f32.xlu0 %v753_v3  ;;  %v746_v39 = vadd.f32 %v745_v16, %v650_v37  ;;  %v497_v41 = vpop.xlane.xlu1 %496  ;;  %v664_v53 = vmul.f32 %v15188_v22, %v15188_v22  ;;  %v15208_v54 = vmul.f32 0.0013020834, %v490_v26  ;;  %v662_v57 = vmul.f32 %v15180_v11, %v15180_v11  ;;  %v14339_v16 = vld [vmem:[%s14940_s4 + $0x108] sm:$0xff] }
 0x173   : > { %17547 = vst [vmem:[#allocation25_spill] sm:$0xff] %v15199_v35  ;;  %17548 = vst [vmem:[#allocation26_spill] sm:$0xff] %v15202_v46  ;;  %v758_v60 = vadd.f32 %v757_v28, %v660_v13  ;;  %v665_v37 = vmul.f32 %v15191_v25, %v15191_v25  ;;  %v15214_v20 = vmul.f32 0.0013020834, %v497_v41  ;;  %v666_v62 = vmul.f32 %v15196_v32, %v15196_v32  ;;  %v14338_v13 = vld [vmem:[%s14940_s4 + $0x100] sm:$0xff]  ;;  %v14340_v28 = vld [vmem:[%s14940_s4 + $0x110] sm:$0xff] }
 0x174   : > { %747 = vadd.xlane.f32.xlu1 %v746_v39  ;;  %v763_v0 = vadd.f32 %v664_v53, %v663_v50  ;;  %v15220_v2 = vsub.f32 %v14336_v61, %v15134_v24  ;;  %v15224_v9 = vsub.f32 %v14337_v6, %v15134_v24  ;;  %v15228_v14 = vsub.f32 %v14338_v13, %v15134_v24 }
 0x175   : > { %v504_v3 = vpop.xlane.xlu0 %503  ;;  %v759_v4 = vadd.f32 %v758_v60, %v661_v56  ;;  %v15232_v18 = vsub.f32 %v14339_v16, %v15134_v24  ;;  %v667_v21 = vmul.f32 %v15199_v35, %v15199_v35  ;;  %v668_v23 = vmul.f32 %v15202_v46, %v15202_v46  ;;  %v14341_v60 = vld [vmem:[%s14940_s4 + $0x118] sm:$0xff] }
 0x176   : > { %v764_v26 = vadd.f32 %v763_v0, %v665_v37  ;;  %v511_v56 = vpop.xlane.xlu1 %510  ;;  %v15240_v30 = vsub.f32 %v14340_v28, %v15134_v24  ;;  %v15242_v34 = vmul.f32 0.0013020834, %v504_v3  ;;  %v669_v41 = vmul.f32 %v15220_v2, %v15220_v2  ;;  %v14342_v3 = vld [vmem:[%s14940_s4 + $0x120] sm:$0xff]  ;;  %v14345_v28 = vld [vmem:[%s14940_s4 + $0x138] sm:$0xff] }
 0x177   : > { %v760_v39 = vadd.f32 %v759_v4, %v662_v57  ;;  %v670_v43 = vmul.f32 %v15224_v9, %v15224_v9  ;;  %v15248_v53 = vmul.f32 0.0013020834, %v511_v56  ;;  %v15252_v37 = vsub.f32 %v14341_v60, %v15134_v24  ;;  %v14343_v4 = vld [vmem:[%s14940_s4 + $0x128] sm:$0xff] }
 0x178   : > { %17549 = vst [vmem:[#allocation27_spill] sm:$0xff] %v15240_v30  ;;  %v765_v50 = vadd.f32 %v764_v26, %v666_v62  ;;  %v671_v0 = vmul.f32 %v15228_v14, %v15228_v14  ;;  %v672_v57 = vmul.f32 %v15232_v18, %v15232_v18  ;;  %v15260_v62 = vsub.f32 %v14342_v3, %v15156_v52  ;;  %v14344_v26 = vld [vmem:[%s14940_s4 + $0x130] sm:$0xff]  ;;  %v14347_v3 = vld [vmem:[%s14940_s4 + $0x148] sm:$0xff] }
 0x179   : > { %17550 = vst [vmem:[#allocation28_spill] sm:$0xff] %v15252_v37  ;;  %761 = vadd.xlane.f32.xlu1 %v760_v39  ;;  %v770_v61 = vadd.f32 %v670_v43, %v669_v41  ;;  %v15264_v6 = vsub.f32 %v14343_v4, %v15156_v52  ;;  %v518_v13 = vpop.xlane.xlu0 %517  ;;  %v673_v16 = vmul.f32 %v15240_v30, %v15240_v30  ;;  %v14346_v43 = vld [vmem:[%s14940_s4 + $0x140] sm:$0xff]  ;;  %v14348_v30 = vld [vmem:[%s14940_s4 + $0x150] sm:$0xff] }
 0x17a   : > { %v766_v24 = vadd.f32 %v765_v50, %v667_v21  ;;  %v15270_v56 = vsub.f32 %v14344_v26, %v15156_v52  ;;  %v15274_v39 = vsub.f32 %v14345_v28, %v15156_v52  ;;  %v15278_v60 = vsub.f32 %v14346_v43, %v15156_v52 }
 0x17b   : > { %v771_v41 = vadd.f32 %v770_v61, %v671_v0  ;;  %v15282_v21 = vsub.f32 %v14347_v3, %v15156_v52  ;;  %v675_v50 = vmul.f32 %v15260_v62, %v15260_v62  ;;  %v674_v26 = vmul.f32 %v15252_v37, %v15252_v37  ;;  %v525_v3 = vpop.xlane.xlu1 %524  ;;  %v14349_v37 = vld [vmem:[%s14940_s4 + $0x158] sm:$0xff] }
 0x17c   : > { %17551 = vst [vmem:[#allocation29_spill] sm:$0xff] %v15270_v56  ;;  %17552 = vst [vmem:[#allocation30_spill] sm:$0xff] %v15278_v60  ;;  %v767_v4 = vadd.f32 %v766_v24, %v668_v23  ;;  %v676_v0 = vmul.f32 %v15264_v6, %v15264_v6  ;;  %v677_v61 = vmul.f32 %v15270_v56, %v15270_v56  ;;  %v15292_v28 = vmul.f32 0.0013020834, %v518_v13  ;;  %v14350_v13 = vld [vmem:[%s14940_s4 + $0x160] sm:$0xff] }
 0x17d   : > { %17553 = vst [vmem:[#allocation31_spill] sm:$0xff] %v15282_v21  ;;  %v772_v43 = vadd.f32 %v771_v41, %v672_v57  ;;  %v678_v52 = vmul.f32 %v15274_v39, %v15274_v39  ;;  %v679_v23 = vmul.f32 %v15278_v60, %v15278_v60  ;;  %v15300_v35 = vsub.f32 %v14348_v30, %v15162_v59 }
 0x17e   : > { %768 = vadd.xlane.f32.xlu0 %v767_v4  ;;  %v777_v24 = vadd.f32 %v676_v0, %v675_v50  ;;  %v15304_v46 = vsub.f32 %v14349_v37, %v15162_v59  ;;  %v15308_v57 = vsub.f32 %v14350_v13, %v15162_v59  ;;  %v680_v60 = vmul.f32 %v15282_v21, %v15282_v21  ;;  %v14351_v4 = vld [vmem:[%s14940_s4 + $0x168] sm:$0xff]  ;;  %v14352_v0 = vld [vmem:[%s14940_s4 + $0x170] sm:$0xff]  ;;  %v13036_v13 = vld [vmem:[#allocation8 + $0x510] ss:$72 sps:$4 sm:$0xff]  }
 0x17f   : > { %17554 = vst [vmem:[#allocation32_spill] sm:$0xff] %v15300_v35  ;;  %v773_v41 = vadd.f32 %v772_v43, %v673_v16  ;;  %v15314_v50 = vsub.f32 %v14351_v4, %v15162_v59  ;;  %v15318_v30 = vsub.f32 %v14352_v0, %v15162_v59  ;;  %v681_v63 = vmul.f32 %v15300_v35, %v15300_v35  ;;  %v13037_v21 = vld [vmem:[#allocation8 + $0xe10] ss:$72 sps:$4 sm:$0xff]   ;;  %v13038_v4 = vld [vmem:[#allocation8 + $0x5a4] ss:$72 sps:$4 sm:$0xff]   ;;  %v14355_v35 = vld [vmem:[%s14940_s4 + $0x188] sm:$0xff] }
 0x180   : > { %17555 = vst [vmem:[#allocation33_spill] sm:$0xff] %v15308_v57  ;;  %v778_v37 = vadd.f32 %v777_v24, %v677_v61  ;;  %v682_v16 = vmul.f32 %v15304_v46, %v15304_v46  ;;  %v683_v43 = vmul.f32 %v15308_v57, %v15308_v57  ;;  %v15326_v11 = vmul.f32 0.0013020834, %v525_v3  ;;  %v14353_v0 = vld [vmem:[%s14940_s4 + $0x178] sm:$0xff]  ;;  %v14354_v57 = vld [vmem:[%s14940_s4 + $0x180] sm:$0xff]  ;;  %6592 = vmatpush1.bf16.msra.mxu1 %v13036_v13  ;;  %v14356_v3 = vld [vmem:[%s14940_s4 + $0x190] sm:$0xff] }
 0x181   : > { %17556 = vst [vmem:[#allocation34_spill] sm:$0xff] %v15318_v30  ;;  %v774_v42 = vadd.f32 %v773_v41, %v674_v26  ;;  %v15330_v61 = vsub.f32 %v14353_v0, %v15162_v59  ;;  %v684_v24 = vmul.f32 %v15314_v50, %v15314_v50  ;;  %v15336_v56 = vsub.f32 %v14354_v57, %v15172_v1  ;;  %v14358_v57 = vld [vmem:[%s14940_s4 + $0x1a0] sm:$0xff] }
 0x182   : > { %v779_v17 = vadd.f32 %v778_v37, %v678_v52  ;;  %v784_v19 = vadd.f32 %v682_v16, %v681_v63  ;;  %v15340_v26 = vsub.f32 %v14355_v35, %v15172_v1  ;;  %v685_v59 = vmul.f32 %v15318_v30, %v15318_v30  ;;  %v14357_v52 = vld [vmem:[%s14940_s4 + $0x198] sm:$0xff]  ;;  %6705 = vmatpush1.bf16.msra.mxu0 %v13037_v21 }
 0x183   : > { %17557 = vst [vmem:[#allocation35_spill] sm:$0xff] %v15330_v61  ;;  %17558 = vst [vmem:[#allocation36_spill] sm:$0xff] %v15336_v56  ;;  %775 = vadd.xlane.f32.xlu1 %v774_v42  ;;  %v15346_v41 = vsub.f32 %v14356_v3, %v15172_v1  ;;  %v15350_v63 = vsub.f32 %v14357_v52, %v15172_v1  ;;  %v15354_v37 = vsub.f32 %v14358_v57, %v15172_v1  ;;  %v14359_v3 = vld [vmem:[%s14940_s4 + $0x1a8] sm:$0xff]  ;;  %v14360_v57 = vld [vmem:[%s14940_s4 + $0x1b0] sm:$0xff] }
 0x184   : > { %v780_v35 = vadd.f32 %v779_v17, %v679_v23  ;;  %v785_v16 = vadd.f32 %v784_v19, %v683_v43  ;;  %v687_v42 = vmul.f32 %v15336_v56, %v15336_v56  ;;  %v688_v13 = vmul.f32 %v15340_v26, %v15340_v26  ;;  %6593 = vmatprep.subr.bf16.mxu1 %v13038_v4  ;;  %v14361_v56 = vld [vmem:[%s14940_s4 + $0x1b8] sm:$0xff] }
 0x185   : > { %17559 = vst [vmem:[#allocation37_spill] sm:$0xff] %v15346_v41  ;;  %17560 = vst [vmem:[#allocation38_spill] sm:$0xff] %v15350_v63  ;;  %v686_v0 = vmul.f32 %v15330_v61, %v15330_v61  ;;  %v15364_v52 = vsub.f32 %v14359_v3, %v15172_v1  ;;  %v689_v17 = vmul.f32 %v15346_v41, %v15346_v41  ;;  %6706 = vmatprep.subr.bf16.mxu0 %v13040_v55  ;;  %v13042_v1 = vld [vmem:[#allocation8 + $0x5a0] ss:$72 sps:$4 sm:$0xff]   ;;  %v13044_v61 = vld [vmem:[#allocation8 + $0x634] ss:$72 sps:$4 sm:$0xff]  }
 0x186   : > { %17561 = vst [vmem:[#allocation39_spill] sm:$0xff] %v15354_v37  ;;  %v690_v19 = vmul.f32 %v15350_v63, %v15350_v63  ;;  %v781_v23 = vadd.f32 %v780_v35, %v680_v60  ;;  %v786_v43 = vadd.f32 %v785_v16, %v684_v24  ;;  %v791_v21 = vadd.f32 %v688_v13, %v687_v42  ;;  %v13043_v3 = vld [vmem:[#allocation8 + $0xea0] ss:$72 sps:$4 sm:$0xff]   ;;  %v14362_v60 = vld [vmem:[%s14940_s4 + $0x1c0] sm:$0xff] }
 0x187   : > { %17562 = vst [vmem:[#allocation40_spill] sm:$0xff] %v15364_v52  ;;  %v15372_v30 = vsub.f32 %v14360_v57, %v15176_v8  ;;  %v691_v41 = vmul.f32 %v15354_v37, %v15354_v37  ;;  %v15378_v63 = vsub.f32 %v14361_v56, %v15176_v8  ;;  %v15382_v4 = vsub.f32 %v14362_v60, %v15176_v8  ;;  %v14363_v24 = vld [vmem:[%s14940_s4 + $0x1c8] sm:$0xff]  ;;  %v14364_v13 = vld [vmem:[%s14940_s4 + $0x1d0] sm:$0xff]  ;;  %v14365_v37 = vld [vmem:[%s14940_s4 + $0x1d8] sm:$0xff] }
 0x188   : > { %v15386_v35 = vsub.f32 %v14363_v24, %v15176_v8  ;;  %v13046_v55 = vld [vmem:[#allocation8 + $0xf34] ss:$72 sps:$4 sm:$0xff]   ;;  %782 = vadd.xlane.f32.xlu0 %v781_v23  ;;  %v787_v16 = vadd.f32 %v786_v43, %v685_v59  ;;  %v792_v42 = vadd.f32 %v791_v21, %v689_v17  ;;  %v15390_v57 = vsub.f32 %v14364_v13, %v15176_v8 }
 0x189   : > { %17563 = vst [vmem:[#allocation41_spill] sm:$0xff] %v15372_v30  ;;  %17564 = vst [vmem:[#allocation42_spill] sm:$0xff] %v15378_v63  ;;  %v693_v56 = vmul.f32 %v15372_v30, %v15372_v30  ;;  %v692_v60 = vmul.f32 %v15364_v52, %v15364_v52  ;;  %v15398_v24 = vsub.f32 %v14365_v37, %v15176_v8  ;;  %6594 = vmatpush1.bf16.msra.mxu1 %v13042_v1  ;;  %v14366_v13 = vld [vmem:[%s14940_s4 + $0x1e0] sm:$0xff]  ;;  %v14367_v37 = vld [vmem:[%s14940_s4 + $0x1e8] sm:$0xff] }
 0x18a   : > { %17565 = vst [vmem:[#allocation43_spill] sm:$0xff] %v15382_v4  ;;  %17566 = vst [vmem:[#allocation44_spill] sm:$0xff] %v15390_v57  ;;  %v694_v59 = vmul.f32 %v15378_v63, %v15378_v63  ;;  %v695_v17 = vmul.f32 %v15382_v4, %v15382_v4  ;;  %v788_v23 = vadd.f32 %v787_v16, %v686_v0  ;;  %6707 = vmatpush1.bf16.msra.mxu0 %v13043_v3  ;;  %v14368_v63 = vld [vmem:[%s14940_s4 + $0x1f0] sm:$0xff]  ;;  %v14369_v0 = vld [vmem:[%s14940_s4 + $0x1f8] sm:$0xff] }
 0x18b   : > { %17567 = vst [vmem:[#allocation45_spill] sm:$0xff] %v15398_v24  ;;  %v793_v43 = vadd.f32 %v792_v42, %v690_v19  ;;  %v696_v21 = vmul.f32 %v15386_v35, %v15386_v35  ;;  %v15408_v52 = vsub.f32 %v14366_v13, %v15208_v54  ;;  %v15412_v30 = vsub.f32 %v14367_v37, %v15208_v54  ;;  %v14370_v16 = vld [vmem:[%s14940_s4 + $0x200] sm:$0xff] }
 0x18c   : > { %v798_v8 = vadd.f32 %v694_v59, %v693_v56  ;;  %v15416_v4 = vsub.f32 %v14368_v63, %v15208_v54  ;;  %v15420_v19 = vsub.f32 %v14369_v0, %v15208_v54  ;;  %6595 = vmatprep.subr.bf16.mxu1 %v13044_v61  ;;  %789 = vadd.xlane.f32.xlu1 %v788_v23  ;;  %v14372_v0 = vld [vmem:[%s14940_s4 + $0x210] sm:$0xff] }
 0x18d   : > { %17568 = vst [vmem:[#allocation46_spill] sm:$0xff] %v15408_v52  ;;  %17569 = vst [vmem:[#allocation47_spill] sm:$0xff] %v15412_v30  ;;  %v794_v1 = vadd.f32 %v793_v43, %v691_v41  ;;  %v697_v3 = vmul.f32 %v15390_v57, %v15390_v57  ;;  %v15426_v42 = vsub.f32 %v14370_v16, %v15208_v54  ;;  %6708 = vmatprep.subr.bf16.mxu0 %v13046_v55  ;;  %v14371_v43 = vld [vmem:[%s14940_s4 + $0x208] sm:$0xff]  ;;  %v14373_v57 = vld [vmem:[%s14940_s4 + $0x218] sm:$0xff] }
 0x18e   : > { %17570 = vst [vmem:[#allocation48_spill] sm:$0xff] %v15416_v4  ;;  %17571 = vst [vmem:[#allocation49_spill] sm:$0xff] %v15420_v19  ;;  %v699_v63 = vmul.f32 %v15408_v52, %v15408_v52  ;;  %v698_v56 = vmul.f32 %v15398_v24, %v15398_v24  ;;  %v799_v59 = vadd.f32 %v798_v8, %v695_v17  ;;  %v14374_v55 = vld [vmem:[%s14940_s4 + $0x220] sm:$0xff]  ;;  %v14377_v52 = vld [vmem:[%s14940_s4 + $0x238] sm:$0xff] }
 0x18f   : > { %17572 = vst [vmem:[#allocation50_spill] sm:$0xff] %v15426_v42  ;;  %v700_v61 = vmul.f32 %v15412_v30, %v15412_v30  ;;  %v701_v41 = vmul.f32 %v15416_v4, %v15416_v4  ;;  %v795_v23 = vadd.f32 %v794_v1, %v692_v60  ;;  %v15438_v13 = vsub.f32 %v14371_v43, %v15208_v54  ;;  %v14375_v1 = vld [vmem:[%s14940_s4 + $0x228] sm:$0xff]  ;;  %v13052_v4 = vld [vmem:[#allocation8 + $0xfc4] ss:$72 sps:$4 sm:$0xff]  }
 0x190   : > { %v702_v37 = vmul.f32 %v15420_v19, %v15420_v19  ;;  %v15444_v17 = vsub.f32 %v14372_v0, %v15214_v20  ;;  %v800_v8 = vadd.f32 %v799_v59, %v696_v21  ;;  %v15448_v24 = vsub.f32 %v14373_v57, %v15214_v20  ;;  %v14376_v21 = vld [vmem:[%s14940_s4 + $0x230] sm:$0xff]  ;;  %v13048_v59 = vld [vmem:[#allocation8 + $0x630] ss:$72 sps:$4 sm:$0xff]  }
 0x191   : > { %17573 = vst [vmem:[#allocation51_spill] sm:$0xff] %v15438_v13  ;;  %v805_v16 = vadd.f32 %v700_v61, %v699_v63  ;;  %v15452_v60 = vsub.f32 %v14374_v55, %v15214_v20  ;;  %796 = vadd.xlane.f32.xlu0 %v795_v23  ;;  %v703_v54 = vmul.f32 %v15426_v42, %v15426_v42  ;;  %v13049_v61 = vld [vmem:[#allocation8 + $0xf30] ss:$72 sps:$4 sm:$0xff]   ;;  %v13050_v0 = vld [vmem:[#allocation8 + $0x6c4] ss:$72 sps:$4 sm:$0xff]  }
 0x192   : > { %17574 = vst [vmem:[#allocation52_spill] sm:$0xff] %v15444_v17  ;;  %17575 = vst [vmem:[#allocation53_spill] sm:$0xff] %v15448_v24  ;;  %v15458_v43 = vsub.f32 %v14375_v1, %v15214_v20  ;;  %v15462_v63 = vsub.f32 %v14376_v21, %v15214_v20  ;;  %v705_v57 = vmul.f32 %v15444_v17, %v15444_v17  ;;  %6596 = vmatpush1.bf16.msra.mxu1 %v13048_v59  ;;  %v14381_v30 = vld [vmem:[%s14940_s4 + $0x258] sm:$0xff] }
 0x193   : > { %17576 = vst [vmem:[#allocation54_spill] sm:$0xff] %v15452_v60  ;;  %v801_v23 = vadd.f32 %v800_v8, %v697_v3  ;;  %v806_v55 = vadd.f32 %v805_v16, %v701_v41  ;;  %v706_v42 = vmul.f32 %v15448_v24, %v15448_v24  ;;  %v707_v1 = vmul.f32 %v15452_v60, %v15452_v60  ;;  %v14378_v41 = vld [vmem:[%s14940_s4 + $0x240] sm:$0xff]  ;;  %v14379_v24 = vld [vmem:[%s14940_s4 + $0x248] sm:$0xff] }
 0x194   : > { %17577 = vst [vmem:[#allocation55_spill] sm:$0xff] %v15458_v43  ;;  %17578 = vst [vmem:[#allocation56_spill] sm:$0xff] %v15462_v63  ;;  %v704_v21 = vmul.f32 %v15438_v13, %v15438_v13  ;;  %v15474_v17 = vsub.f32 %v14377_v52, %v15214_v20  ;;  %v708_v3 = vmul.f32 %v15458_v43, %v15458_v43  ;;  %6709 = vmatpush1.bf16.msra.mxu0 %v13049_v61  ;;  %v14380_v52 = vld [vmem:[%s14940_s4 + $0x250] sm:$0xff]  ;;  %v14383_v61 = vld [vmem:[%s14940_s4 + $0x268] sm:$0xff] }
 0x195   : > { %v15480_v8 = vsub.f32 %v14378_v41, %v15242_v34  ;;  %v802_v16 = vadd.f32 %v801_v23, %v698_v56  ;;  %v807_v60 = vadd.f32 %v806_v55, %v702_v37  ;;  %v812_v19 = vadd.f32 %v706_v42, %v705_v57  ;;  %v14382_v56 = vld [vmem:[%s14940_s4 + $0x260] sm:$0xff]  ;;  %6597 = vmatprep.subr.bf16.mxu1 %v13050_v0 }
 0x196   : > { %17579 = vst [vmem:[#allocation57_spill] sm:$0xff] %v15474_v17  ;;  %v15484_v13 = vsub.f32 %v14379_v24, %v15242_v34  ;;  %v709_v20 = vmul.f32 %v15462_v63, %v15462_v63  ;;  %v15490_v43 = vsub.f32 %v14380_v52, %v15242_v34  ;;  %v15494_v41 = vsub.f32 %v14381_v30, %v15242_v34  ;;  %v14385_v52 = vld [vmem:[%s14940_s4 + $0x278] sm:$0xff] }
 0x197   : > { %v15498_v42 = vsub.f32 %v14382_v56, %v15242_v34  ;;  %803 = vadd.xlane.f32.xlu1 %v802_v16  ;;  %v808_v24 = vadd.f32 %v807_v60, %v703_v54  ;;  %v813_v37 = vadd.f32 %v812_v19, %v707_v1  ;;  %v711_v57 = vmul.f32 %v15480_v8, %v15480_v8  ;;  %v14384_v1 = vld [vmem:[%s14940_s4 + $0x270] sm:$0xff] }
 0x198   : > { %17580 = vst [vmem:[#allocation58_spill] sm:$0xff] %v15490_v43  ;;  %v712_v59 = vmul.f32 %v15484_v13, %v15484_v13  ;;  %v710_v30 = vmul.f32 %v15474_v17, %v15474_v17  ;;  %v15508_v23 = vsub.f32 %v14383_v61, %v15242_v34  ;;  %v713_v60 = vmul.f32 %v15490_v43, %v15490_v43  ;;  %v14386_v61 = vld [vmem:[%s14940_s4 + $0x280] sm:$0xff] }
 0x199   : > { %17581 = vst [vmem:[#allocation59_spill] sm:$0xff] %v15498_v42  ;;  %v714_v19 = vmul.f32 %v15494_v41, %v15494_v41  ;;  %6710 = vmatprep.subr.bf16.mxu0 %v13052_v4  ;;  %v809_v54 = vadd.f32 %v808_v24, %v704_v21  ;;  %v814_v0 = vadd.f32 %v813_v37, %v708_v3  ;;  %v14387_v4 = vld [vmem:[%s14940_s4 + $0x288] sm:$0xff]  ;;  %v14388_v37 = vld [vmem:[%s14940_s4 + $0x290] sm:$0xff] }
 0x19a   : > { %17582 = vst [vmem:[#allocation60_spill] sm:$0xff] %v15508_v23  ;;  %v819_v55 = vadd.f32 %v712_v59, %v711_v57  ;;  %v15516_v16 = vsub.f32 %v14384_v1, %v15248_v53  ;;  %v715_v34 = vmul.f32 %v15498_v42, %v15498_v42  ;;  %v15522_v56 = vsub.f32 %v14385_v52, %v15248_v53  ;;  %v14389_v52 = vld [vmem:[%s14940_s4 + $0x298] sm:$0xff] }
 0x19b   : > { %v15526_v63 = vsub.f32 %v14386_v61, %v15248_v53  ;;  %v15530_v21 = vsub.f32 %v14387_v4, %v15248_v53  ;;  %810 = vadd.xlane.f32.xlu0 %v809_v54  ;;  %v815_v3 = vadd.f32 %v814_v0, %v709_v20  ;;  %v15534_v57 = vsub.f32 %v14388_v37, %v15248_v53  ;;  %v13054_v54 = vld [vmem:[#allocation8 + $0x6c0] ss:$72 sps:$4 sm:$0xff]  }
 0x19c   : > { %17583 = vst [vmem:[#allocation61_spill] sm:$0xff] %v15516_v16  ;;  %17584 = vst [vmem:[#allocation62_spill] sm:$0xff] %v15522_v56  ;;  %v820_v24 = vadd.f32 %v819_v55, %v713_v60  ;;  %v717_v59 = vmul.f32 %v15516_v16, %v15516_v16  ;;  %v716_v1 = vmul.f32 %v15508_v23, %v15508_v23  ;;  %v13055_v0 = vld [vmem:[#allocation8 + $0xfc0] ss:$72 sps:$4 sm:$0xff]   ;;  %v13056_v55 = vld [vmem:[#allocation8 + $0x754] ss:$72 sps:$4 sm:$0xff]   ;;  %6598 = vmatpush1.bf16.msra.mxu1 %v13054_v54 }
 0x19d   : > { %17585 = vst [vmem:[#allocation63_spill] sm:$0xff] %v15526_v63  ;;  %17586 = vst [vmem:[#allocation64_spill] sm:$0xff] %v15534_v57  ;;  %v15542_v61 = vsub.f32 %v14389_v52, %v15248_v53  ;;  %v718_v20 = vmul.f32 %v15522_v56, %v15522_v56  ;;  %v719_v60 = vmul.f32 %v15526_v63, %v15526_v63  ;;  %v14390_v23 = vld [vmem:[%s14940_s4 + $0x2a0] sm:$0xff]  ;;  %v14391_v16 = vld [vmem:[%s14940_s4 + $0x2a8] sm:$0xff]  ;;  %6711 = vmatpush1.bf16.msra.mxu0 %v13055_v0 }
 0x19e   : > { %v816_v4 = vadd.f32 %v815_v3, %v710_v30  ;;  %v821_v37 = vadd.f32 %v820_v24, %v714_v19  ;;  %v720_v42 = vmul.f32 %v15530_v21, %v15530_v21  ;;  %v15552_v53 = vsub.f32 %v14390_v23, %v15292_v28  ;;  %v13058_v52 = vld [vmem:[#allocation8 + $0x1054] ss:$72 sps:$4 sm:$0xff]   ;;  %v14392_v63 = vld [vmem:[%s14940_s4 + $0x2b0] sm:$0xff]  ;;  %v14393_v30 = vld [vmem:[%s14940_s4 + $0x2b8] sm:$0xff]  ;;  %6599 = vmatprep.subr.bf16.mxu1 %v13056_v55 }
 0x19f   : > { %17587 = vst [vmem:[#allocation65_spill] sm:$0xff] %v15542_v61  ;;  %v826_v17 = vadd.f32 %v718_v20, %v717_v59  ;;  %v15556_v56 = vsub.f32 %v14391_v16, %v15292_v28  ;;  %v15560_v43 = vsub.f32 %v14392_v63, %v15292_v28  ;;  %v15564_v19 = vsub.f32 %v14393_v30, %v15292_v28  ;;  %v14394_v24 = vld [vmem:[%s14940_s4 + $0x2c0] sm:$0xff] }
 0x1a0   : > { %17588 = vst [vmem:[#allocation66_spill] sm:$0xff] %v15552_v53  ;;  %817 = vadd.xlane.f32.xlu1 %v816_v4  ;;  %v822_v23 = vadd.f32 %v821_v37, %v715_v34  ;;  %v721_v3 = vmul.f32 %v15534_v57, %v15534_v57  ;;  %v15570_v16 = vsub.f32 %v14394_v24, %v15292_v28  ;;  %v14395_v37 = vld [vmem:[%s14940_s4 + $0x2c8] sm:$0xff]  ;;  %v14396_v57 = vld [vmem:[%s14940_s4 + $0x2d0] sm:$0xff] }
 0x1a1   : > { %17589 = vst [vmem:[#allocation67_spill] sm:$0xff] %v15560_v43  ;;  %17590 = vst [vmem:[#allocation68_spill] sm:$0xff] %v15564_v19  ;;  %v723_v63 = vmul.f32 %v15552_v53, %v15552_v53  ;;  %v722_v59 = vmul.f32 %v15542_v61, %v15542_v61  ;;  %v827_v20 = vadd.f32 %v826_v17, %v719_v60  ;;  %v14397_v53 = vld [vmem:[%s14940_s4 + $0x2d8] sm:$0xff]  ;;  %6712 = vmatprep.subr.bf16.mxu0 %v13058_v52 }
 0x1a2   : > { %17591 = vst [vmem:[#allocation69_spill] sm:$0xff] %v15570_v16  ;;  %v724_v54 = vmul.f32 %v15556_v56, %v15556_v56  ;;  %v725_v34 = vmul.f32 %v15560_v43, %v15560_v43  ;;  %v823_v4 = vadd.f32 %v822_v23, %v716_v1  ;;  %v15582_v30 = vsub.f32 %v14395_v37, %v15292_v28  ;;  %v14398_v1 = vld [vmem:[%s14940_s4 + $0x2e0] sm:$0xff]  ;;  %v14399_v37 = vld [vmem:[%s14940_s4 + $0x2e8] sm:$0xff]  ;;  %v14401_v43 = vld [vmem:[%s14940_s4 + $0x2f8] sm:$0xff] }
 0x1a3   : > { %v726_v24 = vmul.f32 %v15564_v19, %v15564_v19  ;;  %v15588_v17 = vsub.f32 %v14396_v57, %v15326_v11  ;;  %v828_v60 = vadd.f32 %v827_v20, %v720_v42  ;;  %v15592_v0 = vsub.f32 %v14397_v53, %v15326_v11  ;;  %v14400_v42 = vld [vmem:[%s14940_s4 + $0x2f0] sm:$0xff] }
 0x1a4   : > { %17592 = vst [vmem:[#allocation70_spill] sm:$0xff] %v15582_v30  ;;  %v833_v61 = vadd.f32 %v724_v54, %v723_v63  ;;  %v15596_v23 = vsub.f32 %v14398_v1, %v15326_v11  ;;  %824 = vadd.xlane.f32.xlu0 %v823_v4  ;;  %v727_v28 = vmul.f32 %v15570_v16, %v15570_v16  ;;  %v13060_v4 = vld [vmem:[#allocation8 + $0x750] ss:$72 sps:$4 sm:$0xff]   ;;  %v13062_v16 = vld [vmem:[#allocation8 + $0x7e4] ss:$72 sps:$4 sm:$0xff]  }
 0x1a5   : > { %17593 = vst [vmem:[#allocation71_spill] sm:$0xff] %v15588_v17  ;;  %17594 = vst [vmem:[#allocation72_spill] sm:$0xff] %v15592_v0  ;;  %v15602_v57 = vsub.f32 %v14399_v37, %v15326_v11  ;;  %v15606_v55 = vsub.f32 %v14400_v42, %v15326_v11  ;;  %v729_v53 = vmul.f32 %v15588_v17, %v15588_v17  ;;  %v13061_v1 = vld [vmem:[#allocation8 + $0x1050] ss:$72 sps:$4 sm:$0xff]   ;;  %6600 = vmatpush1.bf16.msra.mxu1 %v13060_v4 }
 0x1a6   : > { %17595 = vst [vmem:[#allocation73_spill] sm:$0xff] %v15596_v23  ;;  %v829_v63 = vadd.f32 %v828_v60, %v721_v3  ;;  %v834_v20 = vadd.f32 %v833_v61, %v725_v34  ;;  %v730_v52 = vmul.f32 %v15592_v0, %v15592_v0  ;;  %v731_v54 = vmul.f32 %v15596_v23, %v15596_v23  ;;  %v13064_v61 = vld [vmem:[#allocation8 + $0x10e4] ss:$72 sps:$4 sm:$0xff]  }
 0x1a7   : > { %17596 = vst [vmem:[#allocation74_spill] sm:$0xff] %v15602_v57  ;;  %17597 = vst [vmem:[#allocation75_spill] sm:$0xff] %v15606_v55  ;;  %v728_v37 = vmul.f32 %v15582_v30, %v15582_v30  ;;  %v15618_v42 = vsub.f32 %v14401_v43, %v15326_v11  ;;  %v732_v3 = vmul.f32 %v15602_v57, %v15602_v57  ;;  %6713 = vmatpush1.bf16.msra.mxu0 %v13061_v1 }
 0x1a8   : > { %v830_v34 = vadd.f32 %v829_v63, %v722_v59  ;;  %v835_v60 = vadd.f32 %v834_v20, %v726_v24  ;;  %v840_v17 = vadd.f32 %v730_v52, %v729_v53  ;;  %6601 = vmatprep.subr.bf16.mxu1 %v13062_v16  ;;  %6714 = vmatprep.subr.bf16.mxu0 %v13064_v61  ;;  %v13066_v59 = vld [vmem:[#allocation8 + $0x7e0] ss:$72 sps:$4 sm:$0xff]   ;;  %v13068_v53 = vld [vmem:[#allocation8 + $0x874] ss:$72 sps:$4 sm:$0xff]   ;;  %v13072_v16 = vld [vmem:[#allocation8 + $0x870] ss:$72 sps:$4 sm:$0xff]  }
 0x1a9   : > { %17598 = vst [vmem:[#allocation76_spill] sm:$0xff] %v15618_v42  ;;  %v733_v30 = vmul.f32 %v15606_v55, %v15606_v55  ;;  %v734_v11 = vmul.f32 %v15618_v42, %v15618_v42  ;;  %v13067_v24 = vld [vmem:[#allocation8 + $0x10e0] ss:$72 sps:$4 sm:$0xff]   ;;  %v13070_v20 = vld [vmem:[#allocation8 + $0x1174] ss:$72 sps:$4 sm:$0xff]   ;;  %6602 = vmatpush1.bf16.msra.mxu1 %v13066_v59 }
 0x1aa   : > { %831 = vadd.xlane.f32.xlu1 %v830_v34  ;;  %v836_v23 = vadd.f32 %v835_v60, %v727_v28  ;;  %v841_v0 = vadd.f32 %v840_v17, %v731_v54  ;;  %6603 = vmatprep.subr.bf16.mxu1 %v13068_v53  ;;  %v13073_v28 = vld [vmem:[#allocation8 + $0x1170] ss:$72 sps:$4 sm:$0xff]   ;;  %v13076_v17 = vld [vmem:[#allocation8 + $0x1204] ss:$72 sps:$4 sm:$0xff]  }
 0x1ab   : > { %6715 = vmatpush1.bf16.msra.mxu0 %v13067_v24  ;;  %v412_v59 = vld [vmem:[#allocation5] sm:$0x3f]  ;;  %v413_v24 = vld [vmem:[#allocation7] sm:$0x3f] }
 0x1ac   : > { %v837_v19 = vadd.f32 %v836_v23, %v728_v37  ;;  %v842_v43 = vadd.f32 %v841_v0, %v732_v3  ;;  %6716 = vmatprep.subr.bf16.mxu0 %v13070_v20  ;;  %v13079_v23 = vld [vmem:[#allocation8 + $0xc] ss:$72 sps:$4 sm:$0xff]  }
 0x1ad   : > { %6604 = vmatpush1.bf16.msra.mxu1 %v13072_v16 }
 0x1ae   : > { %838 = vadd.xlane.f32.xlu0 %v837_v19  ;;  %v843_v57 = vadd.f32 %v842_v43, %v733_v30  ;;  %6912 = vmatprep.subr.bf16.mxu1 %v13079_v23  ;;  %v992_v30 = vlaneseq }
 0x1af   : > { %6717 = vmatpush1.bf16.msra.mxu0 %v13073_v28 }
 0x1b0   : > { %v844_v63 = vadd.f32 %v843_v57, %v734_v11  ;;  %6799 = vmatprep.subr.bf16.mxu0 %v13076_v17  ;;  %v15626_v57 = vshrl.u32 %v992_v30, 7 }
 0x1b2   : > { %845 = vadd.xlane.f32.xlu1 %v844_v63  ;;  %17599 = vst [vmem:[#allocation77_spill] sm:$0xff] %v15626_v57  ;;  %v15629_v61 = vsub.s32 1, %v15626_v57  ;;  %v15632_v34 = vsub.s32 3, %v15626_v57  ;;  %v15635_v11 = vsub.s32 0, %v15626_v57  ;;  %v15638_v43 = vsub.s32 2, %v15626_v57 }
 0x1b3   : > { %v15641_v63 = vsub.s32 5, %v15626_v57  ;;  %v15644_v20 = vsub.s32 4, %v15626_v57 }
 0x1b4   : > { %17600 = vst [vmem:[#allocation78_spill] sm:$0xff] %v15629_v61  ;;  %17601 = vst [vmem:[#allocation79_spill] sm:$0xff] %v15632_v34  ;;  %v15647_v28 = vrot.slane %v412_v59, %v15629_v61  ;;  %v15650_v17 = vrot.slane %v412_v59, %v15632_v34  ;;  %v15653_v23 = vrot.slane %v412_v59, %v15635_v11 }
 0x1b5   : > { %17602 = vst [vmem:[#allocation80_spill] sm:$0xff] %v15635_v11  ;;  %17603 = vst [vmem:[#allocation81_spill] sm:$0xff] %v15638_v43  ;;  %v15689_v42 = vrot.slane %v413_v24, %v15644_v20 }
 0x1b6   : > { %17604 = vst [vmem:[#allocation82_spill] sm:$0xff] %v15641_v63  ;;  %17605 = vst [vmem:[#allocation83_spill] sm:$0xff] %v15644_v20 }
 0x1b7   : > { %17608 = vst [vmem:[#allocation86_spill] sm:$0xff] %v15689_v42 }
 0x1fb   : > { %v741_v19 = vpop.xlane.xlu0 %740 }
 0x1fc   : > { %v847_v0 = vmul.f32 0.0013020834, %v741_v19  ;;  %v15656_v19 = vrot.slane %v412_v59, %v15638_v43 }
 0x1fe   : > { %v863_v52 = vadd.f32 1e-05, %v847_v0  ;;  %v15659_v0 = vrot.slane %v413_v24, %v15629_v61 }
 0x1ff   : > { %v755_v54 = vpop.xlane.xlu0 %754 }
 0x200   : > { %14274 = vrsqrt.f32 %v863_v52  ;;  %v849_v4 = vmul.f32 0.0013020834, %v755_v54  ;;  %v15662_v52 = vrot.slane %v413_v24, %v15632_v34  ;;  %v15665_v54 = vrot.slane %v413_v24, %v15635_v11 }
 0x201   : > { %v748_v1 = vpop.xlane.xlu1 %747 }
 0x202   : > { %v848_v37 = vmul.f32 0.0013020834, %v748_v1  ;;  %v865_v3 = vadd.f32 1e-05, %v849_v4  ;;  %v15668_v1 = vrot.slane %v413_v24, %v15638_v43 }
 0x204   : > { %v864_v60 = vadd.f32 1e-05, %v848_v37  ;;  %14276 = vrsqrt.f32 %v865_v3  ;;  %v15671_v37 = vrot.slane %v412_v59, %v15641_v63  ;;  %v15674_v3 = vrot.slane %v413_v24, %v15641_v63 }
 0x206   : > { %14278 = vrsqrt.f32 %v864_v60  ;;  %v762_v53 = vpop.xlane.xlu1 %761  ;;  %17606 = vst [vmem:[#allocation84_spill] sm:$0xff] %v15674_v3  ;;  %v15677_v60 = vrot.slane %v412_v59, %v15644_v20 }
 0x207   : > { %v850_v16 = vmul.f32 0.0013020834, %v762_v53 }
 0x208   : > { %17607 = vst [vmem:[#allocation85_spill] sm:$0xff] %v15677_v60 }
 0x209   : > { %v866_v30 = vadd.f32 1e-05, %v850_v16 }
 0x20a   : > { %v14275_v4 = vpop.eup %14274 }
 0x20b   : > { %14280 = vrsqrt.f32 %v866_v30  ;;  %v769_v53 = vpop.xlane.xlu0 %768  ;;  %v896_v16 = vmul.f32 %v14275_v4, %v15066_v38  ;;  %v898_v57 = vmul.f32 %v14275_v4, %v15075_v45  ;;  %v895_v34 = vmul.f32 %v14275_v4, %v15063_v36 }
 0x20c   : > { %v851_v61 = vmul.f32 0.0013020834, %v769_v53  ;;  %v897_v43 = vmul.f32 %v14275_v4, %v15069_v40  ;;  %v900_v11 = vmul.f32 %v14275_v4, %v15081_v49  ;;  %v899_v55 = vmul.f32 %v14275_v4, %v15078_v47 }
 0x20d   : > { %v1023_v63 = vmul.f32 %v15647_v28, %v896_v16  ;;  %v1025_v59 = vmul.f32 %v15650_v17, %v898_v57  ;;  %v1022_v30 = vmul.f32 %v15653_v23, %v895_v34 }
 0x20e   : > { %v15691_v38 = vpop.eup %14276  ;;  %v867_v45 = vadd.f32 1e-05, %v851_v61  ;;  %v1024_v36 = vmul.f32 %v15656_v19, %v897_v43  ;;  %v15695_v40 = vmul.f32 %v15671_v37, %v900_v11  ;;  %v15698_v49 = vmul.f32 %v15677_v60, %v899_v55 }
 0x20f   : > { %v1150_v47 = vadd.f32 %v15659_v0, %v1023_v63  ;;  %v1152_v57 = vadd.f32 %v15662_v52, %v1025_v59  ;;  %v1149_v34 = vadd.f32 %v15665_v54, %v1022_v30  ;;  %v908_v24 = vmul.f32 %v15691_v38, %v15054_v29 }
 0x210   : > { %17609 = vst [vmem:[#allocation87_spill] sm:$0xff] %v15698_v49  ;;  %v15705_v4 = vpop.eup %14278  ;;  %14282 = vrsqrt.f32 %v867_v45  ;;  %v776_v61 = vpop.xlane.xlu1 %775  ;;  %v1151_v43 = vadd.f32 %v15668_v1, %v1024_v36  ;;  %v910_v11 = vmul.f32 %v15691_v38, %v15060_v33  ;;  %v907_v55 = vmul.f32 %v15691_v38, %v15051_v27  ;;  %v13085_v49 = vld [vmem:[#allocation8 + $0x9c] ss:$72 sps:$4 sm:$0xff]  }
 0x211   : > { %v852_v63 = vmul.f32 0.0013020834, %v776_v61  ;;  %v902_v53 = vmul.f32 %v15705_v4, %v15112_v7  ;;  %v904_v16 = vmul.f32 %v15705_v4, %v15122_v15  ;;  %v901_v29 = vmul.f32 %v15705_v4, %v15109_v5 }
 0x212   : > { %v903_v59 = vmul.f32 %v15705_v4, %v15119_v12  ;;  %v1035_v30 = vmul.f32 %v15647_v28, %v908_v24  ;;  %v1037_v33 = vmul.f32 %v15650_v17, %v910_v11  ;;  %v1034_v45 = vmul.f32 %v15653_v23, %v907_v55  ;;  %v13074_v55 = vld [vmem:[#allocation8 + $0x1200] ss:$72 sps:$4 sm:$0xff]  }
 0x213   : > { %v868_v27 = vadd.f32 1e-05, %v852_v63  ;;  %v1029_v36 = vmul.f32 %v15647_v28, %v902_v53  ;;  %v1031_v7 = vmul.f32 %v15650_v17, %v904_v16  ;;  %v1028_v61 = vmul.f32 %v15653_v23, %v901_v29  ;;  %v13077_v63 = vld [vmem:[#allocation8 + $0x8] ss:$72 sps:$4 sm:$0xff]  }
 0x214   : > { %v1030_v15 = vmul.f32 %v15656_v19, %v903_v59  ;;  %v1162_v5 = vadd.f32 %v15659_v0, %v1035_v30  ;;  %v1164_v20 = vadd.f32 %v15662_v52, %v1037_v33  ;;  %v1161_v12 = vadd.f32 %v15665_v54, %v1034_v45 }
 0x215   : > { %v15730_v24 = vpop.eup %14280  ;;  %14284 = vrsqrt.f32 %v868_v27  ;;  %v783_v11 = vpop.xlane.xlu0 %782  ;;  %v1156_v53 = vadd.f32 %v15659_v0, %v1029_v36  ;;  %v1158_v16 = vadd.f32 %v15662_v52, %v1031_v7  ;;  %v1155_v29 = vadd.f32 %v15665_v54, %v1028_v61 }
 0x216   : > { %v853_v60 = vmul.f32 0.0013020834, %v783_v11  ;;  %v1157_v59 = vadd.f32 %v15668_v1, %v1030_v15  ;;  %v914_v30 = vmul.f32 %v15730_v24, %v15150_v48  ;;  %v916_v33 = vmul.f32 %v15730_v24, %v15160_v58  ;;  %v13082_v48 = vld [vmem:[#allocation8 + $0x1294] ss:$72 sps:$4 sm:$0xff]   ;;  %v13080_v58 = vld [vmem:[#allocation8 + $0x1290] ss:$72 sps:$4 sm:$0xff]  }
 0x217   : > { %v15740_v45 = vpack.c.bf16 %v1156_v53, %v1150_v47  ;;  %v15742_v27 = vpack.c.bf16 %v1158_v16, %v1152_v57  ;;  %v15744_v42 = vpack.c.bf16 %v1155_v29, %v1149_v34  ;;  %v913_v36 = vmul.f32 %v15730_v24, %v15146_v44  ;;  %v13083_v47 = vld [vmem:[#allocation8 + $0x98] ss:$72 sps:$4 sm:$0xff]  }
 0x218   : > { %v869_v7 = vadd.f32 1e-05, %v853_v60  ;;  %v15748_v61 = vpack.c.bf16 %v1157_v59, %v1151_v43  ;;  %v1041_v15 = vmul.f32 %v15647_v28, %v914_v30  ;;  %v1043_v11 = vmul.f32 %v15650_v17, %v916_v33  ;;  %v13088_v33 = vld [vmem:[#allocation8 + $0x1324] ss:$72 sps:$4 sm:$0xff]  }
 0x219   : > { %17610 = vst [vmem:[#allocation88_spill] sm:$0xff] %v15740_v45  ;;  %17611 = vst [vmem:[#allocation89_spill] sm:$0xff] %v15742_v27  ;;  %v790_v3 = vpop.xlane.xlu1 %789  ;;  %6605 = vmatprep.mubr.bf16.mxu1 %v15740_v45  ;;  %6718 = vmatprep.mubr.bf16.mxu0 %v15742_v27  ;;  %v1040_v57 = vmul.f32 %v15653_v23, %v913_v36  ;;  %v909_v44 = vmul.f32 %v15691_v38, %v15057_v31  ;;  %v13091_v36 = vld [vmem:[#allocation8 + $0x12c] ss:$72 sps:$4 sm:$0xff]  }
 0x21a   : > { %17612 = vst [vmem:[#allocation90_spill] sm:$0xff] %v15744_v42  ;;  %17613 = vst [vmem:[#allocation91_spill] sm:$0xff] %v15748_v61  ;;  %v915_v60 = vmul.f32 %v15730_v24, %v15154_v51  ;;  %v15759_v34 = vpop.eup %14282  ;;  %14286 = vrsqrt.f32 %v869_v7  ;;  %v854_v43 = vmul.f32 0.0013020834, %v790_v3  ;;  %6606 = vmatmul.mubr.bf16.vlgmr.msra.gmra.mrb[0].mxu1 %v15744_v42  ;;  %6719 = vmatmul.mubr.bf16.vlgmr.msra.gmra.mrb[0].mxu0 %v15748_v61 }
 0x21b   : > { %v1168_v53 = vadd.f32 %v15659_v0, %v1041_v15  ;;  %v1170_v16 = vadd.f32 %v15662_v52, %v1043_v11  ;;  %6800 = vmatpush1.bf16.msra.mxu0 %v13074_v55  ;;  %6913 = vmatpush1.bf16.msra.mxu1 %v13077_v63  ;;  %v1167_v29 = vadd.f32 %v15665_v54, %v1040_v57  ;;  %v13086_v63 = vld [vmem:[#allocation8 + $0x1320] ss:$72 sps:$4 sm:$0xff]  }
 0x21c   : > { %v1036_v31 = vmul.f32 %v15656_v19, %v909_v44  ;;  %v1042_v51 = vmul.f32 %v15656_v19, %v915_v60  ;;  %v870_v59 = vadd.f32 1e-05, %v854_v43  ;;  %6801 = vmatprep.subr.bf16.mxu0 %v13082_v48  ;;  %6914 = vmatprep.subr.bf16.mxu1 %v13085_v49  ;;  %v920_v7 = vmul.f32 %v15759_v34, %v15188_v22  ;;  %v13089_v15 = vld [vmem:[#allocation8 + $0x128] ss:$72 sps:$4 sm:$0xff]  }
 0x21d   : > { %v15768_v30 = vpack.c.bf16 %v1168_v53, %v1162_v5  ;;  %v15770_v3 = vpack.c.bf16 %v1170_v16, %v1164_v20  ;;  %v15774_v11 = vpack.c.bf16 %v1167_v29, %v1161_v12  ;;  %v922_v20 = vmul.f32 %v15759_v34, %v15196_v32 }
 0x21e   : > { %v797_v55 = vpop.xlane.xlu0 %796  ;;  %v1163_v57 = vadd.f32 %v15668_v1, %v1036_v31  ;;  %v1169_v44 = vadd.f32 %v15668_v1, %v1042_v51  ;;  %14288 = vrsqrt.f32 %v870_v59  ;;  %v1047_v22 = vmul.f32 %v15647_v28, %v920_v7  ;;  %v13092_v31 = vld [vmem:[#allocation8 + $0x13b0] ss:$72 sps:$4 sm:$0xff]  }
 0x21f   : > { %17614 = vst [vmem:[#allocation92_spill] sm:$0xff] %v15768_v30  ;;  %17615 = vst [vmem:[#allocation93_spill] sm:$0xff] %v15770_v3  ;;  %v855_v5 = vmul.f32 0.0013020834, %v797_v55  ;;  %6615 = vmatprep.mubr.bf16.mxu1 %v15768_v30  ;;  %6728 = vmatprep.mubr.bf16.mxu0 %v15770_v3  ;;  %v919_v49 = vmul.f32 %v15759_v34, %v15185_v10  ;;  %v15785_v12 = vpop.eup %14284  ;;  %v1049_v60 = vmul.f32 %v15650_v17, %v922_v20  ;;  %v13095_v51 = vld [vmem:[#allocation8 + $0x1b8] ss:$72 sps:$4 sm:$0xff]  }
 0x220   : > { %17616 = vst [vmem:[#allocation94_spill] sm:$0xff] %v15774_v11  ;;  %6802 = vmatpush1.bf16.msra.mxu0 %v13080_v58  ;;  %6915 = vmatpush1.bf16.msra.mxu1 %v13083_v47  ;;  %v15787_v48 = vpack.c.bf16 %v1169_v44, %v1163_v57  ;;  %v921_v32 = vmul.f32 %v15759_v34, %v15191_v25  ;;  %v13094_v58 = vld [vmem:[#allocation8 + $0x13b4] ss:$72 sps:$4 sm:$0xff]   ;;  %v17659_v3 = vld [vmem:[#allocation73_spill] sm:$0xff] }
 0x221   : > { %v871_v43 = vadd.f32 1e-05, %v855_v5  ;;  %6803 = vmatprep.subr.bf16.mxu0 %v13088_v33  ;;  %6916 = vmatprep.subr.bf16.mxu1 %v13091_v36  ;;  %v926_v53 = vmul.f32 %v15785_v12, %v15224_v9  ;;  %v1174_v16 = vadd.f32 %v15659_v0, %v1047_v22  ;;  %v928_v10 = vmul.f32 %v15785_v12, %v15232_v18  ;;  %v13097_v47 = vld [vmem:[#allocation8 + $0x1bc] ss:$72 sps:$4 sm:$0xff]  }
 0x222   : > { %17617 = vst [vmem:[#allocation95_spill] sm:$0xff] %v15787_v48  ;;  %v1176_v29 = vadd.f32 %v15662_v52, %v1049_v60  ;;  %v925_v25 = vmul.f32 %v15785_v12, %v15220_v2  ;;  %v1046_v59 = vmul.f32 %v15653_v23, %v919_v49  ;;  %v927_v33 = vmul.f32 %v15785_v12, %v15228_v14  ;;  %v13100_v22 = vld [vmem:[#allocation8 + $0x1444] ss:$72 sps:$4 sm:$0xff]  }
 0x223   : > { %14290 = vrsqrt.f32 %v871_v43  ;;  %6616 = vmatmul.mubr.bf16.gmra.mrb[4].mxu1 %v15774_v11  ;;  %6729 = vmatmul.mubr.bf16.gmra.mrb[4].mxu0 %v15787_v48  ;;  %v1053_v18 = vmul.f32 %v15647_v28, %v926_v53  ;;  %v1055_v36 = vmul.f32 %v15650_v17, %v928_v10  ;;  %v1048_v7 = vmul.f32 %v15656_v19, %v921_v32  ;;  %v13103_v32 = vld [vmem:[#allocation8 + $0x24c] ss:$72 sps:$4 sm:$0xff]  }
 0x224   : > { %v804_v9 = vpop.xlane.xlu1 %803  ;;  %6804 = vmatpush1.bf16.msra.mxu0 %v13086_v63  ;;  %6917 = vmatpush1.bf16.msra.mxu1 %v13089_v15  ;;  %v1052_v2 = vmul.f32 %v15653_v23, %v925_v25  ;;  %v1173_v57 = vadd.f32 %v15665_v54, %v1046_v59  ;;  %v1054_v14 = vmul.f32 %v15656_v19, %v927_v33  ;;  %v15811_v44 = vpop.eup %14286  ;;  %v13098_v63 = vld [vmem:[#allocation8 + $0x1440] ss:$72 sps:$4 sm:$0xff]  }
 0x225   : > { %v856_v55 = vmul.f32 0.0013020834, %v804_v9  ;;  %v1180_v20 = vadd.f32 %v15659_v0, %v1053_v18  ;;  %v1182_v5 = vadd.f32 %v15662_v52, %v1055_v36  ;;  %6805 = vmatprep.subr.bf16.mxu0 %v13094_v58  ;;  %6918 = vmatprep.subr.bf16.mxu1 %v13097_v47  ;;  %v1175_v49 = vadd.f32 %v15668_v1, %v1048_v7  ;;  %v13101_v15 = vld [vmem:[#allocation8 + $0x248] ss:$72 sps:$4 sm:$0xff]  }
 0x226   : > { %v1179_v43 = vadd.f32 %v15665_v54, %v1052_v2  ;;  %v1181_v53 = vadd.f32 %v15668_v1, %v1054_v14  ;;  %v932_v10 = vmul.f32 %v15811_v44, %v15264_v6  ;;  %v934_v58 = vmul.f32 %v15811_v44, %v15274_v39  ;;  %v13104_v2 = vld [vmem:[#allocation8 + $0x14d0] ss:$72 sps:$4 sm:$0xff]  }
 0x227   : > { %v872_v60 = vadd.f32 1e-05, %v856_v55  ;;  %v15820_v59 = vpack.c.bf16 %v1180_v20, %v1174_v16  ;;  %v15822_v33 = vpack.c.bf16 %v1182_v5, %v1176_v29  ;;  %v931_v47 = vmul.f32 %v15811_v44, %v15260_v62  ;;  %v13106_v29 = vld [vmem:[#allocation8 + $0x14d4] ss:$72 sps:$4 sm:$0xff]   ;;  %v17644_v48 = vld [vmem:[#allocation54_spill] sm:$0xff] }
 0x228   : > { %v811_v25 = vpop.xlane.xlu0 %810  ;;  %6806 = vmatpush1.bf16.msra.mxu0 %v13092_v31  ;;  %6919 = vmatpush1.bf16.msra.mxu1 %v13095_v51  ;;  %v15828_v18 = vpack.c.bf16 %v1179_v43, %v1173_v57  ;;  %v15830_v36 = vpack.c.bf16 %v1181_v53, %v1175_v49  ;;  %v15832_v6 = vpop.eup %14288  ;;  %v1059_v16 = vmul.f32 %v15647_v28, %v932_v10  ;;  %v13109_v62 = vld [vmem:[#allocation8 + $0x2dc] ss:$72 sps:$4 sm:$0xff]   ;;  %v13107_v57 = vld [vmem:[#allocation8 + $0x2d8] ss:$72 sps:$4 sm:$0xff]   ;;  %v13115_v10 = vld [vmem:[#allocation8 + $0x36c] ss:$72 sps:$4 sm:$0xff]  }
 0x229   : > { %17618 = vst [vmem:[#allocation96_spill] sm:$0xff] %v15820_v59  ;;  %17619 = vst [vmem:[#allocation97_spill] sm:$0xff] %v15822_v33  ;;  %14292 = vrsqrt.f32 %v872_v60  ;;  %v857_v9 = vmul.f32 0.0013020834, %v811_v25  ;;  %6625 = vmatprep.mubr.bf16.mxu1 %v15820_v59  ;;  %6738 = vmatprep.mubr.bf16.mxu0 %v15822_v33  ;;  %v1061_v39 = vmul.f32 %v15650_v17, %v934_v58  ;;  %v17622_v14 = vld [vmem:[#allocation32_spill] sm:$0xff]  ;;  %v17623_v58 = vld [vmem:[#allocation29_spill] sm:$0xff] }
 0x22a   : > { %17620 = vst [vmem:[#allocation98_spill] sm:$0xff] %v15828_v18  ;;  %17621 = vst [vmem:[#allocation99_spill] sm:$0xff] %v15830_v36  ;;  %v1058_v7 = vmul.f32 %v15653_v23, %v931_v47  ;;  %6807 = vmatprep.subr.bf16.mxu0 %v13100_v22  ;;  %6920 = vmatprep.subr.bf16.mxu1 %v13103_v32  ;;  %v938_v51 = vmul.f32 %v15832_v6, %v15304_v46  ;;  %v13112_v53 = vld [vmem:[#allocation8 + $0x1564] ss:$72 sps:$4 sm:$0xff]  }
 0x22b   : > { %v873_v31 = vadd.f32 1e-05, %v857_v9  ;;  %v940_v55 = vmul.f32 %v15832_v6, %v15314_v50  ;;  %v937_v20 = vmul.f32 %v15832_v6, %v17622_v14  ;;  %6626 = vmatmul.mubr.bf16.gmra.mrb[8].mxu1 %v15828_v18  ;;  %6739 = vmatmul.mubr.bf16.gmra.mrb[8].mxu0 %v15830_v36  ;;  %v1186_v49 = vadd.f32 %v15659_v0, %v1059_v16  ;;  %v17624_v9 = vld [vmem:[#allocation33_spill] sm:$0xff] }
 0x22c   : > { %v1188_v22 = vadd.f32 %v15662_v52, %v1061_v39  ;;  %v1185_v60 = vadd.f32 %v15665_v54, %v1058_v7  ;;  %6808 = vmatpush1.bf16.msra.mxu0 %v13098_v63  ;;  %6921 = vmatpush1.bf16.msra.mxu1 %v13101_v15  ;;  %v1065_v50 = vmul.f32 %v15647_v28, %v938_v51  ;;  %v13110_v7 = vld [vmem:[#allocation8 + $0x1560] ss:$72 sps:$4 sm:$0xff]  }
 0x22d   : > { %v818_v5 = vpop.xlane.xlu1 %817  ;;  %14294 = vrsqrt.f32 %v873_v31  ;;  %v1067_v32 = vmul.f32 %v15650_v17, %v940_v55  ;;  %v15852_v43 = vpop.eup %14290  ;;  %6809 = vmatprep.subr.bf16.mxu0 %v13106_v29  ;;  %6922 = vmatprep.subr.bf16.mxu1 %v13109_v62  ;;  %v1064_v25 = vmul.f32 %v15653_v23, %v937_v20  ;;  %v933_v47 = vmul.f32 %v15811_v44, %v17623_v58  ;;  %v13113_v31 = vld [vmem:[#allocation8 + $0x368] ss:$72 sps:$4 sm:$0xff]  }
 0x22e   : > { %v858_v46 = vmul.f32 0.0013020834, %v818_v5  ;;  %v939_v16 = vmul.f32 %v15832_v6, %v17624_v9  ;;  %v1192_v15 = vadd.f32 %v15659_v0, %v1065_v50  ;;  %v944_v29 = vmul.f32 %v15852_v43, %v15340_v26  ;;  %v17625_v20 = vld [vmem:[#allocation38_spill] sm:$0xff] }
 0x22f   : > { %v1194_v39 = vadd.f32 %v15662_v52, %v1067_v32  ;;  %v1191_v51 = vadd.f32 %v15665_v54, %v1064_v25  ;;  %v1060_v55 = vmul.f32 %v15656_v19, %v933_v47  ;;  %v946_v5 = vmul.f32 %v15852_v43, %v17625_v20  ;;  %v13118_v47 = vld [vmem:[#allocation8 + $0x15f4] ss:$72 sps:$4 sm:$0xff]  }
 0x230   : > { %v874_v63 = vadd.f32 1e-05, %v858_v46  ;;  %v1066_v14 = vmul.f32 %v15656_v19, %v939_v16  ;;  %v15868_v50 = vpack.c.bf16 %v1192_v15, %v1186_v49  ;;  %6810 = vmatpush1.bf16.msra.mxu0 %v13104_v2  ;;  %6923 = vmatpush1.bf16.msra.mxu1 %v13107_v57  ;;  %v1071_v49 = vmul.f32 %v15647_v28, %v944_v29  ;;  %v13116_v57 = vld [vmem:[#allocation8 + $0x15f0] ss:$72 sps:$4 sm:$0xff]  }
 0x231   : > { %v825_v62 = vpop.xlane.xlu0 %824  ;;  %v15870_v32 = vpack.c.bf16 %v1194_v39, %v1188_v22  ;;  %6811 = vmatprep.subr.bf16.mxu0 %v13112_v53  ;;  %6924 = vmatprep.subr.bf16.mxu1 %v13115_v10  ;;  %v15872_v26 = vpack.c.bf16 %v1191_v51, %v1185_v60  ;;  %v1187_v25 = vadd.f32 %v15668_v1, %v1060_v55  ;;  %v13119_v22 = vld [vmem:[#allocation8 + $0x3f8] ss:$72 sps:$4 sm:$0xff]   ;;  %v13121_v60 = vld [vmem:[#allocation8 + $0x3fc] ss:$72 sps:$4 sm:$0xff]   ;;  %v17630_v15 = vld [vmem:[#allocation42_spill] sm:$0xff] }
 0x232   : > { %14296 = vrsqrt.f32 %v874_v63  ;;  %v859_v46 = vmul.f32 0.0013020834, %v825_v62  ;;  %17626 = vst [vmem:[#allocation32_spill] sm:$0xff] %v15868_v50  ;;  %v1193_v58 = vadd.f32 %v15668_v1, %v1066_v14  ;;  %6635 = vmatprep.mubr.bf16.mxu1 %v15868_v50  ;;  %v1073_v2 = vmul.f32 %v15650_v17, %v946_v5  ;;  %v17628_v53 = vld [vmem:[#allocation36_spill] sm:$0xff]  ;;  %v17631_v51 = vld [vmem:[#allocation41_spill] sm:$0xff] }
 0x233   : > { %17627 = vst [vmem:[#allocation29_spill] sm:$0xff] %v15870_v32  ;;  %v15876_v9 = vpop.eup %14292  ;;  %6748 = vmatprep.mubr.bf16.mxu0 %v15870_v32  ;;  %v943_v10 = vmul.f32 %v15852_v43, %v17628_v53  ;;  %6636 = vmatmul.mubr.bf16.gmra.mrb[12].mxu1 %v15872_v26  ;;  %v1198_v14 = vadd.f32 %v15659_v0, %v1071_v49  ;;  %v13127_v53 = vld [vmem:[#allocation8 + $0x48c] ss:$72 sps:$4 sm:$0xff]  }
 0x234   : > { %v875_v16 = vadd.f32 1e-05, %v859_v46  ;;  %v15885_v63 = vpack.c.bf16 %v1193_v58, %v1187_v25  ;;  %v950_v39 = vmul.f32 %v15876_v9, %v17630_v15  ;;  %v952_v62 = vmul.f32 %v15876_v9, %v15386_v35  ;;  %6812 = vmatpush1.bf16.msra.mxu0 %v13110_v7  ;;  %6925 = vmatpush1.bf16.msra.mxu1 %v13113_v31  ;;  %v13124_v58 = vld [vmem:[#allocation8 + $0x1684] ss:$72 sps:$4 sm:$0xff]   ;;  %v13122_v31 = vld [vmem:[#allocation8 + $0x1680] ss:$72 sps:$4 sm:$0xff]  }
 0x235   : > { %v949_v29 = vmul.f32 %v15876_v9, %v17631_v51  ;;  %v1200_v20 = vadd.f32 %v15662_v52, %v1073_v2  ;;  %v1070_v5 = vmul.f32 %v15653_v23, %v943_v10  ;;  %6813 = vmatprep.subr.bf16.mxu0 %v13118_v47  ;;  %6926 = vmatprep.subr.bf16.mxu1 %v13121_v60  ;;  %v17632_v2 = vld [vmem:[#allocation37_spill] sm:$0xff]  ;;  %v17633_v15 = vld [vmem:[#allocation43_spill] sm:$0xff] }
 0x236   : > { %17629 = vst [vmem:[#allocation33_spill] sm:$0xff] %v15885_v63  ;;  %14298 = vrsqrt.f32 %v875_v16  ;;  %6749 = vmatmul.mubr.bf16.gmra.mrb[12].mxu0 %v15885_v63  ;;  %v1077_v25 = vmul.f32 %v15647_v28, %v950_v39  ;;  %v1079_v35 = vmul.f32 %v15650_v17, %v952_v62  ;;  %v945_v10 = vmul.f32 %v15852_v43, %v17632_v2  ;;  %v17634_v39 = vld [vmem:[#allocation22_spill] sm:$0xff]  ;;  %v17635_v32 = vld [vmem:[#allocation47_spill] sm:$0xff] }
 0x237   : > { %v832_v55 = vpop.xlane.xlu1 %831  ;;  %v1076_v16 = vmul.f32 %v15653_v23, %v949_v29  ;;  %v15900_v7 = vpop.eup %14294  ;;  %v1197_v49 = vadd.f32 %v15665_v54, %v1070_v5  ;;  %v951_v51 = vmul.f32 %v15876_v9, %v17633_v15  ;;  %v15909_v62 = vmul.f32 %v15705_v4, %v17634_v39 }
 0x238   : > { %v860_v46 = vmul.f32 0.0013020834, %v832_v55  ;;  %v1204_v55 = vadd.f32 %v15659_v0, %v1077_v25  ;;  %v1206_v29 = vadd.f32 %v15662_v52, %v1079_v35  ;;  %6814 = vmatpush1.bf16.msra.mxu0 %v13116_v57  ;;  %6927 = vmatpush1.bf16.msra.mxu1 %v13119_v22  ;;  %v1072_v5 = vmul.f32 %v15656_v19, %v945_v10  ;;  %v13125_v25 = vld [vmem:[#allocation8 + $0x488] ss:$72 sps:$4 sm:$0xff]   ;;  %v13130_v35 = vld [vmem:[#allocation8 + $0x1714] ss:$72 sps:$4 sm:$0xff]  }
 0x239   : > { %v1203_v60 = vadd.f32 %v15665_v54, %v1076_v16  ;;  %v1078_v2 = vmul.f32 %v15656_v19, %v951_v51  ;;  %v956_v15 = vmul.f32 %v15900_v7, %v17635_v32  ;;  %6815 = vmatprep.subr.bf16.mxu0 %v13124_v58  ;;  %6928 = vmatprep.subr.bf16.mxu1 %v13127_v53  ;;  %v13128_v51 = vld [vmem:[#allocation8 + $0x1710] ss:$72 sps:$4 sm:$0xff]   ;;  %v17638_v53 = vld [vmem:[#allocation49_spill] sm:$0xff] }
 0x23a   : > { %v876_v47 = vadd.f32 1e-05, %v860_v46  ;;  %v15918_v36 = vpack.c.bf16 %v1204_v55, %v1198_v14  ;;  %v15920_v46 = vpack.c.bf16 %v1206_v29, %v1200_v20  ;;  %v1199_v22 = vadd.f32 %v15668_v1, %v1072_v5  ;;  %v17637_v20 = vld [vmem:[#allocation53_spill] sm:$0xff] }
 0x23b   : > { %v839_v63 = vpop.xlane.xlu0 %838  ;;  %v15924_v57 = vpack.c.bf16 %v1203_v60, %v1197_v49  ;;  %v1205_v10 = vadd.f32 %v15668_v1, %v1078_v2  ;;  %v1083_v32 = vmul.f32 %v15647_v28, %v956_v15  ;;  %v958_v49 = vmul.f32 %v15900_v7, %v17638_v53  ;;  %v17641_v2 = vld [vmem:[#allocation46_spill] sm:$0xff] }
 0x23c   : > { %14300 = vrsqrt.f32 %v876_v47  ;;  %v861_v39 = vmul.f32 0.0013020834, %v839_v63  ;;  %17636 = vst [vmem:[#allocation38_spill] sm:$0xff] %v15920_v46  ;;  %v15922_v16 = vpop.eup %14296  ;;  %v13133_v63 = vld [vmem:[#allocation8 + $0x51c] ss:$72 sps:$4 sm:$0xff]   ;;  %6645 = vmatprep.mubr.bf16.mxu1 %v15918_v36  ;;  %6758 = vmatprep.mubr.bf16.mxu0 %v15920_v46  ;;  %v17639_v47 = vld [vmem:[#allocation55_spill] sm:$0xff]  ;;  %v955_v15 = vmul.f32 %v15900_v7, %v17641_v2 }
 0x23d   : > { %v962_v58 = vmul.f32 %v15922_v16, %v17637_v20  ;;  %v964_v55 = vmul.f32 %v15922_v16, %v17639_v47  ;;  %6646 = vmatmul.mubr.bf16.gmra.mrb[16].mxu1 %v15924_v57  ;;  %v15938_v60 = vpack.c.bf16 %v1205_v10, %v1199_v22  ;;  %6816 = vmatpush1.bf16.msra.mxu0 %v13122_v31  ;;  %v13131_v47 = vld [vmem:[#allocation8 + $0x518] ss:$72 sps:$4 sm:$0xff]   ;;  %v13136_v46 = vld [vmem:[#allocation8 + $0x17a4] ss:$72 sps:$4 sm:$0xff]  }
 0x23e   : > { %v877_v14 = vadd.f32 1e-05, %v861_v39  ;;  %v1210_v5 = vadd.f32 %v15659_v0, %v1083_v32  ;;  %6929 = vmatpush1.bf16.msra.mxu1 %v13125_v25  ;;  %v1085_v53 = vmul.f32 %v15650_v17, %v958_v49  ;;  %6817 = vmatprep.subr.bf16.mxu0 %v13130_v35  ;;  %v13134_v22 = vld [vmem:[#allocation8 + $0x17a0] ss:$72 sps:$4 sm:$0xff]   ;;  %v13139_v10 = vld [vmem:[#allocation8 + $0x5ac] ss:$72 sps:$4 sm:$0xff]   ;;  %v1082_v25 = vmul.f32 %v15653_v23, %v955_v15 }
 0x23f   : > { %v846_v29 = vpop.xlane.xlu1 %845  ;;  %17640 = vst [vmem:[#allocation36_spill] sm:$0xff] %v15938_v60  ;;  %v1089_v20 = vmul.f32 %v15647_v28, %v962_v58  ;;  %6759 = vmatmul.mubr.bf16.gmra.mrb[16].mxu0 %v15938_v60  ;;  %v1091_v31 = vmul.f32 %v15650_v17, %v964_v55  ;;  %6930 = vmatprep.subr.bf16.mxu1 %v13133_v63  ;;  %v17642_v32 = vld [vmem:[#allocation52_spill] sm:$0xff] }
 0x240   : > { %14302 = vrsqrt.f32 %v877_v14  ;;  %v862_v39 = vmul.f32 0.0013020834, %v846_v29  ;;  %v15945_v33 = vpop.eup %14298  ;;  %v961_v14 = vmul.f32 %v15922_v16, %v17642_v32  ;;  %v1212_v35 = vadd.f32 %v15662_v52, %v1085_v53  ;;  %v17643_v29 = vld [vmem:[#allocation48_spill] sm:$0xff] }
 0x241   : > { %v1216_v49 = vadd.f32 %v15659_v0, %v1089_v20  ;;  %v957_v2 = vmul.f32 %v15900_v7, %v17643_v29  ;;  %v1218_v60 = vadd.f32 %v15662_v52, %v1091_v31  ;;  %6818 = vmatpush1.bf16.msra.mxu0 %v13128_v51  ;;  %v1209_v55 = vadd.f32 %v15665_v54, %v1082_v25  ;;  %v13142_v31 = vld [vmem:[#allocation8 + $0x1834] ss:$72 sps:$4 sm:$0xff]  }
 0x242   : > { %v878_v58 = vadd.f32 1e-05, %v862_v39  ;;  %v1088_v63 = vmul.f32 %v15653_v23, %v961_v14  ;;  %v963_v32 = vmul.f32 %v15922_v16, %v17644_v48  ;;  %6931 = vmatpush1.bf16.msra.mxu1 %v13131_v47  ;;  %6819 = vmatprep.subr.bf16.mxu0 %v13136_v46  ;;  %v13137_v39 = vld [vmem:[#allocation8 + $0x5a8] ss:$72 sps:$4 sm:$0xff]   ;;  %v968_v53 = vmul.f32 %v15945_v33, %v15484_v13 }
 0x243   : > { %v15961_v15 = vpack.c.bf16 %v1216_v49, %v1210_v5  ;;  %v1084_v20 = vmul.f32 %v15656_v19, %v957_v2  ;;  %v15966_v51 = vpack.c.bf16 %v1218_v60, %v1212_v35  ;;  %6932 = vmatprep.subr.bf16.mxu1 %v13139_v10  ;;  %v970_v48 = vmul.f32 %v15945_v33, %v15494_v41  ;;  %v13145_v5 = vld [vmem:[#allocation8 + $0x63c] ss:$72 sps:$4 sm:$0xff]   ;;  %v17646_v10 = vld [vmem:[#allocation58_spill] sm:$0xff] }
 0x244   : > { %14304 = vrsqrt.f32 %v878_v58  ;;  %v1215_v14 = vadd.f32 %v15665_v54, %v1088_v63  ;;  %v1090_v25 = vmul.f32 %v15656_v19, %v963_v32  ;;  %v1095_v13 = vmul.f32 %v15647_v28, %v968_v53  ;;  %v17647_v35 = vld [vmem:[#allocation62_spill] sm:$0xff] }
 0x245   : > { %17645 = vst [vmem:[#allocation42_spill] sm:$0xff] %v15966_v51  ;;  %6655 = vmatprep.mubr.bf16.mxu1 %v15961_v15  ;;  %v1211_v46 = vadd.f32 %v15668_v1, %v1084_v20  ;;  %v967_v60 = vmul.f32 %v15945_v33, %v15480_v8  ;;  %v969_v58 = vmul.f32 %v15945_v33, %v17646_v10  ;;  %v13140_v32 = vld [vmem:[#allocation8 + $0x1830] ss:$72 sps:$4 sm:$0xff]   ;;  %v13148_v53 = vld [vmem:[#allocation8 + $0x18c4] ss:$72 sps:$4 sm:$0xff]  }
 0x246   : > { %v15972_v47 = vpop.eup %14300  ;;  %6768 = vmatprep.mubr.bf16.mxu0 %v15966_v51  ;;  %v15982_v49 = vpack.c.bf16 %v1215_v14, %v1209_v55  ;;  %v1217_v41 = vadd.f32 %v15668_v1, %v1090_v25  ;;  %6820 = vmatpush1.bf16.msra.mxu0 %v13134_v22  ;;  %v1222_v2 = vadd.f32 %v15659_v0, %v1095_v13  ;;  %v13143_v20 = vld [vmem:[#allocation8 + $0x638] ss:$72 sps:$4 sm:$0xff]   ;;  %v13151_v14 = vld [vmem:[#allocation8 + $0x6cc] ss:$72 sps:$4 sm:$0xff]  }
 0x247   : > { %v974_v29 = vmul.f32 %v15972_v47, %v17647_v35  ;;  %6933 = vmatpush1.bf16.msra.mxu1 %v13137_v39  ;;  %v976_v63 = vmul.f32 %v15972_v47, %v15530_v21  ;;  %v1097_v8 = vmul.f32 %v15650_v17, %v970_v48  ;;  %6821 = vmatprep.subr.bf16.mxu0 %v13142_v31  ;;  %v17649_v39 = vld [vmem:[#allocation61_spill] sm:$0xff]  ;;  %v17650_v10 = vld [vmem:[#allocation63_spill] sm:$0xff] }
 0x248   : > { %6656 = vmatmul.mubr.bf16.gmra.mrb[20].mxu1 %v15982_v49  ;;  %v15992_v55 = vpack.c.bf16 %v1217_v41, %v1211_v46  ;;  %6934 = vmatprep.subr.bf16.mxu1 %v13145_v5  ;;  %v973_v25 = vmul.f32 %v15972_v47, %v17649_v39  ;;  %v1094_v31 = vmul.f32 %v15653_v23, %v967_v60  ;;  %v13149_v60 = vld [vmem:[#allocation8 + $0x6c8] ss:$72 sps:$4 sm:$0xff]  }
 0x249   : > { %v1101_v22 = vmul.f32 %v15647_v28, %v974_v29  ;;  %v1103_v21 = vmul.f32 %v15650_v17, %v976_v63  ;;  %v1224_v48 = vadd.f32 %v15662_v52, %v1097_v8  ;;  %v975_v35 = vmul.f32 %v15972_v47, %v17650_v10  ;;  %v13146_v8 = vld [vmem:[#allocation8 + $0x18c0] ss:$72 sps:$4 sm:$0xff]  }
 0x24a   : > { %17648 = vst [vmem:[#allocation41_spill] sm:$0xff] %v15992_v55  ;;  %v15997_v13 = vpop.eup %14302  ;;  %6769 = vmatmul.mubr.bf16.gmra.mrb[20].mxu0 %v15992_v55  ;;  %v1100_v5 = vmul.f32 %v15653_v23, %v973_v25  ;;  %v1096_v41 = vmul.f32 %v15656_v19, %v969_v58  ;;  %v1221_v39 = vadd.f32 %v15665_v54, %v1094_v31  ;;  %v13154_v55 = vld [vmem:[#allocation8 + $0x1954] ss:$72 sps:$4 sm:$0xff]  }
 0x24b   : > { %v1228_v46 = vadd.f32 %v15659_v0, %v1101_v22  ;;  %v980_v29 = vmul.f32 %v15997_v13, %v15556_v56  ;;  %v1230_v63 = vadd.f32 %v15662_v52, %v1103_v21  ;;  %6822 = vmatpush1.bf16.msra.mxu0 %v13140_v32  ;;  %6935 = vmatpush1.bf16.msra.mxu1 %v13143_v20  ;;  %v13157_v56 = vld [vmem:[#allocation8 + $0x75c] ss:$72 sps:$4 sm:$0xff]  }
 0x24c   : > { %v1102_v10 = vmul.f32 %v15656_v19, %v975_v35  ;;  %6823 = vmatprep.subr.bf16.mxu0 %v13148_v53  ;;  %6936 = vmatprep.subr.bf16.mxu1 %v13151_v14  ;;  %v1227_v58 = vadd.f32 %v15665_v54, %v1100_v5  ;;  %v1223_v22 = vadd.f32 %v15668_v1, %v1096_v41  ;;  %v17652_v31 = vld [vmem:[#allocation68_spill] sm:$0xff]  ;;  %v17655_v41 = vld [vmem:[#allocation66_spill] sm:$0xff] }
 0x24d   : > { %v16013_v51 = vpack.c.bf16 %v1228_v46, %v1222_v2  ;;  %v16019_v32 = vpack.c.bf16 %v1230_v63, %v1224_v48  ;;  %v1107_v21 = vmul.f32 %v15647_v28, %v980_v29  ;;  %v982_v35 = vmul.f32 %v15997_v13, %v17652_v31  ;;  %v17653_v53 = vld [vmem:[#allocation72_spill] sm:$0xff]  ;;  %v17654_v46 = vld [vmem:[#allocation74_spill] sm:$0xff] }
 0x24e   : > { %v16017_v25 = vpop.eup %14304  ;;  %v1229_v20 = vadd.f32 %v15668_v1, %v1102_v10  ;;  %v16026_v2 = vpack.c.bf16 %v1227_v58, %v1221_v39  ;;  %v979_v48 = vmul.f32 %v15997_v13, %v17655_v41  ;;  %v13152_v39 = vld [vmem:[#allocation8 + $0x1950] ss:$72 sps:$4 sm:$0xff]  }
 0x24f   : > { %17651 = vst [vmem:[#allocation37_spill] sm:$0xff] %v16019_v32  ;;  %6665 = vmatprep.mubr.bf16.mxu1 %v16013_v51  ;;  %v986_v14 = vmul.f32 %v16017_v25, %v17653_v53  ;;  %v988_v5 = vmul.f32 %v16017_v25, %v17654_v46  ;;  %6778 = vmatprep.mubr.bf16.mxu0 %v16019_v32  ;;  %v13155_v58 = vld [vmem:[#allocation8 + $0x758] ss:$72 sps:$4 sm:$0xff]   ;;  %v13160_v46 = vld [vmem:[#allocation8 + $0x19e4] ss:$72 sps:$4 sm:$0xff]  }
 0x250   : > { %v16035_v63 = vpack.c.bf16 %v1229_v20, %v1223_v22  ;;  %6824 = vmatpush1.bf16.msra.mxu0 %v13146_v8  ;;  %v1234_v29 = vadd.f32 %v15659_v0, %v1107_v21  ;;  %v1109_v10 = vmul.f32 %v15650_v17, %v982_v35  ;;  %6666 = vmatmul.mubr.bf16.gmra.mrb[24].mxu1 %v16026_v2  ;;  %v17657_v41 = vld [vmem:[#allocation71_spill] sm:$0xff]  ;;  %v13158_v22 = vld [vmem:[#allocation8 + $0x19e0] ss:$72 sps:$4 sm:$0xff]  }
 0x251   : > { %v1113_v31 = vmul.f32 %v15647_v28, %v986_v14  ;;  %v1115_v53 = vmul.f32 %v15650_v17, %v988_v5  ;;  %6825 = vmatprep.subr.bf16.mxu0 %v13154_v55  ;;  %v985_v32 = vmul.f32 %v16017_v25, %v17657_v41  ;;  %6937 = vmatpush1.bf16.msra.mxu1 %v13149_v60  ;;  %v17658_v21 = vld [vmem:[#allocation67_spill] sm:$0xff] }
 0x252   : > { %17656 = vst [vmem:[#allocation43_spill] sm:$0xff] %v16035_v63  ;;  %v1236_v8 = vadd.f32 %v15662_v52, %v1109_v10  ;;  %v1106_v20 = vmul.f32 %v15653_v23, %v979_v48  ;;  %v981_v35 = vmul.f32 %v15997_v13, %v17658_v21  ;;  %v987_v61 = vmul.f32 %v16017_v25, %v17659_v3  ;;  %v13161_v60 = vld [vmem:[#allocation8 + $0x7e8] ss:$72 sps:$4 sm:$0xff]   ;;  %v13163_v14 = vld [vmem:[#allocation8 + $0x7ec] ss:$72 sps:$4 sm:$0xff]  }
 0x253   : > { %6779 = vmatmul.mubr.bf16.gmra.mrb[24].mxu0 %v16035_v63  ;;  %v1240_v28 = vadd.f32 %v15659_v0, %v1113_v31  ;;  %v1242_v17 = vadd.f32 %v15662_v52, %v1115_v53  ;;  %6938 = vmatprep.subr.bf16.mxu1 %v13157_v56  ;;  %v1112_v55 = vmul.f32 %v15653_v23, %v985_v32  ;;  %v13166_v41 = vld [vmem:[#allocation8 + $0x1a74] ss:$72 sps:$4 sm:$0xff]   ;;  %v17664_v53 = vld [vmem:[#allocation86_spill] sm:$0xff] }
 0x254   : > { %6826 = vmatpush1.bf16.msra.mxu0 %v13152_v39  ;;  %v1233_v5 = vadd.f32 %v15665_v54, %v1106_v20  ;;  %v1108_v48 = vmul.f32 %v15656_v19, %v981_v35  ;;  %v1114_v10 = vmul.f32 %v15656_v19, %v987_v61  ;;  %v1033_v3 = vmul.f32 %v15671_v37, %v15909_v62  ;;  %v17661_v52 = vld [vmem:[#allocation84_spill] sm:$0xff]  ;;  %v17662_v62 = vld [vmem:[#allocation21_spill] sm:$0xff] }
 0x255   : > { %v16059_v21 = vpack.c.bf16 %v1240_v28, %v1234_v29  ;;  %v16061_v0 = vpack.c.bf16 %v1242_v17, %v1236_v8  ;;  %6827 = vmatprep.subr.bf16.mxu0 %v13160_v46  ;;  %v1239_v23 = vadd.f32 %v15665_v54, %v1112_v55  ;;  %v1154_v56 = vadd.f32 %v17661_v52, %v15695_v40  ;;  %v13169_v32 = vld [vmem:[#allocation8 + $0x87c] ss:$72 sps:$4 sm:$0xff]   ;;  %v17663_v54 = vld [vmem:[#allocation87_spill] sm:$0xff] }
 0x256   : > { %6939 = vmatpush1.bf16.msra.mxu1 %v13155_v58  ;;  %v1235_v39 = vadd.f32 %v15668_v1, %v1108_v48  ;;  %v1241_v19 = vadd.f32 %v15668_v1, %v1114_v10  ;;  %v1160_v61 = vadd.f32 %v17661_v52, %v1033_v3  ;;  %v905_v29 = vmul.f32 %v15705_v4, %v17662_v62  ;;  %v17665_v46 = vld [vmem:[#allocation20_spill] sm:$0xff]  ;;  %v17668_v35 = vld [vmem:[#allocation85_spill] sm:$0xff]  ;;  %v13172_v17 = vld [vmem:[#allocation8 + $0x90c] ss:$72 sps:$4 sm:$0xff]  }
 0x257   : > { %17660 = vst [vmem:[#allocation22_spill] sm:$0xff] %v16061_v0  ;;  %6675 = vmatprep.mubr.bf16.mxu1 %v16059_v21  ;;  %6788 = vmatprep.mubr.bf16.mxu0 %v16061_v0  ;;  %v16073_v31 = vpack.c.bf16 %v1239_v23, %v1233_v5  ;;  %v1153_v40 = vadd.f32 %v17664_v53, %v17663_v54  ;;  %v13164_v20 = vld [vmem:[#allocation8 + $0x1a70] ss:$72 sps:$4 sm:$0xff]   ;;  %v13175_v55 = vld [vmem:[#allocation8 + $0x14] ss:$72 sps:$4 sm:$0xff]  }
 0x258   : > { %v912_v58 = vmul.f32 %v15691_v38, %v17665_v46  ;;  %6940 = vmatprep.subr.bf16.mxu1 %v13163_v14  ;;  %v16079_v8 = vpack.c.bf16 %v1241_v19, %v1235_v39  ;;  %6828 = vmatpush1.bf16.msra.mxu0 %v13158_v22  ;;  %v16081_v1 = vpack.c.bf16 %v1160_v61, %v1154_v56  ;;  %v13167_v4 = vld [vmem:[#allocation8 + $0x878] ss:$72 sps:$4 sm:$0xff]   ;;  %v17672_v39 = vld [vmem:[#allocation26_spill] sm:$0xff]  ;;  %v13178_v46 = vld [vmem:[#allocation8 + $0x99c] ss:$72 sps:$4 sm:$0xff]  }
 0x259   : > { %v1032_v28 = vmul.f32 %v17668_v35, %v905_v29  ;;  %6676 = vmatmul.mubr.bf16.gmra.mrb[28].mxu1 %v16073_v31  ;;  %6829 = vmatprep.subr.bf16.mxu0 %v13166_v41  ;;  %v17669_v5 = vld [vmem:[#allocation24_spill] sm:$0xff]  ;;  %v17670_v14 = vld [vmem:[#allocation19_spill] sm:$0xff]  ;;  %v924_v41 = vmul.f32 %v15759_v34, %v17672_v39 }
 0x25a   : > { %17666 = vst [vmem:[#allocation47_spill] sm:$0xff] %v16079_v8  ;;  %17667 = vst [vmem:[#allocation53_spill] sm:$0xff] %v16081_v1  ;;  %v918_v48 = vmul.f32 %v15730_v24, %v17669_v5  ;;  %v1039_v10 = vmul.f32 %v15671_v37, %v912_v58  ;;  %v911_v3 = vmul.f32 %v15691_v38, %v17670_v14  ;;  %6941 = vmatpush1.bf16.msra.mxu1 %v13161_v60  ;;  %v17671_v23 = vld [vmem:[#allocation23_spill] sm:$0xff]  ;;  %v17674_v29 = vld [vmem:[#allocation28_spill] sm:$0xff] }
 0x25b   : > { %6944 = vmatprep.mubr.bf16.mxu1 %v15740_v45  ;;  %v1159_v22 = vadd.f32 %v17664_v53, %v1032_v28  ;;  %v917_v56 = vmul.f32 %v15730_v24, %v17671_v23  ;;  %6789 = vmatmul.mubr.bf16.gmra.mrb[28].mxu0 %v16079_v8  ;;  %v13170_v60 = vld [vmem:[#allocation8 + $0x908] ss:$72 sps:$4 sm:$0xff]   ;;  %v930_v54 = vmul.f32 %v15785_v12, %v17674_v29 }
 0x25c   : > { %6942 = vmatprep.subr.bf16.mxu1 %v13169_v32  ;;  %v1045_v19 = vmul.f32 %v15671_v37, %v918_v48  ;;  %v1166_v61 = vadd.f32 %v17661_v52, %v1039_v10  ;;  %v1038_v38 = vmul.f32 %v17668_v35, %v911_v3  ;;  %6831 = vmatprep.mubr.bf16.mxu0 %v16081_v1  ;;  %v17675_v5 = vld [vmem:[#allocation25_spill] sm:$0xff]  ;;  %v17676_v10 = vld [vmem:[#allocation27_spill] sm:$0xff] }
 0x25d   : > { %6830 = vmatpush1.bf16.msra.mxu0 %v13164_v20  ;;  %v16101_v62 = vpack.c.bf16 %v1159_v22, %v1153_v40  ;;  %v1044_v24 = vmul.f32 %v17668_v35, %v917_v56  ;;  %v1051_v28 = vmul.f32 %v15671_v37, %v924_v41  ;;  %v923_v48 = vmul.f32 %v15759_v34, %v17675_v5  ;;  %v17677_v3 = vld [vmem:[#allocation31_spill] sm:$0xff] }
 0x25e   : > { %7251 = vmatprep.subr.bf16.mxu0 %v13175_v55  ;;  %v1172_v32 = vadd.f32 %v17661_v52, %v1045_v19  ;;  %v1165_v58 = vadd.f32 %v17664_v53, %v1038_v38  ;;  %6943 = vmatpush1.bf16.msra.mxu1 %v13167_v4  ;;  %v1057_v20 = vmul.f32 %v15671_v37, %v930_v54  ;;  %v17679_v39 = vld [vmem:[#allocation35_spill] sm:$0xff]  ;;  %v17681_v54 = vld [vmem:[#allocation30_spill] sm:$0xff] }
 0x25f   : > { %17673 = vst [vmem:[#allocation49_spill] sm:$0xff] %v16101_v62  ;;  %v1171_v40 = vadd.f32 %v17664_v53, %v1044_v24  ;;  %v929_v14 = vmul.f32 %v15785_v12, %v17676_v10  ;;  %v936_v55 = vmul.f32 %v15811_v44, %v17677_v3  ;;  %7025 = vmatprep.subr.bf16.mxu1 %v13172_v17  ;;  %v13173_v4 = vld [vmem:[#allocation8 + $0x10] ss:$72 sps:$4 sm:$0xff]  }
 0x260   : > { %v16117_v22 = vpack.c.bf16 %v1172_v32, %v1166_v61  ;;  %v1178_v23 = vadd.f32 %v17661_v52, %v1051_v28  ;;  %v1050_v56 = vmul.f32 %v17668_v35, %v923_v48  ;;  %v942_v34 = vmul.f32 %v15832_v6, %v17679_v39  ;;  %v13176_v17 = vld [vmem:[#allocation8 + $0x998] ss:$72 sps:$4 sm:$0xff]   ;;  %v13181_v61 = vld [vmem:[#allocation8 + $0xa4] ss:$72 sps:$4 sm:$0xff]  }
 0x261   : > { %v16123_v41 = vpack.c.bf16 %v1171_v40, %v1165_v58  ;;  %v1184_v19 = vadd.f32 %v17661_v52, %v1057_v20  ;;  %v1056_v12 = vmul.f32 %v17668_v35, %v929_v14  ;;  %v1063_v38 = vmul.f32 %v15671_v37, %v936_v55  ;;  %6945 = vmatmul.mubr.bf16.vlgmr.msra.gmra.mrb[32].mxu1 %v15744_v42  ;;  %v17682_v28 = vld [vmem:[#allocation34_spill] sm:$0xff]  ;;  %v17685_v3 = vld [vmem:[#allocation40_spill] sm:$0xff] }
 0x262   : > { %17678 = vst [vmem:[#allocation55_spill] sm:$0xff] %v16117_v22  ;;  %v1177_v24 = vadd.f32 %v17664_v53, %v1050_v56  ;;  %v1069_v29 = vmul.f32 %v15671_v37, %v942_v34  ;;  %v935_v32 = vmul.f32 %v15811_v44, %v17681_v54  ;;  %v941_v58 = vmul.f32 %v15832_v6, %v17682_v28  ;;  %v13184_v20 = vld [vmem:[#allocation8 + $0xa2c] ss:$72 sps:$4 sm:$0xff]   ;;  %v13179_v6 = vld [vmem:[#allocation8 + $0xa0] ss:$72 sps:$4 sm:$0xff]  }
 0x263   : > { %17680 = vst [vmem:[#allocation46_spill] sm:$0xff] %v16123_v41  ;;  %7026 = vmatpush1.bf16.msra.mxu1 %v13170_v60  ;;  %6954 = vmatprep.mubr.bf16.mxu1 %v15768_v30  ;;  %v16136_v5 = vpack.c.bf16 %v1184_v19, %v1178_v23  ;;  %v1183_v48 = vadd.f32 %v17664_v53, %v1056_v12  ;;  %v17686_v23 = vld [vmem:[#allocation45_spill] sm:$0xff]  ;;  %v17689_v54 = vld [vmem:[#allocation44_spill] sm:$0xff] }
 0x264   : > { %v1190_v40 = vadd.f32 %v17661_v52, %v1063_v38  ;;  %6832 = vmatmul.mubr.bf16.vlgmr.msra.gmra.mrb[0].mxu0 %v16101_v62  ;;  %7027 = vmatprep.subr.bf16.mxu1 %v13178_v46  ;;  %v1196_v10 = vadd.f32 %v17661_v52, %v1069_v29  ;;  %v1062_v44 = vmul.f32 %v17668_v35, %v935_v32  ;;  %v13187_v46 = vld [vmem:[#allocation8 + $0x134] ss:$72 sps:$4 sm:$0xff]   ;;  %v13182_v38 = vld [vmem:[#allocation8 + $0xa28] ss:$72 sps:$4 sm:$0xff]  }
 0x265   : > { %17683 = vst [vmem:[#allocation52_spill] sm:$0xff] %v16136_v5  ;;  %v1068_v14 = vmul.f32 %v17668_v35, %v941_v58  ;;  %7252 = vmatpush1.bf16.msra.mxu0 %v13173_v4  ;;  %6841 = vmatprep.mubr.bf16.mxu0 %v16117_v22  ;;  %v16145_v60 = vpack.c.bf16 %v1183_v48, %v1177_v24  ;;  %v17688_v4 = vld [vmem:[#allocation39_spill] sm:$0xff]  ;;  %v13190_v58 = vld [vmem:[#allocation8 + $0xabc] ss:$72 sps:$4 sm:$0xff]  }
 0x266   : > { %v948_v55 = vmul.f32 %v15852_v43, %v17685_v3  ;;  %v954_v56 = vmul.f32 %v15876_v9, %v17686_v23  ;;  %7253 = vmatprep.subr.bf16.mxu0 %v13181_v61  ;;  %v16151_v39 = vpack.c.bf16 %v1196_v10, %v1190_v40  ;;  %v1189_v34 = vadd.f32 %v17664_v53, %v1062_v44  ;;  %v17690_v61 = vld [vmem:[#allocation51_spill] sm:$0xff]  ;;  %v17691_v10 = vld [vmem:[#allocation57_spill] sm:$0xff] }
 0x267   : > { %17684 = vst [vmem:[#allocation48_spill] sm:$0xff] %v16145_v60  ;;  %v1195_v19 = vadd.f32 %v17664_v53, %v1068_v14  ;;  %v947_v12 = vmul.f32 %v15852_v43, %v17688_v4  ;;  %7028 = vmatpush1.bf16.msra.mxu1 %v13176_v17  ;;  %v953_v32 = vmul.f32 %v15876_v9, %v17689_v54  ;;  %v17692_v17 = vld [vmem:[#allocation50_spill] sm:$0xff] }
 0x268   : > { %17687 = vst [vmem:[#allocation54_spill] sm:$0xff] %v16151_v39  ;;  %v1075_v24 = vmul.f32 %v15671_v37, %v948_v55  ;;  %v1081_v29 = vmul.f32 %v15671_v37, %v954_v56  ;;  %v960_v28 = vmul.f32 %v15900_v7, %v17690_v61  ;;  %7029 = vmatprep.subr.bf16.mxu1 %v13184_v20  ;;  %v13185_v14 = vld [vmem:[#allocation8 + $0x130] ss:$72 sps:$4 sm:$0xff]   ;;  %v13193_v23 = vld [vmem:[#allocation8 + $0x1c4] ss:$72 sps:$4 sm:$0xff]  }
 0x269   : > { %v16163_v48 = vpack.c.bf16 %v1195_v19, %v1189_v34  ;;  %v1074_v40 = vmul.f32 %v17668_v35, %v947_v12  ;;  %v966_v43 = vmul.f32 %v15922_v16, %v17691_v10  ;;  %v959_v44 = vmul.f32 %v15900_v7, %v17692_v17  ;;  %7254 = vmatpush1.bf16.msra.mxu0 %v13179_v6  ;;  %v17693_v19 = vld [vmem:[#allocation56_spill] sm:$0xff] }
 0x26a   : > { %v1202_v3 = vadd.f32 %v17661_v52, %v1075_v24  ;;  %v1208_v9 = vadd.f32 %v17661_v52, %v1081_v29  ;;  %v1080_v55 = vmul.f32 %v17668_v35, %v953_v32  ;;  %v1087_v20 = vmul.f32 %v15671_v37, %v960_v28  ;;  %7255 = vmatprep.subr.bf16.mxu0 %v13187_v46  ;;  %v13188_v6 = vld [vmem:[#allocation8 + $0xab8] ss:$72 sps:$4 sm:$0xff]   ;;  %v13196_v24 = vld [vmem:[#allocation8 + $0xb4c] ss:$72 sps:$4 sm:$0xff]  }
 0x26b   : > { %6955 = vmatmul.mubr.bf16.gmra.mrb[36].mxu1 %v15774_v11  ;;  %v1201_v56 = vadd.f32 %v17664_v53, %v1074_v40  ;;  %v1093_v34 = vmul.f32 %v15671_v37, %v966_v43  ;;  %v965_v7 = vmul.f32 %v15922_v16, %v17693_v19  ;;  %v1086_v54 = vmul.f32 %v17668_v35, %v959_v44  ;;  %v17694_v61 = vld [vmem:[#allocation60_spill] sm:$0xff]  ;;  %v17695_v40 = vld [vmem:[#allocation65_spill] sm:$0xff] }
 0x26c   : > { %7030 = vmatpush1.bf16.msra.mxu1 %v13182_v38  ;;  %6964 = vmatprep.mubr.bf16.mxu1 %v15820_v59  ;;  %v16180_v4 = vpack.c.bf16 %v1208_v9, %v1202_v3  ;;  %v1207_v12 = vadd.f32 %v17664_v53, %v1080_v55  ;;  %v1214_v46 = vadd.f32 %v17661_v52, %v1087_v20  ;;  %v13191_v38 = vld [vmem:[#allocation8 + $0x1c0] ss:$72 sps:$4 sm:$0xff]  }
 0x26d   : > { %6842 = vmatmul.mubr.bf16.gmra.mrb[4].mxu0 %v16123_v41  ;;  %7031 = vmatprep.subr.bf16.mxu1 %v13190_v58  ;;  %v1220_v29 = vadd.f32 %v17661_v52, %v1093_v34  ;;  %v1092_v16 = vmul.f32 %v17668_v35, %v965_v7  ;;  %v972_v28 = vmul.f32 %v15945_v33, %v17694_v61  ;;  %v13199_v58 = vld [vmem:[#allocation8 + $0x254] ss:$72 sps:$4 sm:$0xff]   ;;  %v13194_v9 = vld [vmem:[#allocation8 + $0xb48] ss:$72 sps:$4 sm:$0xff]  }
 0x26e   : > { %7256 = vmatpush1.bf16.msra.mxu0 %v13185_v14  ;;  %6851 = vmatprep.mubr.bf16.mxu0 %v16136_v5  ;;  %v16189_v32 = vpack.c.bf16 %v1207_v12, %v1201_v56  ;;  %v978_v10 = vmul.f32 %v15972_v47, %v17695_v40  ;;  %v1213_v17 = vadd.f32 %v17664_v53, %v1086_v54  ;;  %v17696_v14 = vld [vmem:[#allocation59_spill] sm:$0xff]  ;;  %v17697_v56 = vld [vmem:[#allocation64_spill] sm:$0xff]  ;;  %v13205_v40 = vld [vmem:[#allocation8 + $0x2e4] ss:$72 sps:$4 sm:$0xff]  }
 0x26f   : > { %7257 = vmatprep.subr.bf16.mxu0 %v13193_v23  ;;  %v16195_v43 = vpack.c.bf16 %v1220_v29, %v1214_v46  ;;  %v1219_v44 = vadd.f32 %v17664_v53, %v1092_v16  ;;  %v971_v3 = vmul.f32 %v15945_v33, %v17696_v14  ;;  %v1099_v55 = vmul.f32 %v15671_v37, %v972_v28  ;;  %v17698_v23 = vld [vmem:[#allocation70_spill] sm:$0xff]  ;;  %v13202_v7 = vld [vmem:[#allocation8 + $0xbdc] ss:$72 sps:$4 sm:$0xff]  }
 0x270   : > { %7032 = vmatpush1.bf16.msra.mxu1 %v13188_v6  ;;  %v1105_v20 = vmul.f32 %v15671_v37, %v978_v10  ;;  %v977_v34 = vmul.f32 %v15972_v47, %v17697_v56  ;;  %v984_v19 = vmul.f32 %v15997_v13, %v17698_v23  ;;  %v17699_v29 = vld [vmem:[#allocation76_spill] sm:$0xff]  ;;  %v17700_v6 = vld [vmem:[#allocation69_spill] sm:$0xff] }
 0x271   : > { %7033 = vmatprep.subr.bf16.mxu1 %v13196_v24  ;;  %v16207_v12 = vpack.c.bf16 %v1219_v44, %v1213_v17  ;;  %v1098_v46 = vmul.f32 %v17668_v35, %v971_v3  ;;  %v990_v33 = vmul.f32 %v16017_v25, %v17699_v29  ;;  %v983_v54 = vmul.f32 %v15997_v13, %v17700_v6  ;;  %v13197_v16 = vld [vmem:[#allocation8 + $0x250] ss:$72 sps:$4 sm:$0xff]  }
 0x272   : > { %7258 = vmatpush1.bf16.msra.mxu0 %v13191_v38  ;;  %v1226_v61 = vadd.f32 %v17661_v52, %v1099_v55  ;;  %v1232_v47 = vadd.f32 %v17661_v52, %v1105_v20  ;;  %v1104_v28 = vmul.f32 %v17668_v35, %v977_v34  ;;  %v1111_v24 = vmul.f32 %v15671_v37, %v984_v19  ;;  %v17701_v44 = vld [vmem:[#allocation75_spill] sm:$0xff] }
 0x273   : > { %7259 = vmatprep.subr.bf16.mxu0 %v13199_v58  ;;  %6965 = vmatmul.mubr.bf16.gmra.mrb[40].mxu1 %v15828_v18  ;;  %v1225_v10 = vadd.f32 %v17664_v53, %v1098_v46  ;;  %v1117_v17 = vmul.f32 %v15671_v37, %v990_v33  ;;  %v989_v13 = vmul.f32 %v16017_v25, %v17701_v44  ;;  %v13200_v38 = vld [vmem:[#allocation8 + $0xbd8] ss:$72 sps:$4 sm:$0xff]   ;;  %v13208_v55 = vld [vmem:[#allocation8 + $0xc6c] ss:$72 sps:$4 sm:$0xff]   ;;  %v13214_v46 = vld [vmem:[#allocation8 + $0xcfc] ss:$72 sps:$4 sm:$0xff]  }
 0x274   : > { %7034 = vmatpush1.bf16.msra.mxu1 %v13194_v9  ;;  %6974 = vmatprep.mubr.bf16.mxu1 %v15868_v50  ;;  %v16224_v14 = vpack.c.bf16 %v1232_v47, %v1226_v61  ;;  %v1231_v3 = vadd.f32 %v17664_v53, %v1104_v28  ;;  %v1238_v58 = vadd.f32 %v17661_v52, %v1111_v24  ;;  %v13203_v9 = vld [vmem:[#allocation8 + $0x2e0] ss:$72 sps:$4 sm:$0xff]   ;;  %v13211_v34 = vld [vmem:[#allocation8 + $0x374] ss:$72 sps:$4 sm:$0xff]   ;;  %v13217_v33 = vld [vmem:[#allocation8 + $0x404] ss:$72 sps:$4 sm:$0xff]  }
 0x275   : > { %6852 = vmatmul.mubr.bf16.gmra.mrb[8].mxu0 %v16145_v60  ;;  %7035 = vmatprep.subr.bf16.mxu1 %v13202_v7  ;;  %v1244_v20 = vadd.f32 %v17661_v52, %v1117_v17  ;;  %v1110_v37 = vmul.f32 %v17668_v35, %v983_v54  ;;  %v1116_v25 = vmul.f32 %v17668_v35, %v989_v13  ;;  %v13206_v52 = vld [vmem:[#allocation8 + $0xc68] ss:$72 sps:$4 sm:$0xff]   ;;  %v13212_v6 = vld [vmem:[#allocation8 + $0xcf8] ss:$72 sps:$4 sm:$0xff]   ;;  %v13226_v47 = vld [vmem:[#allocation8 + $0xe1c] ss:$72 sps:$4 sm:$0xff]  }
 0x276   : > { %7260 = vmatpush1.bf16.msra.mxu0 %v13197_v16  ;;  %6861 = vmatprep.mubr.bf16.mxu0 %v16151_v39  ;;  %v16233_v56 = vpack.c.bf16 %v1231_v3, %v1225_v10  ;;  %v13209_v35 = vld [vmem:[#allocation8 + $0x370] ss:$72 sps:$4 sm:$0xff]   ;;  %v13215_v54 = vld [vmem:[#allocation8 + $0x400] ss:$72 sps:$4 sm:$0xff]   ;;  %v13223_v16 = vld [vmem:[#allocation8 + $0x494] ss:$72 sps:$4 sm:$0xff]  }
 0x277   : > { %7261 = vmatprep.subr.bf16.mxu0 %v13205_v40  ;;  %v16235_v23 = vpack.c.bf16 %v1244_v20, %v1238_v58  ;;  %v1237_v19 = vadd.f32 %v17664_v53, %v1110_v37  ;;  %v1243_v7 = vadd.f32 %v17664_v53, %v1116_v25  ;;  %v13220_v53 = vld [vmem:[#allocation8 + $0xd8c] ss:$72 sps:$4 sm:$0xff]   ;;  %v13218_v61 = vld [vmem:[#allocation8 + $0xd88] ss:$72 sps:$4 sm:$0xff]   ;;  %v13224_v40 = vld [vmem:[#allocation8 + $0xe18] ss:$72 sps:$4 sm:$0xff]  }
 0x278   : > { %7036 = vmatpush1.bf16.msra.mxu1 %v13200_v38  ;;  %v13221_v28 = vld [vmem:[#allocation8 + $0x490] ss:$72 sps:$4 sm:$0xff]   ;;  %v13229_v24 = vld [vmem:[#allocation8 + $0x524] ss:$72 sps:$4 sm:$0xff]   ;;  %v13227_v17 = vld [vmem:[#allocation8 + $0x520] ss:$72 sps:$4 sm:$0xff]  }
 0x279   : > { %7037 = vmatprep.subr.bf16.mxu1 %v13208_v55  ;;  %v16239_v29 = vpack.c.bf16 %v1243_v7, %v1237_v19  ;;  %v13232_v10 = vld [vmem:[#allocation8 + $0xeac] ss:$72 sps:$4 sm:$0xff]   ;;  %v13230_v13 = vld [vmem:[#allocation8 + $0xea8] ss:$72 sps:$4 sm:$0xff]   ;;  %v13238_v38 = vld [vmem:[#allocation8 + $0xf3c] ss:$72 sps:$4 sm:$0xff]  }
 0x27a   : > { %7262 = vmatpush1.bf16.msra.mxu0 %v13203_v9  ;;  %v13235_v44 = vld [vmem:[#allocation8 + $0x5b4] ss:$72 sps:$4 sm:$0xff]   ;;  %v13233_v3 = vld [vmem:[#allocation8 + $0x5b0] ss:$72 sps:$4 sm:$0xff]   ;;  %v13241_v58 = vld [vmem:[#allocation8 + $0x644] ss:$72 sps:$4 sm:$0xff]  }
 0x27b   : > { %7263 = vmatprep.subr.bf16.mxu0 %v13211_v34  ;;  %6975 = vmatmul.mubr.bf16.gmra.mrb[44].mxu1 %v15872_v26  ;;  %v13236_v55 = vld [vmem:[#allocation8 + $0xf38] ss:$72 sps:$4 sm:$0xff]   ;;  %v13244_v20 = vld [vmem:[#allocation8 + $0xfcc] ss:$72 sps:$4 sm:$0xff]   ;;  %v13242_v9 = vld [vmem:[#allocation8 + $0xfc8] ss:$72 sps:$4 sm:$0xff]  }
 0x27c   : > { %7038 = vmatpush1.bf16.msra.mxu1 %v13206_v52  ;;  %6984 = vmatprep.mubr.bf16.mxu1 %v15918_v36  ;;  %v13239_v37 = vld [vmem:[#allocation8 + $0x640] ss:$72 sps:$4 sm:$0xff]   ;;  %v13247_v25 = vld [vmem:[#allocation8 + $0x6d4] ss:$72 sps:$4 sm:$0xff]   ;;  %v13245_v19 = vld [vmem:[#allocation8 + $0x6d0] ss:$72 sps:$4 sm:$0xff]  }
 0x27d   : > { %6862 = vmatmul.mubr.bf16.gmra.mrb[12].mxu0 %v16163_v48  ;;  %7039 = vmatprep.subr.bf16.mxu1 %v13214_v46  ;;  %v13250_v34 = vld [vmem:[#allocation8 + $0x105c] ss:$72 sps:$4 sm:$0xff]   ;;  %v13248_v52 = vld [vmem:[#allocation8 + $0x1058] ss:$72 sps:$4 sm:$0xff]   ;;  %v13256_v46 = vld [vmem:[#allocation8 + $0x10ec] ss:$72 sps:$4 sm:$0xff]  }
 0x27e   : > { %7264 = vmatpush1.bf16.msra.mxu0 %v13209_v35  ;;  %6871 = vmatprep.mubr.bf16.mxu0 %v16180_v4  ;;  %v13253_v7 = vld [vmem:[#allocation8 + $0x764] ss:$72 sps:$4 sm:$0xff]   ;;  %v13251_v35 = vld [vmem:[#allocation8 + $0x760] ss:$72 sps:$4 sm:$0xff]  }
 0x27f   : > { %7265 = vmatprep.subr.bf16.mxu0 %v13217_v33  ;;  %v13259_v33 = vld [vmem:[#allocation8 + $0x7f4] ss:$72 sps:$4 sm:$0xff]  }
 0x280   : > { %7040 = vmatpush1.bf16.msra.mxu1 %v13212_v6  ;;  %v13254_v6 = vld [vmem:[#allocation8 + $0x10e8] ss:$72 sps:$4 sm:$0xff]  }
 0x281   : > { %7041 = vmatprep.subr.bf16.mxu1 %v13220_v53  ;;  %v13262_v53 = vld [vmem:[#allocation8 + $0x117c] ss:$72 sps:$4 sm:$0xff]  }
 0x282   : > { %7266 = vmatpush1.bf16.msra.mxu0 %v13215_v54  ;;  %v13257_v54 = vld [vmem:[#allocation8 + $0x7f0] ss:$72 sps:$4 sm:$0xff]  }
 0x283   : > { %7267 = vmatprep.subr.bf16.mxu0 %v13223_v16  ;;  %6985 = vmatmul.mubr.bf16.gmra.mrb[48].mxu1 %v15924_v57  ;;  %v13265_v16 = vld [vmem:[#allocation8 + $0x884] ss:$72 sps:$4 sm:$0xff]  }
 0x284   : > { %7042 = vmatpush1.bf16.msra.mxu1 %v13218_v61  ;;  %6994 = vmatprep.mubr.bf16.mxu1 %v15961_v15  ;;  %v13260_v61 = vld [vmem:[#allocation8 + $0x1178] ss:$72 sps:$4 sm:$0xff]  }
 0x285   : > { %6872 = vmatmul.mubr.bf16.gmra.mrb[16].mxu0 %v16189_v32  ;;  %7043 = vmatprep.subr.bf16.mxu1 %v13226_v47  ;;  %v13268_v47 = vld [vmem:[#allocation8 + $0x120c] ss:$72 sps:$4 sm:$0xff]  }
 0x286   : > { %7268 = vmatpush1.bf16.msra.mxu0 %v13221_v28  ;;  %6881 = vmatprep.mubr.bf16.mxu0 %v16195_v43  ;;  %v13263_v28 = vld [vmem:[#allocation8 + $0x880] ss:$72 sps:$4 sm:$0xff]  }
 0x287   : > { %7269 = vmatprep.subr.bf16.mxu0 %v13229_v24  ;;  %v13271_v24 = vld [vmem:[#allocation8 + $0x914] ss:$72 sps:$4 sm:$0xff]  }
 0x288   : > { %7044 = vmatpush1.bf16.msra.mxu1 %v13224_v40  ;;  %v13266_v40 = vld [vmem:[#allocation8 + $0x1208] ss:$72 sps:$4 sm:$0xff]  }
 0x289   : > { %7045 = vmatprep.subr.bf16.mxu1 %v13232_v10  ;;  %v13274_v10 = vld [vmem:[#allocation8 + $0x129c] ss:$72 sps:$4 sm:$0xff]  }
 0x28a   : > { %7270 = vmatpush1.bf16.msra.mxu0 %v13227_v17  ;;  %v13269_v17 = vld [vmem:[#allocation8 + $0x910] ss:$72 sps:$4 sm:$0xff]  }
 0x28b   : > { %7271 = vmatprep.subr.bf16.mxu0 %v13235_v44  ;;  %6995 = vmatmul.mubr.bf16.gmra.mrb[52].mxu1 %v15982_v49  ;;  %v17702_v44 = vld [vmem:[#allocation91_spill] sm:$0xff] }
 0x28c   : > { %7046 = vmatpush1.bf16.msra.mxu1 %v13230_v13  ;;  %7004 = vmatprep.mubr.bf16.mxu1 %v16013_v51  ;;  %v13277_v13 = vld [vmem:[#allocation8 + $0x9a4] ss:$72 sps:$4 sm:$0xff]  }
 0x28d   : > { %6882 = vmatmul.mubr.bf16.gmra.mrb[20].mxu0 %v16207_v12  ;;  %7047 = vmatprep.subr.bf16.mxu1 %v13238_v38  ;;  %v17703_v38 = vld [vmem:[#allocation93_spill] sm:$0xff] }
 0x28e   : > { %7272 = vmatpush1.bf16.msra.mxu0 %v13233_v3  ;;  %6891 = vmatprep.mubr.bf16.mxu0 %v16224_v14  ;;  %v13272_v3 = vld [vmem:[#allocation8 + $0x1298] ss:$72 sps:$4 sm:$0xff]  }
 0x28f   : > { %7273 = vmatprep.subr.bf16.mxu0 %v13241_v58  ;;  %v13280_v58 = vld [vmem:[#allocation8 + $0x132c] ss:$72 sps:$4 sm:$0xff]  }
 0x290   : > { %7048 = vmatpush1.bf16.msra.mxu1 %v13236_v55  ;;  %v13275_v55 = vld [vmem:[#allocation8 + $0x9a0] ss:$72 sps:$4 sm:$0xff]  }
 0x291   : > { %7049 = vmatprep.subr.bf16.mxu1 %v13244_v20  ;;  %v13283_v20 = vld [vmem:[#allocation8 + $0xa34] ss:$72 sps:$4 sm:$0xff]  }
 0x292   : > { %7274 = vmatpush1.bf16.msra.mxu0 %v13239_v37  ;;  %v13278_v37 = vld [vmem:[#allocation8 + $0x1328] ss:$72 sps:$4 sm:$0xff]  }
 0x293   : > { %7275 = vmatprep.subr.bf16.mxu0 %v13247_v25  ;;  %7005 = vmatmul.mubr.bf16.gmra.mrb[56].mxu1 %v16026_v2  ;;  %v13286_v25 = vld [vmem:[#allocation8 + $0x13bc] ss:$72 sps:$4 sm:$0xff]  }
 0x294   : > { %7050 = vmatpush1.bf16.msra.mxu1 %v13242_v9  ;;  %7014 = vmatprep.mubr.bf16.mxu1 %v16059_v21  ;;  %v13281_v9 = vld [vmem:[#allocation8 + $0xa30] ss:$72 sps:$4 sm:$0xff]  }
 0x295   : > { %6892 = vmatmul.mubr.bf16.gmra.mrb[24].mxu0 %v16233_v56  ;;  %7051 = vmatprep.subr.bf16.mxu1 %v13250_v34  ;;  %v17704_v34 = vld [vmem:[#allocation95_spill] sm:$0xff] }
 0x296   : > { %7276 = vmatpush1.bf16.msra.mxu0 %v13245_v19  ;;  %6901 = vmatprep.mubr.bf16.mxu0 %v16235_v23  ;;  %v13289_v19 = vld [vmem:[#allocation8 + $0xac4] ss:$72 sps:$4 sm:$0xff]  }
 0x297   : > { %7277 = vmatprep.subr.bf16.mxu0 %v13253_v7  ;;  %v17705_v7 = vld [vmem:[#allocation97_spill] sm:$0xff] }
 0x298   : > { %7052 = vmatpush1.bf16.msra.mxu1 %v13248_v52  ;;  %v13284_v52 = vld [vmem:[#allocation8 + $0x13b8] ss:$72 sps:$4 sm:$0xff]  }
 0x299   : > { %7053 = vmatprep.subr.bf16.mxu1 %v13256_v46  ;;  %v13292_v46 = vld [vmem:[#allocation8 + $0x144c] ss:$72 sps:$4 sm:$0xff]  }
 0x29a   : > { %7278 = vmatpush1.bf16.msra.mxu0 %v13251_v35  ;;  %v13287_v35 = vld [vmem:[#allocation8 + $0xac0] ss:$72 sps:$4 sm:$0xff]  }
 0x29b   : > { %7279 = vmatprep.subr.bf16.mxu0 %v13259_v33  ;;  %7015 = vmatmul.mubr.bf16.gmra.mrb[60].mxu1 %v16073_v31  ;;  %v13295_v33 = vld [vmem:[#allocation8 + $0xb54] ss:$72 sps:$4 sm:$0xff]  }
 0x29c   : > { %7054 = vmatpush1.bf16.msra.mxu1 %v13254_v6  ;;  %7057 = vmatprep.mubr.bf16.mxu1 %v15742_v27  ;;  %v13290_v6 = vld [vmem:[#allocation8 + $0x1448] ss:$72 sps:$4 sm:$0xff]  }
 0x29d   : > { %6902 = vmatmul.mubr.bf16.gmra.mrb[28].mxu0 %v16239_v29  ;;  %7055 = vmatprep.subr.bf16.mxu1 %v13262_v53  ;;  %v13298_v53 = vld [vmem:[#allocation8 + $0x14dc] ss:$72 sps:$4 sm:$0xff]  }
 0x29e   : > { %7280 = vmatpush1.bf16.msra.mxu0 %v13257_v54  ;;  %7283 = vmatprep.mubr.bf16.mxu0 %v15740_v45  ;;  %v13293_v54 = vld [vmem:[#allocation8 + $0xb50] ss:$72 sps:$4 sm:$0xff]  }
 0x29f   : > { %7281 = vmatprep.subr.bf16.mxu0 %v13265_v16  ;;  %v17706_v16 = vld [vmem:[#allocation99_spill] sm:$0xff] }
 0x2a0   : > { %7056 = vmatpush1.bf16.msra.mxu1 %v13260_v61  ;;  %v13301_v61 = vld [vmem:[#allocation8 + $0xbe4] ss:$72 sps:$4 sm:$0xff]  }
 0x2a1   : > { %7138 = vmatprep.subr.bf16.mxu1 %v13268_v47  ;;  %v17707_v47 = vld [vmem:[#allocation29_spill] sm:$0xff] }
 0x2a2   : > { %7282 = vmatpush1.bf16.msra.mxu0 %v13263_v28  ;;  %v13296_v28 = vld [vmem:[#allocation8 + $0x14d8] ss:$72 sps:$4 sm:$0xff]  }
 0x2a3   : > { %7364 = vmatprep.subr.bf16.mxu0 %v13271_v24  ;;  %7058 = vmatmul.mubr.bf16.vlgmr.msra.gmra.mrb[32].mxu1 %v17702_v44  ;;  %v13304_v24 = vld [vmem:[#allocation8 + $0x156c] ss:$72 sps:$4 sm:$0xff]  }
 0x2a4   : > { %7139 = vmatpush1.bf16.msra.mxu1 %v13266_v40  ;;  %7067 = vmatprep.mubr.bf16.mxu1 %v17703_v38  ;;  %v13299_v40 = vld [vmem:[#allocation8 + $0xbe0] ss:$72 sps:$4 sm:$0xff]  }
 0x2a5   : > { %7284 = vmatmul.mubr.bf16.vlgmr.msra.gmra.mrb[32].mxu0 %v15744_v42  ;;  %7140 = vmatprep.subr.bf16.mxu1 %v13274_v10  ;;  %v13307_v10 = vld [vmem:[#allocation8 + $0xc74] ss:$72 sps:$4 sm:$0xff]  }
 0x2a6   : > { %7365 = vmatpush1.bf16.msra.mxu0 %v13269_v17  ;;  %7293 = vmatprep.mubr.bf16.mxu0 %v15768_v30  ;;  %v13302_v17 = vld [vmem:[#allocation8 + $0x1568] ss:$72 sps:$4 sm:$0xff]  }
 0x2a7   : > { %7366 = vmatprep.subr.bf16.mxu0 %v13277_v13  ;;  %v13310_v13 = vld [vmem:[#allocation8 + $0x15fc] ss:$72 sps:$4 sm:$0xff]  }
 0x2a8   : > { %7141 = vmatpush1.bf16.msra.mxu1 %v13272_v3  ;;  %v13305_v3 = vld [vmem:[#allocation8 + $0xc70] ss:$72 sps:$4 sm:$0xff]  }
 0x2a9   : > { %7142 = vmatprep.subr.bf16.mxu1 %v13280_v58  ;;  %v17708_v58 = vld [vmem:[#allocation33_spill] sm:$0xff] }
 0x2aa   : > { %7367 = vmatpush1.bf16.msra.mxu0 %v13275_v55  ;;  %v13313_v55 = vld [vmem:[#allocation8 + $0xd04] ss:$72 sps:$4 sm:$0xff]  }
 0x2ab   : > { %7368 = vmatprep.subr.bf16.mxu0 %v13283_v20  ;;  %7068 = vmatmul.mubr.bf16.gmra.mrb[36].mxu1 %v17704_v34  ;;  %v17709_v20 = vld [vmem:[#allocation38_spill] sm:$0xff] }
 0x2ac   : > { %7143 = vmatpush1.bf16.msra.mxu1 %v13278_v37  ;;  %7077 = vmatprep.mubr.bf16.mxu1 %v17705_v7  ;;  %v13308_v37 = vld [vmem:[#allocation8 + $0x15f8] ss:$72 sps:$4 sm:$0xff]  }
 0x2ad   : > { %7294 = vmatmul.mubr.bf16.gmra.mrb[36].mxu0 %v15774_v11  ;;  %7144 = vmatprep.subr.bf16.mxu1 %v13286_v25  ;;  %v13316_v25 = vld [vmem:[#allocation8 + $0x168c] ss:$72 sps:$4 sm:$0xff]  }
 0x2ae   : > { %7369 = vmatpush1.bf16.msra.mxu0 %v13281_v9  ;;  %7303 = vmatprep.mubr.bf16.mxu0 %v15820_v59  ;;  %v13311_v9 = vld [vmem:[#allocation8 + $0xd00] ss:$72 sps:$4 sm:$0xff]  }
 0x2af   : > { %7370 = vmatprep.subr.bf16.mxu0 %v13289_v19  ;;  %v13319_v19 = vld [vmem:[#allocation8 + $0xd94] ss:$72 sps:$4 sm:$0xff]  }
 0x2b0   : > { %7145 = vmatpush1.bf16.msra.mxu1 %v13284_v52  ;;  %v13314_v52 = vld [vmem:[#allocation8 + $0x1688] ss:$72 sps:$4 sm:$0xff]  }
 0x2b1   : > { %7146 = vmatprep.subr.bf16.mxu1 %v13292_v46  ;;  %v13322_v46 = vld [vmem:[#allocation8 + $0x171c] ss:$72 sps:$4 sm:$0xff]  }
 0x2b2   : > { %7371 = vmatpush1.bf16.msra.mxu0 %v13287_v35  ;;  %v13317_v35 = vld [vmem:[#allocation8 + $0xd90] ss:$72 sps:$4 sm:$0xff]  }
 0x2b3   : > { %7372 = vmatprep.subr.bf16.mxu0 %v13295_v33  ;;  %7078 = vmatmul.mubr.bf16.gmra.mrb[40].mxu1 %v17706_v16  ;;  %v17710_v33 = vld [vmem:[#allocation36_spill] sm:$0xff] }
 0x2b4   : > { %7147 = vmatpush1.bf16.msra.mxu1 %v13290_v6  ;;  %7087 = vmatprep.mubr.bf16.mxu1 %v17707_v47  ;;  %v13325_v6 = vld [vmem:[#allocation8 + $0xe24] ss:$72 sps:$4 sm:$0xff]  }
 0x2b5   : > { %7304 = vmatmul.mubr.bf16.gmra.mrb[40].mxu0 %v15828_v18  ;;  %7148 = vmatprep.subr.bf16.mxu1 %v13298_v53  ;;  %v17711_v53 = vld [vmem:[#allocation42_spill] sm:$0xff] }
 0x2b6   : > { %7373 = vmatpush1.bf16.msra.mxu0 %v13293_v54  ;;  %7313 = vmatprep.mubr.bf16.mxu0 %v15868_v50  ;;  %v13320_v54 = vld [vmem:[#allocation8 + $0x1718] ss:$72 sps:$4 sm:$0xff]  }
 0x2b7   : > { %7374 = vmatprep.subr.bf16.mxu0 %v13301_v61  ;;  %v13328_v61 = vld [vmem:[#allocation8 + $0x17ac] ss:$72 sps:$4 sm:$0xff]  }
 0x2b8   : > { %7149 = vmatpush1.bf16.msra.mxu1 %v13296_v28  ;;  %v13323_v28 = vld [vmem:[#allocation8 + $0xe20] ss:$72 sps:$4 sm:$0xff]  }
 0x2b9   : > { %7150 = vmatprep.subr.bf16.mxu1 %v13304_v24  ;;  %v13331_v24 = vld [vmem:[#allocation8 + $0xeb4] ss:$72 sps:$4 sm:$0xff]  }
 0x2ba   : > { %7375 = vmatpush1.bf16.msra.mxu0 %v13299_v40  ;;  %v13326_v40 = vld [vmem:[#allocation8 + $0x17a8] ss:$72 sps:$4 sm:$0xff]  }
 0x2bb   : > { %7376 = vmatprep.subr.bf16.mxu0 %v13307_v10  ;;  %7088 = vmatmul.mubr.bf16.gmra.mrb[44].mxu1 %v17708_v58  ;;  %v13334_v10 = vld [vmem:[#allocation8 + $0x183c] ss:$72 sps:$4 sm:$0xff]  }
 0x2bc   : > { %7151 = vmatpush1.bf16.msra.mxu1 %v13302_v17  ;;  %7097 = vmatprep.mubr.bf16.mxu1 %v17709_v20  ;;  %v13329_v17 = vld [vmem:[#allocation8 + $0xeb0] ss:$72 sps:$4 sm:$0xff]  }
 0x2bd   : > { %7314 = vmatmul.mubr.bf16.gmra.mrb[44].mxu0 %v15872_v26  ;;  %7152 = vmatprep.subr.bf16.mxu1 %v13310_v13  ;;  %v17712_v13 = vld [vmem:[#allocation41_spill] sm:$0xff] }
 0x2be   : > { %7377 = vmatpush1.bf16.msra.mxu0 %v13305_v3  ;;  %7323 = vmatprep.mubr.bf16.mxu0 %v15918_v36  ;;  %v13337_v3 = vld [vmem:[#allocation8 + $0xf44] ss:$72 sps:$4 sm:$0xff]  }
 0x2bf   : > { %7378 = vmatprep.subr.bf16.mxu0 %v13313_v55  ;;  %v17713_v55 = vld [vmem:[#allocation37_spill] sm:$0xff] }
 0x2c0   : > { %7153 = vmatpush1.bf16.msra.mxu1 %v13308_v37  ;;  %v13332_v37 = vld [vmem:[#allocation8 + $0x1838] ss:$72 sps:$4 sm:$0xff]  }
 0x2c1   : > { %7154 = vmatprep.subr.bf16.mxu1 %v13316_v25  ;;  %v13340_v25 = vld [vmem:[#allocation8 + $0x18cc] ss:$72 sps:$4 sm:$0xff]  }
 0x2c2   : > { %7379 = vmatpush1.bf16.msra.mxu0 %v13311_v9  ;;  %v13335_v9 = vld [vmem:[#allocation8 + $0xf40] ss:$72 sps:$4 sm:$0xff]  }
 0x2c3   : > { %7380 = vmatprep.subr.bf16.mxu0 %v13319_v19  ;;  %7098 = vmatmul.mubr.bf16.gmra.mrb[48].mxu1 %v17710_v33  ;;  %v13343_v19 = vld [vmem:[#allocation8 + $0xfd4] ss:$72 sps:$4 sm:$0xff]  }
 0x2c4   : > { %7155 = vmatpush1.bf16.msra.mxu1 %v13314_v52  ;;  %7107 = vmatprep.mubr.bf16.mxu1 %v17711_v53  ;;  %v13338_v52 = vld [vmem:[#allocation8 + $0x18c8] ss:$72 sps:$4 sm:$0xff]  }
 0x2c5   : > { %7324 = vmatmul.mubr.bf16.gmra.mrb[48].mxu0 %v15924_v57  ;;  %7156 = vmatprep.subr.bf16.mxu1 %v13322_v46  ;;  %v13346_v46 = vld [vmem:[#allocation8 + $0x195c] ss:$72 sps:$4 sm:$0xff]  }
 0x2c6   : > { %7381 = vmatpush1.bf16.msra.mxu0 %v13317_v35  ;;  %7333 = vmatprep.mubr.bf16.mxu0 %v15961_v15  ;;  %v13341_v35 = vld [vmem:[#allocation8 + $0xfd0] ss:$72 sps:$4 sm:$0xff]  }
 0x2c7   : > { %7382 = vmatprep.subr.bf16.mxu0 %v13325_v6  ;;  %v13349_v6 = vld [vmem:[#allocation8 + $0x1064] ss:$72 sps:$4 sm:$0xff]  }
 0x2c8   : > { %7157 = vmatpush1.bf16.msra.mxu1 %v13320_v54  ;;  %v13344_v54 = vld [vmem:[#allocation8 + $0x1958] ss:$72 sps:$4 sm:$0xff]  }
 0x2c9   : > { %7158 = vmatprep.subr.bf16.mxu1 %v13328_v61  ;;  %v13352_v61 = vld [vmem:[#allocation8 + $0x19ec] ss:$72 sps:$4 sm:$0xff]  }
 0x2ca   : > { %7383 = vmatpush1.bf16.msra.mxu0 %v13323_v28  ;;  %v13347_v28 = vld [vmem:[#allocation8 + $0x1060] ss:$72 sps:$4 sm:$0xff]  }
 0x2cb   : > { %7384 = vmatprep.subr.bf16.mxu0 %v13331_v24  ;;  %7108 = vmatmul.mubr.bf16.gmra.mrb[52].mxu1 %v17712_v13  ;;  %v13355_v24 = vld [vmem:[#allocation8 + $0x10f4] ss:$72 sps:$4 sm:$0xff]  }
 0x2cc   : > { %7159 = vmatpush1.bf16.msra.mxu1 %v13326_v40  ;;  %7117 = vmatprep.mubr.bf16.mxu1 %v17713_v55  ;;  %v13350_v40 = vld [vmem:[#allocation8 + $0x19e8] ss:$72 sps:$4 sm:$0xff]  }
 0x2cd   : > { %7334 = vmatmul.mubr.bf16.gmra.mrb[52].mxu0 %v15982_v49  ;;  %7160 = vmatprep.subr.bf16.mxu1 %v13334_v10  ;;  %v13358_v10 = vld [vmem:[#allocation8 + $0x1a7c] ss:$72 sps:$4 sm:$0xff]  }
 0x2ce   : > { %7385 = vmatpush1.bf16.msra.mxu0 %v13329_v17  ;;  %7343 = vmatprep.mubr.bf16.mxu0 %v16013_v51  ;;  %v13353_v17 = vld [vmem:[#allocation8 + $0x10f0] ss:$72 sps:$4 sm:$0xff]  }
 0x2cf   : > { %7386 = vmatprep.subr.bf16.mxu0 %v13337_v3  ;;  %v13361_v3 = vld [vmem:[#allocation8 + $0x1184] ss:$72 sps:$4 sm:$0xff]  }
 0x2d0   : > { %7161 = vmatpush1.bf16.msra.mxu1 %v13332_v37  ;;  %v13356_v37 = vld [vmem:[#allocation8 + $0x1a78] ss:$72 sps:$4 sm:$0xff]  }
 0x2d1   : > { %7162 = vmatprep.subr.bf16.mxu1 %v13340_v25  ;;  %v13367_v25 = vld [vmem:[#allocation8 + $0x1c] ss:$72 sps:$4 sm:$0xff]  }
 0x2d2   : > { %7387 = vmatpush1.bf16.msra.mxu0 %v13335_v9  ;;  %v13359_v9 = vld [vmem:[#allocation8 + $0x1180] ss:$72 sps:$4 sm:$0xff]  }
 0x2d3   : > { %7388 = vmatprep.subr.bf16.mxu0 %v13343_v19  ;;  %7118 = vmatmul.mubr.bf16.gmra.mrb[56].mxu1 %v16035_v63  ;;  %v13364_v19 = vld [vmem:[#allocation8 + $0x1214] ss:$72 sps:$4 sm:$0xff]  }
 0x2d4   : > { %7163 = vmatpush1.bf16.msra.mxu1 %v13338_v52  ;;  %7127 = vmatprep.mubr.bf16.mxu1 %v16061_v0  ;;  %v13365_v52 = vld [vmem:[#allocation8 + $0x18] ss:$72 sps:$4 sm:$0xff]  }
 0x2d5   : > { %7344 = vmatmul.mubr.bf16.gmra.mrb[56].mxu0 %v16026_v2  ;;  %7164 = vmatprep.subr.bf16.mxu1 %v13346_v46  ;;  %v13373_v46 = vld [vmem:[#allocation8 + $0xac] ss:$72 sps:$4 sm:$0xff]  }
 0x2d6   : > { %7389 = vmatpush1.bf16.msra.mxu0 %v13341_v35  ;;  %7353 = vmatprep.mubr.bf16.mxu0 %v16059_v21  ;;  %v13362_v35 = vld [vmem:[#allocation8 + $0x1210] ss:$72 sps:$4 sm:$0xff]  }
 0x2d7   : > { %7390 = vmatprep.subr.bf16.mxu0 %v13349_v6  ;;  %v13370_v6 = vld [vmem:[#allocation8 + $0x12a4] ss:$72 sps:$4 sm:$0xff]  }
 0x2d8   : > { %7165 = vmatpush1.bf16.msra.mxu1 %v13344_v54  ;;  %v13371_v54 = vld [vmem:[#allocation8 + $0xa8] ss:$72 sps:$4 sm:$0xff]  }
 0x2d9   : > { %7166 = vmatprep.subr.bf16.mxu1 %v13352_v61  ;;  %v13379_v61 = vld [vmem:[#allocation8 + $0x13c] ss:$72 sps:$4 sm:$0xff]  }
 0x2da   : > { %7391 = vmatpush1.bf16.msra.mxu0 %v13347_v28  ;;  %v13368_v28 = vld [vmem:[#allocation8 + $0x12a0] ss:$72 sps:$4 sm:$0xff]  }
 0x2db   : > { %7392 = vmatprep.subr.bf16.mxu0 %v13355_v24  ;;  %7128 = vmatmul.mubr.bf16.gmra.mrb[60].mxu1 %v16079_v8  ;;  %v13376_v24 = vld [vmem:[#allocation8 + $0x1334] ss:$72 sps:$4 sm:$0xff]  }
 0x2dc   : > { %7167 = vmatpush1.bf16.msra.mxu1 %v13350_v40  ;;  %7170 = vmatprep.mubr.bf16.mxu1 %v16081_v1  ;;  %v13377_v40 = vld [vmem:[#allocation8 + $0x138] ss:$72 sps:$4 sm:$0xff]  }
 0x2dd   : > { %7354 = vmatmul.mubr.bf16.gmra.mrb[60].mxu0 %v16073_v31  ;;  %7168 = vmatprep.subr.bf16.mxu1 %v13358_v10  ;;  %v13385_v10 = vld [vmem:[#allocation8 + $0x1cc] ss:$72 sps:$4 sm:$0xff]  }
 0x2de   : > { %7393 = vmatpush1.bf16.msra.mxu0 %v13353_v17  ;;  %7396 = vmatprep.mubr.bf16.mxu0 %v15742_v27  ;;  %v13374_v17 = vld [vmem:[#allocation8 + $0x1330] ss:$72 sps:$4 sm:$0xff]   ;;  %v13457_v27 = vld [vmem:[#allocation8 + $0x88c] ss:$72 sps:$4 sm:$0xff]  }
 0x2df   : > { %7394 = vmatprep.subr.bf16.mxu0 %v13361_v3  ;;  %v13382_v3 = vld [vmem:[#allocation8 + $0x13c4] ss:$72 sps:$4 sm:$0xff]  }
 0x2e0   : > { %7169 = vmatpush1.bf16.msra.mxu1 %v13356_v37  ;;  %v13383_v37 = vld [vmem:[#allocation8 + $0x1c8] ss:$72 sps:$4 sm:$0xff]  }
 0x2e1   : > { %7590 = vmatprep.subr.bf16.mxu1 %v13367_v25  ;;  %v13391_v25 = vld [vmem:[#allocation8 + $0x25c] ss:$72 sps:$4 sm:$0xff]  }
 0x2e2   : > { %7395 = vmatpush1.bf16.msra.mxu0 %v13359_v9  ;;  %v13380_v9 = vld [vmem:[#allocation8 + $0x13c0] ss:$72 sps:$4 sm:$0xff]  }
 0x2e3   : > { %7477 = vmatprep.subr.bf16.mxu0 %v13364_v19  ;;  %7171 = vmatmul.mubr.bf16.vlgmr.msra.gmra.mrb[32].mxu1 %v16101_v62  ;;  %v13388_v19 = vld [vmem:[#allocation8 + $0x1454] ss:$72 sps:$4 sm:$0xff]  }
 0x2e4   : > { %7591 = vmatpush1.bf16.msra.mxu1 %v13365_v52  ;;  %7180 = vmatprep.mubr.bf16.mxu1 %v16117_v22  ;;  %v13389_v52 = vld [vmem:[#allocation8 + $0x258] ss:$72 sps:$4 sm:$0xff]  }
 0x2e5   : > { %7397 = vmatmul.mubr.bf16.vlgmr.msra.gmra.mrb[32].mxu0 %v17702_v44  ;;  %7592 = vmatprep.subr.bf16.mxu1 %v13373_v46  ;;  %v13397_v46 = vld [vmem:[#allocation8 + $0x2ec] ss:$72 sps:$4 sm:$0xff]   ;;  %v13434_v44 = vld [vmem:[#allocation8 + $0x18d0] ss:$72 sps:$4 sm:$0xff]  }
 0x2e6   : > { %7478 = vmatpush1.bf16.msra.mxu0 %v13362_v35  ;;  %7406 = vmatprep.mubr.bf16.mxu0 %v17703_v38  ;;  %v13386_v35 = vld [vmem:[#allocation8 + $0x1450] ss:$72 sps:$4 sm:$0xff]   ;;  %v13445_v38 = vld [vmem:[#allocation8 + $0x76c] ss:$72 sps:$4 sm:$0xff]  }
 0x2e7   : > { %7479 = vmatprep.subr.bf16.mxu0 %v13370_v6 }
 0x2e8   : > { %7593 = vmatpush1.bf16.msra.mxu1 %v13371_v54  ;;  %v13394_v54 = vld [vmem:[#allocation8 + $0x14e4] ss:$72 sps:$4 sm:$0xff]  }
 0x2e9   : > { %7594 = vmatprep.subr.bf16.mxu1 %v13379_v61  ;;  %v13395_v61 = vld [vmem:[#allocation8 + $0x2e8] ss:$72 sps:$4 sm:$0xff]  }
 0x2ea   : > { %7480 = vmatpush1.bf16.msra.mxu0 %v13368_v28 }
 0x2eb   : > { %7481 = vmatprep.subr.bf16.mxu0 %v13376_v24  ;;  %7181 = vmatmul.mubr.bf16.gmra.mrb[36].mxu1 %v16123_v41 }
 0x2ec   : > { %7595 = vmatpush1.bf16.msra.mxu1 %v13377_v40  ;;  %7190 = vmatprep.mubr.bf16.mxu1 %v16136_v5  ;;  %v13403_v40 = vld [vmem:[#allocation8 + $0x37c] ss:$72 sps:$4 sm:$0xff]  }
 0x2ed   : > { %7407 = vmatmul.mubr.bf16.gmra.mrb[36].mxu0 %v17704_v34  ;;  %7596 = vmatprep.subr.bf16.mxu1 %v13385_v10  ;;  %v16302_v6 = vpop.f32.mrb[0].mxu1  ;;  %v13392_v10 = vld [vmem:[#allocation8 + $0x14e0] ss:$72 sps:$4 sm:$0xff]   ;;  %v13422_v34 = vld [vmem:[#allocation8 + $0x17b0] ss:$72 sps:$4 sm:$0xff]  }
 0x2ee   : > { %7482 = vmatpush1.bf16.msra.mxu0 %v13374_v17  ;;  %7416 = vmatprep.mubr.bf16.mxu0 %v17705_v7  ;;  %v16305_v28 = vpop.f32.mrb[1].mxu1  ;;  %v13433_v7 = vld [vmem:[#allocation8 + $0x64c] ss:$72 sps:$4 sm:$0xff]  }
 0x2ef   : > { %7483 = vmatprep.subr.bf16.mxu0 %v13382_v3  ;;  %v16308_v24 = vpop.f32.mrb[2].mxu1  ;;  %v13400_v3 = vld [vmem:[#allocation8 + $0x1574] ss:$72 sps:$4 sm:$0xff]  }
 0x2f0   : > { %7597 = vmatpush1.bf16.msra.mxu1 %v13383_v37  ;;  %v16311_v17 = vpop.f32.mrb[3].mxu1  ;;  %v13401_v37 = vld [vmem:[#allocation8 + $0x378] ss:$72 sps:$4 sm:$0xff]  }
 0x2f1   : > { %7598 = vmatprep.subr.bf16.mxu1 %v13391_v25  ;;  %v13409_v25 = vld [vmem:[#allocation8 + $0x40c] ss:$72 sps:$4 sm:$0xff]  }
 0x2f2   : > { %7484 = vmatpush1.bf16.msra.mxu0 %v13380_v9  ;;  %v13398_v9 = vld [vmem:[#allocation8 + $0x1570] ss:$72 sps:$4 sm:$0xff]  }
 0x2f3   : > { %7485 = vmatprep.subr.bf16.mxu0 %v13388_v19  ;;  %7191 = vmatmul.mubr.bf16.gmra.mrb[40].mxu1 %v16145_v60 }
 0x2f4   : > { %7599 = vmatpush1.bf16.msra.mxu1 %v13389_v52  ;;  %7200 = vmatprep.mubr.bf16.mxu1 %v16151_v39  ;;  %v13406_v52 = vld [vmem:[#allocation8 + $0x1604] ss:$72 sps:$4 sm:$0xff]  }
 0x2f5   : > { %7417 = vmatmul.mubr.bf16.gmra.mrb[40].mxu0 %v17706_v16  ;;  %7600 = vmatprep.subr.bf16.mxu1 %v13397_v46  ;;  %v13407_v46 = vld [vmem:[#allocation8 + $0x408] ss:$72 sps:$4 sm:$0xff]  }
 0x2f6   : > { %7486 = vmatpush1.bf16.msra.mxu0 %v13386_v35  ;;  %7426 = vmatprep.mubr.bf16.mxu0 %v17707_v47  ;;  %v16314_v19 = vpop.f32.mrb[4].mxu1  ;;  %v13421_v47 = vld [vmem:[#allocation8 + $0x52c] ss:$72 sps:$4 sm:$0xff]   ;;  %v13410_v16 = vld [vmem:[#allocation8 + $0x1690] ss:$72 sps:$4 sm:$0xff]  }
 0x2f7   : > { %7487 = vmatprep.subr.bf16.mxu0 %v13394_v54  ;;  %v16317_v35 = vpop.f32.mrb[5].mxu1 }
 0x2f8   : > { %7601 = vmatpush1.bf16.msra.mxu1 %v13395_v61  ;;  %v16320_v54 = vpop.f32.mrb[6].mxu1  ;;  %v13415_v61 = vld [vmem:[#allocation8 + $0x49c] ss:$72 sps:$4 sm:$0xff]  }
 0x2f9   : > { %7602 = vmatprep.subr.bf16.mxu1 %v13403_v40  ;;  %v13404_v40 = vld [vmem:[#allocation8 + $0x1600] ss:$72 sps:$4 sm:$0xff]  }
 0x2fa   : > { %7488 = vmatpush1.bf16.msra.mxu0 %v13392_v10  ;;  %v16323_v10 = vpop.f32.mrb[7].mxu1 }
 0x2fb   : > { %7489 = vmatprep.subr.bf16.mxu0 %v13400_v3  ;;  %7201 = vmatmul.mubr.bf16.gmra.mrb[44].mxu1 %v16163_v48  ;;  %v13412_v3 = vld [vmem:[#allocation8 + $0x1694] ss:$72 sps:$4 sm:$0xff]  }
 0x2fc   : > { %7603 = vmatpush1.bf16.msra.mxu1 %v13401_v37  ;;  %7210 = vmatprep.mubr.bf16.mxu1 %v16180_v4  ;;  %v13413_v37 = vld [vmem:[#allocation8 + $0x498] ss:$72 sps:$4 sm:$0xff]  }
 0x2fd   : > { %7427 = vmatmul.mubr.bf16.gmra.mrb[44].mxu0 %v17708_v58  ;;  %7604 = vmatprep.subr.bf16.mxu1 %v13409_v25  ;;  %v13418_v58 = vld [vmem:[#allocation8 + $0x1724] ss:$72 sps:$4 sm:$0xff]  }
 0x2fe   : > { %7490 = vmatpush1.bf16.msra.mxu0 %v13398_v9  ;;  %7436 = vmatprep.mubr.bf16.mxu0 %v17709_v20  ;;  %v16326_v25 = vpop.f32.mrb[8].mxu1  ;;  %v13419_v9 = vld [vmem:[#allocation8 + $0x528] ss:$72 sps:$4 sm:$0xff]  }
 0x2ff   : > { %7491 = vmatprep.subr.bf16.mxu0 %v13406_v52  ;;  %v16329_v20 = vpop.f32.mrb[9].mxu1 }
 0x300   : > { %7605 = vmatpush1.bf16.msra.mxu1 %v13407_v46  ;;  %v16332_v52 = vpop.f32.mrb[10].mxu1  ;;  %v13427_v46 = vld [vmem:[#allocation8 + $0x5bc] ss:$72 sps:$4 sm:$0xff]  }
 0x301   : > { %7606 = vmatprep.subr.bf16.mxu1 %v13415_v61  ;;  %v13416_v61 = vld [vmem:[#allocation8 + $0x1720] ss:$72 sps:$4 sm:$0xff]  }
 0x302   : > { %7492 = vmatpush1.bf16.msra.mxu0 %v13404_v40  ;;  %v16335_v40 = vpop.f32.mrb[11].mxu1 }
 0x303   : > { %7493 = vmatprep.subr.bf16.mxu0 %v13412_v3  ;;  %7211 = vmatmul.mubr.bf16.gmra.mrb[48].mxu1 %v16189_v32  ;;  %v13424_v3 = vld [vmem:[#allocation8 + $0x17b4] ss:$72 sps:$4 sm:$0xff]  }
 0x304   : > { %7607 = vmatpush1.bf16.msra.mxu1 %v13413_v37  ;;  %7220 = vmatprep.mubr.bf16.mxu1 %v16195_v43  ;;  %v13425_v37 = vld [vmem:[#allocation8 + $0x5b8] ss:$72 sps:$4 sm:$0xff]  }
 0x305   : > { %7437 = vmatmul.mubr.bf16.gmra.mrb[48].mxu0 %v17710_v33  ;;  %7608 = vmatprep.subr.bf16.mxu1 %v13421_v47  ;;  %v13430_v33 = vld [vmem:[#allocation8 + $0x1844] ss:$72 sps:$4 sm:$0xff]  }
 0x306   : > { %7494 = vmatpush1.bf16.msra.mxu0 %v13410_v16  ;;  %7446 = vmatprep.mubr.bf16.mxu0 %v17711_v53  ;;  %v16338_v47 = vpop.f32.mrb[12].mxu1  ;;  %v13431_v16 = vld [vmem:[#allocation8 + $0x648] ss:$72 sps:$4 sm:$0xff]  }
 0x307   : > { %7495 = vmatprep.subr.bf16.mxu0 %v13418_v58  ;;  %v16341_v53 = vpop.f32.mrb[13].mxu1 }
 0x308   : > { %7609 = vmatpush1.bf16.msra.mxu1 %v13419_v9  ;;  %v16344_v58 = vpop.f32.mrb[14].mxu1  ;;  %v13439_v9 = vld [vmem:[#allocation8 + $0x6dc] ss:$72 sps:$4 sm:$0xff]  }
 0x309   : > { %7610 = vmatprep.subr.bf16.mxu1 %v13427_v46  ;;  %v13428_v46 = vld [vmem:[#allocation8 + $0x1840] ss:$72 sps:$4 sm:$0xff]  }
 0x30a   : > { %7496 = vmatpush1.bf16.msra.mxu0 %v13416_v61  ;;  %v16347_v61 = vpop.f32.mrb[15].mxu1 }
 0x30b   : > { %7497 = vmatprep.subr.bf16.mxu0 %v13424_v3  ;;  %7221 = vmatmul.mubr.bf16.gmra.mrb[52].mxu1 %v16207_v12  ;;  %v13436_v3 = vld [vmem:[#allocation8 + $0x18d4] ss:$72 sps:$4 sm:$0xff]  }
 0x30c   : > { %7611 = vmatpush1.bf16.msra.mxu1 %v13425_v37  ;;  %7230 = vmatprep.mubr.bf16.mxu1 %v16224_v14  ;;  %v13437_v37 = vld [vmem:[#allocation8 + $0x6d8] ss:$72 sps:$4 sm:$0xff]  }
 0x30d   : > { %7447 = vmatmul.mubr.bf16.gmra.mrb[52].mxu0 %v17712_v13  ;;  %7612 = vmatprep.subr.bf16.mxu1 %v13433_v7  ;;  %v13442_v7 = vld [vmem:[#allocation8 + $0x1964] ss:$72 sps:$4 sm:$0xff]   ;;  %v13449_v13 = vld [vmem:[#allocation8 + $0x7f8] ss:$72 sps:$4 sm:$0xff]  }
 0x30e   : > { %7498 = vmatpush1.bf16.msra.mxu0 %v13422_v34  ;;  %7456 = vmatprep.mubr.bf16.mxu0 %v17713_v55  ;;  %v13443_v55 = vld [vmem:[#allocation8 + $0x768] ss:$72 sps:$4 sm:$0xff]  }
 0x30f   : > { %7499 = vmatprep.subr.bf16.mxu0 %v13430_v33 }
 0x310   : > { %7613 = vmatpush1.bf16.msra.mxu1 %v13431_v16  ;;  %v16351_v34 = vpop.f32.mrb[16].mxu1  ;;  %v13451_v16 = vld [vmem:[#allocation8 + $0x7fc] ss:$72 sps:$4 sm:$0xff]  }
 0x311   : > { %7614 = vmatprep.subr.bf16.mxu1 %v13439_v9  ;;  %v16354_v33 = vpop.f32.mrb[17].mxu1  ;;  %v13440_v9 = vld [vmem:[#allocation8 + $0x1960] ss:$72 sps:$4 sm:$0xff]  }
 0x312   : > { %7500 = vmatpush1.bf16.msra.mxu0 %v13428_v46  ;;  %v16357_v46 = vpop.f32.mrb[18].mxu1 }
 0x313   : > { %7501 = vmatprep.subr.bf16.mxu0 %v13436_v3  ;;  %7231 = vmatmul.mubr.bf16.gmra.mrb[56].mxu1 %v16233_v56  ;;  %v16359_v3 = vpop.f32.mrb[19].mxu1 }
 0x314   : > { %7615 = vmatpush1.bf16.msra.mxu1 %v13437_v37  ;;  %7240 = vmatprep.mubr.bf16.mxu1 %v16235_v23  ;;  %v13448_v37 = vld [vmem:[#allocation8 + $0x19f4] ss:$72 sps:$4 sm:$0xff]  }
 0x315   : > { %7457 = vmatmul.mubr.bf16.gmra.mrb[56].mxu0 %v16035_v63  ;;  %7616 = vmatprep.subr.bf16.mxu1 %v13445_v38  ;;  %v13446_v63 = vld [vmem:[#allocation8 + $0x19f0] ss:$72 sps:$4 sm:$0xff]   ;;  %v13454_v38 = vld [vmem:[#allocation8 + $0x1a84] ss:$72 sps:$4 sm:$0xff]  }
 0x316   : > { %7502 = vmatpush1.bf16.msra.mxu0 %v13434_v44  ;;  %7466 = vmatprep.mubr.bf16.mxu0 %v16061_v0  ;;  %v13455_v44 = vld [vmem:[#allocation8 + $0x888] ss:$72 sps:$4 sm:$0xff]  }
 0x317   : > { %7503 = vmatprep.subr.bf16.mxu0 %v13442_v7  ;;  %v13460_v7 = vld [vmem:[#allocation8 + $0x91c] ss:$72 sps:$4 sm:$0xff]  }
 0x318   : > { %7617 = vmatpush1.bf16.msra.mxu1 %v13443_v55 }
 0x319   : > { %7618 = vmatprep.subr.bf16.mxu1 %v13451_v16  ;;  %v13452_v16 = vld [vmem:[#allocation8 + $0x1a80] ss:$72 sps:$4 sm:$0xff]  }
 0x31a   : > { %7504 = vmatpush1.bf16.msra.mxu0 %v13440_v9 }
 0x31b   : > { %7505 = vmatprep.subr.bf16.mxu0 %v13448_v37  ;;  %7241 = vmatmul.mubr.bf16.gmra.mrb[60].mxu1 %v16239_v29  ;;  %v16365_v55 = vpop.f32.mrb[20].mxu1  ;;  %v13463_v37 = vld [vmem:[#allocation8 + $0x24] ss:$72 sps:$4 sm:$0xff]  }
 0x31c   : > { %7619 = vmatpush1.bf16.msra.mxu1 %v13449_v13  ;;  %7622 = vmatprep.mubr.bf16.mxu1 %v15740_v45  ;;  %v16367_v9 = vpop.f32.mrb[21].mxu1  ;;  %v13458_v13 = vld [vmem:[#allocation8 + $0x918] ss:$72 sps:$4 sm:$0xff]  }
 0x31d   : > { %7467 = vmatmul.mubr.bf16.gmra.mrb[60].mxu0 %v16079_v8  ;;  %7620 = vmatprep.subr.bf16.mxu1 %v13457_v27  ;;  %v16369_v0 = vpop.f32.mrb[22].mxu1  ;;  %v13466_v8 = vld [vmem:[#allocation8 + $0x9ac] ss:$72 sps:$4 sm:$0xff]   ;;  %v13461_v27 = vld [vmem:[#allocation8 + $0x20] ss:$72 sps:$4 sm:$0xff]  }
 0x31e   : > { %7506 = vmatpush1.bf16.msra.mxu0 %v13446_v63  ;;  %7509 = vmatprep.mubr.bf16.mxu0 %v16081_v1  ;;  %v16371_v45 = vpop.f32.mrb[23].mxu1  ;;  %v13469_v63 = vld [vmem:[#allocation8 + $0xb4] ss:$72 sps:$4 sm:$0xff]  }
 0x31f   : > { %7507 = vmatprep.subr.bf16.mxu0 %v13454_v38  ;;  %v13464_v38 = vld [vmem:[#allocation8 + $0x9a8] ss:$72 sps:$4 sm:$0xff]  }
 0x320   : > { %7621 = vmatpush1.bf16.msra.mxu1 %v13455_v44  ;;  %v13472_v44 = vld [vmem:[#allocation8 + $0xa3c] ss:$72 sps:$4 sm:$0xff]  }
 0x321   : > { %7703 = vmatprep.subr.bf16.mxu1 %v13460_v7  ;;  %v13467_v7 = vld [vmem:[#allocation8 + $0xb0] ss:$72 sps:$4 sm:$0xff]  }
 0x322   : > { %7508 = vmatpush1.bf16.msra.mxu0 %v13452_v16 }
 0x323   : > { %7929 = vmatprep.subr.bf16.mxu0 %v13463_v37  ;;  %7623 = vmatmul.mubr.bf16.vlgmr.msra.gmra.mrb[64].mxu1 %v15744_v42  ;;  %v16377_v1 = vpop.f32.mrb[24].mxu1  ;;  %v13475_v37 = vld [vmem:[#allocation8 + $0x144] ss:$72 sps:$4 sm:$0xff]  }
 0x324   : > { %7704 = vmatpush1.bf16.msra.mxu1 %v13458_v13  ;;  %7632 = vmatprep.mubr.bf16.mxu1 %v15768_v30  ;;  %v16379_v16 = vpop.f32.mrb[25].mxu1  ;;  %v13470_v13 = vld [vmem:[#allocation8 + $0xa38] ss:$72 sps:$4 sm:$0xff]  }
 0x325   : > { %7510 = vmatmul.mubr.bf16.vlgmr.msra.gmra.mrb[32].mxu0 %v16101_v62  ;;  %7705 = vmatprep.subr.bf16.mxu1 %v13466_v8  ;;  %v16381_v42 = vpop.f32.mrb[26].mxu1  ;;  %v13478_v62 = vld [vmem:[#allocation8 + $0xacc] ss:$72 sps:$4 sm:$0xff]   ;;  %v13473_v8 = vld [vmem:[#allocation8 + $0x140] ss:$72 sps:$4 sm:$0xff]  }
 0x326   : > { %7930 = vmatpush1.bf16.msra.mxu0 %v13461_v27  ;;  %7519 = vmatprep.mubr.bf16.mxu0 %v16117_v22  ;;  %17714 = vst [vmem:[#allocation58_spill] sm:$0xff] %v16381_v42  ;;  %v16383_v30 = vpop.f32.mrb[27].mxu1  ;;  %v13481_v27 = vld [vmem:[#allocation8 + $0x1d4] ss:$72 sps:$4 sm:$0xff]  }
 0x327   : > { %7931 = vmatprep.subr.bf16.mxu0 %v13469_v63  ;;  %17715 = vst [vmem:[#allocation62_spill] sm:$0xff] %v16383_v30  ;;  %v13476_v63 = vld [vmem:[#allocation8 + $0xac8] ss:$72 sps:$4 sm:$0xff]  }
 0x328   : > { %7706 = vmatpush1.bf16.msra.mxu1 %v13464_v38  ;;  %v13484_v38 = vld [vmem:[#allocation8 + $0xb5c] ss:$72 sps:$4 sm:$0xff]  }
 0x329   : > { %7707 = vmatprep.subr.bf16.mxu1 %v13472_v44  ;;  %v13479_v44 = vld [vmem:[#allocation8 + $0x1d0] ss:$72 sps:$4 sm:$0xff]  }
 0x32a   : > { %7932 = vmatpush1.bf16.msra.mxu0 %v13467_v7 }
 0x32b   : > { %7933 = vmatprep.subr.bf16.mxu0 %v13475_v37  ;;  %7633 = vmatmul.mubr.bf16.gmra.mrb[68].mxu1 %v15774_v11  ;;  %v13487_v37 = vld [vmem:[#allocation8 + $0x264] ss:$72 sps:$4 sm:$0xff]  }
 0x32c   : > { %7708 = vmatpush1.bf16.msra.mxu1 %v13470_v13  ;;  %7642 = vmatprep.mubr.bf16.mxu1 %v15820_v59  ;;  %v16389_v22 = vpop.f32.mrb[28].mxu1  ;;  %v16393_v11 = vld [vmem:[#allocation10] sm:$0xff] }
 0x32d   : > { %7520 = vmatmul.mubr.bf16.gmra.mrb[36].mxu0 %v16123_v41  ;;  %7709 = vmatprep.subr.bf16.mxu1 %v13478_v62  ;;  %17716 = vst [vmem:[#allocation61_spill] sm:$0xff] %v16389_v22  ;;  %v16391_v7 = vpop.f32.mrb[29].mxu1  ;;  %17718 = vst [vmem:[#allocation68_spill] sm:$0xff] %v16393_v11  ;;  %v13482_v59 = vld [vmem:[#allocation8 + $0xb58] ss:$72 sps:$4 sm:$0xff]  }
 0x32e   : > { %7934 = vmatpush1.bf16.msra.mxu0 %v13473_v8  ;;  %7529 = vmatprep.mubr.bf16.mxu0 %v16136_v5  ;;  %17717 = vst [vmem:[#allocation63_spill] sm:$0xff] %v16391_v7  ;;  %v16395_v13 = vpop.f32.mrb[30].mxu1  ;;  %v13490_v62 = vld [vmem:[#allocation8 + $0xbec] ss:$72 sps:$4 sm:$0xff]   ;;  %v13485_v8 = vld [vmem:[#allocation8 + $0x260] ss:$72 sps:$4 sm:$0xff]  }
 0x32f   : > { %7935 = vmatprep.subr.bf16.mxu0 %v13481_v27  ;;  %17719 = vst [vmem:[#allocation72_spill] sm:$0xff] %v16395_v13  ;;  %v16397_v30 = vpop.f32.mrb[31].mxu1  ;;  %v17721_v5 = vld [vmem:[#allocation80_spill] sm:$0xff]  ;;  %v17722_v7 = vld [vmem:[#allocation78_spill] sm:$0xff] }
 0x330   : > { %7710 = vmatpush1.bf16.msra.mxu1 %v13476_v63  ;;  %17720 = vst [vmem:[#allocation74_spill] sm:$0xff] %v16397_v30  ;;  %v16401_v41 = vrot.slane %v16393_v11, %v17721_v5  ;;  %v13493_v27 = vld [vmem:[#allocation8 + $0x2f4] ss:$72 sps:$4 sm:$0xff]   ;;  %v16406_v63 = vrot.slane %v16393_v11, %v17722_v7  ;;  %v13491_v5 = vld [vmem:[#allocation8 + $0x2f0] ss:$72 sps:$4 sm:$0xff]  }
 0x331   : > { %7711 = vmatprep.subr.bf16.mxu1 %v13484_v38  ;;  %v13488_v38 = vld [vmem:[#allocation8 + $0xbe8] ss:$72 sps:$4 sm:$0xff]   ;;  %v13494_v11 = vld [vmem:[#allocation8 + $0xc78] ss:$72 sps:$4 sm:$0xff]  }
 0x332   : > { %7936 = vmatpush1.bf16.msra.mxu0 %v13479_v44  ;;  %v13496_v44 = vld [vmem:[#allocation8 + $0xc7c] ss:$72 sps:$4 sm:$0xff]   ;;  %v13497_v30 = vld [vmem:[#allocation8 + $0x380] ss:$72 sps:$4 sm:$0xff]  }
 0x333   : > { %7937 = vmatprep.subr.bf16.mxu0 %v13487_v37  ;;  %7643 = vmatmul.mubr.bf16.gmra.mrb[72].mxu1 %v15828_v18  ;;  %v6608_v37 = vadd.f32 %v16302_v6, %v16401_v41  ;;  %v13499_v18 = vld [vmem:[#allocation8 + $0x384] ss:$72 sps:$4 sm:$0xff]  }
 0x334   : > { %7712 = vmatpush1.bf16.msra.mxu1 %v13482_v59  ;;  %7652 = vmatprep.mubr.bf16.mxu1 %v15868_v50  ;;  %v6610_v59 = vadd.f32 %v16305_v28, %v16406_v63  ;;  %v6614_v50 = vadd.f32 %v16311_v17, %v16406_v63  ;;  %v13505_v28 = vld [vmem:[#allocation8 + $0x414] ss:$72 sps:$4 sm:$0xff]  }
 0x335   : > { %7530 = vmatmul.mubr.bf16.gmra.mrb[40].mxu0 %v16145_v60  ;;  %7713 = vmatprep.subr.bf16.mxu1 %v13490_v62  ;;  %v6612_v62 = vadd.f32 %v16308_v24, %v16401_v41  ;;  %v13500_v24 = vld [vmem:[#allocation8 + $0xd08] ss:$72 sps:$4 sm:$0xff]   ;;  %v13508_v17 = vld [vmem:[#allocation8 + $0xd9c] ss:$72 sps:$4 sm:$0xff]  }
 0x336   : > { %7938 = vmatpush1.bf16.msra.mxu0 %v13485_v8  ;;  %7539 = vmatprep.mubr.bf16.mxu0 %v16151_v39  ;;  %v13502_v39 = vld [vmem:[#allocation8 + $0xd0c] ss:$72 sps:$4 sm:$0xff]  }
 0x337   : > { %7939 = vmatprep.subr.bf16.mxu0 %v13493_v27  ;;  %v6833_v7 = vpop.f32.mrb[0].mxu0 }
 0x338   : > { %7714 = vmatpush1.bf16.msra.mxu1 %v13488_v38  ;;  %v11983_v60 = vadd.f32 %v6833_v7, %v6608_v37  ;;  %v6835_v8 = vpop.f32.mrb[1].mxu0  ;;  %v6622_v7 = vadd.f32 %v16320_v54, %v16401_v41 }
 0x339   : > { %7715 = vmatprep.subr.bf16.mxu1 %v13496_v44  ;;  %v11985_v6 = vadd.f32 %v6835_v8, %v6610_v59  ;;  %v6837_v27 = vpop.f32.mrb[2].mxu0  ;;  %v6624_v44 = vadd.f32 %v16323_v10, %v16406_v63  ;;  %v13509_v59 = vld [vmem:[#allocation8 + $0x4a0] ss:$72 sps:$4 sm:$0xff]   ;;  %v13517_v8 = vld [vmem:[#allocation8 + $0x534] ss:$72 sps:$4 sm:$0xff]  }
 0x33a   : > { %7940 = vmatpush1.bf16.msra.mxu0 %v13491_v5  ;;  %v11987_v13 = vadd.f32 %v6837_v27, %v6612_v62  ;;  %v6839_v22 = vpop.f32.mrb[3].mxu0  ;;  %v13512_v27 = vld [vmem:[#allocation8 + $0xe28] ss:$72 sps:$4 sm:$0xff]   ;;  %v13520_v10 = vld [vmem:[#allocation8 + $0xebc] ss:$72 sps:$4 sm:$0xff]  }
 0x33b   : > { %7941 = vmatprep.subr.bf16.mxu0 %v13499_v18  ;;  %7653 = vmatmul.mubr.bf16.gmra.mrb[76].mxu1 %v15872_v26  ;;  %v11806_v38 = vpack.c.bf16 %v11985_v6, %v11983_v60  ;;  %v11989_v42 = vadd.f32 %v6839_v22, %v6614_v50  ;;  %v13503_v18 = vld [vmem:[#allocation8 + $0x410] ss:$72 sps:$4 sm:$0xff]   ;;  %v13511_v50 = vld [vmem:[#allocation8 + $0x4a4] ss:$72 sps:$4 sm:$0xff]   ;;  %v6620_v22 = vadd.f32 %v16317_v35, %v16406_v63 }
 0x33c   : > { %7716 = vmatpush1.bf16.msra.mxu1 %v13494_v11  ;;  %7662 = vmatprep.mubr.bf16.mxu1 %v15918_v36  ;;  %v6618_v11 = vadd.f32 %v16314_v19, %v16401_v41 }
 0x33d   : > { %7540 = vmatmul.mubr.bf16.gmra.mrb[44].mxu0 %v16163_v48  ;;  %7717 = vmatprep.subr.bf16.mxu1 %v13502_v39  ;;  %10488 = vst [vmem:[%s16423_s30] sm:$0xff] %v11806_v38  ;;  %v11815_v5 = vpack.c.bf16 %v11989_v42, %v11987_v13  ;;  %v13506_v39 = vld [vmem:[#allocation8 + $0xd98] ss:$72 sps:$4 sm:$0xff]   ;;  %v13514_v13 = vld [vmem:[#allocation8 + $0xe2c] ss:$72 sps:$4 sm:$0xff]  }
 0x33e   : > { %7942 = vmatpush1.bf16.msra.mxu0 %v13497_v30  ;;  %7549 = vmatprep.mubr.bf16.mxu0 %v16180_v4  ;;  %v13515_v38 = vld [vmem:[#allocation8 + $0x530] ss:$72 sps:$4 sm:$0xff]  }
 0x33f   : > { %7943 = vmatprep.subr.bf16.mxu0 %v13505_v28  ;;  %10497 = vst [vmem:[%s16423_s30 + $0x48] sm:$0xff] %v11815_v5  ;;  %v6630_v5 = vadd.f32 %v16329_v20, %v16406_v63 }
 0x340   : > { %v6843_v60 = vpop.f32.mrb[4].mxu0  ;;  %7718 = vmatpush1.bf16.msra.mxu1 %v13500_v24  ;;  %v6628_v24 = vadd.f32 %v16326_v25, %v16401_v41 }
 0x341   : > { %v11991_v42 = vadd.f32 %v6843_v60, %v6618_v11  ;;  %v6845_v30 = vpop.f32.mrb[5].mxu0  ;;  %7719 = vmatprep.subr.bf16.mxu1 %v13508_v17  ;;  %v13523_v17 = vld [vmem:[#allocation8 + $0x5c4] ss:$72 sps:$4 sm:$0xff]   ;;  %v13518_v11 = vld [vmem:[#allocation8 + $0xeb8] ss:$72 sps:$4 sm:$0xff]  }
 0x342   : > { %v11993_v19 = vadd.f32 %v6845_v30, %v6620_v22  ;;  %7944 = vmatpush1.bf16.msra.mxu0 %v13503_v18  ;;  %v6847_v37 = vpop.f32.mrb[6].mxu0  ;;  %v13521_v30 = vld [vmem:[#allocation8 + $0x5c0] ss:$72 sps:$4 sm:$0xff]  }
 0x343   : > { %v11995_v35 = vadd.f32 %v6847_v37, %v6622_v7  ;;  %v6849_v62 = vpop.f32.mrb[7].mxu0  ;;  %7945 = vmatprep.subr.bf16.mxu0 %v13511_v50  ;;  %7663 = vmatmul.mubr.bf16.gmra.mrb[80].mxu1 %v15924_v57  ;;  %v6632_v50 = vadd.f32 %v16332_v52, %v16401_v41  ;;  %v6634_v7 = vadd.f32 %v16335_v40, %v16406_v63  ;;  %v13524_v37 = vld [vmem:[#allocation8 + $0xf48] ss:$72 sps:$4 sm:$0xff]   ;;  %v13532_v40 = vld [vmem:[#allocation8 + $0xfdc] ss:$72 sps:$4 sm:$0xff]  }
 0x344   : > { %v11824_v6 = vpack.c.bf16 %v11993_v19, %v11991_v42  ;;  %v11997_v54 = vadd.f32 %v6849_v62, %v6624_v44  ;;  %7720 = vmatpush1.bf16.msra.mxu1 %v13506_v39  ;;  %7672 = vmatprep.mubr.bf16.mxu1 %v15961_v15  ;;  %v13526_v39 = vld [vmem:[#allocation8 + $0xf4c] ss:$72 sps:$4 sm:$0xff]   ;;  %v6638_v62 = vadd.f32 %v16338_v47, %v16401_v41 }
 0x345   : > { %7550 = vmatmul.mubr.bf16.gmra.mrb[48].mxu0 %v16189_v32  ;;  %7721 = vmatprep.subr.bf16.mxu1 %v13514_v13  ;;  %v13529_v44 = vld [vmem:[#allocation8 + $0x654] ss:$72 sps:$4 sm:$0xff]  }
 0x346   : > { %10506 = vst [vmem:[%s16423_s30 + $0x90] sm:$0xff] %v11824_v6  ;;  %v11833_v28 = vpack.c.bf16 %v11997_v54, %v11995_v35  ;;  %7946 = vmatpush1.bf16.msra.mxu0 %v13509_v59  ;;  %7559 = vmatprep.mubr.bf16.mxu0 %v16195_v43  ;;  %v13527_v35 = vld [vmem:[#allocation8 + $0x650] ss:$72 sps:$4 sm:$0xff]   ;;  %v6640_v6 = vadd.f32 %v16341_v53, %v16406_v63 }
 0x347   : > { %7947 = vmatprep.subr.bf16.mxu0 %v13517_v8  ;;  %v13535_v8 = vld [vmem:[#allocation8 + $0x6e4] ss:$72 sps:$4 sm:$0xff]  }
 0x348   : > { %10515 = vst [vmem:[%s16423_s30 + $0xd8] sm:$0xff] %v11833_v28  ;;  %v6853_v18 = vpop.f32.mrb[8].mxu0  ;;  %7722 = vmatpush1.bf16.msra.mxu1 %v13512_v27  ;;  %v13530_v27 = vld [vmem:[#allocation8 + $0xfd8] ss:$72 sps:$4 sm:$0xff]  }
 0x349   : > { %v11999_v22 = vadd.f32 %v6853_v18, %v6628_v24  ;;  %v6855_v60 = vpop.f32.mrb[9].mxu0  ;;  %7723 = vmatprep.subr.bf16.mxu1 %v13520_v10  ;;  %v6642_v10 = vadd.f32 %v16344_v58, %v16401_v41  ;;  %v13538_v24 = vld [vmem:[#allocation8 + $0x106c] ss:$72 sps:$4 sm:$0xff]   ;;  %v13533_v18 = vld [vmem:[#allocation8 + $0x6e0] ss:$72 sps:$4 sm:$0xff]  }
 0x34a   : > { %v12001_v25 = vadd.f32 %v6855_v60, %v6630_v5  ;;  %7948 = vmatpush1.bf16.msra.mxu0 %v13515_v38  ;;  %v6857_v42 = vpop.f32.mrb[10].mxu0  ;;  %v13536_v60 = vld [vmem:[#allocation8 + $0x1068] ss:$72 sps:$4 sm:$0xff]  }
 0x34b   : > { %v12003_v20 = vadd.f32 %v6857_v42, %v6632_v50  ;;  %v6859_v13 = vpop.f32.mrb[11].mxu0  ;;  %7949 = vmatprep.subr.bf16.mxu0 %v13523_v17  ;;  %7673 = vmatmul.mubr.bf16.gmra.mrb[84].mxu1 %v15982_v49  ;;  %v6644_v17 = vadd.f32 %v16347_v61, %v16406_v63  ;;  %v13541_v50 = vld [vmem:[#allocation8 + $0x774] ss:$72 sps:$4 sm:$0xff]   ;;  %v13547_v42 = vld [vmem:[#allocation8 + $0x804] ss:$72 sps:$4 sm:$0xff]  }
 0x34c   : > { %v11842_v19 = vpack.c.bf16 %v12001_v25, %v11999_v22  ;;  %v12005_v52 = vadd.f32 %v6859_v13, %v6634_v7  ;;  %7724 = vmatpush1.bf16.msra.mxu1 %v13518_v11  ;;  %7682 = vmatprep.mubr.bf16.mxu1 %v16013_v51  ;;  %v13544_v61 = vld [vmem:[#allocation8 + $0x10fc] ss:$72 sps:$4 sm:$0xff]   ;;  %v13539_v7 = vld [vmem:[#allocation8 + $0x770] ss:$72 sps:$4 sm:$0xff]   ;;  %v6648_v25 = vadd.f32 %v16351_v34, %v16401_v41 }
 0x34d   : > { %7560 = vmatmul.mubr.bf16.gmra.mrb[52].mxu0 %v16207_v12  ;;  %7725 = vmatprep.subr.bf16.mxu1 %v13526_v39  ;;  %v13542_v13 = vld [vmem:[#allocation8 + $0x10f8] ss:$72 sps:$4 sm:$0xff]  }
 0x34e   : > { %10524 = vst [vmem:[%s16423_s30 + $0x120] sm:$0xff] %v11842_v19  ;;  %v11851_v59 = vpack.c.bf16 %v12005_v52, %v12003_v20  ;;  %7950 = vmatpush1.bf16.msra.mxu0 %v13521_v30  ;;  %7569 = vmatprep.mubr.bf16.mxu0 %v16224_v14  ;;  %v6650_v30 = vadd.f32 %v16354_v33, %v16406_v63 }
 0x34f   : > { %7951 = vmatprep.subr.bf16.mxu0 %v13529_v44  ;;  %v6652_v44 = vadd.f32 %v16357_v46, %v16401_v41 }
 0x350   : > { %10533 = vst [vmem:[%s16423_s30 + $0x168] sm:$0xff] %v11851_v59  ;;  %v6863_v54 = vpop.f32.mrb[12].mxu0  ;;  %7726 = vmatpush1.bf16.msra.mxu1 %v13524_v37  ;;  %v13550_v37 = vld [vmem:[#allocation8 + $0x118c] ss:$72 sps:$4 sm:$0xff]  }
 0x351   : > { %v12007_v28 = vadd.f32 %v6863_v54, %v6638_v62  ;;  %v6865_v38 = vpop.f32.mrb[13].mxu0  ;;  %7727 = vmatprep.subr.bf16.mxu1 %v13532_v40  ;;  %v6654_v40 = vadd.f32 %v16359_v3, %v16406_v63  ;;  %v17723_v54 = vld [vmem:[#allocation89_spill] sm:$0xff] }
 0x352   : > { %v12009_v47 = vadd.f32 %v6865_v38, %v6640_v6  ;;  %7952 = vmatpush1.bf16.msra.mxu0 %v13527_v35  ;;  %v6867_v5 = vpop.f32.mrb[14].mxu0  ;;  %v13545_v35 = vld [vmem:[#allocation8 + $0x800] ss:$72 sps:$4 sm:$0xff]   ;;  %v13556_v3 = vld [vmem:[#allocation8 + $0x121c] ss:$72 sps:$4 sm:$0xff]  }
 0x353   : > { %v12011_v53 = vadd.f32 %v6867_v5, %v6642_v10  ;;  %v6869_v11 = vpop.f32.mrb[15].mxu0  ;;  %7953 = vmatprep.subr.bf16.mxu0 %v13535_v8  ;;  %7683 = vmatmul.mubr.bf16.gmra.mrb[88].mxu1 %v16026_v2  ;;  %v13553_v8 = vld [vmem:[#allocation8 + $0x894] ss:$72 sps:$4 sm:$0xff]   ;;  %v13551_v38 = vld [vmem:[#allocation8 + $0x890] ss:$72 sps:$4 sm:$0xff]  }
 0x354   : > { %v11860_v22 = vpack.c.bf16 %v12009_v47, %v12007_v28  ;;  %v12013_v58 = vadd.f32 %v6869_v11, %v6644_v17  ;;  %7728 = vmatpush1.bf16.msra.mxu1 %v13530_v27  ;;  %7692 = vmatprep.mubr.bf16.mxu1 %v16059_v21  ;;  %v13548_v27 = vld [vmem:[#allocation8 + $0x1188] ss:$72 sps:$4 sm:$0xff]   ;;  %v17724_v28 = vld [vmem:[#allocation88_spill] sm:$0xff]  ;;  %v13559_v17 = vld [vmem:[#allocation8 + $0x924] ss:$72 sps:$4 sm:$0xff]   ;;  %v6660_v47 = vadd.f32 %v16367_v9, %v16406_v63 }
 0x355   : > { %7570 = vmatmul.mubr.bf16.gmra.mrb[56].mxu0 %v16233_v56  ;;  %7729 = vmatprep.subr.bf16.mxu1 %v13538_v24  ;;  %v6658_v24 = vadd.f32 %v16365_v55, %v16401_v41 }
 0x356   : > { %10542 = vst [vmem:[%s16423_s30 + $0x1b0] sm:$0xff] %v11860_v22  ;;  %v11869_v39 = vpack.c.bf16 %v12013_v58, %v12011_v53  ;;  %7954 = vmatpush1.bf16.msra.mxu0 %v13533_v18  ;;  %7579 = vmatprep.mubr.bf16.mxu0 %v16235_v23  ;;  %v13554_v18 = vld [vmem:[#allocation8 + $0x1218] ss:$72 sps:$4 sm:$0xff]   ;;  %v6662_v53 = vadd.f32 %v16369_v0, %v16401_v41  ;;  %v13562_v22 = vld [vmem:[#allocation8 + $0x12ac] ss:$72 sps:$4 sm:$0xff]  }
 0x357   : > { %7955 = vmatprep.subr.bf16.mxu0 %v13541_v50  ;;  %v6664_v58 = vadd.f32 %v16371_v45, %v16406_v63  ;;  %v13568_v45 = vld [vmem:[#allocation8 + $0x133c] ss:$72 sps:$4 sm:$0xff]  }
 0x358   : > { %10551 = vst [vmem:[%s16423_s30 + $0x1f8] sm:$0xff] %v11869_v39  ;;  %v6873_v20 = vpop.f32.mrb[16].mxu0  ;;  %7730 = vmatpush1.bf16.msra.mxu1 %v13536_v60 }
 0x359   : > { %v12015_v19 = vadd.f32 %v6873_v20, %v6648_v25  ;;  %v6875_v52 = vpop.f32.mrb[17].mxu0  ;;  %7731 = vmatprep.subr.bf16.mxu1 %v13544_v61  ;;  %v13557_v61 = vld [vmem:[#allocation8 + $0x920] ss:$72 sps:$4 sm:$0xff]   ;;  %v13565_v25 = vld [vmem:[#allocation8 + $0x9b4] ss:$72 sps:$4 sm:$0xff]  }
 0x35a   : > { %v12017_v34 = vadd.f32 %v6875_v52, %v6650_v30  ;;  %7956 = vmatpush1.bf16.msra.mxu0 %v13539_v7  ;;  %v6877_v59 = vpop.f32.mrb[18].mxu0  ;;  %v17725_v7 = vld [vmem:[#allocation91_spill] sm:$0xff]  ;;  %v17726_v30 = vld [vmem:[#allocation93_spill] sm:$0xff] }
 0x35b   : > { %v12019_v33 = vadd.f32 %v6877_v59, %v6652_v44  ;;  %v6879_v62 = vpop.f32.mrb[19].mxu0  ;;  %7957 = vmatprep.subr.bf16.mxu0 %v13547_v42  ;;  %7693 = vmatmul.mubr.bf16.gmra.mrb[92].mxu1 %v16073_v31  ;;  %v13560_v20 = vld [vmem:[#allocation8 + $0x12a8] ss:$72 sps:$4 sm:$0xff]  }
 0x35c   : > { %v11878_v6 = vpack.c.bf16 %v12017_v34, %v12015_v19  ;;  %v12021_v46 = vadd.f32 %v6879_v62, %v6654_v40  ;;  %7732 = vmatpush1.bf16.msra.mxu1 %v13542_v13  ;;  %7735 = vmatprep.mubr.bf16.mxu1 %v17723_v54  ;;  %v17727_v13 = vld [vmem:[#allocation90_spill] sm:$0xff]  ;;  %v17728_v19 = vld [vmem:[#allocation92_spill] sm:$0xff]  ;;  %v6670_v34 = vadd.f32 %v16379_v16, %v16406_v63 }
 0x35d   : > { %7580 = vmatmul.mubr.bf16.gmra.mrb[60].mxu0 %v16239_v29  ;;  %7733 = vmatprep.subr.bf16.mxu1 %v13550_v37  ;;  %v13563_v52 = vld [vmem:[#allocation8 + $0x9b0] ss:$72 sps:$4 sm:$0xff]   ;;  %v6668_v37 = vadd.f32 %v16377_v1, %v16401_v41  ;;  %v13571_v40 = vld [vmem:[#allocation8 + $0xa44] ss:$72 sps:$4 sm:$0xff]  }
 0x35e   : > { %10560 = vst [vmem:[%s16423_s30 + $0x240] sm:$0xff] %v11878_v6  ;;  %v11887_v10 = vpack.c.bf16 %v12021_v46, %v12019_v33  ;;  %7958 = vmatpush1.bf16.msra.mxu0 %v13545_v35  ;;  %7961 = vmatprep.mubr.bf16.mxu0 %v17724_v28  ;;  %v13566_v35 = vld [vmem:[#allocation8 + $0x1338] ss:$72 sps:$4 sm:$0xff]   ;;  %v17729_v33 = vld [vmem:[#allocation58_spill] sm:$0xff] }
 0x35f   : > { %7959 = vmatprep.subr.bf16.mxu0 %v13553_v8  ;;  %v6672_v62 = vadd.f32 %v17729_v33, %v16401_v41  ;;  %v13574_v46 = vld [vmem:[#allocation8 + $0x13cc] ss:$72 sps:$4 sm:$0xff]  }
 0x360   : > { %10569 = vst [vmem:[%s16423_s30 + $0x288] sm:$0xff] %v11887_v10  ;;  %v6883_v5 = vpop.f32.mrb[20].mxu0  ;;  %7734 = vmatpush1.bf16.msra.mxu1 %v13548_v27  ;;  %v17730_v27 = vld [vmem:[#allocation62_spill] sm:$0xff] }
 0x361   : > { %v12023_v11 = vadd.f32 %v6883_v5, %v6658_v24  ;;  %v6885_v50 = vpop.f32.mrb[21].mxu0  ;;  %7816 = vmatprep.subr.bf16.mxu1 %v13556_v3  ;;  %v6674_v3 = vadd.f32 %v17730_v27, %v16406_v63  ;;  %v13589_v27 = vld [vmem:[#allocation8 + $0xbf4] ss:$72 sps:$4 sm:$0xff]  }
 0x362   : > { %v12025_v55 = vadd.f32 %v6885_v50, %v6660_v47  ;;  %7960 = vmatpush1.bf16.msra.mxu0 %v13551_v38  ;;  %v6887_v60 = vpop.f32.mrb[22].mxu0  ;;  %v13569_v38 = vld [vmem:[#allocation8 + $0xa40] ss:$72 sps:$4 sm:$0xff]   ;;  %v13577_v47 = vld [vmem:[#allocation8 + $0xad4] ss:$72 sps:$4 sm:$0xff]  }
 0x363   : > { %v12027_v9 = vadd.f32 %v6887_v60, %v6662_v53  ;;  %v6889_v39 = vpop.f32.mrb[23].mxu0  ;;  %8042 = vmatprep.subr.bf16.mxu0 %v13559_v17  ;;  %7736 = vmatmul.mubr.bf16.vlgmr.msra.gmra.mrb[64].mxu1 %v17725_v7  ;;  %v17731_v17 = vld [vmem:[#allocation95_spill] sm:$0xff]  ;;  %v17732_v53 = vld [vmem:[#allocation97_spill] sm:$0xff]  ;;  %v17733_v50 = vld [vmem:[#allocation94_spill] sm:$0xff] }
 0x364   : > { %v11896_v42 = vpack.c.bf16 %v12025_v55, %v12023_v11  ;;  %v12029_v0 = vadd.f32 %v6889_v39, %v6664_v58  ;;  %7817 = vmatpush1.bf16.msra.mxu1 %v13554_v18  ;;  %7745 = vmatprep.mubr.bf16.mxu1 %v17726_v30  ;;  %v13572_v11 = vld [vmem:[#allocation8 + $0x13c8] ss:$72 sps:$4 sm:$0xff]   ;;  %v17734_v55 = vld [vmem:[#allocation96_spill] sm:$0xff]  ;;  %v13583_v39 = vld [vmem:[#allocation8 + $0xb64] ss:$72 sps:$4 sm:$0xff]  }
 0x365   : > { %7962 = vmatmul.mubr.bf16.vlgmr.msra.gmra.mrb[64].mxu0 %v17727_v13  ;;  %7818 = vmatprep.subr.bf16.mxu1 %v13562_v22  ;;  %v13580_v22 = vld [vmem:[#allocation8 + $0x145c] ss:$72 sps:$4 sm:$0xff]   ;;  %v13575_v60 = vld [vmem:[#allocation8 + $0xad0] ss:$72 sps:$4 sm:$0xff]  }
 0x366   : > { %10578 = vst [vmem:[%s16423_s30 + $0x2d0] sm:$0xff] %v11896_v42  ;;  %v11905_v44 = vpack.c.bf16 %v12029_v0, %v12027_v9  ;;  %8043 = vmatpush1.bf16.msra.mxu0 %v13557_v61  ;;  %7971 = vmatprep.mubr.bf16.mxu0 %v17728_v19  ;;  %v17735_v61 = vld [vmem:[#allocation61_spill] sm:$0xff] }
 0x367   : > { %8044 = vmatprep.subr.bf16.mxu0 %v13565_v25  ;;  %v6678_v9 = vadd.f32 %v17735_v61, %v16401_v41  ;;  %v17736_v25 = vld [vmem:[#allocation63_spill] sm:$0xff]  ;;  %v17744_v61 = vld [vmem:[#allocation38_spill] sm:$0xff] }
 0x368   : > { %10587 = vst [vmem:[%s16423_s30 + $0x318] sm:$0xff] %v11905_v44  ;;  %v6893_v59 = vpop.f32.mrb[24].mxu0  ;;  %7819 = vmatpush1.bf16.msra.mxu1 %v13560_v20  ;;  %v6680_v42 = vadd.f32 %v17736_v25, %v16406_v63  ;;  %v13578_v20 = vld [vmem:[#allocation8 + $0x1458] ss:$72 sps:$4 sm:$0xff]  }
 0x369   : > { %v12031_v8 = vadd.f32 %v6893_v59, %v6668_v37  ;;  %v6895_v6 = vpop.f32.mrb[25].mxu0  ;;  %7820 = vmatprep.subr.bf16.mxu1 %v13568_v45  ;;  %v17737_v45 = vld [vmem:[#allocation72_spill] sm:$0xff] }
 0x36a   : > { %v12033_v1 = vadd.f32 %v6895_v6, %v6670_v34  ;;  %8045 = vmatpush1.bf16.msra.mxu0 %v13563_v52  ;;  %v6897_v10 = vpop.f32.mrb[26].mxu0  ;;  %v6682_v44 = vadd.f32 %v17737_v45, %v16401_v41  ;;  %v17738_v34 = vld [vmem:[#allocation74_spill] sm:$0xff] }
 0x36b   : > { %v12035_v16 = vadd.f32 %v6897_v10, %v6672_v62  ;;  %v6899_v24 = vpop.f32.mrb[27].mxu0  ;;  %8046 = vmatprep.subr.bf16.mxu0 %v13571_v40  ;;  %7746 = vmatmul.mubr.bf16.gmra.mrb[68].mxu1 %v17731_v17  ;;  %v13586_v40 = vld [vmem:[#allocation8 + $0x14ec] ss:$72 sps:$4 sm:$0xff]   ;;  %v6684_v59 = vadd.f32 %v17738_v34, %v16406_v63  ;;  %v13581_v62 = vld [vmem:[#allocation8 + $0xb60] ss:$72 sps:$4 sm:$0xff]  }
 0x36c   : > { %v11914_v5 = vpack.c.bf16 %v12033_v1, %v12031_v8  ;;  %v12037_v18 = vadd.f32 %v6899_v24, %v6674_v3  ;;  %7821 = vmatpush1.bf16.msra.mxu1 %v13566_v35  ;;  %7755 = vmatprep.mubr.bf16.mxu1 %v17732_v53  ;;  %v17740_v1 = vld [vmem:[#allocation29_spill] sm:$0xff]  ;;  %v17742_v24 = vld [vmem:[#allocation32_spill] sm:$0xff] }
 0x36d   : > { %7972 = vmatmul.mubr.bf16.gmra.mrb[68].mxu0 %v17733_v50  ;;  %7822 = vmatprep.subr.bf16.mxu1 %v13574_v46  ;;  %v17739_v46 = vld [vmem:[#allocation99_spill] sm:$0xff]  ;;  %v13592_v63 = vld [vmem:[#allocation8 + $0x157c] ss:$72 sps:$4 sm:$0xff]   ;;  %v13605_v45 = vld [vmem:[#allocation8 + $0xda0] ss:$72 sps:$4 sm:$0xff]  }
 0x36e   : > { %10596 = vst [vmem:[%s16423_s30 + $0x360] sm:$0xff] %v11914_v5  ;;  %v11923_v58 = vpack.c.bf16 %v12037_v18, %v12035_v16  ;;  %8047 = vmatpush1.bf16.msra.mxu0 %v13569_v38  ;;  %7981 = vmatprep.mubr.bf16.mxu0 %v17734_v55  ;;  %v13584_v10 = vld [vmem:[#allocation8 + $0x14e8] ss:$72 sps:$4 sm:$0xff]   ;;  %v13595_v5 = vld [vmem:[#allocation8 + $0xc84] ss:$72 sps:$4 sm:$0xff]  }
 0x36f   : > { %8048 = vmatprep.subr.bf16.mxu0 %v13577_v47  ;;  %v17741_v38 = vld [vmem:[#allocation98_spill] sm:$0xff]  ;;  %v13590_v18 = vld [vmem:[#allocation8 + $0x1578] ss:$72 sps:$4 sm:$0xff]   ;;  %v13616_v34 = vld [vmem:[#allocation8 + $0x17bc] ss:$72 sps:$4 sm:$0xff]  }
 0x370   : > { %10605 = vst [vmem:[%s16423_s30 + $0x3a8] sm:$0xff] %v11923_v58  ;;  %v6903_v0 = vpop.f32.mrb[28].mxu0  ;;  %7823 = vmatpush1.bf16.msra.mxu1 %v13572_v11  ;;  %v13587_v47 = vld [vmem:[#allocation8 + $0xbf0] ss:$72 sps:$4 sm:$0xff]   ;;  %v13598_v11 = vld [vmem:[#allocation8 + $0x160c] ss:$72 sps:$4 sm:$0xff]  }
 0x371   : > { %v12039_v52 = vadd.f32 %v6903_v0, %v6678_v9  ;;  %v6905_v37 = vpop.f32.mrb[29].mxu0  ;;  %7824 = vmatprep.subr.bf16.mxu1 %v13580_v22  ;;  %v13593_v22 = vld [vmem:[#allocation8 + $0xc80] ss:$72 sps:$4 sm:$0xff]   ;;  %v13599_v25 = vld [vmem:[#allocation8 + $0xd10] ss:$72 sps:$4 sm:$0xff]  }
 0x372   : > { %v12041_v35 = vadd.f32 %v6905_v37, %v6680_v42  ;;  %8049 = vmatpush1.bf16.msra.mxu0 %v13575_v60  ;;  %v6907_v33 = vpop.f32.mrb[30].mxu0  ;;  %v17743_v58 = vld [vmem:[#allocation33_spill] sm:$0xff]  ;;  %v13601_v60 = vld [vmem:[#allocation8 + $0xd14] ss:$72 sps:$4 sm:$0xff]   ;;  %v17746_v37 = vld [vmem:[#allocation42_spill] sm:$0xff] }
 0x373   : > { %v12043_v8 = vadd.f32 %v6907_v33, %v6682_v44  ;;  %v6909_v6 = vpop.f32.mrb[31].mxu0  ;;  %8050 = vmatprep.subr.bf16.mxu0 %v13583_v39  ;;  %7756 = vmatmul.mubr.bf16.gmra.mrb[72].mxu1 %v17739_v46  ;;  %v13596_v9 = vld [vmem:[#allocation8 + $0x1608] ss:$72 sps:$4 sm:$0xff]   ;;  %v13604_v39 = vld [vmem:[#allocation8 + $0x169c] ss:$72 sps:$4 sm:$0xff]  }
 0x374   : > { %v11932_v41 = vpack.c.bf16 %v12041_v35, %v12039_v52  ;;  %v12045_v3 = vadd.f32 %v6909_v6, %v6684_v59  ;;  %7825 = vmatpush1.bf16.msra.mxu1 %v13578_v20  ;;  %7765 = vmatprep.mubr.bf16.mxu1 %v17740_v1  ;;  %v13607_v42 = vld [vmem:[#allocation8 + $0xda4] ss:$72 sps:$4 sm:$0xff]   ;;  %v13602_v0 = vld [vmem:[#allocation8 + $0x1698] ss:$72 sps:$4 sm:$0xff]   ;;  %v13613_v52 = vld [vmem:[#allocation8 + $0xe34] ss:$72 sps:$4 sm:$0xff]  }
 0x375   : > { %7982 = vmatmul.mubr.bf16.gmra.mrb[72].mxu0 %v17741_v38  ;;  %7826 = vmatprep.subr.bf16.mxu1 %v13586_v40  ;;  %v13610_v20 = vld [vmem:[#allocation8 + $0x172c] ss:$72 sps:$4 sm:$0xff]   ;;  %v17745_v44 = vld [vmem:[#allocation36_spill] sm:$0xff]  ;;  %v13608_v40 = vld [vmem:[#allocation8 + $0x1728] ss:$72 sps:$4 sm:$0xff]  }
 0x376   : > { %10614 = vst [vmem:[%s16423_s30 + $0x3f0] sm:$0xff] %v11932_v41  ;;  %v11941_v16 = vpack.c.bf16 %v12045_v3, %v12043_v8  ;;  %8051 = vmatpush1.bf16.msra.mxu0 %v13581_v62  ;;  %7991 = vmatprep.mubr.bf16.mxu0 %v17742_v24  ;;  %v13611_v59 = vld [vmem:[#allocation8 + $0xe30] ss:$72 sps:$4 sm:$0xff]   ;;  %v13619_v35 = vld [vmem:[#allocation8 + $0xec4] ss:$72 sps:$4 sm:$0xff]  }
 0x377   : > { %8052 = vmatprep.subr.bf16.mxu0 %v13589_v27  ;;  %v13614_v33 = vld [vmem:[#allocation8 + $0x17b8] ss:$72 sps:$4 sm:$0xff]   ;;  %v13622_v62 = vld [vmem:[#allocation8 + $0x184c] ss:$72 sps:$4 sm:$0xff]   ;;  %v13620_v3 = vld [vmem:[#allocation8 + $0x1848] ss:$72 sps:$4 sm:$0xff]  }
 0x378   : > { %10623 = vst [vmem:[%s16423_s30 + $0x438] sm:$0xff] %v11941_v16  ;;  %7827 = vmatpush1.bf16.msra.mxu1 %v13584_v10  ;;  %v13617_v8 = vld [vmem:[#allocation8 + $0xec0] ss:$72 sps:$4 sm:$0xff]   ;;  %v13625_v27 = vld [vmem:[#allocation8 + $0xf54] ss:$72 sps:$4 sm:$0xff]  }
 0x379   : > { %7828 = vmatprep.subr.bf16.mxu1 %v13592_v63  ;;  %v17747_v6 = vld [vmem:[#allocation41_spill] sm:$0xff]  ;;  %v13623_v63 = vld [vmem:[#allocation8 + $0xf50] ss:$72 sps:$4 sm:$0xff]  }
 0x37a   : > { %8053 = vmatpush1.bf16.msra.mxu0 %v13587_v47  ;;  %v17748_v41 = vld [vmem:[#allocation37_spill] sm:$0xff] }
 0x37b   : > { %8054 = vmatprep.subr.bf16.mxu0 %v13595_v5  ;;  %7766 = vmatmul.mubr.bf16.gmra.mrb[76].mxu1 %v17743_v58  ;;  %v13628_v10 = vld [vmem:[#allocation8 + $0x18dc] ss:$72 sps:$4 sm:$0xff]   ;;  %v13626_v47 = vld [vmem:[#allocation8 + $0x18d8] ss:$72 sps:$4 sm:$0xff]   ;;  %v13634_v5 = vld [vmem:[#allocation8 + $0x196c] ss:$72 sps:$4 sm:$0xff]  }
 0x37c   : > { %7829 = vmatpush1.bf16.msra.mxu1 %v13590_v18  ;;  %7775 = vmatprep.mubr.bf16.mxu1 %v17744_v61  ;;  %v13631_v16 = vld [vmem:[#allocation8 + $0xfe4] ss:$72 sps:$4 sm:$0xff]   ;;  %v13629_v18 = vld [vmem:[#allocation8 + $0xfe0] ss:$72 sps:$4 sm:$0xff]  }
 0x37d   : > { %7992 = vmatmul.mubr.bf16.gmra.mrb[76].mxu0 %v15872_v26  ;;  %7830 = vmatprep.subr.bf16.mxu1 %v13598_v11  ;;  %v17749_v11 = vld [vmem:[#allocation43_spill] sm:$0xff] }
 0x37e   : > { %8055 = vmatpush1.bf16.msra.mxu0 %v13593_v22  ;;  %8001 = vmatprep.mubr.bf16.mxu0 %v15918_v36  ;;  %v13637_v22 = vld [vmem:[#allocation8 + $0x1074] ss:$72 sps:$4 sm:$0xff]  }
 0x37f   : > { %8056 = vmatprep.subr.bf16.mxu0 %v13601_v60  ;;  %v17750_v60 = vld [vmem:[#allocation22_spill] sm:$0xff] }
 0x380   : > { %7831 = vmatpush1.bf16.msra.mxu1 %v13596_v9  ;;  %v13632_v9 = vld [vmem:[#allocation8 + $0x1968] ss:$72 sps:$4 sm:$0xff]  }
 0x381   : > { %7832 = vmatprep.subr.bf16.mxu1 %v13604_v39  ;;  %v13640_v39 = vld [vmem:[#allocation8 + $0x19fc] ss:$72 sps:$4 sm:$0xff]  }
 0x382   : > { %8057 = vmatpush1.bf16.msra.mxu0 %v13599_v25  ;;  %v13635_v25 = vld [vmem:[#allocation8 + $0x1070] ss:$72 sps:$4 sm:$0xff]  }
 0x383   : > { %8058 = vmatprep.subr.bf16.mxu0 %v13607_v42  ;;  %7776 = vmatmul.mubr.bf16.gmra.mrb[80].mxu1 %v17745_v44  ;;  %v13643_v42 = vld [vmem:[#allocation8 + $0x1104] ss:$72 sps:$4 sm:$0xff]  }
 0x384   : > { %7833 = vmatpush1.bf16.msra.mxu1 %v13602_v0  ;;  %7785 = vmatprep.mubr.bf16.mxu1 %v17746_v37  ;;  %v13638_v0 = vld [vmem:[#allocation8 + $0x19f8] ss:$72 sps:$4 sm:$0xff]  }
 0x385   : > { %8002 = vmatmul.mubr.bf16.gmra.mrb[80].mxu0 %v15924_v57  ;;  %7834 = vmatprep.subr.bf16.mxu1 %v13610_v20  ;;  %v13646_v20 = vld [vmem:[#allocation8 + $0x1a8c] ss:$72 sps:$4 sm:$0xff]  }
 0x386   : > { %8059 = vmatpush1.bf16.msra.mxu0 %v13605_v45  ;;  %8011 = vmatprep.mubr.bf16.mxu0 %v15961_v15  ;;  %v13641_v45 = vld [vmem:[#allocation8 + $0x1100] ss:$72 sps:$4 sm:$0xff]  }
 0x387   : > { %8060 = vmatprep.subr.bf16.mxu0 %v13613_v52  ;;  %v17751_v52 = vld [vmem:[#allocation47_spill] sm:$0xff] }
 0x388   : > { %7835 = vmatpush1.bf16.msra.mxu1 %v13608_v40  ;;  %v13649_v40 = vld [vmem:[#allocation8 + $0x1194] ss:$72 sps:$4 sm:$0xff]  }
 0x389   : > { %7836 = vmatprep.subr.bf16.mxu1 %v13616_v34  ;;  %v17752_v34 = vld [vmem:[#allocation53_spill] sm:$0xff] }
 0x38a   : > { %8061 = vmatpush1.bf16.msra.mxu0 %v13611_v59  ;;  %v13644_v59 = vld [vmem:[#allocation8 + $0x1a88] ss:$72 sps:$4 sm:$0xff]  }
 0x38b   : > { %8062 = vmatprep.subr.bf16.mxu0 %v13619_v35  ;;  %7786 = vmatmul.mubr.bf16.gmra.mrb[84].mxu1 %v17747_v6  ;;  %v13655_v35 = vld [vmem:[#allocation8 + $0x2c] ss:$72 sps:$4 sm:$0xff]  }
 0x38c   : > { %7837 = vmatpush1.bf16.msra.mxu1 %v13614_v33  ;;  %7795 = vmatprep.mubr.bf16.mxu1 %v17748_v41  ;;  %v13647_v33 = vld [vmem:[#allocation8 + $0x1190] ss:$72 sps:$4 sm:$0xff]  }
 0x38d   : > { %8012 = vmatmul.mubr.bf16.gmra.mrb[84].mxu0 %v15982_v49  ;;  %7838 = vmatprep.subr.bf16.mxu1 %v13622_v62  ;;  %v13652_v62 = vld [vmem:[#allocation8 + $0x1224] ss:$72 sps:$4 sm:$0xff]  }
 0x38e   : > { %8063 = vmatpush1.bf16.msra.mxu0 %v13617_v8  ;;  %8021 = vmatprep.mubr.bf16.mxu0 %v16013_v51  ;;  %v13653_v8 = vld [vmem:[#allocation8 + $0x28] ss:$72 sps:$4 sm:$0xff]  }
 0x38f   : > { %8064 = vmatprep.subr.bf16.mxu0 %v13625_v27  ;;  %v13661_v27 = vld [vmem:[#allocation8 + $0xbc] ss:$72 sps:$4 sm:$0xff]  }
 0x390   : > { %7839 = vmatpush1.bf16.msra.mxu1 %v13620_v3  ;;  %v13650_v3 = vld [vmem:[#allocation8 + $0x1220] ss:$72 sps:$4 sm:$0xff]  }
 0x391   : > { %7840 = vmatprep.subr.bf16.mxu1 %v13628_v10  ;;  %v17753_v10 = vld [vmem:[#allocation49_spill] sm:$0xff] }
 0x392   : > { %8065 = vmatpush1.bf16.msra.mxu0 %v13623_v63  ;;  %v13658_v63 = vld [vmem:[#allocation8 + $0x12b4] ss:$72 sps:$4 sm:$0xff]  }
 0x393   : > { %8066 = vmatprep.subr.bf16.mxu0 %v13631_v16  ;;  %7796 = vmatmul.mubr.bf16.gmra.mrb[88].mxu1 %v17749_v11  ;;  %v17754_v16 = vld [vmem:[#allocation55_spill] sm:$0xff] }
 0x394   : > { %7841 = vmatpush1.bf16.msra.mxu1 %v13626_v47  ;;  %7805 = vmatprep.mubr.bf16.mxu1 %v17750_v60  ;;  %v13659_v47 = vld [vmem:[#allocation8 + $0xb8] ss:$72 sps:$4 sm:$0xff]  }
 0x395   : > { %8022 = vmatmul.mubr.bf16.gmra.mrb[88].mxu0 %v16026_v2  ;;  %7842 = vmatprep.subr.bf16.mxu1 %v13634_v5  ;;  %v13667_v5 = vld [vmem:[#allocation8 + $0x14c] ss:$72 sps:$4 sm:$0xff]  }
 0x396   : > { %8067 = vmatpush1.bf16.msra.mxu0 %v13629_v18  ;;  %8031 = vmatprep.mubr.bf16.mxu0 %v16059_v21  ;;  %v13656_v18 = vld [vmem:[#allocation8 + $0x12b0] ss:$72 sps:$4 sm:$0xff]  }
 0x397   : > { %8068 = vmatprep.subr.bf16.mxu0 %v13637_v22  ;;  %v13664_v22 = vld [vmem:[#allocation8 + $0x1344] ss:$72 sps:$4 sm:$0xff]  }
 0x398   : > { %7843 = vmatpush1.bf16.msra.mxu1 %v13632_v9  ;;  %v13665_v9 = vld [vmem:[#allocation8 + $0x148] ss:$72 sps:$4 sm:$0xff]  }
 0x399   : > { %7844 = vmatprep.subr.bf16.mxu1 %v13640_v39  ;;  %v13673_v39 = vld [vmem:[#allocation8 + $0x1dc] ss:$72 sps:$4 sm:$0xff]  }
 0x39a   : > { %8069 = vmatpush1.bf16.msra.mxu0 %v13635_v25  ;;  %v13662_v25 = vld [vmem:[#allocation8 + $0x1340] ss:$72 sps:$4 sm:$0xff]  }
 0x39b   : > { %8070 = vmatprep.subr.bf16.mxu0 %v13643_v42  ;;  %7806 = vmatmul.mubr.bf16.gmra.mrb[92].mxu1 %v17751_v52  ;;  %v17755_v42 = vld [vmem:[#allocation46_spill] sm:$0xff] }
 0x39c   : > { %7845 = vmatpush1.bf16.msra.mxu1 %v13638_v0  ;;  %7848 = vmatprep.mubr.bf16.mxu1 %v17752_v34  ;;  %v13670_v0 = vld [vmem:[#allocation8 + $0x13d4] ss:$72 sps:$4 sm:$0xff]  }
 0x39d   : > { %8032 = vmatmul.mubr.bf16.gmra.mrb[92].mxu0 %v16073_v31  ;;  %7846 = vmatprep.subr.bf16.mxu1 %v13646_v20  ;;  %v17756_v20 = vld [vmem:[#allocation52_spill] sm:$0xff] }
 0x39e   : > { %8071 = vmatpush1.bf16.msra.mxu0 %v13641_v45  ;;  %8074 = vmatprep.mubr.bf16.mxu0 %v17723_v54  ;;  %v13671_v45 = vld [vmem:[#allocation8 + $0x1d8] ss:$72 sps:$4 sm:$0xff]  }
 0x39f   : > { %8072 = vmatprep.subr.bf16.mxu0 %v13649_v40  ;;  %v13679_v40 = vld [vmem:[#allocation8 + $0x26c] ss:$72 sps:$4 sm:$0xff]  }
 0x3a0   : > { %7847 = vmatpush1.bf16.msra.mxu1 %v13644_v59  ;;  %v13668_v59 = vld [vmem:[#allocation8 + $0x13d0] ss:$72 sps:$4 sm:$0xff]  }
 0x3a1   : > { %8268 = vmatprep.subr.bf16.mxu1 %v13655_v35  ;;  %v13676_v35 = vld [vmem:[#allocation8 + $0x1464] ss:$72 sps:$4 sm:$0xff]  }
 0x3a2   : > { %8073 = vmatpush1.bf16.msra.mxu0 %v13647_v33  ;;  %v13677_v33 = vld [vmem:[#allocation8 + $0x268] ss:$72 sps:$4 sm:$0xff]  }
 0x3a3   : > { %8155 = vmatprep.subr.bf16.mxu0 %v13652_v62  ;;  %7849 = vmatmul.mubr.bf16.vlgmr.msra.gmra.mrb[64].mxu1 %v17753_v10  ;;  %v13685_v62 = vld [vmem:[#allocation8 + $0x2fc] ss:$72 sps:$4 sm:$0xff]  }
 0x3a4   : > { %8269 = vmatpush1.bf16.msra.mxu1 %v13653_v8  ;;  %7858 = vmatprep.mubr.bf16.mxu1 %v17754_v16  ;;  %v13674_v8 = vld [vmem:[#allocation8 + $0x1460] ss:$72 sps:$4 sm:$0xff]  }
 0x3a5   : > { %8075 = vmatmul.mubr.bf16.vlgmr.msra.gmra.mrb[64].mxu0 %v17725_v7  ;;  %8270 = vmatprep.subr.bf16.mxu1 %v13661_v27  ;;  %v17757_v27 = vld [vmem:[#allocation48_spill] sm:$0xff] }
 0x3a6   : > { %8156 = vmatpush1.bf16.msra.mxu0 %v13650_v3  ;;  %8084 = vmatprep.mubr.bf16.mxu0 %v17726_v30  ;;  %v17758_v3 = vld [vmem:[#allocation81_spill] sm:$0xff] }
 0x3a7   : > { %8157 = vmatprep.subr.bf16.mxu0 %v13658_v63  ;;  %v17759_v63 = vld [vmem:[#allocation68_spill] sm:$0xff] }
 0x3a8   : > { %8271 = vmatpush1.bf16.msra.mxu1 %v13659_v47  ;;  %v16557_v47 = vrot.slane %v17759_v63, %v17758_v3 }
 0x3a9   : > { %8272 = vmatprep.subr.bf16.mxu1 %v13667_v5  ;;  %v13682_v5 = vld [vmem:[#allocation8 + $0x14f4] ss:$72 sps:$4 sm:$0xff]  }
 0x3aa   : > { %8158 = vmatpush1.bf16.msra.mxu0 %v13656_v18  ;;  %v17760_v18 = vld [vmem:[#allocation54_spill] sm:$0xff] }
 0x3ab   : > { %8159 = vmatprep.subr.bf16.mxu0 %v13664_v22  ;;  %7859 = vmatmul.mubr.bf16.gmra.mrb[68].mxu1 %v17755_v42  ;;  %v13683_v22 = vld [vmem:[#allocation8 + $0x2f8] ss:$72 sps:$4 sm:$0xff]  }
 0x3ac   : > { %8273 = vmatpush1.bf16.msra.mxu1 %v13665_v9  ;;  %7868 = vmatprep.mubr.bf16.mxu1 %v17756_v20  ;;  %v17761_v9 = vld [vmem:[#allocation79_spill] sm:$0xff] }
 0x3ad   : > { %8085 = vmatmul.mubr.bf16.gmra.mrb[68].mxu0 %v17731_v17  ;;  %8274 = vmatprep.subr.bf16.mxu1 %v13673_v39  ;;  %v16562_v39 = vrot.slane %v17759_v63, %v17761_v9  ;;  %v13689_v9 = vld [vmem:[#allocation8 + $0x388] ss:$72 sps:$4 sm:$0xff]  }
 0x3ae   : > { %8160 = vmatpush1.bf16.msra.mxu0 %v13662_v25  ;;  %8094 = vmatprep.mubr.bf16.mxu0 %v17732_v53  ;;  %v13691_v25 = vld [vmem:[#allocation8 + $0x38c] ss:$72 sps:$4 sm:$0xff]  }
 0x3af   : > { %8161 = vmatprep.subr.bf16.mxu0 %v13670_v0 }
 0x3b0   : > { %8275 = vmatpush1.bf16.msra.mxu1 %v13671_v45  ;;  %v13680_v45 = vld [vmem:[#allocation8 + $0x14f0] ss:$72 sps:$4 sm:$0xff]  }
 0x3b1   : > { %8276 = vmatprep.subr.bf16.mxu1 %v13679_v40 }
 0x3b2   : > { %8162 = vmatpush1.bf16.msra.mxu0 %v13668_v59 }
 0x3b3   : > { %8163 = vmatprep.subr.bf16.mxu0 %v13676_v35  ;;  %7869 = vmatmul.mubr.bf16.gmra.mrb[72].mxu1 %v17757_v27  ;;  %v13688_v35 = vld [vmem:[#allocation8 + $0x1584] ss:$72 sps:$4 sm:$0xff]  }
 0x3b4   : > { %8277 = vmatpush1.bf16.msra.mxu1 %v13677_v33  ;;  %7878 = vmatprep.mubr.bf16.mxu1 %v17760_v18 }
 0x3b5   : > { %8095 = vmatmul.mubr.bf16.gmra.mrb[72].mxu0 %v17739_v46  ;;  %8278 = vmatprep.subr.bf16.mxu1 %v13685_v62 }
 0x3b6   : > { %8164 = vmatpush1.bf16.msra.mxu0 %v13674_v8  ;;  %8104 = vmatprep.mubr.bf16.mxu0 %v17740_v1  ;;  %v7172_v0 = vpop.f32.mrb[32].mxu1  ;;  %v13697_v8 = vld [vmem:[#allocation8 + $0x41c] ss:$72 sps:$4 sm:$0xff]  }
 0x3b7   : > { %v12046_v40 = vadd.f32 %v7172_v0, %v16557_v47  ;;  %8165 = vmatprep.subr.bf16.mxu0 %v13682_v5  ;;  %v7174_v59 = vpop.f32.mrb[33].mxu1  ;;  %v13686_v0 = vld [vmem:[#allocation8 + $0x1580] ss:$72 sps:$4 sm:$0xff]   ;;  %v13694_v5 = vld [vmem:[#allocation8 + $0x1614] ss:$72 sps:$4 sm:$0xff]  }
 0x3b8   : > { %v12047_v33 = vadd.f32 %v7174_v59, %v16562_v39  ;;  %8279 = vmatpush1.bf16.msra.mxu1 %v13683_v22  ;;  %v7176_v63 = vpop.f32.mrb[34].mxu1  ;;  %v13695_v22 = vld [vmem:[#allocation8 + $0x418] ss:$72 sps:$4 sm:$0xff]  }
 0x3b9   : > { %v12048_v3 = vadd.f32 %v7176_v63, %v16557_v47  ;;  %v7178_v62 = vpop.f32.mrb[35].mxu1  ;;  %8280 = vmatprep.subr.bf16.mxu1 %v13691_v25  ;;  %v13703_v25 = vld [vmem:[#allocation8 + $0x4ac] ss:$72 sps:$4 sm:$0xff]  }
 0x3ba   : > { %v11807_v1 = vpack.c.bf16 %v12047_v33, %v12046_v40  ;;  %8166 = vmatpush1.bf16.msra.mxu0 %v13680_v45  ;;  %v12049_v46 = vadd.f32 %v7178_v62, %v16562_v39  ;;  %v13692_v40 = vld [vmem:[#allocation8 + $0x1610] ss:$72 sps:$4 sm:$0xff]  }
 0x3bb   : > { %8167 = vmatprep.subr.bf16.mxu0 %v13688_v35  ;;  %7879 = vmatmul.mubr.bf16.gmra.mrb[76].mxu1 %v16163_v48 }
 0x3bc   : > { %10489 = vst [vmem:[%s16423_s30 + $0x8] sm:$0xff] %v11807_v1  ;;  %v11816_v59 = vpack.c.bf16 %v12049_v46, %v12048_v3  ;;  %8281 = vmatpush1.bf16.msra.mxu1 %v13689_v9  ;;  %7888 = vmatprep.mubr.bf16.mxu1 %v16180_v4  ;;  %v13700_v1 = vld [vmem:[#allocation8 + $0x16a4] ss:$72 sps:$4 sm:$0xff]   ;;  %v13701_v9 = vld [vmem:[#allocation8 + $0x4a8] ss:$72 sps:$4 sm:$0xff]  }
 0x3bd   : > { %8105 = vmatmul.mubr.bf16.gmra.mrb[76].mxu0 %v17743_v58  ;;  %8282 = vmatprep.subr.bf16.mxu1 %v13697_v8  ;;  %v13709_v8 = vld [vmem:[#allocation8 + $0x53c] ss:$72 sps:$4 sm:$0xff]  }
 0x3be   : > { %10498 = vst [vmem:[%s16423_s30 + $0x50] sm:$0xff] %v11816_v59  ;;  %8168 = vmatpush1.bf16.msra.mxu0 %v13686_v0  ;;  %8114 = vmatprep.mubr.bf16.mxu0 %v17744_v61  ;;  %v7182_v45 = vpop.f32.mrb[36].mxu1 }
 0x3bf   : > { %v12050_v35 = vadd.f32 %v7182_v45, %v16557_v47  ;;  %8169 = vmatprep.subr.bf16.mxu0 %v13694_v5  ;;  %v7184_v33 = vpop.f32.mrb[37].mxu1  ;;  %v13698_v45 = vld [vmem:[#allocation8 + $0x16a0] ss:$72 sps:$4 sm:$0xff]   ;;  %v13706_v5 = vld [vmem:[#allocation8 + $0x1734] ss:$72 sps:$4 sm:$0xff]  }
 0x3c0   : > { %v12051_v46 = vadd.f32 %v7184_v33, %v16562_v39  ;;  %8283 = vmatpush1.bf16.msra.mxu1 %v13695_v22  ;;  %v7186_v3 = vpop.f32.mrb[38].mxu1  ;;  %v13707_v22 = vld [vmem:[#allocation8 + $0x538] ss:$72 sps:$4 sm:$0xff]  }
 0x3c1   : > { %v12052_v63 = vadd.f32 %v7186_v3, %v16557_v47  ;;  %v7188_v62 = vpop.f32.mrb[39].mxu1  ;;  %8284 = vmatprep.subr.bf16.mxu1 %v13703_v25  ;;  %v13715_v25 = vld [vmem:[#allocation8 + $0x5cc] ss:$72 sps:$4 sm:$0xff]  }
 0x3c2   : > { %v11825_v0 = vpack.c.bf16 %v12051_v46, %v12050_v35  ;;  %8170 = vmatpush1.bf16.msra.mxu0 %v13692_v40  ;;  %v12053_v59 = vadd.f32 %v7188_v62, %v16562_v39  ;;  %v13704_v35 = vld [vmem:[#allocation8 + $0x1730] ss:$72 sps:$4 sm:$0xff]   ;;  %v13712_v3 = vld [vmem:[#allocation8 + $0x17c4] ss:$72 sps:$4 sm:$0xff]  }
 0x3c3   : > { %8171 = vmatprep.subr.bf16.mxu0 %v13700_v1  ;;  %7889 = vmatmul.mubr.bf16.gmra.mrb[80].mxu1 %v16189_v32  ;;  %v13713_v62 = vld [vmem:[#allocation8 + $0x5c8] ss:$72 sps:$4 sm:$0xff]  }
 0x3c4   : > { %10507 = vst [vmem:[%s16423_s30 + $0x98] sm:$0xff] %v11825_v0  ;;  %v11834_v33 = vpack.c.bf16 %v12053_v59, %v12052_v63  ;;  %8285 = vmatpush1.bf16.msra.mxu1 %v13701_v9  ;;  %7898 = vmatprep.mubr.bf16.mxu1 %v16195_v43  ;;  %v13721_v59 = vld [vmem:[#allocation8 + $0x65c] ss:$72 sps:$4 sm:$0xff]  }
 0x3c5   : > { %8115 = vmatmul.mubr.bf16.gmra.mrb[80].mxu0 %v17745_v44  ;;  %8286 = vmatprep.subr.bf16.mxu1 %v13709_v8 }
 0x3c6   : > { %10516 = vst [vmem:[%s16423_s30 + $0xe0] sm:$0xff] %v11834_v33  ;;  %8172 = vmatpush1.bf16.msra.mxu0 %v13698_v45  ;;  %8124 = vmatprep.mubr.bf16.mxu0 %v17746_v37  ;;  %v7192_v40 = vpop.f32.mrb[40].mxu1 }
 0x3c7   : > { %v12054_v1 = vadd.f32 %v7192_v40, %v16557_v47  ;;  %8173 = vmatprep.subr.bf16.mxu0 %v13706_v5  ;;  %v7194_v46 = vpop.f32.mrb[41].mxu1  ;;  %v13710_v40 = vld [vmem:[#allocation8 + $0x17c0] ss:$72 sps:$4 sm:$0xff]   ;;  %v13718_v5 = vld [vmem:[#allocation8 + $0x1854] ss:$72 sps:$4 sm:$0xff]  }
 0x3c8   : > { %v12055_v9 = vadd.f32 %v7194_v46, %v16562_v39  ;;  %8287 = vmatpush1.bf16.msra.mxu1 %v13707_v22  ;;  %v7196_v63 = vpop.f32.mrb[42].mxu1  ;;  %v13719_v22 = vld [vmem:[#allocation8 + $0x658] ss:$72 sps:$4 sm:$0xff]  }
 0x3c9   : > { %v12056_v8 = vadd.f32 %v7196_v63, %v16557_v47  ;;  %v7198_v0 = vpop.f32.mrb[43].mxu1  ;;  %8288 = vmatprep.subr.bf16.mxu1 %v13715_v25  ;;  %v13727_v25 = vld [vmem:[#allocation8 + $0x6ec] ss:$72 sps:$4 sm:$0xff]  }
 0x3ca   : > { %v11843_v45 = vpack.c.bf16 %v12055_v9, %v12054_v1  ;;  %8174 = vmatpush1.bf16.msra.mxu0 %v13704_v35  ;;  %v12057_v33 = vadd.f32 %v7198_v0, %v16562_v39  ;;  %v13716_v1 = vld [vmem:[#allocation8 + $0x1850] ss:$72 sps:$4 sm:$0xff]   ;;  %v13724_v63 = vld [vmem:[#allocation8 + $0x18e4] ss:$72 sps:$4 sm:$0xff]  }
 0x3cb   : > { %8175 = vmatprep.subr.bf16.mxu0 %v13712_v3  ;;  %7899 = vmatmul.mubr.bf16.gmra.mrb[84].mxu1 %v16207_v12  ;;  %v13725_v0 = vld [vmem:[#allocation8 + $0x6e8] ss:$72 sps:$4 sm:$0xff]  }
 0x3cc   : > { %10525 = vst [vmem:[%s16423_s30 + $0x128] sm:$0xff] %v11843_v45  ;;  %v11852_v46 = vpack.c.bf16 %v12057_v33, %v12056_v8  ;;  %8289 = vmatpush1.bf16.msra.mxu1 %v13713_v62  ;;  %7908 = vmatprep.mubr.bf16.mxu1 %v16224_v14  ;;  %v13733_v33 = vld [vmem:[#allocation8 + $0x77c] ss:$72 sps:$4 sm:$0xff]  }
 0x3cd   : > { %8125 = vmatmul.mubr.bf16.gmra.mrb[84].mxu0 %v17747_v6  ;;  %8290 = vmatprep.subr.bf16.mxu1 %v13721_v59 }
 0x3ce   : > { %10534 = vst [vmem:[%s16423_s30 + $0x170] sm:$0xff] %v11852_v46  ;;  %8176 = vmatpush1.bf16.msra.mxu0 %v13710_v40  ;;  %8134 = vmatprep.mubr.bf16.mxu0 %v17748_v41  ;;  %v7202_v35 = vpop.f32.mrb[44].mxu1 }
 0x3cf   : > { %v12058_v3 = vadd.f32 %v7202_v35, %v16557_v47  ;;  %8177 = vmatprep.subr.bf16.mxu0 %v13718_v5  ;;  %v7204_v9 = vpop.f32.mrb[45].mxu1  ;;  %v13722_v35 = vld [vmem:[#allocation8 + $0x18e0] ss:$72 sps:$4 sm:$0xff]   ;;  %v13730_v5 = vld [vmem:[#allocation8 + $0x1974] ss:$72 sps:$4 sm:$0xff]  }
 0x3d0   : > { %v12059_v62 = vadd.f32 %v7204_v9, %v16562_v39  ;;  %8291 = vmatpush1.bf16.msra.mxu1 %v13719_v22  ;;  %v7206_v8 = vpop.f32.mrb[46].mxu1  ;;  %v13731_v22 = vld [vmem:[#allocation8 + $0x778] ss:$72 sps:$4 sm:$0xff]  }
 0x3d1   : > { %v12060_v59 = vadd.f32 %v7206_v8, %v16557_v47  ;;  %v7208_v45 = vpop.f32.mrb[47].mxu1  ;;  %8292 = vmatprep.subr.bf16.mxu1 %v13727_v25  ;;  %v13739_v25 = vld [vmem:[#allocation8 + $0x80c] ss:$72 sps:$4 sm:$0xff]  }
 0x3d2   : > { %v11861_v40 = vpack.c.bf16 %v12059_v62, %v12058_v3  ;;  %8178 = vmatpush1.bf16.msra.mxu0 %v13716_v1  ;;  %v12061_v46 = vadd.f32 %v7208_v45, %v16562_v39  ;;  %v13728_v3 = vld [vmem:[#allocation8 + $0x1970] ss:$72 sps:$4 sm:$0xff]   ;;  %v13736_v8 = vld [vmem:[#allocation8 + $0x1a04] ss:$72 sps:$4 sm:$0xff]  }
 0x3d3   : > { %8179 = vmatprep.subr.bf16.mxu0 %v13724_v63  ;;  %7909 = vmatmul.mubr.bf16.gmra.mrb[88].mxu1 %v16233_v56  ;;  %v13737_v45 = vld [vmem:[#allocation8 + $0x808] ss:$72 sps:$4 sm:$0xff]  }
 0x3d4   : > { %10543 = vst [vmem:[%s16423_s30 + $0x1b8] sm:$0xff] %v11861_v40  ;;  %v11870_v9 = vpack.c.bf16 %v12061_v46, %v12060_v59  ;;  %8293 = vmatpush1.bf16.msra.mxu1 %v13725_v0  ;;  %7918 = vmatprep.mubr.bf16.mxu1 %v16235_v23  ;;  %v13745_v46 = vld [vmem:[#allocation8 + $0x89c] ss:$72 sps:$4 sm:$0xff]  }
 0x3d5   : > { %8135 = vmatmul.mubr.bf16.gmra.mrb[88].mxu0 %v17749_v11  ;;  %8294 = vmatprep.subr.bf16.mxu1 %v13733_v33 }
 0x3d6   : > { %10552 = vst [vmem:[%s16423_s30 + $0x200] sm:$0xff] %v11870_v9  ;;  %8180 = vmatpush1.bf16.msra.mxu0 %v13722_v35  ;;  %8144 = vmatprep.mubr.bf16.mxu0 %v17750_v60  ;;  %v7212_v1 = vpop.f32.mrb[48].mxu1 }
 0x3d7   : > { %v12062_v63 = vadd.f32 %v7212_v1, %v16557_v47  ;;  %8181 = vmatprep.subr.bf16.mxu0 %v13730_v5  ;;  %v7214_v62 = vpop.f32.mrb[49].mxu1  ;;  %v13734_v1 = vld [vmem:[#allocation8 + $0x1a00] ss:$72 sps:$4 sm:$0xff]   ;;  %v13742_v5 = vld [vmem:[#allocation8 + $0x1a94] ss:$72 sps:$4 sm:$0xff]  }
 0x3d8   : > { %v12063_v0 = vadd.f32 %v7214_v62, %v16562_v39  ;;  %8295 = vmatpush1.bf16.msra.mxu1 %v13731_v22  ;;  %v7216_v59 = vpop.f32.mrb[50].mxu1  ;;  %v13743_v22 = vld [vmem:[#allocation8 + $0x898] ss:$72 sps:$4 sm:$0xff]  }
 0x3d9   : > { %v12064_v33 = vadd.f32 %v7216_v59, %v16557_v47  ;;  %v7218_v40 = vpop.f32.mrb[51].mxu1  ;;  %8296 = vmatprep.subr.bf16.mxu1 %v13739_v25  ;;  %v13748_v25 = vld [vmem:[#allocation8 + $0x92c] ss:$72 sps:$4 sm:$0xff]  }
 0x3da   : > { %v11879_v35 = vpack.c.bf16 %v12063_v0, %v12062_v63  ;;  %8182 = vmatpush1.bf16.msra.mxu0 %v13728_v3  ;;  %v12065_v9 = vadd.f32 %v7218_v40, %v16562_v39  ;;  %v13740_v63 = vld [vmem:[#allocation8 + $0x1a90] ss:$72 sps:$4 sm:$0xff]   ;;  %v13751_v59 = vld [vmem:[#allocation8 + $0x34] ss:$72 sps:$4 sm:$0xff]  }
 0x3db   : > { %8183 = vmatprep.subr.bf16.mxu0 %v13736_v8  ;;  %7919 = vmatmul.mubr.bf16.gmra.mrb[92].mxu1 %v16239_v29  ;;  %v13746_v40 = vld [vmem:[#allocation8 + $0x928] ss:$72 sps:$4 sm:$0xff]  }
 0x3dc   : > { %10561 = vst [vmem:[%s16423_s30 + $0x248] sm:$0xff] %v11879_v35  ;;  %v11888_v62 = vpack.c.bf16 %v12065_v9, %v12064_v33  ;;  %8297 = vmatpush1.bf16.msra.mxu1 %v13737_v45  ;;  %8300 = vmatprep.mubr.bf16.mxu1 %v17724_v28  ;;  %v13754_v9 = vld [vmem:[#allocation8 + $0x9bc] ss:$72 sps:$4 sm:$0xff]  }
 0x3dd   : > { %8145 = vmatmul.mubr.bf16.gmra.mrb[92].mxu0 %v17751_v52  ;;  %8298 = vmatprep.subr.bf16.mxu1 %v13745_v46 }
 0x3de   : > { %10570 = vst [vmem:[%s16423_s30 + $0x290] sm:$0xff] %v11888_v62  ;;  %8184 = vmatpush1.bf16.msra.mxu0 %v13734_v1  ;;  %8187 = vmatprep.mubr.bf16.mxu0 %v17752_v34  ;;  %v7222_v3 = vpop.f32.mrb[52].mxu1 }
 0x3df   : > { %v12066_v8 = vadd.f32 %v7222_v3, %v16557_v47  ;;  %8185 = vmatprep.subr.bf16.mxu0 %v13742_v5  ;;  %v7224_v0 = vpop.f32.mrb[53].mxu1  ;;  %v13749_v3 = vld [vmem:[#allocation8 + $0x30] ss:$72 sps:$4 sm:$0xff]   ;;  %v13757_v5 = vld [vmem:[#allocation8 + $0xc4] ss:$72 sps:$4 sm:$0xff]  }
 0x3e0   : > { %v12067_v45 = vadd.f32 %v7224_v0, %v16562_v39  ;;  %8299 = vmatpush1.bf16.msra.mxu1 %v13743_v22  ;;  %v7226_v33 = vpop.f32.mrb[54].mxu1  ;;  %v13752_v22 = vld [vmem:[#allocation8 + $0x9b8] ss:$72 sps:$4 sm:$0xff]  }
 0x3e1   : > { %v12068_v46 = vadd.f32 %v7226_v33, %v16557_v47  ;;  %v7228_v35 = vpop.f32.mrb[55].mxu1  ;;  %8381 = vmatprep.subr.bf16.mxu1 %v13748_v25  ;;  %v13760_v25 = vld [vmem:[#allocation8 + $0xa4c] ss:$72 sps:$4 sm:$0xff]  }
 0x3e2   : > { %v11897_v1 = vpack.c.bf16 %v12067_v45, %v12066_v8  ;;  %8186 = vmatpush1.bf16.msra.mxu0 %v13740_v63  ;;  %v12069_v62 = vadd.f32 %v7228_v35, %v16562_v39  ;;  %v13755_v8 = vld [vmem:[#allocation8 + $0xc0] ss:$72 sps:$4 sm:$0xff]   ;;  %v13763_v33 = vld [vmem:[#allocation8 + $0x154] ss:$72 sps:$4 sm:$0xff]  }
 0x3e3   : > { %8607 = vmatprep.subr.bf16.mxu0 %v13751_v59  ;;  %8301 = vmatmul.mubr.bf16.vlgmr.msra.gmra.mrb[96].mxu1 %v17727_v13  ;;  %v13758_v35 = vld [vmem:[#allocation8 + $0xa48] ss:$72 sps:$4 sm:$0xff]  }
 0x3e4   : > { %10579 = vst [vmem:[%s16423_s30 + $0x2d8] sm:$0xff] %v11897_v1  ;;  %v11906_v0 = vpack.c.bf16 %v12069_v62, %v12068_v46  ;;  %8382 = vmatpush1.bf16.msra.mxu1 %v13746_v40  ;;  %8310 = vmatprep.mubr.bf16.mxu1 %v17728_v19  ;;  %v13766_v62 = vld [vmem:[#allocation8 + $0xadc] ss:$72 sps:$4 sm:$0xff]  }
 0x3e5   : > { %8188 = vmatmul.mubr.bf16.vlgmr.msra.gmra.mrb[64].mxu0 %v17753_v10  ;;  %8383 = vmatprep.subr.bf16.mxu1 %v13754_v9 }
 0x3e6   : > { %10588 = vst [vmem:[%s16423_s30 + $0x320] sm:$0xff] %v11906_v0  ;;  %8608 = vmatpush1.bf16.msra.mxu0 %v13749_v3  ;;  %8197 = vmatprep.mubr.bf16.mxu0 %v17754_v16  ;;  %v7232_v63 = vpop.f32.mrb[56].mxu1 }
 0x3e7   : > { %v12070_v59 = vadd.f32 %v7232_v63, %v16557_v47  ;;  %8609 = vmatprep.subr.bf16.mxu0 %v13757_v5  ;;  %v7234_v45 = vpop.f32.mrb[57].mxu1  ;;  %v13761_v63 = vld [vmem:[#allocation8 + $0x150] ss:$72 sps:$4 sm:$0xff]   ;;  %v13769_v5 = vld [vmem:[#allocation8 + $0x1e4] ss:$72 sps:$4 sm:$0xff]  }
 0x3e8   : > { %v12071_v40 = vadd.f32 %v7234_v45, %v16562_v39  ;;  %8384 = vmatpush1.bf16.msra.mxu1 %v13752_v22  ;;  %v7236_v46 = vpop.f32.mrb[58].mxu1  ;;  %v13764_v22 = vld [vmem:[#allocation8 + $0xad8] ss:$72 sps:$4 sm:$0xff]  }
 0x3e9   : > { %v12072_v9 = vadd.f32 %v7236_v46, %v16557_v47  ;;  %v7238_v1 = vpop.f32.mrb[59].mxu1  ;;  %8385 = vmatprep.subr.bf16.mxu1 %v13760_v25  ;;  %v13772_v25 = vld [vmem:[#allocation8 + $0xb6c] ss:$72 sps:$4 sm:$0xff]  }
 0x3ea   : > { %v11915_v3 = vpack.c.bf16 %v12071_v40, %v12070_v59  ;;  %8610 = vmatpush1.bf16.msra.mxu0 %v13755_v8  ;;  %v12073_v0 = vadd.f32 %v7238_v1, %v16562_v39  ;;  %v13767_v59 = vld [vmem:[#allocation8 + $0x1e0] ss:$72 sps:$4 sm:$0xff]   ;;  %v13775_v46 = vld [vmem:[#allocation8 + $0x274] ss:$72 sps:$4 sm:$0xff]  }
 0x3eb   : > { %8611 = vmatprep.subr.bf16.mxu0 %v13763_v33  ;;  %8311 = vmatmul.mubr.bf16.gmra.mrb[100].mxu1 %v17733_v50  ;;  %v13770_v1 = vld [vmem:[#allocation8 + $0xb68] ss:$72 sps:$4 sm:$0xff]  }
 0x3ec   : > { %10597 = vst [vmem:[%s16423_s30 + $0x368] sm:$0xff] %v11915_v3  ;;  %v11924_v45 = vpack.c.bf16 %v12073_v0, %v12072_v9  ;;  %8386 = vmatpush1.bf16.msra.mxu1 %v13758_v35  ;;  %8320 = vmatprep.mubr.bf16.mxu1 %v17734_v55  ;;  %v13778_v0 = vld [vmem:[#allocation8 + $0xbfc] ss:$72 sps:$4 sm:$0xff]  }
 0x3ed   : > { %8198 = vmatmul.mubr.bf16.gmra.mrb[68].mxu0 %v17755_v42  ;;  %8387 = vmatprep.subr.bf16.mxu1 %v13766_v62 }
 0x3ee   : > { %10606 = vst [vmem:[%s16423_s30 + $0x3b0] sm:$0xff] %v11924_v45  ;;  %8612 = vmatpush1.bf16.msra.mxu0 %v13761_v63  ;;  %8207 = vmatprep.mubr.bf16.mxu0 %v17756_v20  ;;  %v7242_v8 = vpop.f32.mrb[60].mxu1 }
 0x3ef   : > { %v12074_v33 = vadd.f32 %v7242_v8, %v16557_v47  ;;  %8613 = vmatprep.subr.bf16.mxu0 %v13769_v5  ;;  %v7244_v40 = vpop.f32.mrb[61].mxu1  ;;  %v13773_v8 = vld [vmem:[#allocation8 + $0x270] ss:$72 sps:$4 sm:$0xff]   ;;  %v13781_v5 = vld [vmem:[#allocation8 + $0x304] ss:$72 sps:$4 sm:$0xff]  }
 0x3f0   : > { %v12075_v35 = vadd.f32 %v7244_v40, %v16562_v39  ;;  %8388 = vmatpush1.bf16.msra.mxu1 %v13764_v22  ;;  %v7246_v9 = vpop.f32.mrb[62].mxu1  ;;  %v13776_v22 = vld [vmem:[#allocation8 + $0xbf8] ss:$72 sps:$4 sm:$0xff]  }
 0x3f1   : > { %v12076_v62 = vadd.f32 %v7246_v9, %v16557_v47  ;;  %v7248_v3 = vpop.f32.mrb[63].mxu1  ;;  %8389 = vmatprep.subr.bf16.mxu1 %v13772_v25  ;;  %v16644_v47 = vld [vmem:[#allocation10] sm:$0xff]  ;;  %v17762_v25 = vld [vmem:[#allocation83_spill] sm:$0xff] }
 0x3f2   : > { %v11933_v63 = vpack.c.bf16 %v12075_v35, %v12074_v33  ;;  %8614 = vmatpush1.bf16.msra.mxu0 %v13767_v59  ;;  %v12077_v45 = vadd.f32 %v7248_v3, %v16562_v39  ;;  %v16648_v59 = vrot.slane %v16644_v47, %v17762_v25  ;;  %v13784_v39 = vld [vmem:[#allocation8 + $0xc8c] ss:$72 sps:$4 sm:$0xff]   ;;  %v13779_v33 = vld [vmem:[#allocation8 + $0x300] ss:$72 sps:$4 sm:$0xff]  }
 0x3f3   : > { %8615 = vmatprep.subr.bf16.mxu0 %v13775_v46  ;;  %8321 = vmatmul.mubr.bf16.gmra.mrb[104].mxu1 %v17741_v38  ;;  %v17763_v46 = vld [vmem:[#allocation82_spill] sm:$0xff]  ;;  %v13787_v9 = vld [vmem:[#allocation8 + $0x394] ss:$72 sps:$4 sm:$0xff]  }
 0x3f4   : > { %10615 = vst [vmem:[%s16423_s30 + $0x3f8] sm:$0xff] %v11933_v63  ;;  %v11942_v40 = vpack.c.bf16 %v12077_v45, %v12076_v62  ;;  %8390 = vmatpush1.bf16.msra.mxu1 %v13770_v1  ;;  %8330 = vmatprep.mubr.bf16.mxu1 %v17742_v24  ;;  %v16654_v35 = vrot.slane %v16644_v47, %v17763_v46  ;;  %v13782_v62 = vld [vmem:[#allocation8 + $0xc88] ss:$72 sps:$4 sm:$0xff]  }
 0x3f5   : > { %8208 = vmatmul.mubr.bf16.gmra.mrb[72].mxu0 %v17757_v27  ;;  %8391 = vmatprep.subr.bf16.mxu1 %v13778_v0  ;;  %v13790_v0 = vld [vmem:[#allocation8 + $0xd1c] ss:$72 sps:$4 sm:$0xff]  }
 0x3f6   : > { %10624 = vst [vmem:[%s16423_s30 + $0x440] sm:$0xff] %v11942_v40  ;;  %8616 = vmatpush1.bf16.msra.mxu0 %v13773_v8  ;;  %8217 = vmatprep.mubr.bf16.mxu0 %v17760_v18  ;;  %v13785_v40 = vld [vmem:[#allocation8 + $0x390] ss:$72 sps:$4 sm:$0xff]   ;;  %v13802_v18 = vld [vmem:[#allocation8 + $0xe3c] ss:$72 sps:$4 sm:$0xff]  }
 0x3f7   : > { %8617 = vmatprep.subr.bf16.mxu0 %v13781_v5  ;;  %v13793_v5 = vld [vmem:[#allocation8 + $0x424] ss:$72 sps:$4 sm:$0xff]  }
 0x3f8   : > { %v7511_v1 = vpop.f32.mrb[32].mxu0  ;;  %8392 = vmatpush1.bf16.msra.mxu1 %v13776_v22 }
 0x3f9   : > { %v12078_v3 = vadd.f32 %v7511_v1, %v16648_v59  ;;  %v7513_v63 = vpop.f32.mrb[33].mxu0  ;;  %8393 = vmatprep.subr.bf16.mxu1 %v13784_v39  ;;  %v13788_v39 = vld [vmem:[#allocation8 + $0xd18] ss:$72 sps:$4 sm:$0xff]  }
 0x3fa   : > { %v12079_v45 = vadd.f32 %v7513_v63, %v16654_v35  ;;  %8618 = vmatpush1.bf16.msra.mxu0 %v13779_v33  ;;  %v7515_v8 = vpop.f32.mrb[34].mxu0  ;;  %v13796_v33 = vld [vmem:[#allocation8 + $0xdac] ss:$72 sps:$4 sm:$0xff]  }
 0x3fb   : > { %v12080_v25 = vadd.f32 %v7515_v8, %v16648_v59  ;;  %v7517_v46 = vpop.f32.mrb[35].mxu0  ;;  %8619 = vmatprep.subr.bf16.mxu0 %v13787_v9  ;;  %8331 = vmatmul.mubr.bf16.gmra.mrb[108].mxu1 %v15872_v26  ;;  %v13791_v9 = vld [vmem:[#allocation8 + $0x420] ss:$72 sps:$4 sm:$0xff]   ;;  %v13799_v8 = vld [vmem:[#allocation8 + $0x4b4] ss:$72 sps:$4 sm:$0xff]  }
 0x3fc   : > { %v11808_v22 = vpack.c.bf16 %v12079_v45, %v12078_v3  ;;  %v12081_v1 = vadd.f32 %v7517_v46, %v16654_v35  ;;  %8394 = vmatpush1.bf16.msra.mxu1 %v13782_v62  ;;  %8340 = vmatprep.mubr.bf16.mxu1 %v15918_v36  ;;  %v13794_v46 = vld [vmem:[#allocation8 + $0xda8] ss:$72 sps:$4 sm:$0xff]  }
 0x3fd   : > { %8218 = vmatmul.mubr.bf16.gmra.mrb[76].mxu0 %v16163_v48  ;;  %8395 = vmatprep.subr.bf16.mxu1 %v13790_v0 }
 0x3fe   : > { %10490 = vst [vmem:[%s16423_s30 + $0x10] sm:$0xff] %v11808_v22  ;;  %v11817_v63 = vpack.c.bf16 %v12081_v1, %v12080_v25  ;;  %8620 = vmatpush1.bf16.msra.mxu0 %v13785_v40  ;;  %8227 = vmatprep.mubr.bf16.mxu0 %v16180_v4  ;;  %v13797_v40 = vld [vmem:[#allocation8 + $0x4b0] ss:$72 sps:$4 sm:$0xff]  }
 0x3ff   : > { %8621 = vmatprep.subr.bf16.mxu0 %v13793_v5  ;;  %v13805_v5 = vld [vmem:[#allocation8 + $0x544] ss:$72 sps:$4 sm:$0xff]  }
 0x400   : > { %10499 = vst [vmem:[%s16423_s30 + $0x58] sm:$0xff] %v11817_v63  ;;  %v7521_v3 = vpop.f32.mrb[36].mxu0  ;;  %8396 = vmatpush1.bf16.msra.mxu1 %v13788_v39 }
 0x401   : > { %v12082_v62 = vadd.f32 %v7521_v3, %v16648_v59  ;;  %v7523_v45 = vpop.f32.mrb[37].mxu0  ;;  %8397 = vmatprep.subr.bf16.mxu1 %v13796_v33  ;;  %v13800_v33 = vld [vmem:[#allocation8 + $0xe38] ss:$72 sps:$4 sm:$0xff]  }
 0x402   : > { %v12083_v0 = vadd.f32 %v7523_v45, %v16654_v35  ;;  %8622 = vmatpush1.bf16.msra.mxu0 %v13791_v9  ;;  %v7525_v25 = vpop.f32.mrb[38].mxu0  ;;  %v13808_v9 = vld [vmem:[#allocation8 + $0xecc] ss:$72 sps:$4 sm:$0xff]  }
 0x403   : > { %v12084_v22 = vadd.f32 %v7525_v25, %v16648_v59  ;;  %v7527_v1 = vpop.f32.mrb[39].mxu0  ;;  %8623 = vmatprep.subr.bf16.mxu0 %v13799_v8  ;;  %8341 = vmatmul.mubr.bf16.gmra.mrb[112].mxu1 %v15924_v57  ;;  %v13803_v8 = vld [vmem:[#allocation8 + $0x540] ss:$72 sps:$4 sm:$0xff]   ;;  %v13811_v45 = vld [vmem:[#allocation8 + $0x5d4] ss:$72 sps:$4 sm:$0xff]  }
 0x404   : > { %v11826_v39 = vpack.c.bf16 %v12083_v0, %v12082_v62  ;;  %v12085_v63 = vadd.f32 %v7527_v1, %v16654_v35  ;;  %8398 = vmatpush1.bf16.msra.mxu1 %v13794_v46  ;;  %8350 = vmatprep.mubr.bf16.mxu1 %v15961_v15  ;;  %v13806_v0 = vld [vmem:[#allocation8 + $0xec8] ss:$72 sps:$4 sm:$0xff]   ;;  %v13814_v1 = vld [vmem:[#allocation8 + $0xf5c] ss:$72 sps:$4 sm:$0xff]  }
 0x405   : > { %8228 = vmatmul.mubr.bf16.gmra.mrb[80].mxu0 %v16189_v32  ;;  %8399 = vmatprep.subr.bf16.mxu1 %v13802_v18 }
 0x406   : > { %10508 = vst [vmem:[%s16423_s30 + $0xa0] sm:$0xff] %v11826_v39  ;;  %v11835_v3 = vpack.c.bf16 %v12085_v63, %v12084_v22  ;;  %8624 = vmatpush1.bf16.msra.mxu0 %v13797_v40  ;;  %8237 = vmatprep.mubr.bf16.mxu0 %v16195_v43  ;;  %v13809_v40 = vld [vmem:[#allocation8 + $0x5d0] ss:$72 sps:$4 sm:$0xff]  }
 0x407   : > { %8625 = vmatprep.subr.bf16.mxu0 %v13805_v5  ;;  %v13817_v5 = vld [vmem:[#allocation8 + $0x664] ss:$72 sps:$4 sm:$0xff]  }
 0x408   : > { %10517 = vst [vmem:[%s16423_s30 + $0xe8] sm:$0xff] %v11835_v3  ;;  %v7531_v62 = vpop.f32.mrb[40].mxu0  ;;  %8400 = vmatpush1.bf16.msra.mxu1 %v13800_v33 }
 0x409   : > { %v12086_v46 = vadd.f32 %v7531_v62, %v16648_v59  ;;  %v7533_v25 = vpop.f32.mrb[41].mxu0  ;;  %8401 = vmatprep.subr.bf16.mxu1 %v13808_v9  ;;  %v13812_v9 = vld [vmem:[#allocation8 + $0xf58] ss:$72 sps:$4 sm:$0xff]  }
 0x40a   : > { %v12087_v18 = vadd.f32 %v7533_v25, %v16654_v35  ;;  %8626 = vmatpush1.bf16.msra.mxu0 %v13803_v8  ;;  %v7535_v22 = vpop.f32.mrb[42].mxu0  ;;  %v13820_v8 = vld [vmem:[#allocation8 + $0xfec] ss:$72 sps:$4 sm:$0xff]  }
 0x40b   : > { %v12088_v39 = vadd.f32 %v7535_v22, %v16648_v59  ;;  %v7537_v63 = vpop.f32.mrb[43].mxu0  ;;  %8627 = vmatprep.subr.bf16.mxu0 %v13811_v45  ;;  %8351 = vmatmul.mubr.bf16.gmra.mrb[116].mxu1 %v15982_v49  ;;  %v13815_v45 = vld [vmem:[#allocation8 + $0x660] ss:$72 sps:$4 sm:$0xff]   ;;  %v13823_v25 = vld [vmem:[#allocation8 + $0x6f4] ss:$72 sps:$4 sm:$0xff]  }
 0x40c   : > { %v11844_v33 = vpack.c.bf16 %v12087_v18, %v12086_v46  ;;  %v12089_v3 = vadd.f32 %v7537_v63, %v16654_v35  ;;  %8402 = vmatpush1.bf16.msra.mxu1 %v13806_v0  ;;  %8360 = vmatprep.mubr.bf16.mxu1 %v16013_v51  ;;  %v13818_v18 = vld [vmem:[#allocation8 + $0xfe8] ss:$72 sps:$4 sm:$0xff]   ;;  %v13826_v63 = vld [vmem:[#allocation8 + $0x107c] ss:$72 sps:$4 sm:$0xff]  }
 0x40d   : > { %8238 = vmatmul.mubr.bf16.gmra.mrb[84].mxu0 %v16207_v12  ;;  %8403 = vmatprep.subr.bf16.mxu1 %v13814_v1 }
 0x40e   : > { %10526 = vst [vmem:[%s16423_s30 + $0x130] sm:$0xff] %v11844_v33  ;;  %v11853_v62 = vpack.c.bf16 %v12089_v3, %v12088_v39  ;;  %8628 = vmatpush1.bf16.msra.mxu0 %v13809_v40  ;;  %8247 = vmatprep.mubr.bf16.mxu0 %v16224_v14  ;;  %v13821_v40 = vld [vmem:[#allocation8 + $0x6f0] ss:$72 sps:$4 sm:$0xff]  }
 0x40f   : > { %8629 = vmatprep.subr.bf16.mxu0 %v13817_v5  ;;  %v13829_v5 = vld [vmem:[#allocation8 + $0x784] ss:$72 sps:$4 sm:$0xff]  }
 0x410   : > { %10535 = vst [vmem:[%s16423_s30 + $0x178] sm:$0xff] %v11853_v62  ;;  %v7541_v46 = vpop.f32.mrb[44].mxu0  ;;  %8404 = vmatpush1.bf16.msra.mxu1 %v13812_v9 }
 0x411   : > { %v12090_v0 = vadd.f32 %v7541_v46, %v16648_v59  ;;  %v7543_v22 = vpop.f32.mrb[45].mxu0  ;;  %8405 = vmatprep.subr.bf16.mxu1 %v13820_v8  ;;  %v13824_v8 = vld [vmem:[#allocation8 + $0x1078] ss:$72 sps:$4 sm:$0xff]  }
 0x412   : > { %v12091_v1 = vadd.f32 %v7543_v22, %v16654_v35  ;;  %8630 = vmatpush1.bf16.msra.mxu0 %v13815_v45  ;;  %v7545_v39 = vpop.f32.mrb[46].mxu0  ;;  %v13832_v45 = vld [vmem:[#allocation8 + $0x110c] ss:$72 sps:$4 sm:$0xff]  }
 0x413   : > { %v12092_v33 = vadd.f32 %v7545_v39, %v16648_v59  ;;  %v7547_v3 = vpop.f32.mrb[47].mxu0  ;;  %8631 = vmatprep.subr.bf16.mxu0 %v13823_v25  ;;  %8361 = vmatmul.mubr.bf16.gmra.mrb[120].mxu1 %v16026_v2  ;;  %v13827_v25 = vld [vmem:[#allocation8 + $0x780] ss:$72 sps:$4 sm:$0xff]   ;;  %v13835_v22 = vld [vmem:[#allocation8 + $0x814] ss:$72 sps:$4 sm:$0xff]  }
 0x414   : > { %v11862_v9 = vpack.c.bf16 %v12091_v1, %v12090_v0  ;;  %v12093_v62 = vadd.f32 %v7547_v3, %v16654_v35  ;;  %8406 = vmatpush1.bf16.msra.mxu1 %v13818_v18  ;;  %8370 = vmatprep.mubr.bf16.mxu1 %v16059_v21  ;;  %v13830_v1 = vld [vmem:[#allocation8 + $0x1108] ss:$72 sps:$4 sm:$0xff]   ;;  %v13838_v3 = vld [vmem:[#allocation8 + $0x119c] ss:$72 sps:$4 sm:$0xff]  }
 0x415   : > { %8248 = vmatmul.mubr.bf16.gmra.mrb[88].mxu0 %v16233_v56  ;;  %8407 = vmatprep.subr.bf16.mxu1 %v13826_v63 }
 0x416   : > { %10544 = vst [vmem:[%s16423_s30 + $0x1c0] sm:$0xff] %v11862_v9  ;;  %v11871_v46 = vpack.c.bf16 %v12093_v62, %v12092_v33  ;;  %8632 = vmatpush1.bf16.msra.mxu0 %v13821_v40  ;;  %8257 = vmatprep.mubr.bf16.mxu0 %v16235_v23  ;;  %v13833_v40 = vld [vmem:[#allocation8 + $0x810] ss:$72 sps:$4 sm:$0xff]  }
 0x417   : > { %8633 = vmatprep.subr.bf16.mxu0 %v13829_v5  ;;  %v13841_v5 = vld [vmem:[#allocation8 + $0x8a4] ss:$72 sps:$4 sm:$0xff]  }
 0x418   : > { %10553 = vst [vmem:[%s16423_s30 + $0x208] sm:$0xff] %v11871_v46  ;;  %v7551_v0 = vpop.f32.mrb[48].mxu0  ;;  %8408 = vmatpush1.bf16.msra.mxu1 %v13824_v8 }
 0x419   : > { %v12094_v18 = vadd.f32 %v7551_v0, %v16648_v59  ;;  %v7553_v39 = vpop.f32.mrb[49].mxu0  ;;  %8409 = vmatprep.subr.bf16.mxu1 %v13832_v45  ;;  %v13836_v45 = vld [vmem:[#allocation8 + $0x1198] ss:$72 sps:$4 sm:$0xff]  }
 0x41a   : > { %v12095_v63 = vadd.f32 %v7553_v39, %v16654_v35  ;;  %8634 = vmatpush1.bf16.msra.mxu0 %v13827_v25  ;;  %v7555_v33 = vpop.f32.mrb[50].mxu0  ;;  %v13844_v25 = vld [vmem:[#allocation8 + $0x122c] ss:$72 sps:$4 sm:$0xff]  }
 0x41b   : > { %v12096_v9 = vadd.f32 %v7555_v33, %v16648_v59  ;;  %v7557_v62 = vpop.f32.mrb[51].mxu0  ;;  %8635 = vmatprep.subr.bf16.mxu0 %v13835_v22  ;;  %8371 = vmatmul.mubr.bf16.gmra.mrb[124].mxu1 %v16073_v31  ;;  %v13839_v22 = vld [vmem:[#allocation8 + $0x8a0] ss:$72 sps:$4 sm:$0xff]   ;;  %v13847_v39 = vld [vmem:[#allocation8 + $0x934] ss:$72 sps:$4 sm:$0xff]  }
 0x41c   : > { %v11880_v8 = vpack.c.bf16 %v12095_v63, %v12094_v18  ;;  %v12097_v46 = vadd.f32 %v7557_v62, %v16654_v35  ;;  %8410 = vmatpush1.bf16.msra.mxu1 %v13830_v1  ;;  %8413 = vmatprep.mubr.bf16.mxu1 %v17723_v54  ;;  %v13842_v63 = vld [vmem:[#allocation8 + $0x1228] ss:$72 sps:$4 sm:$0xff]   ;;  %v13850_v62 = vld [vmem:[#allocation8 + $0x12bc] ss:$72 sps:$4 sm:$0xff]  }
 0x41d   : > { %8258 = vmatmul.mubr.bf16.gmra.mrb[92].mxu0 %v16239_v29  ;;  %8411 = vmatprep.subr.bf16.mxu1 %v13838_v3 }
 0x41e   : > { %10562 = vst [vmem:[%s16423_s30 + $0x250] sm:$0xff] %v11880_v8  ;;  %v11889_v0 = vpack.c.bf16 %v12097_v46, %v12096_v9  ;;  %8636 = vmatpush1.bf16.msra.mxu0 %v13833_v40  ;;  %8639 = vmatprep.mubr.bf16.mxu0 %v17724_v28  ;;  %v13845_v40 = vld [vmem:[#allocation8 + $0x930] ss:$72 sps:$4 sm:$0xff]  }
 0x41f   : > { %8637 = vmatprep.subr.bf16.mxu0 %v13841_v5  ;;  %v13853_v5 = vld [vmem:[#allocation8 + $0x9c4] ss:$72 sps:$4 sm:$0xff]  }
 0x420   : > { %10571 = vst [vmem:[%s16423_s30 + $0x298] sm:$0xff] %v11889_v0  ;;  %v7561_v18 = vpop.f32.mrb[52].mxu0  ;;  %8412 = vmatpush1.bf16.msra.mxu1 %v13836_v45 }
 0x421   : > { %v12098_v1 = vadd.f32 %v7561_v18, %v16648_v59  ;;  %v7563_v33 = vpop.f32.mrb[53].mxu0  ;;  %8494 = vmatprep.subr.bf16.mxu1 %v13844_v25  ;;  %v13848_v25 = vld [vmem:[#allocation8 + $0x12b8] ss:$72 sps:$4 sm:$0xff]  }
 0x422   : > { %v12099_v3 = vadd.f32 %v7563_v33, %v16654_v35  ;;  %8638 = vmatpush1.bf16.msra.mxu0 %v13839_v22  ;;  %v7565_v9 = vpop.f32.mrb[54].mxu0  ;;  %v13856_v22 = vld [vmem:[#allocation8 + $0x134c] ss:$72 sps:$4 sm:$0xff]  }
 0x423   : > { %v12100_v8 = vadd.f32 %v7565_v9, %v16648_v59  ;;  %v7567_v46 = vpop.f32.mrb[55].mxu0  ;;  %8720 = vmatprep.subr.bf16.mxu0 %v13847_v39  ;;  %8414 = vmatmul.mubr.bf16.vlgmr.msra.gmra.mrb[96].mxu1 %v17725_v7  ;;  %v13851_v39 = vld [vmem:[#allocation8 + $0x9c0] ss:$72 sps:$4 sm:$0xff]   ;;  %v13859_v33 = vld [vmem:[#allocation8 + $0xa54] ss:$72 sps:$4 sm:$0xff]  }
 0x424   : > { %v11898_v45 = vpack.c.bf16 %v12099_v3, %v12098_v1  ;;  %v12101_v0 = vadd.f32 %v7567_v46, %v16654_v35  ;;  %8495 = vmatpush1.bf16.msra.mxu1 %v13842_v63  ;;  %8423 = vmatprep.mubr.bf16.mxu1 %v17726_v30  ;;  %v13854_v3 = vld [vmem:[#allocation8 + $0x1348] ss:$72 sps:$4 sm:$0xff]   ;;  %v13862_v46 = vld [vmem:[#allocation8 + $0x13dc] ss:$72 sps:$4 sm:$0xff]  }
 0x425   : > { %8640 = vmatmul.mubr.bf16.vlgmr.msra.gmra.mrb[96].mxu0 %v17727_v13  ;;  %8496 = vmatprep.subr.bf16.mxu1 %v13850_v62 }
 0x426   : > { %10580 = vst [vmem:[%s16423_s30 + $0x2e0] sm:$0xff] %v11898_v45  ;;  %v11907_v18 = vpack.c.bf16 %v12101_v0, %v12100_v8  ;;  %8721 = vmatpush1.bf16.msra.mxu0 %v13845_v40  ;;  %8649 = vmatprep.mubr.bf16.mxu0 %v17728_v19  ;;  %v13857_v40 = vld [vmem:[#allocation8 + $0xa50] ss:$72 sps:$4 sm:$0xff]  }
 0x427   : > { %8722 = vmatprep.subr.bf16.mxu0 %v13853_v5  ;;  %v13865_v5 = vld [vmem:[#allocation8 + $0xae4] ss:$72 sps:$4 sm:$0xff]  }
 0x428   : > { %10589 = vst [vmem:[%s16423_s30 + $0x328] sm:$0xff] %v11907_v18  ;;  %v7571_v1 = vpop.f32.mrb[56].mxu0  ;;  %8497 = vmatpush1.bf16.msra.mxu1 %v13848_v25 }
 0x429   : > { %v12102_v63 = vadd.f32 %v7571_v1, %v16648_v59  ;;  %v7573_v9 = vpop.f32.mrb[57].mxu0  ;;  %8498 = vmatprep.subr.bf16.mxu1 %v13856_v22  ;;  %v13860_v22 = vld [vmem:[#allocation8 + $0x13d8] ss:$72 sps:$4 sm:$0xff]  }
 0x42a   : > { %v12103_v62 = vadd.f32 %v7573_v9, %v16654_v35  ;;  %8723 = vmatpush1.bf16.msra.mxu0 %v13851_v39  ;;  %v7575_v8 = vpop.f32.mrb[58].mxu0  ;;  %v13868_v39 = vld [vmem:[#allocation8 + $0x146c] ss:$72 sps:$4 sm:$0xff]  }
 0x42b   : > { %v12104_v45 = vadd.f32 %v7575_v8, %v16648_v59  ;;  %v7577_v0 = vpop.f32.mrb[59].mxu0  ;;  %8724 = vmatprep.subr.bf16.mxu0 %v13859_v33  ;;  %8424 = vmatmul.mubr.bf16.gmra.mrb[100].mxu1 %v17731_v17  ;;  %v13863_v33 = vld [vmem:[#allocation8 + $0xae0] ss:$72 sps:$4 sm:$0xff]   ;;  %v13871_v9 = vld [vmem:[#allocation8 + $0xb74] ss:$72 sps:$4 sm:$0xff]  }
 0x42c   : > { %v11916_v25 = vpack.c.bf16 %v12103_v62, %v12102_v63  ;;  %v12105_v18 = vadd.f32 %v7577_v0, %v16654_v35  ;;  %8499 = vmatpush1.bf16.msra.mxu1 %v13854_v3  ;;  %8433 = vmatprep.mubr.bf16.mxu1 %v17732_v53  ;;  %v13866_v62 = vld [vmem:[#allocation8 + $0x1468] ss:$72 sps:$4 sm:$0xff]   ;;  %v13874_v0 = vld [vmem:[#allocation8 + $0x14fc] ss:$72 sps:$4 sm:$0xff]  }
 0x42d   : > { %8650 = vmatmul.mubr.bf16.gmra.mrb[100].mxu0 %v17733_v50  ;;  %8500 = vmatprep.subr.bf16.mxu1 %v13862_v46 }
 0x42e   : > { %10598 = vst [vmem:[%s16423_s30 + $0x370] sm:$0xff] %v11916_v25  ;;  %v11925_v1 = vpack.c.bf16 %v12105_v18, %v12104_v45  ;;  %8725 = vmatpush1.bf16.msra.mxu0 %v13857_v40  ;;  %8659 = vmatprep.mubr.bf16.mxu0 %v17734_v55  ;;  %v13869_v40 = vld [vmem:[#allocation8 + $0xb70] ss:$72 sps:$4 sm:$0xff]  }
 0x42f   : > { %8726 = vmatprep.subr.bf16.mxu0 %v13865_v5  ;;  %v17764_v5 = vld [vmem:[#allocation99_spill] sm:$0xff] }
 0x430   : > { %10607 = vst [vmem:[%s16423_s30 + $0x3b8] sm:$0xff] %v11925_v1  ;;  %v7581_v63 = vpop.f32.mrb[60].mxu0  ;;  %8501 = vmatpush1.bf16.msra.mxu1 %v13860_v22  ;;  %v13877_v1 = vld [vmem:[#allocation8 + $0xc04] ss:$72 sps:$4 sm:$0xff]   ;;  %v13872_v55 = vld [vmem:[#allocation8 + $0x14f8] ss:$72 sps:$4 sm:$0xff]  }
 0x431   : > { %v12106_v3 = vadd.f32 %v7581_v63, %v16648_v59  ;;  %v7583_v8 = vpop.f32.mrb[61].mxu0  ;;  %8502 = vmatprep.subr.bf16.mxu1 %v13868_v39  ;;  %v17765_v39 = vld [vmem:[#allocation29_spill] sm:$0xff] }
 0x432   : > { %v12107_v46 = vadd.f32 %v7583_v8, %v16654_v35  ;;  %8727 = vmatpush1.bf16.msra.mxu0 %v13863_v33  ;;  %v7585_v45 = vpop.f32.mrb[62].mxu0  ;;  %v13880_v33 = vld [vmem:[#allocation8 + $0x158c] ss:$72 sps:$4 sm:$0xff]  }
 0x433   : > { %v12108_v25 = vadd.f32 %v7585_v45, %v16648_v59  ;;  %v7587_v18 = vpop.f32.mrb[63].mxu0  ;;  %8728 = vmatprep.subr.bf16.mxu0 %v13871_v9  ;;  %8434 = vmatmul.mubr.bf16.gmra.mrb[104].mxu1 %v17764_v5  ;;  %v13875_v59 = vld [vmem:[#allocation8 + $0xc00] ss:$72 sps:$4 sm:$0xff]   ;;  %v13883_v9 = vld [vmem:[#allocation8 + $0xc94] ss:$72 sps:$4 sm:$0xff]  }
 0x434   : > { %v11934_v22 = vpack.c.bf16 %v12107_v46, %v12106_v3  ;;  %v12109_v63 = vadd.f32 %v7587_v18, %v16654_v35  ;;  %8503 = vmatpush1.bf16.msra.mxu1 %v13866_v62  ;;  %8443 = vmatprep.mubr.bf16.mxu1 %v17765_v39  ;;  %v13878_v3 = vld [vmem:[#allocation8 + $0x1588] ss:$72 sps:$4 sm:$0xff]   ;;  %v13886_v35 = vld [vmem:[#allocation8 + $0x161c] ss:$72 sps:$4 sm:$0xff]   ;;  %v13884_v46 = vld [vmem:[#allocation8 + $0x1618] ss:$72 sps:$4 sm:$0xff]  }
 0x435   : > { %8660 = vmatmul.mubr.bf16.gmra.mrb[104].mxu0 %v17741_v38  ;;  %8504 = vmatprep.subr.bf16.mxu1 %v13874_v0  ;;  %v13881_v62 = vld [vmem:[#allocation8 + $0xc90] ss:$72 sps:$4 sm:$0xff]   ;;  %v13889_v0 = vld [vmem:[#allocation8 + $0xd24] ss:$72 sps:$4 sm:$0xff]  }
 0x436   : > { %10616 = vst [vmem:[%s16423_s30 + $0x400] sm:$0xff] %v11934_v22  ;;  %v11943_v8 = vpack.c.bf16 %v12109_v63, %v12108_v25  ;;  %8729 = vmatpush1.bf16.msra.mxu0 %v13869_v40  ;;  %8669 = vmatprep.mubr.bf16.mxu0 %v17742_v24  ;;  %v13892_v45 = vld [vmem:[#allocation8 + $0x16ac] ss:$72 sps:$4 sm:$0xff]   ;;  %v13890_v25 = vld [vmem:[#allocation8 + $0x16a8] ss:$72 sps:$4 sm:$0xff]  }
 0x437   : > { %8730 = vmatprep.subr.bf16.mxu0 %v13877_v1  ;;  %v13895_v40 = vld [vmem:[#allocation8 + $0xdb4] ss:$72 sps:$4 sm:$0xff]   ;;  %v13893_v1 = vld [vmem:[#allocation8 + $0xdb0] ss:$72 sps:$4 sm:$0xff]   ;;  %v13901_v22 = vld [vmem:[#allocation8 + $0xe44] ss:$72 sps:$4 sm:$0xff]  }
 0x438   : > { %10625 = vst [vmem:[%s16423_s30 + $0x448] sm:$0xff] %v11943_v8  ;;  %8505 = vmatpush1.bf16.msra.mxu1 %v13872_v55  ;;  %v13887_v55 = vld [vmem:[#allocation8 + $0xd20] ss:$72 sps:$4 sm:$0xff]   ;;  %v13898_v18 = vld [vmem:[#allocation8 + $0x173c] ss:$72 sps:$4 sm:$0xff]  }
 0x439   : > { %8506 = vmatprep.subr.bf16.mxu1 %v13880_v33  ;;  %v13896_v63 = vld [vmem:[#allocation8 + $0x1738] ss:$72 sps:$4 sm:$0xff]   ;;  %v13904_v33 = vld [vmem:[#allocation8 + $0x17cc] ss:$72 sps:$4 sm:$0xff]  }
 0x43a   : > { %8731 = vmatpush1.bf16.msra.mxu0 %v13875_v59  ;;  %v13899_v8 = vld [vmem:[#allocation8 + $0xe40] ss:$72 sps:$4 sm:$0xff]   ;;  %v13907_v59 = vld [vmem:[#allocation8 + $0xed4] ss:$72 sps:$4 sm:$0xff]  }
 0x43b   : > { %8732 = vmatprep.subr.bf16.mxu0 %v13883_v9  ;;  %8444 = vmatmul.mubr.bf16.gmra.mrb[108].mxu1 %v17743_v58  ;;  %v13902_v9 = vld [vmem:[#allocation8 + $0x17c8] ss:$72 sps:$4 sm:$0xff]  }
 0x43c   : > { %8507 = vmatpush1.bf16.msra.mxu1 %v13878_v3  ;;  %8453 = vmatprep.mubr.bf16.mxu1 %v17744_v61  ;;  %v13910_v3 = vld [vmem:[#allocation8 + $0x185c] ss:$72 sps:$4 sm:$0xff]  }
 0x43d   : > { %8670 = vmatmul.mubr.bf16.gmra.mrb[108].mxu0 %v15872_v26  ;;  %8508 = vmatprep.subr.bf16.mxu1 %v13886_v35  ;;  %v13905_v35 = vld [vmem:[#allocation8 + $0xed0] ss:$72 sps:$4 sm:$0xff]  }
 0x43e   : > { %8733 = vmatpush1.bf16.msra.mxu0 %v13881_v62  ;;  %8679 = vmatprep.mubr.bf16.mxu0 %v15918_v36  ;;  %v13913_v62 = vld [vmem:[#allocation8 + $0xf64] ss:$72 sps:$4 sm:$0xff]  }
 0x43f   : > { %8734 = vmatprep.subr.bf16.mxu0 %v13889_v0  ;;  %v13908_v0 = vld [vmem:[#allocation8 + $0x1858] ss:$72 sps:$4 sm:$0xff]  }
 0x440   : > { %8509 = vmatpush1.bf16.msra.mxu1 %v13884_v46  ;;  %v13916_v46 = vld [vmem:[#allocation8 + $0x18ec] ss:$72 sps:$4 sm:$0xff]  }
 0x441   : > { %8510 = vmatprep.subr.bf16.mxu1 %v13892_v45  ;;  %v13911_v45 = vld [vmem:[#allocation8 + $0xf60] ss:$72 sps:$4 sm:$0xff]  }
 0x442   : > { %8735 = vmatpush1.bf16.msra.mxu0 %v13887_v55  ;;  %v13919_v55 = vld [vmem:[#allocation8 + $0xff4] ss:$72 sps:$4 sm:$0xff]  }
 0x443   : > { %8736 = vmatprep.subr.bf16.mxu0 %v13895_v40  ;;  %8454 = vmatmul.mubr.bf16.gmra.mrb[112].mxu1 %v17745_v44  ;;  %v13914_v40 = vld [vmem:[#allocation8 + $0x18e8] ss:$72 sps:$4 sm:$0xff]  }
 0x444   : > { %8511 = vmatpush1.bf16.msra.mxu1 %v13890_v25  ;;  %8463 = vmatprep.mubr.bf16.mxu1 %v17746_v37  ;;  %v13922_v25 = vld [vmem:[#allocation8 + $0x197c] ss:$72 sps:$4 sm:$0xff]  }
 0x445   : > { %8680 = vmatmul.mubr.bf16.gmra.mrb[112].mxu0 %v15924_v57  ;;  %8512 = vmatprep.subr.bf16.mxu1 %v13898_v18  ;;  %v13917_v18 = vld [vmem:[#allocation8 + $0xff0] ss:$72 sps:$4 sm:$0xff]  }
 0x446   : > { %8737 = vmatpush1.bf16.msra.mxu0 %v13893_v1  ;;  %8689 = vmatprep.mubr.bf16.mxu0 %v15961_v15  ;;  %v13925_v1 = vld [vmem:[#allocation8 + $0x1084] ss:$72 sps:$4 sm:$0xff]  }
 0x447   : > { %8738 = vmatprep.subr.bf16.mxu0 %v13901_v22  ;;  %v13920_v22 = vld [vmem:[#allocation8 + $0x1978] ss:$72 sps:$4 sm:$0xff]  }
 0x448   : > { %8513 = vmatpush1.bf16.msra.mxu1 %v13896_v63  ;;  %v13928_v63 = vld [vmem:[#allocation8 + $0x1a0c] ss:$72 sps:$4 sm:$0xff]  }
 0x449   : > { %8514 = vmatprep.subr.bf16.mxu1 %v13904_v33  ;;  %v13923_v33 = vld [vmem:[#allocation8 + $0x1080] ss:$72 sps:$4 sm:$0xff]  }
 0x44a   : > { %8739 = vmatpush1.bf16.msra.mxu0 %v13899_v8  ;;  %v13931_v8 = vld [vmem:[#allocation8 + $0x1114] ss:$72 sps:$4 sm:$0xff]  }
 0x44b   : > { %8740 = vmatprep.subr.bf16.mxu0 %v13907_v59  ;;  %8464 = vmatmul.mubr.bf16.gmra.mrb[116].mxu1 %v17747_v6  ;;  %v13926_v59 = vld [vmem:[#allocation8 + $0x1a08] ss:$72 sps:$4 sm:$0xff]  }
 0x44c   : > { %8515 = vmatpush1.bf16.msra.mxu1 %v13902_v9  ;;  %8473 = vmatprep.mubr.bf16.mxu1 %v17748_v41  ;;  %v13934_v9 = vld [vmem:[#allocation8 + $0x1a9c] ss:$72 sps:$4 sm:$0xff]  }
 0x44d   : > { %8690 = vmatmul.mubr.bf16.gmra.mrb[116].mxu0 %v15982_v49  ;;  %8516 = vmatprep.subr.bf16.mxu1 %v13910_v3  ;;  %v13929_v3 = vld [vmem:[#allocation8 + $0x1110] ss:$72 sps:$4 sm:$0xff]  }
 0x44e   : > { %8741 = vmatpush1.bf16.msra.mxu0 %v13905_v35  ;;  %8699 = vmatprep.mubr.bf16.mxu0 %v16013_v51  ;;  %v13937_v35 = vld [vmem:[#allocation8 + $0x11a4] ss:$72 sps:$4 sm:$0xff]  }
 0x44f   : > { %8742 = vmatprep.subr.bf16.mxu0 %v13913_v62  ;;  %v13932_v62 = vld [vmem:[#allocation8 + $0x1a98] ss:$72 sps:$4 sm:$0xff]  }
 0x450   : > { %8517 = vmatpush1.bf16.msra.mxu1 %v13908_v0  ;;  %v13943_v0 = vld [vmem:[#allocation8 + $0x3c] ss:$72 sps:$4 sm:$0xff]  }
 0x451   : > { %8518 = vmatprep.subr.bf16.mxu1 %v13916_v46  ;;  %v13935_v46 = vld [vmem:[#allocation8 + $0x11a0] ss:$72 sps:$4 sm:$0xff]  }
 0x452   : > { %8743 = vmatpush1.bf16.msra.mxu0 %v13911_v45  ;;  %v13940_v45 = vld [vmem:[#allocation8 + $0x1234] ss:$72 sps:$4 sm:$0xff]  }
 0x453   : > { %8744 = vmatprep.subr.bf16.mxu0 %v13919_v55  ;;  %8474 = vmatmul.mubr.bf16.gmra.mrb[120].mxu1 %v17749_v11  ;;  %v13941_v55 = vld [vmem:[#allocation8 + $0x38] ss:$72 sps:$4 sm:$0xff]  }
 0x454   : > { %8519 = vmatpush1.bf16.msra.mxu1 %v13914_v40  ;;  %8483 = vmatprep.mubr.bf16.mxu1 %v17750_v60  ;;  %v13949_v40 = vld [vmem:[#allocation8 + $0xcc] ss:$72 sps:$4 sm:$0xff]  }
 0x455   : > { %8700 = vmatmul.mubr.bf16.gmra.mrb[120].mxu0 %v16026_v2  ;;  %8520 = vmatprep.subr.bf16.mxu1 %v13922_v25  ;;  %v13938_v25 = vld [vmem:[#allocation8 + $0x1230] ss:$72 sps:$4 sm:$0xff]  }
 0x456   : > { %8745 = vmatpush1.bf16.msra.mxu0 %v13917_v18  ;;  %8709 = vmatprep.mubr.bf16.mxu0 %v16059_v21  ;;  %v13946_v18 = vld [vmem:[#allocation8 + $0x12c4] ss:$72 sps:$4 sm:$0xff]  }
 0x457   : > { %8746 = vmatprep.subr.bf16.mxu0 %v13925_v1  ;;  %v13947_v1 = vld [vmem:[#allocation8 + $0xc8] ss:$72 sps:$4 sm:$0xff]  }
 0x458   : > { %8521 = vmatpush1.bf16.msra.mxu1 %v13920_v22  ;;  %v13955_v22 = vld [vmem:[#allocation8 + $0x15c] ss:$72 sps:$4 sm:$0xff]  }
 0x459   : > { %8522 = vmatprep.subr.bf16.mxu1 %v13928_v63  ;;  %v13944_v63 = vld [vmem:[#allocation8 + $0x12c0] ss:$72 sps:$4 sm:$0xff]  }
 0x45a   : > { %8747 = vmatpush1.bf16.msra.mxu0 %v13923_v33  ;;  %v13952_v33 = vld [vmem:[#allocation8 + $0x1354] ss:$72 sps:$4 sm:$0xff]  }
 0x45b   : > { %8748 = vmatprep.subr.bf16.mxu0 %v13931_v8  ;;  %8484 = vmatmul.mubr.bf16.gmra.mrb[124].mxu1 %v17751_v52  ;;  %v13953_v8 = vld [vmem:[#allocation8 + $0x158] ss:$72 sps:$4 sm:$0xff]  }
 0x45c   : > { %8523 = vmatpush1.bf16.msra.mxu1 %v13926_v59  ;;  %8526 = vmatprep.mubr.bf16.mxu1 %v17752_v34  ;;  %v13961_v59 = vld [vmem:[#allocation8 + $0x1ec] ss:$72 sps:$4 sm:$0xff]  }
 0x45d   : > { %8710 = vmatmul.mubr.bf16.gmra.mrb[124].mxu0 %v16073_v31  ;;  %8524 = vmatprep.subr.bf16.mxu1 %v13934_v9  ;;  %v13950_v9 = vld [vmem:[#allocation8 + $0x1350] ss:$72 sps:$4 sm:$0xff]  }
 0x45e   : > { %8749 = vmatpush1.bf16.msra.mxu0 %v13929_v3  ;;  %8752 = vmatprep.mubr.bf16.mxu0 %v17723_v54  ;;  %v13958_v3 = vld [vmem:[#allocation8 + $0x13e4] ss:$72 sps:$4 sm:$0xff]  }
 0x45f   : > { %8750 = vmatprep.subr.bf16.mxu0 %v13937_v35  ;;  %v13959_v35 = vld [vmem:[#allocation8 + $0x1e8] ss:$72 sps:$4 sm:$0xff]  }
 0x460   : > { %8525 = vmatpush1.bf16.msra.mxu1 %v13932_v62  ;;  %v13967_v62 = vld [vmem:[#allocation8 + $0x27c] ss:$72 sps:$4 sm:$0xff]  }
 0x461   : > { %8946 = vmatprep.subr.bf16.mxu1 %v13943_v0  ;;  %v13956_v0 = vld [vmem:[#allocation8 + $0x13e0] ss:$72 sps:$4 sm:$0xff]  }
 0x462   : > { %8751 = vmatpush1.bf16.msra.mxu0 %v13935_v46  ;;  %v13964_v46 = vld [vmem:[#allocation8 + $0x1474] ss:$72 sps:$4 sm:$0xff]  }
 0x463   : > { %8833 = vmatprep.subr.bf16.mxu0 %v13940_v45  ;;  %8527 = vmatmul.mubr.bf16.vlgmr.msra.gmra.mrb[96].mxu1 %v17753_v10  ;;  %v17766_v45 = vld [vmem:[#allocation77_spill] sm:$0xff] }
 0x464   : > { %8947 = vmatpush1.bf16.msra.mxu1 %v13941_v55  ;;  %8536 = vmatprep.mubr.bf16.mxu1 %v17754_v16  ;;  %v17511_v55 = vsub.s32 6, %v17766_v45 }
 0x465   : > { %8753 = vmatmul.mubr.bf16.vlgmr.msra.gmra.mrb[96].mxu0 %v17725_v7  ;;  %8948 = vmatprep.subr.bf16.mxu1 %v13949_v40  ;;  %v13965_v40 = vld [vmem:[#allocation8 + $0x278] ss:$72 sps:$4 sm:$0xff]  }
 0x466   : > { %8834 = vmatpush1.bf16.msra.mxu0 %v13938_v25  ;;  %8762 = vmatprep.mubr.bf16.mxu0 %v17726_v30  ;;  %v17510_v25 = vsub.s32 7, %v17766_v45 }
 0x467   : > { %8835 = vmatprep.subr.bf16.mxu0 %v13946_v18  ;;  %v13973_v18 = vld [vmem:[#allocation8 + $0x30c] ss:$72 sps:$4 sm:$0xff]  }
 0x468   : > { %8949 = vmatpush1.bf16.msra.mxu1 %v13947_v1  ;;  %v13962_v1 = vld [vmem:[#allocation8 + $0x1470] ss:$72 sps:$4 sm:$0xff]  }
 0x469   : > { %8950 = vmatprep.subr.bf16.mxu1 %v13955_v22  ;;  %v16770_v22 = vrot.slane %v16644_v47, %v17511_v55 }
 0x46a   : > { %8836 = vmatpush1.bf16.msra.mxu0 %v13944_v63  ;;  %v13970_v63 = vld [vmem:[#allocation8 + $0x1504] ss:$72 sps:$4 sm:$0xff]  }
 0x46b   : > { %8837 = vmatprep.subr.bf16.mxu0 %v13952_v33  ;;  %8537 = vmatmul.mubr.bf16.gmra.mrb[100].mxu1 %v17755_v42  ;;  %v17767_v33 = vld [vmem:[#allocation54_spill] sm:$0xff] }
 0x46c   : > { %8951 = vmatpush1.bf16.msra.mxu1 %v13953_v8  ;;  %8546 = vmatprep.mubr.bf16.mxu1 %v17756_v20  ;;  %v13971_v8 = vld [vmem:[#allocation8 + $0x308] ss:$72 sps:$4 sm:$0xff]  }
 0x46d   : > { %8763 = vmatmul.mubr.bf16.gmra.mrb[100].mxu0 %v17731_v17  ;;  %8952 = vmatprep.subr.bf16.mxu1 %v13961_v59  ;;  %v16776_v59 = vrot.slane %v16644_v47, %v17510_v25  ;;  %v13977_v25 = vld [vmem:[#allocation8 + $0x398] ss:$72 sps:$4 sm:$0xff]  }
 0x46e   : > { %8838 = vmatpush1.bf16.msra.mxu0 %v13950_v9  ;;  %8772 = vmatprep.mubr.bf16.mxu0 %v17732_v53  ;;  %v13979_v9 = vld [vmem:[#allocation8 + $0x39c] ss:$72 sps:$4 sm:$0xff]  }
 0x46f   : > { %8839 = vmatprep.subr.bf16.mxu0 %v13958_v3 }
 0x470   : > { %8953 = vmatpush1.bf16.msra.mxu1 %v13959_v35  ;;  %v13968_v35 = vld [vmem:[#allocation8 + $0x1500] ss:$72 sps:$4 sm:$0xff]  }
 0x471   : > { %8954 = vmatprep.subr.bf16.mxu1 %v13967_v62 }
 0x472   : > { %8840 = vmatpush1.bf16.msra.mxu0 %v13956_v0 }
 0x473   : > { %8841 = vmatprep.subr.bf16.mxu0 %v13964_v46  ;;  %8547 = vmatmul.mubr.bf16.gmra.mrb[104].mxu1 %v17757_v27  ;;  %v13976_v46 = vld [vmem:[#allocation8 + $0x1594] ss:$72 sps:$4 sm:$0xff]  }
 0x474   : > { %8955 = vmatpush1.bf16.msra.mxu1 %v13965_v40  ;;  %8556 = vmatprep.mubr.bf16.mxu1 %v17767_v33 }
 0x475   : > { %8773 = vmatmul.mubr.bf16.gmra.mrb[104].mxu0 %v17764_v5  ;;  %8956 = vmatprep.subr.bf16.mxu1 %v13973_v18 }
 0x476   : > { %8842 = vmatpush1.bf16.msra.mxu0 %v13962_v1  ;;  %8782 = vmatprep.mubr.bf16.mxu0 %v17765_v39  ;;  %v7850_v3 = vpop.f32.mrb[64].mxu1  ;;  %v13985_v1 = vld [vmem:[#allocation8 + $0x42c] ss:$72 sps:$4 sm:$0xff]  }
 0x477   : > { %v12110_v62 = vadd.f32 %v7850_v3, %v16770_v22  ;;  %8843 = vmatprep.subr.bf16.mxu0 %v13970_v63  ;;  %v7852_v0 = vpop.f32.mrb[65].mxu1  ;;  %v13974_v3 = vld [vmem:[#allocation8 + $0x1590] ss:$72 sps:$4 sm:$0xff]   ;;  %v13982_v63 = vld [vmem:[#allocation8 + $0x1624] ss:$72 sps:$4 sm:$0xff]  }
 0x478   : > { %v12111_v40 = vadd.f32 %v7852_v0, %v16776_v59  ;;  %8957 = vmatpush1.bf16.msra.mxu1 %v13971_v8  ;;  %v7854_v47 = vpop.f32.mrb[66].mxu1  ;;  %v13983_v8 = vld [vmem:[#allocation8 + $0x428] ss:$72 sps:$4 sm:$0xff]  }
 0x479   : > { %v12112_v55 = vadd.f32 %v7854_v47, %v16770_v22  ;;  %v7856_v18 = vpop.f32.mrb[67].mxu1  ;;  %8958 = vmatprep.subr.bf16.mxu1 %v13979_v9  ;;  %v13991_v9 = vld [vmem:[#allocation8 + $0x4bc] ss:$72 sps:$4 sm:$0xff]  }
 0x47a   : > { %v11809_v45 = vpack.c.bf16 %v12111_v40, %v12110_v62  ;;  %8844 = vmatpush1.bf16.msra.mxu0 %v13968_v35  ;;  %v12113_v39 = vadd.f32 %v7856_v18, %v16776_v59  ;;  %v13980_v62 = vld [vmem:[#allocation8 + $0x1620] ss:$72 sps:$4 sm:$0xff]  }
 0x47b   : > { %8845 = vmatprep.subr.bf16.mxu0 %v13976_v46  ;;  %8557 = vmatmul.mubr.bf16.gmra.mrb[108].mxu1 %v16163_v48 }
 0x47c   : > { %10491 = vst [vmem:[%s16423_s30 + $0x18] sm:$0xff] %v11809_v45  ;;  %v11818_v0 = vpack.c.bf16 %v12113_v39, %v12112_v55  ;;  %8959 = vmatpush1.bf16.msra.mxu1 %v13977_v25  ;;  %8566 = vmatprep.mubr.bf16.mxu1 %v16180_v4  ;;  %v13988_v45 = vld [vmem:[#allocation8 + $0x16b4] ss:$72 sps:$4 sm:$0xff]   ;;  %v13989_v25 = vld [vmem:[#allocation8 + $0x4b8] ss:$72 sps:$4 sm:$0xff]  }
 0x47d   : > { %8783 = vmatmul.mubr.bf16.gmra.mrb[108].mxu0 %v17743_v58  ;;  %8960 = vmatprep.subr.bf16.mxu1 %v13985_v1  ;;  %v13997_v1 = vld [vmem:[#allocation8 + $0x54c] ss:$72 sps:$4 sm:$0xff]  }
 0x47e   : > { %10500 = vst [vmem:[%s16423_s30 + $0x60] sm:$0xff] %v11818_v0  ;;  %8846 = vmatpush1.bf16.msra.mxu0 %v13974_v3  ;;  %8792 = vmatprep.mubr.bf16.mxu0 %v17744_v61  ;;  %v7860_v35 = vpop.f32.mrb[68].mxu1 }
 0x47f   : > { %v12114_v46 = vadd.f32 %v7860_v35, %v16770_v22  ;;  %8847 = vmatprep.subr.bf16.mxu0 %v13982_v63  ;;  %v7862_v40 = vpop.f32.mrb[69].mxu1  ;;  %v13986_v35 = vld [vmem:[#allocation8 + $0x16b0] ss:$72 sps:$4 sm:$0xff]   ;;  %v13994_v63 = vld [vmem:[#allocation8 + $0x1744] ss:$72 sps:$4 sm:$0xff]  }
 0x480   : > { %v12115_v39 = vadd.f32 %v7862_v40, %v16776_v59  ;;  %8961 = vmatpush1.bf16.msra.mxu1 %v13983_v8  ;;  %v7864_v55 = vpop.f32.mrb[70].mxu1  ;;  %v13995_v8 = vld [vmem:[#allocation8 + $0x548] ss:$72 sps:$4 sm:$0xff]  }
 0x481   : > { %v12116_v47 = vadd.f32 %v7864_v55, %v16770_v22  ;;  %v7866_v18 = vpop.f32.mrb[71].mxu1  ;;  %8962 = vmatprep.subr.bf16.mxu1 %v13991_v9  ;;  %v14003_v9 = vld [vmem:[#allocation8 + $0x5dc] ss:$72 sps:$4 sm:$0xff]  }
 0x482   : > { %v11827_v3 = vpack.c.bf16 %v12115_v39, %v12114_v46  ;;  %8848 = vmatpush1.bf16.msra.mxu0 %v13980_v62  ;;  %v12117_v0 = vadd.f32 %v7866_v18, %v16776_v59  ;;  %v13992_v46 = vld [vmem:[#allocation8 + $0x1740] ss:$72 sps:$4 sm:$0xff]   ;;  %v14000_v55 = vld [vmem:[#allocation8 + $0x17d4] ss:$72 sps:$4 sm:$0xff]  }
 0x483   : > { %8849 = vmatprep.subr.bf16.mxu0 %v13988_v45  ;;  %8567 = vmatmul.mubr.bf16.gmra.mrb[112].mxu1 %v16189_v32  ;;  %v14001_v18 = vld [vmem:[#allocation8 + $0x5d8] ss:$72 sps:$4 sm:$0xff]  }
 0x484   : > { %10509 = vst [vmem:[%s16423_s30 + $0xa8] sm:$0xff] %v11827_v3  ;;  %v11836_v40 = vpack.c.bf16 %v12117_v0, %v12116_v47  ;;  %8963 = vmatpush1.bf16.msra.mxu1 %v13989_v25  ;;  %8576 = vmatprep.mubr.bf16.mxu1 %v16195_v43  ;;  %v14009_v0 = vld [vmem:[#allocation8 + $0x66c] ss:$72 sps:$4 sm:$0xff]  }
 0x485   : > { %8793 = vmatmul.mubr.bf16.gmra.mrb[112].mxu0 %v17745_v44  ;;  %8964 = vmatprep.subr.bf16.mxu1 %v13997_v1 }
 0x486   : > { %10518 = vst [vmem:[%s16423_s30 + $0xf0] sm:$0xff] %v11836_v40  ;;  %8850 = vmatpush1.bf16.msra.mxu0 %v13986_v35  ;;  %8802 = vmatprep.mubr.bf16.mxu0 %v17746_v37  ;;  %v7870_v62 = vpop.f32.mrb[72].mxu1 }
 0x487   : > { %v12118_v45 = vadd.f32 %v7870_v62, %v16770_v22  ;;  %8851 = vmatprep.subr.bf16.mxu0 %v13994_v63  ;;  %v7872_v39 = vpop.f32.mrb[73].mxu1  ;;  %v13998_v62 = vld [vmem:[#allocation8 + $0x17d0] ss:$72 sps:$4 sm:$0xff]   ;;  %v14006_v63 = vld [vmem:[#allocation8 + $0x1864] ss:$72 sps:$4 sm:$0xff]  }
 0x488   : > { %v12119_v25 = vadd.f32 %v7872_v39, %v16776_v59  ;;  %8965 = vmatpush1.bf16.msra.mxu1 %v13995_v8  ;;  %v7874_v47 = vpop.f32.mrb[74].mxu1  ;;  %v14007_v8 = vld [vmem:[#allocation8 + $0x668] ss:$72 sps:$4 sm:$0xff]  }
 0x489   : > { %v12120_v1 = vadd.f32 %v7874_v47, %v16770_v22  ;;  %v7876_v3 = vpop.f32.mrb[75].mxu1  ;;  %8966 = vmatprep.subr.bf16.mxu1 %v14003_v9  ;;  %v14015_v9 = vld [vmem:[#allocation8 + $0x6fc] ss:$72 sps:$4 sm:$0xff]  }
 0x48a   : > { %v11845_v35 = vpack.c.bf16 %v12119_v25, %v12118_v45  ;;  %8852 = vmatpush1.bf16.msra.mxu0 %v13992_v46  ;;  %v12121_v40 = vadd.f32 %v7876_v3, %v16776_v59  ;;  %v14004_v45 = vld [vmem:[#allocation8 + $0x1860] ss:$72 sps:$4 sm:$0xff]   ;;  %v14012_v47 = vld [vmem:[#allocation8 + $0x18f4] ss:$72 sps:$4 sm:$0xff]  }
 0x48b   : > { %8853 = vmatprep.subr.bf16.mxu0 %v14000_v55  ;;  %8577 = vmatmul.mubr.bf16.gmra.mrb[116].mxu1 %v16207_v12  ;;  %v14013_v3 = vld [vmem:[#allocation8 + $0x6f8] ss:$72 sps:$4 sm:$0xff]  }
 0x48c   : > { %10527 = vst [vmem:[%s16423_s30 + $0x138] sm:$0xff] %v11845_v35  ;;  %v11854_v39 = vpack.c.bf16 %v12121_v40, %v12120_v1  ;;  %8967 = vmatpush1.bf16.msra.mxu1 %v14001_v18  ;;  %8586 = vmatprep.mubr.bf16.mxu1 %v16224_v14  ;;  %v14021_v40 = vld [vmem:[#allocation8 + $0x78c] ss:$72 sps:$4 sm:$0xff]  }
 0x48d   : > { %8803 = vmatmul.mubr.bf16.gmra.mrb[116].mxu0 %v17747_v6  ;;  %8968 = vmatprep.subr.bf16.mxu1 %v14009_v0 }
 0x48e   : > { %10536 = vst [vmem:[%s16423_s30 + $0x180] sm:$0xff] %v11854_v39  ;;  %8854 = vmatpush1.bf16.msra.mxu0 %v13998_v62  ;;  %8812 = vmatprep.mubr.bf16.mxu0 %v17748_v41  ;;  %v7880_v46 = vpop.f32.mrb[76].mxu1 }
 0x48f   : > { %v12122_v55 = vadd.f32 %v7880_v46, %v16770_v22  ;;  %8855 = vmatprep.subr.bf16.mxu0 %v14006_v63  ;;  %v7882_v25 = vpop.f32.mrb[77].mxu1  ;;  %v14010_v46 = vld [vmem:[#allocation8 + $0x18f0] ss:$72 sps:$4 sm:$0xff]   ;;  %v14018_v63 = vld [vmem:[#allocation8 + $0x1984] ss:$72 sps:$4 sm:$0xff]  }
 0x490   : > { %v12123_v18 = vadd.f32 %v7882_v25, %v16776_v59  ;;  %8969 = vmatpush1.bf16.msra.mxu1 %v14007_v8  ;;  %v7884_v1 = vpop.f32.mrb[78].mxu1  ;;  %v14019_v8 = vld [vmem:[#allocation8 + $0x788] ss:$72 sps:$4 sm:$0xff]  }
 0x491   : > { %v12124_v0 = vadd.f32 %v7884_v1, %v16770_v22  ;;  %v7886_v35 = vpop.f32.mrb[79].mxu1  ;;  %8970 = vmatprep.subr.bf16.mxu1 %v14015_v9  ;;  %v14027_v9 = vld [vmem:[#allocation8 + $0x81c] ss:$72 sps:$4 sm:$0xff]  }
 0x492   : > { %v11863_v62 = vpack.c.bf16 %v12123_v18, %v12122_v55  ;;  %8856 = vmatpush1.bf16.msra.mxu0 %v14004_v45  ;;  %v12125_v39 = vadd.f32 %v7886_v35, %v16776_v59  ;;  %v14016_v55 = vld [vmem:[#allocation8 + $0x1980] ss:$72 sps:$4 sm:$0xff]   ;;  %v14024_v1 = vld [vmem:[#allocation8 + $0x1a14] ss:$72 sps:$4 sm:$0xff]  }
 0x493   : > { %8857 = vmatprep.subr.bf16.mxu0 %v14012_v47  ;;  %8587 = vmatmul.mubr.bf16.gmra.mrb[120].mxu1 %v16233_v56  ;;  %v14025_v35 = vld [vmem:[#allocation8 + $0x818] ss:$72 sps:$4 sm:$0xff]  }
 0x494   : > { %10545 = vst [vmem:[%s16423_s30 + $0x1c8] sm:$0xff] %v11863_v62  ;;  %v11872_v25 = vpack.c.bf16 %v12125_v39, %v12124_v0  ;;  %8971 = vmatpush1.bf16.msra.mxu1 %v14013_v3  ;;  %8596 = vmatprep.mubr.bf16.mxu1 %v16235_v23  ;;  %v14033_v39 = vld [vmem:[#allocation8 + $0x8ac] ss:$72 sps:$4 sm:$0xff]  }
 0x495   : > { %8813 = vmatmul.mubr.bf16.gmra.mrb[120].mxu0 %v17749_v11  ;;  %8972 = vmatprep.subr.bf16.mxu1 %v14021_v40 }
 0x496   : > { %10554 = vst [vmem:[%s16423_s30 + $0x210] sm:$0xff] %v11872_v25  ;;  %8858 = vmatpush1.bf16.msra.mxu0 %v14010_v46  ;;  %8822 = vmatprep.mubr.bf16.mxu0 %v17750_v60  ;;  %v7890_v45 = vpop.f32.mrb[80].mxu1 }
 0x497   : > { %v12126_v47 = vadd.f32 %v7890_v45, %v16770_v22  ;;  %8859 = vmatprep.subr.bf16.mxu0 %v14018_v63  ;;  %v7892_v18 = vpop.f32.mrb[81].mxu1  ;;  %v14022_v45 = vld [vmem:[#allocation8 + $0x1a10] ss:$72 sps:$4 sm:$0xff]   ;;  %v14030_v63 = vld [vmem:[#allocation8 + $0x1aa4] ss:$72 sps:$4 sm:$0xff]  }
 0x498   : > { %v12127_v3 = vadd.f32 %v7892_v18, %v16776_v59  ;;  %8973 = vmatpush1.bf16.msra.mxu1 %v14019_v8  ;;  %v7894_v0 = vpop.f32.mrb[82].mxu1  ;;  %v14031_v8 = vld [vmem:[#allocation8 + $0x8a8] ss:$72 sps:$4 sm:$0xff]  }
 0x499   : > { %v12128_v40 = vadd.f32 %v7894_v0, %v16770_v22  ;;  %v7896_v62 = vpop.f32.mrb[83].mxu1  ;;  %8974 = vmatprep.subr.bf16.mxu1 %v14027_v9  ;;  %v14036_v9 = vld [vmem:[#allocation8 + $0x93c] ss:$72 sps:$4 sm:$0xff]  }
 0x49a   : > { %v11881_v46 = vpack.c.bf16 %v12127_v3, %v12126_v47  ;;  %8860 = vmatpush1.bf16.msra.mxu0 %v14016_v55  ;;  %v12129_v25 = vadd.f32 %v7896_v62, %v16776_v59  ;;  %v14028_v47 = vld [vmem:[#allocation8 + $0x1aa0] ss:$72 sps:$4 sm:$0xff]   ;;  %v14039_v0 = vld [vmem:[#allocation8 + $0x44] ss:$72 sps:$4 sm:$0xff]  }
 0x49b   : > { %8861 = vmatprep.subr.bf16.mxu0 %v14024_v1  ;;  %8597 = vmatmul.mubr.bf16.gmra.mrb[124].mxu1 %v16239_v29  ;;  %v14034_v62 = vld [vmem:[#allocation8 + $0x938] ss:$72 sps:$4 sm:$0xff]  }
 0x49c   : > { %10563 = vst [vmem:[%s16423_s30 + $0x258] sm:$0xff] %v11881_v46  ;;  %v11890_v18 = vpack.c.bf16 %v12129_v25, %v12128_v40  ;;  %8975 = vmatpush1.bf16.msra.mxu1 %v14025_v35  ;;  %8978 = vmatprep.mubr.bf16.mxu1 %v17724_v28  ;;  %v14042_v25 = vld [vmem:[#allocation8 + $0x9cc] ss:$72 sps:$4 sm:$0xff]  }
 0x49d   : > { %8823 = vmatmul.mubr.bf16.gmra.mrb[124].mxu0 %v17751_v52  ;;  %8976 = vmatprep.subr.bf16.mxu1 %v14033_v39 }
 0x49e   : > { %10572 = vst [vmem:[%s16423_s30 + $0x2a0] sm:$0xff] %v11890_v18  ;;  %8862 = vmatpush1.bf16.msra.mxu0 %v14022_v45  ;;  %8865 = vmatprep.mubr.bf16.mxu0 %v17752_v34  ;;  %v7900_v55 = vpop.f32.mrb[84].mxu1 }
 0x49f   : > { %v12130_v1 = vadd.f32 %v7900_v55, %v16770_v22  ;;  %8863 = vmatprep.subr.bf16.mxu0 %v14030_v63  ;;  %v7902_v3 = vpop.f32.mrb[85].mxu1  ;;  %v14037_v55 = vld [vmem:[#allocation8 + $0x40] ss:$72 sps:$4 sm:$0xff]   ;;  %v14045_v63 = vld [vmem:[#allocation8 + $0xd4] ss:$72 sps:$4 sm:$0xff]  }
 0x4a0   : > { %v12131_v35 = vadd.f32 %v7902_v3, %v16776_v59  ;;  %8977 = vmatpush1.bf16.msra.mxu1 %v14031_v8  ;;  %v7904_v40 = vpop.f32.mrb[86].mxu1  ;;  %v14040_v8 = vld [vmem:[#allocation8 + $0x9c8] ss:$72 sps:$4 sm:$0xff]  }
 0x4a1   : > { %v12132_v39 = vadd.f32 %v7904_v40, %v16770_v22  ;;  %v7906_v46 = vpop.f32.mrb[87].mxu1  ;;  %9059 = vmatprep.subr.bf16.mxu1 %v14036_v9  ;;  %v14048_v9 = vld [vmem:[#allocation8 + $0xa5c] ss:$72 sps:$4 sm:$0xff]  }
 0x4a2   : > { %v11899_v45 = vpack.c.bf16 %v12131_v35, %v12130_v1  ;;  %8864 = vmatpush1.bf16.msra.mxu0 %v14028_v47  ;;  %v12133_v18 = vadd.f32 %v7906_v46, %v16776_v59  ;;  %v14043_v1 = vld [vmem:[#allocation8 + $0xd0] ss:$72 sps:$4 sm:$0xff]   ;;  %v14051_v40 = vld [vmem:[#allocation8 + $0x164] ss:$72 sps:$4 sm:$0xff]  }
 0x4a3   : > { %9285 = vmatprep.subr.bf16.mxu0 %v14039_v0  ;;  %8979 = vmatmul.mubr.bf16.vlgmr.msra.gmra.mrb[128].mxu1 %v17727_v13  ;;  %v14046_v46 = vld [vmem:[#allocation8 + $0xa58] ss:$72 sps:$4 sm:$0xff]  }
 0x4a4   : > { %10581 = vst [vmem:[%s16423_s30 + $0x2e8] sm:$0xff] %v11899_v45  ;;  %v11908_v3 = vpack.c.bf16 %v12133_v18, %v12132_v39  ;;  %9060 = vmatpush1.bf16.msra.mxu1 %v14034_v62  ;;  %8988 = vmatprep.mubr.bf16.mxu1 %v17728_v19  ;;  %v14054_v18 = vld [vmem:[#allocation8 + $0xaec] ss:$72 sps:$4 sm:$0xff]  }
 0x4a5   : > { %8866 = vmatmul.mubr.bf16.vlgmr.msra.gmra.mrb[96].mxu0 %v17753_v10  ;;  %9061 = vmatprep.subr.bf16.mxu1 %v14042_v25 }
 0x4a6   : > { %10590 = vst [vmem:[%s16423_s30 + $0x330] sm:$0xff] %v11908_v3  ;;  %9286 = vmatpush1.bf16.msra.mxu0 %v14037_v55  ;;  %8875 = vmatprep.mubr.bf16.mxu0 %v17754_v16  ;;  %v7910_v47 = vpop.f32.mrb[88].mxu1  ;;  %v14052_v16 = vld [vmem:[#allocation8 + $0xae8] ss:$72 sps:$4 sm:$0xff]  }
 0x4a7   : > { %v12134_v0 = vadd.f32 %v7910_v47, %v16770_v22  ;;  %9287 = vmatprep.subr.bf16.mxu0 %v14045_v63  ;;  %v7912_v35 = vpop.f32.mrb[89].mxu1  ;;  %v14049_v47 = vld [vmem:[#allocation8 + $0x160] ss:$72 sps:$4 sm:$0xff]   ;;  %v14057_v63 = vld [vmem:[#allocation8 + $0x1f4] ss:$72 sps:$4 sm:$0xff]  }
 0x4a8   : > { %v12135_v62 = vadd.f32 %v7912_v35, %v16776_v59  ;;  %9062 = vmatpush1.bf16.msra.mxu1 %v14040_v8  ;;  %v7914_v39 = vpop.f32.mrb[90].mxu1  ;;  %v17768_v8 = vld [vmem:[#allocation96_spill] sm:$0xff] }
 0x4a9   : > { %v12136_v25 = vadd.f32 %v7914_v39, %v16770_v22  ;;  %v7916_v45 = vpop.f32.mrb[91].mxu1  ;;  %9063 = vmatprep.subr.bf16.mxu1 %v14048_v9  ;;  %v14060_v9 = vld [vmem:[#allocation8 + $0xb7c] ss:$72 sps:$4 sm:$0xff]  }
 0x4aa   : > { %v11917_v55 = vpack.c.bf16 %v12135_v62, %v12134_v0  ;;  %9288 = vmatpush1.bf16.msra.mxu0 %v14043_v1  ;;  %v12137_v3 = vadd.f32 %v7916_v45, %v16776_v59  ;;  %v14055_v0 = vld [vmem:[#allocation8 + $0x1f0] ss:$72 sps:$4 sm:$0xff]   ;;  %v14063_v39 = vld [vmem:[#allocation8 + $0x284] ss:$72 sps:$4 sm:$0xff]  }
 0x4ab   : > { %9289 = vmatprep.subr.bf16.mxu0 %v14051_v40  ;;  %8989 = vmatmul.mubr.bf16.gmra.mrb[132].mxu1 %v17733_v50  ;;  %v14058_v45 = vld [vmem:[#allocation8 + $0xb78] ss:$72 sps:$4 sm:$0xff]  }
 0x4ac   : > { %10599 = vst [vmem:[%s16423_s30 + $0x378] sm:$0xff] %v11917_v55  ;;  %v11926_v35 = vpack.c.bf16 %v12137_v3, %v12136_v25  ;;  %9064 = vmatpush1.bf16.msra.mxu1 %v14046_v46  ;;  %8998 = vmatprep.mubr.bf16.mxu1 %v17768_v8  ;;  %v14066_v3 = vld [vmem:[#allocation8 + $0xc0c] ss:$72 sps:$4 sm:$0xff]  }
 0x4ad   : > { %8876 = vmatmul.mubr.bf16.gmra.mrb[100].mxu0 %v17755_v42  ;;  %9065 = vmatprep.subr.bf16.mxu1 %v14054_v18 }
 0x4ae   : > { %10608 = vst [vmem:[%s16423_s30 + $0x3c0] sm:$0xff] %v11926_v35  ;;  %9290 = vmatpush1.bf16.msra.mxu0 %v14049_v47  ;;  %8885 = vmatprep.mubr.bf16.mxu0 %v17756_v20  ;;  %v7920_v1 = vpop.f32.mrb[92].mxu1 }
 0x4af   : > { %v12138_v40 = vadd.f32 %v7920_v1, %v16770_v22  ;;  %9291 = vmatprep.subr.bf16.mxu0 %v14057_v63  ;;  %v7922_v62 = vpop.f32.mrb[93].mxu1  ;;  %v14061_v1 = vld [vmem:[#allocation8 + $0x280] ss:$72 sps:$4 sm:$0xff]  }
 0x4b0   : > { %v12139_v46 = vadd.f32 %v7922_v62, %v16776_v59  ;;  %9066 = vmatpush1.bf16.msra.mxu1 %v14052_v16  ;;  %v7924_v25 = vpop.f32.mrb[94].mxu1  ;;  %v16854_v63 = vld [vmem:[#allocation10 + $0x8] sm:$0xff]  ;;  %v14069_v62 = vld [vmem:[#allocation8 + $0x314] ss:$72 sps:$4 sm:$0xff]  }
 0x4b1   : > { %v12140_v18 = vadd.f32 %v7924_v25, %v16770_v22  ;;  %v7926_v55 = vpop.f32.mrb[95].mxu1  ;;  %9067 = vmatprep.subr.bf16.mxu1 %v14060_v9  ;;  %v14064_v22 = vld [vmem:[#allocation8 + $0xc08] ss:$72 sps:$4 sm:$0xff]   ;;  %v17769_v9 = vld [vmem:[#allocation80_spill] sm:$0xff]  ;;  %v14075_v25 = vld [vmem:[#allocation8 + $0x3a4] ss:$72 sps:$4 sm:$0xff]  }
 0x4b2   : > { %v11935_v47 = vpack.c.bf16 %v12139_v46, %v12138_v40  ;;  %9292 = vmatpush1.bf16.msra.mxu0 %v14055_v0  ;;  %v12141_v35 = vadd.f32 %v7926_v55, %v16776_v59  ;;  %v16862_v0 = vrot.slane %v16854_v63, %v17769_v9  ;;  %v14072_v59 = vld [vmem:[#allocation8 + $0xc9c] ss:$72 sps:$4 sm:$0xff]   ;;  %v14067_v40 = vld [vmem:[#allocation8 + $0x310] ss:$72 sps:$4 sm:$0xff]  }
 0x4b3   : > { %9293 = vmatprep.subr.bf16.mxu0 %v14063_v39  ;;  %8999 = vmatmul.mubr.bf16.gmra.mrb[136].mxu1 %v17741_v38  ;;  %v17770_v39 = vld [vmem:[#allocation78_spill] sm:$0xff] }
 0x4b4   : > { %10617 = vst [vmem:[%s16423_s30 + $0x408] sm:$0xff] %v11935_v47  ;;  %v11944_v16 = vpack.c.bf16 %v12141_v35, %v12140_v18  ;;  %9068 = vmatpush1.bf16.msra.mxu1 %v14058_v45  ;;  %9008 = vmatprep.mubr.bf16.mxu1 %v17742_v24  ;;  %v16868_v46 = vrot.slane %v16854_v63, %v17770_v39  ;;  %v14070_v18 = vld [vmem:[#allocation8 + $0xc98] ss:$72 sps:$4 sm:$0xff]  }
 0x4b5   : > { %8886 = vmatmul.mubr.bf16.gmra.mrb[104].mxu0 %v17757_v27  ;;  %9069 = vmatprep.subr.bf16.mxu1 %v14066_v3  ;;  %v14078_v3 = vld [vmem:[#allocation8 + $0xd2c] ss:$72 sps:$4 sm:$0xff]  }
 0x4b6   : > { %10626 = vst [vmem:[%s16423_s30 + $0x450] sm:$0xff] %v11944_v16  ;;  %9294 = vmatpush1.bf16.msra.mxu0 %v14061_v1  ;;  %8895 = vmatprep.mubr.bf16.mxu0 %v17767_v33  ;;  %v14073_v16 = vld [vmem:[#allocation8 + $0x3a0] ss:$72 sps:$4 sm:$0xff]   ;;  %v14090_v33 = vld [vmem:[#allocation8 + $0xe4c] ss:$72 sps:$4 sm:$0xff]  }
 0x4b7   : > { %9295 = vmatprep.subr.bf16.mxu0 %v14069_v62  ;;  %v14081_v62 = vld [vmem:[#allocation8 + $0x434] ss:$72 sps:$4 sm:$0xff]  }
 0x4b8   : > { %v8189_v45 = vpop.f32.mrb[64].mxu0  ;;  %9070 = vmatpush1.bf16.msra.mxu1 %v14064_v22 }
 0x4b9   : > { %v12142_v55 = vadd.f32 %v8189_v45, %v16862_v0  ;;  %v8191_v47 = vpop.f32.mrb[65].mxu0  ;;  %9071 = vmatprep.subr.bf16.mxu1 %v14072_v59  ;;  %v14076_v59 = vld [vmem:[#allocation8 + $0xd28] ss:$72 sps:$4 sm:$0xff]  }
 0x4ba   : > { %v12143_v35 = vadd.f32 %v8191_v47, %v16868_v46  ;;  %9296 = vmatpush1.bf16.msra.mxu0 %v14067_v40  ;;  %v8193_v1 = vpop.f32.mrb[66].mxu0  ;;  %v14084_v40 = vld [vmem:[#allocation8 + $0xdbc] ss:$72 sps:$4 sm:$0xff]  }
 0x4bb   : > { %v12144_v9 = vadd.f32 %v8193_v1, %v16862_v0  ;;  %v8195_v39 = vpop.f32.mrb[67].mxu0  ;;  %9297 = vmatprep.subr.bf16.mxu0 %v14075_v25  ;;  %9009 = vmatmul.mubr.bf16.gmra.mrb[140].mxu1 %v15872_v26  ;;  %v14079_v25 = vld [vmem:[#allocation8 + $0x430] ss:$72 sps:$4 sm:$0xff]   ;;  %v14087_v1 = vld [vmem:[#allocation8 + $0x4c4] ss:$72 sps:$4 sm:$0xff]  }
 0x4bc   : > { %v11810_v22 = vpack.c.bf16 %v12143_v35, %v12142_v55  ;;  %v12145_v45 = vadd.f32 %v8195_v39, %v16868_v46  ;;  %9072 = vmatpush1.bf16.msra.mxu1 %v14070_v18  ;;  %9018 = vmatprep.mubr.bf16.mxu1 %v15918_v36  ;;  %v14082_v39 = vld [vmem:[#allocation8 + $0xdb8] ss:$72 sps:$4 sm:$0xff]  }
 0x4bd   : > { %8896 = vmatmul.mubr.bf16.gmra.mrb[108].mxu0 %v16163_v48  ;;  %9073 = vmatprep.subr.bf16.mxu1 %v14078_v3 }
 0x4be   : > { %10492 = vst [vmem:[%s16423_s30 + $0x20] sm:$0xff] %v11810_v22  ;;  %v11819_v47 = vpack.c.bf16 %v12145_v45, %v12144_v9  ;;  %9298 = vmatpush1.bf16.msra.mxu0 %v14073_v16  ;;  %8905 = vmatprep.mubr.bf16.mxu0 %v16180_v4  ;;  %v14085_v16 = vld [vmem:[#allocation8 + $0x4c0] ss:$72 sps:$4 sm:$0xff]  }
 0x4bf   : > { %9299 = vmatprep.subr.bf16.mxu0 %v14081_v62  ;;  %v14093_v62 = vld [vmem:[#allocation8 + $0x554] ss:$72 sps:$4 sm:$0xff]  }
 0x4c0   : > { %10501 = vst [vmem:[%s16423_s30 + $0x68] sm:$0xff] %v11819_v47  ;;  %v8199_v55 = vpop.f32.mrb[68].mxu0  ;;  %9074 = vmatpush1.bf16.msra.mxu1 %v14076_v59 }
 0x4c1   : > { %v12146_v18 = vadd.f32 %v8199_v55, %v16862_v0  ;;  %v8201_v35 = vpop.f32.mrb[69].mxu0  ;;  %9075 = vmatprep.subr.bf16.mxu1 %v14084_v40  ;;  %v14088_v40 = vld [vmem:[#allocation8 + $0xe48] ss:$72 sps:$4 sm:$0xff]  }
 0x4c2   : > { %v12147_v3 = vadd.f32 %v8201_v35, %v16868_v46  ;;  %9300 = vmatpush1.bf16.msra.mxu0 %v14079_v25  ;;  %v8203_v9 = vpop.f32.mrb[70].mxu0  ;;  %v14096_v25 = vld [vmem:[#allocation8 + $0xedc] ss:$72 sps:$4 sm:$0xff]  }
 0x4c3   : > { %v12148_v22 = vadd.f32 %v8203_v9, %v16862_v0  ;;  %v8205_v45 = vpop.f32.mrb[71].mxu0  ;;  %9301 = vmatprep.subr.bf16.mxu0 %v14087_v1  ;;  %9019 = vmatmul.mubr.bf16.gmra.mrb[144].mxu1 %v15924_v57  ;;  %v14091_v1 = vld [vmem:[#allocation8 + $0x550] ss:$72 sps:$4 sm:$0xff]   ;;  %v14099_v35 = vld [vmem:[#allocation8 + $0x5e4] ss:$72 sps:$4 sm:$0xff]  }
 0x4c4   : > { %v11828_v59 = vpack.c.bf16 %v12147_v3, %v12146_v18  ;;  %v12149_v47 = vadd.f32 %v8205_v45, %v16868_v46  ;;  %9076 = vmatpush1.bf16.msra.mxu1 %v14082_v39  ;;  %9028 = vmatprep.mubr.bf16.mxu1 %v15961_v15  ;;  %v14094_v3 = vld [vmem:[#allocation8 + $0xed8] ss:$72 sps:$4 sm:$0xff]   ;;  %v14102_v45 = vld [vmem:[#allocation8 + $0xf6c] ss:$72 sps:$4 sm:$0xff]  }
 0x4c5   : > { %8906 = vmatmul.mubr.bf16.gmra.mrb[112].mxu0 %v16189_v32  ;;  %9077 = vmatprep.subr.bf16.mxu1 %v14090_v33 }
 0x4c6   : > { %10510 = vst [vmem:[%s16423_s30 + $0xb0] sm:$0xff] %v11828_v59  ;;  %v11837_v55 = vpack.c.bf16 %v12149_v47, %v12148_v22  ;;  %9302 = vmatpush1.bf16.msra.mxu0 %v14085_v16  ;;  %8915 = vmatprep.mubr.bf16.mxu0 %v16195_v43  ;;  %v14097_v16 = vld [vmem:[#allocation8 + $0x5e0] ss:$72 sps:$4 sm:$0xff]  }
 0x4c7   : > { %9303 = vmatprep.subr.bf16.mxu0 %v14093_v62  ;;  %v14105_v62 = vld [vmem:[#allocation8 + $0x674] ss:$72 sps:$4 sm:$0xff]  }
 0x4c8   : > { %10519 = vst [vmem:[%s16423_s30 + $0xf8] sm:$0xff] %v11837_v55  ;;  %v8209_v18 = vpop.f32.mrb[72].mxu0  ;;  %9078 = vmatpush1.bf16.msra.mxu1 %v14088_v40 }
 0x4c9   : > { %v12150_v39 = vadd.f32 %v8209_v18, %v16862_v0  ;;  %v8211_v9 = vpop.f32.mrb[73].mxu0  ;;  %9079 = vmatprep.subr.bf16.mxu1 %v14096_v25  ;;  %v14100_v25 = vld [vmem:[#allocation8 + $0xf68] ss:$72 sps:$4 sm:$0xff]  }
 0x4ca   : > { %v12151_v33 = vadd.f32 %v8211_v9, %v16868_v46  ;;  %9304 = vmatpush1.bf16.msra.mxu0 %v14091_v1  ;;  %v8213_v22 = vpop.f32.mrb[74].mxu0  ;;  %v14108_v1 = vld [vmem:[#allocation8 + $0xffc] ss:$72 sps:$4 sm:$0xff]  }
 0x4cb   : > { %v12152_v59 = vadd.f32 %v8213_v22, %v16862_v0  ;;  %v8215_v47 = vpop.f32.mrb[75].mxu0  ;;  %9305 = vmatprep.subr.bf16.mxu0 %v14099_v35  ;;  %9029 = vmatmul.mubr.bf16.gmra.mrb[148].mxu1 %v15982_v49  ;;  %v14103_v35 = vld [vmem:[#allocation8 + $0x670] ss:$72 sps:$4 sm:$0xff]   ;;  %v14111_v9 = vld [vmem:[#allocation8 + $0x704] ss:$72 sps:$4 sm:$0xff]  }
 0x4cc   : > { %v11846_v40 = vpack.c.bf16 %v12151_v33, %v12150_v39  ;;  %v12153_v55 = vadd.f32 %v8215_v47, %v16868_v46  ;;  %9080 = vmatpush1.bf16.msra.mxu1 %v14094_v3  ;;  %9038 = vmatprep.mubr.bf16.mxu1 %v16013_v51  ;;  %v14106_v33 = vld [vmem:[#allocation8 + $0xff8] ss:$72 sps:$4 sm:$0xff]   ;;  %v14114_v47 = vld [vmem:[#allocation8 + $0x108c] ss:$72 sps:$4 sm:$0xff]  }
 0x4cd   : > { %8916 = vmatmul.mubr.bf16.gmra.mrb[116].mxu0 %v16207_v12  ;;  %9081 = vmatprep.subr.bf16.mxu1 %v14102_v45 }
 0x4ce   : > { %10528 = vst [vmem:[%s16423_s30 + $0x140] sm:$0xff] %v11846_v40  ;;  %v11855_v18 = vpack.c.bf16 %v12153_v55, %v12152_v59  ;;  %9306 = vmatpush1.bf16.msra.mxu0 %v14097_v16  ;;  %8925 = vmatprep.mubr.bf16.mxu0 %v16224_v14  ;;  %v14109_v16 = vld [vmem:[#allocation8 + $0x700] ss:$72 sps:$4 sm:$0xff]  }
 0x4cf   : > { %9307 = vmatprep.subr.bf16.mxu0 %v14105_v62  ;;  %v14117_v62 = vld [vmem:[#allocation8 + $0x794] ss:$72 sps:$4 sm:$0xff]  }
 0x4d0   : > { %10537 = vst [vmem:[%s16423_s30 + $0x188] sm:$0xff] %v11855_v18  ;;  %v8219_v39 = vpop.f32.mrb[76].mxu0  ;;  %9082 = vmatpush1.bf16.msra.mxu1 %v14100_v25 }
 0x4d1   : > { %v12154_v3 = vadd.f32 %v8219_v39, %v16862_v0  ;;  %v8221_v22 = vpop.f32.mrb[77].mxu0  ;;  %9083 = vmatprep.subr.bf16.mxu1 %v14108_v1  ;;  %v14112_v1 = vld [vmem:[#allocation8 + $0x1088] ss:$72 sps:$4 sm:$0xff]  }
 0x4d2   : > { %v12155_v45 = vadd.f32 %v8221_v22, %v16868_v46  ;;  %9308 = vmatpush1.bf16.msra.mxu0 %v14103_v35  ;;  %v8223_v59 = vpop.f32.mrb[78].mxu0  ;;  %v14120_v35 = vld [vmem:[#allocation8 + $0x111c] ss:$72 sps:$4 sm:$0xff]  }
 0x4d3   : > { %v12156_v40 = vadd.f32 %v8223_v59, %v16862_v0  ;;  %v8225_v55 = vpop.f32.mrb[79].mxu0  ;;  %9309 = vmatprep.subr.bf16.mxu0 %v14111_v9  ;;  %9039 = vmatmul.mubr.bf16.gmra.mrb[152].mxu1 %v16026_v2  ;;  %v14115_v9 = vld [vmem:[#allocation8 + $0x790] ss:$72 sps:$4 sm:$0xff]   ;;  %v14123_v22 = vld [vmem:[#allocation8 + $0x824] ss:$72 sps:$4 sm:$0xff]  }
 0x4d4   : > { %v11864_v25 = vpack.c.bf16 %v12155_v45, %v12154_v3  ;;  %v12157_v18 = vadd.f32 %v8225_v55, %v16868_v46  ;;  %9084 = vmatpush1.bf16.msra.mxu1 %v14106_v33  ;;  %9048 = vmatprep.mubr.bf16.mxu1 %v16059_v21  ;;  %v14118_v45 = vld [vmem:[#allocation8 + $0x1118] ss:$72 sps:$4 sm:$0xff]   ;;  %v14126_v55 = vld [vmem:[#allocation8 + $0x11ac] ss:$72 sps:$4 sm:$0xff]  }
 0x4d5   : > { %8926 = vmatmul.mubr.bf16.gmra.mrb[120].mxu0 %v16233_v56  ;;  %9085 = vmatprep.subr.bf16.mxu1 %v14114_v47 }
 0x4d6   : > { %10546 = vst [vmem:[%s16423_s30 + $0x1d0] sm:$0xff] %v11864_v25  ;;  %v11873_v39 = vpack.c.bf16 %v12157_v18, %v12156_v40  ;;  %9310 = vmatpush1.bf16.msra.mxu0 %v14109_v16  ;;  %8935 = vmatprep.mubr.bf16.mxu0 %v16235_v23  ;;  %v14121_v16 = vld [vmem:[#allocation8 + $0x820] ss:$72 sps:$4 sm:$0xff]  }
 0x4d7   : > { %9311 = vmatprep.subr.bf16.mxu0 %v14117_v62  ;;  %v14129_v62 = vld [vmem:[#allocation8 + $0x8b4] ss:$72 sps:$4 sm:$0xff]  }
 0x4d8   : > { %10555 = vst [vmem:[%s16423_s30 + $0x218] sm:$0xff] %v11873_v39  ;;  %v8229_v3 = vpop.f32.mrb[80].mxu0  ;;  %9086 = vmatpush1.bf16.msra.mxu1 %v14112_v1 }
 0x4d9   : > { %v12158_v33 = vadd.f32 %v8229_v3, %v16862_v0  ;;  %v8231_v59 = vpop.f32.mrb[81].mxu0  ;;  %9087 = vmatprep.subr.bf16.mxu1 %v14120_v35  ;;  %v14124_v35 = vld [vmem:[#allocation8 + $0x11a8] ss:$72 sps:$4 sm:$0xff]  }
 0x4da   : > { %v12159_v47 = vadd.f32 %v8231_v59, %v16868_v46  ;;  %9312 = vmatpush1.bf16.msra.mxu0 %v14115_v9  ;;  %v8233_v40 = vpop.f32.mrb[82].mxu0  ;;  %v14132_v9 = vld [vmem:[#allocation8 + $0x123c] ss:$72 sps:$4 sm:$0xff]  }
 0x4db   : > { %v12160_v25 = vadd.f32 %v8233_v40, %v16862_v0  ;;  %v8235_v18 = vpop.f32.mrb[83].mxu0  ;;  %9313 = vmatprep.subr.bf16.mxu0 %v14123_v22  ;;  %9049 = vmatmul.mubr.bf16.gmra.mrb[156].mxu1 %v16073_v31  ;;  %v14127_v22 = vld [vmem:[#allocation8 + $0x8b0] ss:$72 sps:$4 sm:$0xff]   ;;  %v14135_v59 = vld [vmem:[#allocation8 + $0x944] ss:$72 sps:$4 sm:$0xff]  }
 0x4dc   : > { %v11882_v1 = vpack.c.bf16 %v12159_v47, %v12158_v33  ;;  %v12161_v39 = vadd.f32 %v8235_v18, %v16868_v46  ;;  %9088 = vmatpush1.bf16.msra.mxu1 %v14118_v45  ;;  %9091 = vmatprep.mubr.bf16.mxu1 %v17723_v54  ;;  %v14130_v47 = vld [vmem:[#allocation8 + $0x1238] ss:$72 sps:$4 sm:$0xff]   ;;  %v14138_v18 = vld [vmem:[#allocation8 + $0x12cc] ss:$72 sps:$4 sm:$0xff]  }
 0x4dd   : > { %8936 = vmatmul.mubr.bf16.gmra.mrb[124].mxu0 %v16239_v29  ;;  %9089 = vmatprep.subr.bf16.mxu1 %v14126_v55 }
 0x4de   : > { %10564 = vst [vmem:[%s16423_s30 + $0x260] sm:$0xff] %v11882_v1  ;;  %v11891_v3 = vpack.c.bf16 %v12161_v39, %v12160_v25  ;;  %9314 = vmatpush1.bf16.msra.mxu0 %v14121_v16  ;;  %9317 = vmatprep.mubr.bf16.mxu0 %v17724_v28  ;;  %v14133_v16 = vld [vmem:[#allocation8 + $0x940] ss:$72 sps:$4 sm:$0xff]  }
 0x4df   : > { %9315 = vmatprep.subr.bf16.mxu0 %v14129_v62  ;;  %v14141_v62 = vld [vmem:[#allocation8 + $0x9d4] ss:$72 sps:$4 sm:$0xff]  }
 0x4e0   : > { %10573 = vst [vmem:[%s16423_s30 + $0x2a8] sm:$0xff] %v11891_v3  ;;  %v8239_v33 = vpop.f32.mrb[84].mxu0  ;;  %9090 = vmatpush1.bf16.msra.mxu1 %v14124_v35  ;;  %v14144_v3 = vld [vmem:[#allocation8 + $0x135c] ss:$72 sps:$4 sm:$0xff]  }
 0x4e1   : > { %v12162_v45 = vadd.f32 %v8239_v33, %v16862_v0  ;;  %v8241_v40 = vpop.f32.mrb[85].mxu0  ;;  %9172 = vmatprep.subr.bf16.mxu1 %v14132_v9  ;;  %v14136_v9 = vld [vmem:[#allocation8 + $0x12c8] ss:$72 sps:$4 sm:$0xff]   ;;  %v14147_v33 = vld [vmem:[#allocation8 + $0xa64] ss:$72 sps:$4 sm:$0xff]  }
 0x4e2   : > { %v12163_v55 = vadd.f32 %v8241_v40, %v16868_v46  ;;  %9316 = vmatpush1.bf16.msra.mxu0 %v14127_v22  ;;  %v8243_v25 = vpop.f32.mrb[86].mxu0  ;;  %v14142_v40 = vld [vmem:[#allocation8 + $0x1358] ss:$72 sps:$4 sm:$0xff]  }
 0x4e3   : > { %v12164_v28 = vadd.f32 %v8243_v25, %v16862_v0  ;;  %v8245_v1 = vpop.f32.mrb[87].mxu0  ;;  %9398 = vmatprep.subr.bf16.mxu0 %v14135_v59  ;;  %9092 = vmatmul.mubr.bf16.vlgmr.msra.gmra.mrb[128].mxu1 %v17725_v7  ;;  %v14139_v59 = vld [vmem:[#allocation8 + $0x9d0] ss:$72 sps:$4 sm:$0xff]   ;;  %v14150_v25 = vld [vmem:[#allocation8 + $0x13ec] ss:$72 sps:$4 sm:$0xff]  }
 0x4e4   : > { %v11900_v39 = vpack.c.bf16 %v12163_v55, %v12162_v45  ;;  %v12165_v35 = vadd.f32 %v8245_v1, %v16868_v46  ;;  %9173 = vmatpush1.bf16.msra.mxu1 %v14130_v47  ;;  %9101 = vmatprep.mubr.bf16.mxu1 %v17726_v30  ;;  %v14153_v1 = vld [vmem:[#allocation8 + $0xaf4] ss:$72 sps:$4 sm:$0xff]  }
 0x4e5   : > { %9318 = vmatmul.mubr.bf16.vlgmr.msra.gmra.mrb[128].mxu0 %v17727_v13  ;;  %9174 = vmatprep.subr.bf16.mxu1 %v14138_v18 }
 0x4e6   : > { %10582 = vst [vmem:[%s16423_s30 + $0x2f0] sm:$0xff] %v11900_v39  ;;  %v11909_v22 = vpack.c.bf16 %v12165_v35, %v12164_v28  ;;  %9399 = vmatpush1.bf16.msra.mxu0 %v14133_v16  ;;  %9327 = vmatprep.mubr.bf16.mxu0 %v17728_v19  ;;  %v14145_v16 = vld [vmem:[#allocation8 + $0xa60] ss:$72 sps:$4 sm:$0xff]  }
 0x4e7   : > { %9400 = vmatprep.subr.bf16.mxu0 %v14141_v62  ;;  %v14148_v35 = vld [vmem:[#allocation8 + $0x13e8] ss:$72 sps:$4 sm:$0xff]  }
 0x4e8   : > { %10591 = vst [vmem:[%s16423_s30 + $0x338] sm:$0xff] %v11909_v22  ;;  %v8249_v45 = vpop.f32.mrb[88].mxu0  ;;  %9175 = vmatpush1.bf16.msra.mxu1 %v14136_v9  ;;  %v14156_v9 = vld [vmem:[#allocation8 + $0x147c] ss:$72 sps:$4 sm:$0xff]   ;;  %v14151_v22 = vld [vmem:[#allocation8 + $0xaf0] ss:$72 sps:$4 sm:$0xff]  }
 0x4e9   : > { %v12166_v47 = vadd.f32 %v8249_v45, %v16862_v0  ;;  %v8251_v55 = vpop.f32.mrb[89].mxu0  ;;  %9176 = vmatprep.subr.bf16.mxu1 %v14144_v3  ;;  %v14154_v45 = vld [vmem:[#allocation8 + $0x1478] ss:$72 sps:$4 sm:$0xff]  }
 0x4ea   : > { %v12167_v13 = vadd.f32 %v8251_v55, %v16868_v46  ;;  %9401 = vmatpush1.bf16.msra.mxu0 %v14139_v59  ;;  %v8253_v18 = vpop.f32.mrb[90].mxu0  ;;  %v14159_v59 = vld [vmem:[#allocation8 + $0xb84] ss:$72 sps:$4 sm:$0xff]  }
 0x4eb   : > { %v12168_v19 = vadd.f32 %v8253_v18, %v16862_v0  ;;  %v8255_v28 = vpop.f32.mrb[91].mxu0  ;;  %9402 = vmatprep.subr.bf16.mxu0 %v14147_v33  ;;  %9102 = vmatmul.mubr.bf16.gmra.mrb[132].mxu1 %v17731_v17  ;;  %v14162_v55 = vld [vmem:[#allocation8 + $0x150c] ss:$72 sps:$4 sm:$0xff]  }
 0x4ec   : > { %v11918_v62 = vpack.c.bf16 %v12167_v13, %v12166_v47  ;;  %v12169_v39 = vadd.f32 %v8255_v28, %v16868_v46  ;;  %9177 = vmatpush1.bf16.msra.mxu1 %v14142_v40  ;;  %9111 = vmatprep.mubr.bf16.mxu1 %v17732_v53  ;;  %v14157_v13 = vld [vmem:[#allocation8 + $0xb80] ss:$72 sps:$4 sm:$0xff]  }
 0x4ed   : > { %9328 = vmatmul.mubr.bf16.gmra.mrb[132].mxu0 %v17733_v50  ;;  %9178 = vmatprep.subr.bf16.mxu1 %v14150_v25 }
 0x4ee   : > { %10600 = vst [vmem:[%s16423_s30 + $0x380] sm:$0xff] %v11918_v62  ;;  %v11927_v3 = vpack.c.bf16 %v12169_v39, %v12168_v19  ;;  %9403 = vmatpush1.bf16.msra.mxu0 %v14145_v16  ;;  %9337 = vmatprep.mubr.bf16.mxu0 %v17768_v8  ;;  %v14165_v16 = vld [vmem:[#allocation8 + $0xc14] ss:$72 sps:$4 sm:$0xff]   ;;  %v14160_v62 = vld [vmem:[#allocation8 + $0x1508] ss:$72 sps:$4 sm:$0xff]  }
 0x4ef   : > { %9404 = vmatprep.subr.bf16.mxu0 %v14153_v1  ;;  %v17771_v1 = vld [vmem:[#allocation29_spill] sm:$0xff] }
 0x4f0   : > { %10609 = vst [vmem:[%s16423_s30 + $0x3c8] sm:$0xff] %v11927_v3  ;;  %v8259_v33 = vpop.f32.mrb[92].mxu0  ;;  %9179 = vmatpush1.bf16.msra.mxu1 %v14148_v35  ;;  %v14168_v39 = vld [vmem:[#allocation8 + $0x159c] ss:$72 sps:$4 sm:$0xff]   ;;  %v14166_v3 = vld [vmem:[#allocation8 + $0x1598] ss:$72 sps:$4 sm:$0xff]  }
 0x4f1   : > { %v12170_v40 = vadd.f32 %v8259_v33, %v16862_v0  ;;  %v8261_v47 = vpop.f32.mrb[93].mxu0  ;;  %9180 = vmatprep.subr.bf16.mxu1 %v14156_v9  ;;  %v14171_v9 = vld [vmem:[#allocation8 + $0xca4] ss:$72 sps:$4 sm:$0xff]   ;;  %v14175_v33 = vld [vmem:[#allocation8 + $0xd30] ss:$72 sps:$4 sm:$0xff]  }
 0x4f2   : > { %v12171_v50 = vadd.f32 %v8261_v47, %v16868_v46  ;;  %9405 = vmatpush1.bf16.msra.mxu0 %v14151_v22  ;;  %v8263_v25 = vpop.f32.mrb[94].mxu0  ;;  %v14169_v22 = vld [vmem:[#allocation8 + $0xca0] ss:$72 sps:$4 sm:$0xff]   ;;  %v14186_v47 = vld [vmem:[#allocation8 + $0x174c] ss:$72 sps:$4 sm:$0xff]  }
 0x4f3   : > { %v12172_v8 = vadd.f32 %v8263_v25, %v16862_v0  ;;  %v8265_v18 = vpop.f32.mrb[95].mxu0  ;;  %9406 = vmatprep.subr.bf16.mxu0 %v14159_v59  ;;  %9112 = vmatmul.mubr.bf16.gmra.mrb[136].mxu1 %v17764_v5  ;;  %v14163_v0 = vld [vmem:[#allocation8 + $0xc10] ss:$72 sps:$4 sm:$0xff]  }
 0x4f4   : > { %v11936_v19 = vpack.c.bf16 %v12171_v50, %v12170_v40  ;;  %v12173_v28 = vadd.f32 %v8265_v18, %v16868_v46  ;;  %9181 = vmatpush1.bf16.msra.mxu1 %v14154_v45  ;;  %9121 = vmatprep.mubr.bf16.mxu1 %v17771_v1  ;;  %v14174_v46 = vld [vmem:[#allocation8 + $0x162c] ss:$72 sps:$4 sm:$0xff]   ;;  %v14172_v59 = vld [vmem:[#allocation8 + $0x1628] ss:$72 sps:$4 sm:$0xff]   ;;  %v14178_v40 = vld [vmem:[#allocation8 + $0x16b8] ss:$72 sps:$4 sm:$0xff]  }
 0x4f5   : > { %9338 = vmatmul.mubr.bf16.gmra.mrb[136].mxu0 %v17741_v38  ;;  %9182 = vmatprep.subr.bf16.mxu1 %v14162_v55  ;;  %v14177_v38 = vld [vmem:[#allocation8 + $0xd34] ss:$72 sps:$4 sm:$0xff]   ;;  %v14183_v45 = vld [vmem:[#allocation8 + $0xdc4] ss:$72 sps:$4 sm:$0xff]   ;;  %v14181_v55 = vld [vmem:[#allocation8 + $0xdc0] ss:$72 sps:$4 sm:$0xff]  }
 0x4f6   : > { %10618 = vst [vmem:[%s16423_s30 + $0x410] sm:$0xff] %v11936_v19  ;;  %v11945_v35 = vpack.c.bf16 %v12173_v28, %v12172_v8  ;;  %9407 = vmatpush1.bf16.msra.mxu0 %v14157_v13  ;;  %9347 = vmatprep.mubr.bf16.mxu0 %v17742_v24  ;;  %v14180_v24 = vld [vmem:[#allocation8 + $0x16bc] ss:$72 sps:$4 sm:$0xff]   ;;  %v14187_v25 = vld [vmem:[#allocation8 + $0xe50] ss:$72 sps:$4 sm:$0xff]  }
 0x4f7   : > { %9408 = vmatprep.subr.bf16.mxu0 %v14165_v16  ;;  %v14189_v50 = vld [vmem:[#allocation8 + $0xe54] ss:$72 sps:$4 sm:$0xff]   ;;  %v14195_v13 = vld [vmem:[#allocation8 + $0xee4] ss:$72 sps:$4 sm:$0xff]   ;;  %v14190_v8 = vld [vmem:[#allocation8 + $0x17d8] ss:$72 sps:$4 sm:$0xff]  }
 0x4f8   : > { %10627 = vst [vmem:[%s16423_s30 + $0x458] sm:$0xff] %v11945_v35  ;;  %9183 = vmatpush1.bf16.msra.mxu1 %v14160_v62  ;;  %v14198_v18 = vld [vmem:[#allocation8 + $0x186c] ss:$72 sps:$4 sm:$0xff]   ;;  %v14193_v16 = vld [vmem:[#allocation8 + $0xee0] ss:$72 sps:$4 sm:$0xff]  }
 0x4f9   : > { %9184 = vmatprep.subr.bf16.mxu1 %v14168_v39  ;;  %v14201_v19 = vld [vmem:[#allocation8 + $0xf74] ss:$72 sps:$4 sm:$0xff]   ;;  %v14199_v28 = vld [vmem:[#allocation8 + $0xf70] ss:$72 sps:$4 sm:$0xff]   ;;  %v14207_v62 = vld [vmem:[#allocation8 + $0x1004] ss:$72 sps:$4 sm:$0xff]  }
 0x4fa   : > { %9409 = vmatpush1.bf16.msra.mxu0 %v14163_v0  ;;  %v14202_v39 = vld [vmem:[#allocation8 + $0x18f8] ss:$72 sps:$4 sm:$0xff]   ;;  %v14210_v35 = vld [vmem:[#allocation8 + $0x198c] ss:$72 sps:$4 sm:$0xff]  }
 0x4fb   : > { %9410 = vmatprep.subr.bf16.mxu0 %v14171_v9  ;;  %9122 = vmatmul.mubr.bf16.gmra.mrb[140].mxu1 %v17743_v58  ;;  %v14205_v0 = vld [vmem:[#allocation8 + $0x1000] ss:$72 sps:$4 sm:$0xff]   ;;  %v14213_v9 = vld [vmem:[#allocation8 + $0x1094] ss:$72 sps:$4 sm:$0xff]  }
 0x4fc   : > { %9185 = vmatpush1.bf16.msra.mxu1 %v14166_v3  ;;  %9131 = vmatprep.mubr.bf16.mxu1 %v17744_v61  ;;  %v14211_v3 = vld [vmem:[#allocation8 + $0x1090] ss:$72 sps:$4 sm:$0xff]  }
 0x4fd   : > { %9348 = vmatmul.mubr.bf16.gmra.mrb[140].mxu0 %v15872_v26  ;;  %9186 = vmatprep.subr.bf16.mxu1 %v14174_v46  ;;  %v14184_v26 = vld [vmem:[#allocation8 + $0x1748] ss:$72 sps:$4 sm:$0xff]   ;;  %v14219_v46 = vld [vmem:[#allocation8 + $0x1124] ss:$72 sps:$4 sm:$0xff]  }
 0x4fe   : > { %9411 = vmatpush1.bf16.msra.mxu0 %v14169_v22  ;;  %9357 = vmatprep.mubr.bf16.mxu0 %v15918_v36  ;;  %v14192_v36 = vld [vmem:[#allocation8 + $0x17dc] ss:$72 sps:$4 sm:$0xff]   ;;  %v14214_v22 = vld [vmem:[#allocation8 + $0x1a18] ss:$72 sps:$4 sm:$0xff]  }
 0x4ff   : > { %9412 = vmatprep.subr.bf16.mxu0 %v14177_v38  ;;  %v14222_v38 = vld [vmem:[#allocation8 + $0x1aac] ss:$72 sps:$4 sm:$0xff]  }
 0x500   : > { %9187 = vmatpush1.bf16.msra.mxu1 %v14172_v59  ;;  %v14217_v59 = vld [vmem:[#allocation8 + $0x1120] ss:$72 sps:$4 sm:$0xff]  }
 0x501   : > { %9188 = vmatprep.subr.bf16.mxu1 %v14180_v24  ;;  %v14225_v24 = vld [vmem:[#allocation8 + $0x11b4] ss:$72 sps:$4 sm:$0xff]  }
 0x502   : > { %9413 = vmatpush1.bf16.msra.mxu0 %v14175_v33  ;;  %v14223_v33 = vld [vmem:[#allocation8 + $0x11b0] ss:$72 sps:$4 sm:$0xff]  }
 0x503   : > { %9414 = vmatprep.subr.bf16.mxu0 %v14183_v45  ;;  %9132 = vmatmul.mubr.bf16.gmra.mrb[144].mxu1 %v17745_v44  ;;  %v14226_v45 = vld [vmem:[#allocation8 + $0x1240] ss:$72 sps:$4 sm:$0xff]  }
 0x504   : > { %9189 = vmatpush1.bf16.msra.mxu1 %v14178_v40  ;;  %9141 = vmatprep.mubr.bf16.mxu1 %v17746_v37  ;;  %v14231_v40 = vld [vmem:[#allocation8 + $0x12d4] ss:$72 sps:$4 sm:$0xff]  }
 0x505   : > { %9358 = vmatmul.mubr.bf16.gmra.mrb[144].mxu0 %v15924_v57  ;;  %9190 = vmatprep.subr.bf16.mxu1 %v14186_v47  ;;  %v14196_v57 = vld [vmem:[#allocation8 + $0x1868] ss:$72 sps:$4 sm:$0xff]  }
 0x506   : > { %9415 = vmatpush1.bf16.msra.mxu0 %v14181_v55  ;;  %9367 = vmatprep.mubr.bf16.mxu0 %v15961_v15  ;;  %v14204_v15 = vld [vmem:[#allocation8 + $0x18fc] ss:$72 sps:$4 sm:$0xff]   ;;  %v17772_v47 = vld [vmem:[#allocation55_spill] sm:$0xff] }
 0x507   : > { %9416 = vmatprep.subr.bf16.mxu0 %v14189_v50  ;;  %v14229_v55 = vld [vmem:[#allocation8 + $0x12d0] ss:$72 sps:$4 sm:$0xff]   ;;  %v14237_v50 = vld [vmem:[#allocation8 + $0x13f4] ss:$72 sps:$4 sm:$0xff]  }
 0x508   : > { %9191 = vmatpush1.bf16.msra.mxu1 %v14184_v26  ;;  %v14235_v26 = vld [vmem:[#allocation8 + $0x13f0] ss:$72 sps:$4 sm:$0xff]  }
 0x509   : > { %9192 = vmatprep.subr.bf16.mxu1 %v14192_v36  ;;  %v14243_v36 = vld [vmem:[#allocation8 + $0x1514] ss:$72 sps:$4 sm:$0xff]  }
 0x50a   : > { %9417 = vmatpush1.bf16.msra.mxu0 %v14187_v25  ;;  %v17773_v25 = vld [vmem:[#allocation81_spill] sm:$0xff] }
 0x50b   : > { %9418 = vmatprep.subr.bf16.mxu0 %v14195_v13  ;;  %9142 = vmatmul.mubr.bf16.gmra.mrb[148].mxu1 %v17747_v6  ;;  %v16981_v13 = vrot.slane %v16854_v63, %v17773_v25  ;;  %v14261_v25 = vld [vmem:[#allocation8 + $0x1874] ss:$72 sps:$4 sm:$0xff]  }
 0x50c   : > { %9193 = vmatpush1.bf16.msra.mxu1 %v14190_v8  ;;  %9151 = vmatprep.mubr.bf16.mxu1 %v17748_v41  ;;  %v14241_v8 = vld [vmem:[#allocation8 + $0x1510] ss:$72 sps:$4 sm:$0xff]  }
 0x50d   : > { %9368 = vmatmul.mubr.bf16.gmra.mrb[148].mxu0 %v15982_v49  ;;  %9194 = vmatprep.subr.bf16.mxu1 %v14198_v18  ;;  %v14208_v49 = vld [vmem:[#allocation8 + $0x1988] ss:$72 sps:$4 sm:$0xff]  }
 0x50e   : > { %9419 = vmatpush1.bf16.msra.mxu0 %v14193_v16  ;;  %9377 = vmatprep.mubr.bf16.mxu0 %v16013_v51  ;;  %v14216_v51 = vld [vmem:[#allocation8 + $0x1a1c] ss:$72 sps:$4 sm:$0xff]   ;;  %v17775_v18 = vld [vmem:[#allocation79_spill] sm:$0xff] }
 0x50f   : > { %9420 = vmatprep.subr.bf16.mxu0 %v14201_v19  ;;  %v14246_v16 = vld [vmem:[#allocation8 + $0x15a4] ss:$72 sps:$4 sm:$0xff]  }
 0x510   : > { %9195 = vmatpush1.bf16.msra.mxu1 %v14196_v57 }
 0x511   : > { %9196 = vmatprep.subr.bf16.mxu1 %v14204_v15 }
 0x512   : > { %9421 = vmatpush1.bf16.msra.mxu0 %v14199_v28 }
 0x513   : > { %9422 = vmatprep.subr.bf16.mxu0 %v14207_v62  ;;  %9152 = vmatmul.mubr.bf16.gmra.mrb[152].mxu1 %v17749_v11 }
 0x514   : > { %9197 = vmatpush1.bf16.msra.mxu1 %v14202_v39  ;;  %9161 = vmatprep.mubr.bf16.mxu1 %v17750_v60  ;;  %v14244_v39 = vld [vmem:[#allocation8 + $0x15a0] ss:$72 sps:$4 sm:$0xff]  }
 0x515   : > { %9378 = vmatmul.mubr.bf16.gmra.mrb[152].mxu0 %v16026_v2  ;;  %9198 = vmatprep.subr.bf16.mxu1 %v14210_v35  ;;  %v14220_v2 = vld [vmem:[#allocation8 + $0x1aa8] ss:$72 sps:$4 sm:$0xff]  }
 0x516   : > { %9423 = vmatpush1.bf16.msra.mxu0 %v14205_v0  ;;  %9387 = vmatprep.mubr.bf16.mxu0 %v16059_v21  ;;  %v14228_v21 = vld [vmem:[#allocation8 + $0x1244] ss:$72 sps:$4 sm:$0xff]  }
 0x517   : > { %9424 = vmatprep.subr.bf16.mxu0 %v14213_v9 }
 0x518   : > { %9199 = vmatpush1.bf16.msra.mxu1 %v14208_v49  ;;  %v14247_v49 = vld [vmem:[#allocation8 + $0x1630] ss:$72 sps:$4 sm:$0xff]  }
 0x519   : > { %9200 = vmatprep.subr.bf16.mxu1 %v14216_v51  ;;  %v14252_v51 = vld [vmem:[#allocation8 + $0x16c4] ss:$72 sps:$4 sm:$0xff]  }
 0x51a   : > { %9425 = vmatpush1.bf16.msra.mxu0 %v14211_v3 }
 0x51b   : > { %9426 = vmatprep.subr.bf16.mxu0 %v14219_v46  ;;  %9162 = vmatmul.mubr.bf16.gmra.mrb[156].mxu1 %v17751_v52 }
 0x51c   : > { %9201 = vmatpush1.bf16.msra.mxu1 %v14214_v22  ;;  %9204 = vmatprep.mubr.bf16.mxu1 %v17752_v34 }
 0x51d   : > { %9388 = vmatmul.mubr.bf16.gmra.mrb[156].mxu0 %v16073_v31  ;;  %9202 = vmatprep.subr.bf16.mxu1 %v14222_v38  ;;  %v14234_v31 = vld [vmem:[#allocation8 + $0x1364] ss:$72 sps:$4 sm:$0xff]  }
 0x51e   : > { %9427 = vmatpush1.bf16.msra.mxu0 %v14217_v59  ;;  %9430 = vmatprep.mubr.bf16.mxu0 %v17723_v54  ;;  %v14232_v54 = vld [vmem:[#allocation8 + $0x1360] ss:$72 sps:$4 sm:$0xff]  }
 0x51f   : > { %9428 = vmatprep.subr.bf16.mxu0 %v14225_v24  ;;  %v14250_v24 = vld [vmem:[#allocation8 + $0x16c0] ss:$72 sps:$4 sm:$0xff]  }
 0x520   : > { %9203 = vmatpush1.bf16.msra.mxu1 %v14220_v2 }
 0x521   : > { %11950 = vmatprep.subr.bf16.mxu1 %v14228_v21 }
 0x522   : > { %9429 = vmatpush1.bf16.msra.mxu0 %v14223_v33 }
 0x523   : > { %9511 = vmatprep.subr.bf16.mxu0 %v14228_v21  ;;  %9205 = vmatmul.mubr.bf16.vlgmr.msra.gmra.mrb[128].mxu1 %v17753_v10  ;;  %v14255_v21 = vld [vmem:[#allocation8 + $0x1754] ss:$72 sps:$4 sm:$0xff]  }
 0x524   : > { %11966 = vmatpush1.bf16.msra.mxu1 %v14226_v45  ;;  %9214 = vmatprep.mubr.bf16.mxu1 %v17772_v47 }
 0x525   : > { %9431 = vmatmul.mubr.bf16.vlgmr.msra.gmra.mrb[128].mxu0 %v17725_v7  ;;  %11951 = vmatprep.subr.bf16.mxu1 %v14231_v40  ;;  %v14240_v7 = vld [vmem:[#allocation8 + $0x1484] ss:$72 sps:$4 sm:$0xff]  }
 0x526   : > { %9512 = vmatpush1.bf16.msra.mxu0 %v14226_v45  ;;  %9440 = vmatprep.mubr.bf16.mxu0 %v17726_v30  ;;  %v14238_v30 = vld [vmem:[#allocation8 + $0x1480] ss:$72 sps:$4 sm:$0xff]  }
 0x527   : > { %9513 = vmatprep.subr.bf16.mxu0 %v14231_v40  ;;  %v14253_v40 = vld [vmem:[#allocation8 + $0x1750] ss:$72 sps:$4 sm:$0xff]  }
 0x528   : > { %11967 = vmatpush1.bf16.msra.mxu1 %v14229_v55 }
 0x529   : > { %11952 = vmatprep.subr.bf16.mxu1 %v14234_v31 }
 0x52a   : > { %9514 = vmatpush1.bf16.msra.mxu0 %v14229_v55  ;;  %v14258_v55 = vld [vmem:[#allocation8 + $0x17e4] ss:$72 sps:$4 sm:$0xff]  }
 0x52b   : > { %9515 = vmatprep.subr.bf16.mxu0 %v14234_v31  ;;  %9215 = vmatmul.mubr.bf16.gmra.mrb[132].mxu1 %v17755_v42 }
 0x52c   : > { %11968 = vmatpush1.bf16.msra.mxu1 %v14232_v54  ;;  %9224 = vmatprep.mubr.bf16.mxu1 %v17756_v20 }
 0x52d   : > { %9441 = vmatmul.mubr.bf16.gmra.mrb[132].mxu0 %v17731_v17  ;;  %11953 = vmatprep.subr.bf16.mxu1 %v14237_v50  ;;  %v17774_v17 = vld [vmem:[#allocation54_spill] sm:$0xff] }
 0x52e   : > { %9516 = vmatpush1.bf16.msra.mxu0 %v14232_v54  ;;  %9450 = vmatprep.mubr.bf16.mxu0 %v17732_v53  ;;  %v16986_v53 = vrot.slane %v16854_v63, %v17775_v18 }
 0x52f   : > { %9517 = vmatprep.subr.bf16.mxu0 %v14237_v50 }
 0x530   : > { %11969 = vmatpush1.bf16.msra.mxu1 %v14235_v26 }
 0x531   : > { %11954 = vmatprep.subr.bf16.mxu1 %v14240_v7 }
 0x532   : > { %9518 = vmatpush1.bf16.msra.mxu0 %v14235_v26 }
 0x533   : > { %9519 = vmatprep.subr.bf16.mxu0 %v14240_v7  ;;  %9225 = vmatmul.mubr.bf16.gmra.mrb[136].mxu1 %v17757_v27 }
 0x534   : > { %11970 = vmatpush1.bf16.msra.mxu1 %v14238_v30  ;;  %9234 = vmatprep.mubr.bf16.mxu1 %v17774_v17 }
 0x535   : > { %9451 = vmatmul.mubr.bf16.gmra.mrb[136].mxu0 %v17764_v5  ;;  %11955 = vmatprep.subr.bf16.mxu1 %v14243_v36  ;;  %v14249_v5 = vld [vmem:[#allocation8 + $0x1634] ss:$72 sps:$4 sm:$0xff]  }
 0x536   : > { %9520 = vmatpush1.bf16.msra.mxu0 %v14238_v30  ;;  %9460 = vmatprep.mubr.bf16.mxu0 %v17771_v1  ;;  %v8528_v19 = vpop.f32.mrb[96].mxu1  ;;  %v14256_v30 = vld [vmem:[#allocation8 + $0x17e0] ss:$72 sps:$4 sm:$0xff]  }
 0x537   : > { %v12174_v57 = vadd.f32 %v8528_v19, %v16981_v13  ;;  %9521 = vmatprep.subr.bf16.mxu0 %v14243_v36  ;;  %v8530_v15 = vpop.f32.mrb[97].mxu1  ;;  %v14264_v19 = vld [vmem:[#allocation8 + $0x1904] ss:$72 sps:$4 sm:$0xff]  }
 0x538   : > { %v12175_v28 = vadd.f32 %v8530_v15, %v16986_v53  ;;  %11971 = vmatpush1.bf16.msra.mxu1 %v14241_v8  ;;  %v8532_v62 = vpop.f32.mrb[98].mxu1 }
 0x539   : > { %v12176_v63 = vadd.f32 %v8532_v62, %v16981_v13  ;;  %v8534_v35 = vpop.f32.mrb[99].mxu1  ;;  %11956 = vmatprep.subr.bf16.mxu1 %v14246_v16 }
 0x53a   : > { %v11811_v0 = vpack.c.bf16 %v12175_v28, %v12174_v57  ;;  %9522 = vmatpush1.bf16.msra.mxu0 %v14241_v8  ;;  %v12177_v1 = vadd.f32 %v8534_v35, %v16986_v53 }
 0x53b   : > { %9523 = vmatprep.subr.bf16.mxu0 %v14246_v16  ;;  %9235 = vmatmul.mubr.bf16.gmra.mrb[140].mxu1 %v16163_v48  ;;  %v14259_v16 = vld [vmem:[#allocation8 + $0x1870] ss:$72 sps:$4 sm:$0xff]  }
 0x53c   : > { %10493 = vst [vmem:[%s16423_s30 + $0x28] sm:$0xff] %v11811_v0  ;;  %v11820_v9 = vpack.c.bf16 %v12177_v1, %v12176_v63  ;;  %11972 = vmatpush1.bf16.msra.mxu1 %v14244_v39  ;;  %9244 = vmatprep.mubr.bf16.mxu1 %v16180_v4  ;;  %v14262_v63 = vld [vmem:[#allocation8 + $0x1900] ss:$72 sps:$4 sm:$0xff]  }
 0x53d   : > { %9461 = vmatmul.mubr.bf16.gmra.mrb[140].mxu0 %v17743_v58  ;;  %11957 = vmatprep.subr.bf16.mxu1 %v14249_v5 }
 0x53e   : > { %10502 = vst [vmem:[%s16423_s30 + $0x70] sm:$0xff] %v11820_v9  ;;  %9524 = vmatpush1.bf16.msra.mxu0 %v14244_v39  ;;  %9470 = vmatprep.mubr.bf16.mxu0 %v17744_v61  ;;  %v8538_v3 = vpop.f32.mrb[100].mxu1  ;;  %v14265_v9 = vld [vmem:[#allocation8 + $0x1990] ss:$72 sps:$4 sm:$0xff]  }
 0x53f   : > { %v12178_v46 = vadd.f32 %v8538_v3, %v16981_v13  ;;  %9525 = vmatprep.subr.bf16.mxu0 %v14249_v5  ;;  %v8540_v22 = vpop.f32.mrb[101].mxu1  ;;  %v14267_v5 = vld [vmem:[#allocation8 + $0x1994] ss:$72 sps:$4 sm:$0xff]  }
 0x540   : > { %v12179_v38 = vadd.f32 %v8540_v22, %v16986_v53  ;;  %11973 = vmatpush1.bf16.msra.mxu1 %v14247_v49  ;;  %v8542_v59 = vpop.f32.mrb[102].mxu1 }
 0x541   : > { %v12180_v2 = vadd.f32 %v8542_v59, %v16981_v13  ;;  %v8544_v58 = vpop.f32.mrb[103].mxu1  ;;  %11958 = vmatprep.subr.bf16.mxu1 %v14252_v51  ;;  %v14268_v59 = vld [vmem:[#allocation8 + $0x1a20] ss:$72 sps:$4 sm:$0xff]  }
 0x542   : > { %v11829_v33 = vpack.c.bf16 %v12179_v38, %v12178_v46  ;;  %9526 = vmatpush1.bf16.msra.mxu0 %v14247_v49  ;;  %v12181_v61 = vadd.f32 %v8544_v58, %v16986_v53  ;;  %v14270_v49 = vld [vmem:[#allocation8 + $0x1a24] ss:$72 sps:$4 sm:$0xff]  }
 0x543   : > { %9527 = vmatprep.subr.bf16.mxu0 %v14252_v51  ;;  %9245 = vmatmul.mubr.bf16.gmra.mrb[144].mxu1 %v16189_v32 }
 0x544   : > { %10511 = vst [vmem:[%s16423_s30 + $0xb8] sm:$0xff] %v11829_v33  ;;  %v11838_v45 = vpack.c.bf16 %v12181_v61, %v12180_v2  ;;  %11974 = vmatpush1.bf16.msra.mxu1 %v14250_v24  ;;  %9254 = vmatprep.mubr.bf16.mxu1 %v16195_v43  ;;  %v14273_v2 = vld [vmem:[#allocation8 + $0x1ab4] ss:$72 sps:$4 sm:$0xff]   ;;  %v14271_v33 = vld [vmem:[#allocation8 + $0x1ab0] ss:$72 sps:$4 sm:$0xff]  }
 0x545   : > { %9471 = vmatmul.mubr.bf16.gmra.mrb[144].mxu0 %v17745_v44  ;;  %11959 = vmatprep.subr.bf16.mxu1 %v14255_v21 }
 0x546   : > { %10520 = vst [vmem:[%s16423_s30 + $0x100] sm:$0xff] %v11838_v45  ;;  %9528 = vmatpush1.bf16.msra.mxu0 %v14250_v24  ;;  %9480 = vmatprep.mubr.bf16.mxu0 %v17746_v37  ;;  %v8548_v31 = vpop.f32.mrb[104].mxu1 }
 0x547   : > { %v12182_v54 = vadd.f32 %v8548_v31, %v16981_v13  ;;  %9529 = vmatprep.subr.bf16.mxu0 %v14255_v21  ;;  %v8550_v50 = vpop.f32.mrb[105].mxu1 }
 0x548   : > { %v12183_v26 = vadd.f32 %v8550_v50, %v16986_v53  ;;  %11975 = vmatpush1.bf16.msra.mxu1 %v14253_v40  ;;  %v8552_v7 = vpop.f32.mrb[106].mxu1 }
 0x549   : > { %v12184_v36 = vadd.f32 %v8552_v7, %v16981_v13  ;;  %v8554_v44 = vpop.f32.mrb[107].mxu1  ;;  %11960 = vmatprep.subr.bf16.mxu1 %v14258_v55 }
 0x54a   : > { %v11847_v8 = vpack.c.bf16 %v12183_v26, %v12182_v54  ;;  %9530 = vmatpush1.bf16.msra.mxu0 %v14253_v40  ;;  %v12185_v37 = vadd.f32 %v8554_v44, %v16986_v53 }
 0x54b   : > { %9531 = vmatprep.subr.bf16.mxu0 %v14258_v55  ;;  %9255 = vmatmul.mubr.bf16.gmra.mrb[148].mxu1 %v16207_v12 }
 0x54c   : > { %10529 = vst [vmem:[%s16423_s30 + $0x148] sm:$0xff] %v11847_v8  ;;  %v11856_v18 = vpack.c.bf16 %v12185_v37, %v12184_v36  ;;  %11976 = vmatpush1.bf16.msra.mxu1 %v14256_v30  ;;  %9264 = vmatprep.mubr.bf16.mxu1 %v16224_v14 }
 0x54d   : > { %9481 = vmatmul.mubr.bf16.gmra.mrb[148].mxu0 %v17747_v6  ;;  %11961 = vmatprep.subr.bf16.mxu1 %v14261_v25 }
 0x54e   : > { %10538 = vst [vmem:[%s16423_s30 + $0x190] sm:$0xff] %v11856_v18  ;;  %9532 = vmatpush1.bf16.msra.mxu0 %v14256_v30  ;;  %9490 = vmatprep.mubr.bf16.mxu0 %v17748_v41  ;;  %v8558_v57 = vpop.f32.mrb[108].mxu1 }
 0x54f   : > { %v12186_v15 = vadd.f32 %v8558_v57, %v16981_v13  ;;  %9533 = vmatprep.subr.bf16.mxu0 %v14261_v25  ;;  %v8560_v28 = vpop.f32.mrb[109].mxu1 }
 0x550   : > { %v12187_v62 = vadd.f32 %v8560_v28, %v16986_v53  ;;  %11977 = vmatpush1.bf16.msra.mxu1 %v14259_v16  ;;  %v8562_v39 = vpop.f32.mrb[110].mxu1 }
 0x551   : > { %v12188_v35 = vadd.f32 %v8562_v39, %v16981_v13  ;;  %v8564_v6 = vpop.f32.mrb[111].mxu1  ;;  %11962 = vmatprep.subr.bf16.mxu1 %v14264_v19 }
 0x552   : > { %v11865_v0 = vpack.c.bf16 %v12187_v62, %v12186_v15  ;;  %9534 = vmatpush1.bf16.msra.mxu0 %v14259_v16  ;;  %v12189_v41 = vadd.f32 %v8564_v6, %v16986_v53 }
 0x553   : > { %9535 = vmatprep.subr.bf16.mxu0 %v14264_v19  ;;  %9265 = vmatmul.mubr.bf16.gmra.mrb[152].mxu1 %v16233_v56 }
 0x554   : > { %10547 = vst [vmem:[%s16423_s30 + $0x1d8] sm:$0xff] %v11865_v0  ;;  %v11874_v1 = vpack.c.bf16 %v12189_v41, %v12188_v35  ;;  %11978 = vmatpush1.bf16.msra.mxu1 %v14262_v63  ;;  %9274 = vmatprep.mubr.bf16.mxu1 %v16235_v23 }
 0x555   : > { %9491 = vmatmul.mubr.bf16.gmra.mrb[152].mxu0 %v17749_v11  ;;  %11963 = vmatprep.subr.bf16.mxu1 %v14267_v5 }
 0x556   : > { %10556 = vst [vmem:[%s16423_s30 + $0x220] sm:$0xff] %v11874_v1  ;;  %9536 = vmatpush1.bf16.msra.mxu0 %v14262_v63  ;;  %9500 = vmatprep.mubr.bf16.mxu0 %v17750_v60  ;;  %v8568_v51 = vpop.f32.mrb[112].mxu1 }
 0x557   : > { %v12190_v3 = vadd.f32 %v8568_v51, %v16981_v13  ;;  %9537 = vmatprep.subr.bf16.mxu0 %v14267_v5  ;;  %v8570_v46 = vpop.f32.mrb[113].mxu1 }
 0x558   : > { %v12191_v22 = vadd.f32 %v8570_v46, %v16986_v53  ;;  %11979 = vmatpush1.bf16.msra.mxu1 %v14265_v9  ;;  %v8572_v38 = vpop.f32.mrb[114].mxu1 }
 0x559   : > { %v12192_v24 = vadd.f32 %v8572_v38, %v16981_v13  ;;  %v8574_v11 = vpop.f32.mrb[115].mxu1  ;;  %11964 = vmatprep.subr.bf16.mxu1 %v14270_v49 }
 0x55a   : > { %v11883_v58 = vpack.c.bf16 %v12191_v22, %v12190_v3  ;;  %9538 = vmatpush1.bf16.msra.mxu0 %v14265_v9  ;;  %v12193_v60 = vadd.f32 %v8574_v11, %v16986_v53 }
 0x55b   : > { %9539 = vmatprep.subr.bf16.mxu0 %v14270_v49  ;;  %9275 = vmatmul.mubr.bf16.gmra.mrb[156].mxu1 %v16239_v29 }
 0x55c   : > { %10565 = vst [vmem:[%s16423_s30 + $0x268] sm:$0xff] %v11883_v58  ;;  %v11892_v21 = vpack.c.bf16 %v12193_v60, %v12192_v24  ;;  %11980 = vmatpush1.bf16.msra.mxu1 %v14268_v59  ;;  %9583 = vmatprep.mubr.bf16.mxu1 %v16180_v4 }
 0x55d   : > { %9501 = vmatmul.mubr.bf16.gmra.mrb[156].mxu0 %v17751_v52  ;;  %11965 = vmatprep.subr.bf16.mxu1 %v14273_v2 }
 0x55e   : > { %10574 = vst [vmem:[%s16423_s30 + $0x2b0] sm:$0xff] %v11892_v21  ;;  %9540 = vmatpush1.bf16.msra.mxu0 %v14268_v59  ;;  %9543 = vmatprep.mubr.bf16.mxu0 %v17752_v34  ;;  %v8578_v61 = vpop.f32.mrb[116].mxu1 }
 0x55f   : > { %v12194_v45 = vadd.f32 %v8578_v61, %v16981_v13  ;;  %9541 = vmatprep.subr.bf16.mxu0 %v14273_v2  ;;  %v8580_v40 = vpop.f32.mrb[117].mxu1 }
 0x560   : > { %v12195_v55 = vadd.f32 %v8580_v40, %v16986_v53  ;;  %11981 = vmatpush1.bf16.msra.mxu1 %v14271_v33  ;;  %v8582_v31 = vpop.f32.mrb[118].mxu1 }
 0x561   : > { %v12196_v4 = vadd.f32 %v8582_v31, %v16981_v13  ;;  %v8584_v54 = vpop.f32.mrb[119].mxu1 }
 0x562   : > { %v11901_v52 = vpack.c.bf16 %v12195_v55, %v12194_v45  ;;  %9542 = vmatpush1.bf16.msra.mxu0 %v14271_v33  ;;  %v12197_v50 = vadd.f32 %v8584_v54, %v16986_v53 }
 0x563   : > { %9584 = vmatmul.mubr.bf16.vlgmr.msra.gmra.mrb[160].mxu1 %v16189_v32 }
 0x564   : > { %10583 = vst [vmem:[%s16423_s30 + $0x2f8] sm:$0xff] %v11901_v52  ;;  %v11910_v34 = vpack.c.bf16 %v12197_v50, %v12196_v4  ;;  %9593 = vmatprep.mubr.bf16.mxu1 %v16195_v43 }
 0x565   : > { %9544 = vmatmul.mubr.bf16.vlgmr.msra.gmra.mrb[128].mxu0 %v17753_v10 }
 0x566   : > { %10592 = vst [vmem:[%s16423_s30 + $0x340] sm:$0xff] %v11910_v34  ;;  %9553 = vmatprep.mubr.bf16.mxu0 %v17772_v47  ;;  %v8588_v26 = vpop.f32.mrb[120].mxu1 }
 0x567   : > { %v12198_v7 = vadd.f32 %v8588_v26, %v16981_v13  ;;  %v8590_v30 = vpop.f32.mrb[121].mxu1 }
 0x568   : > { %v12199_v36 = vadd.f32 %v8590_v30, %v16986_v53  ;;  %v8592_v44 = vpop.f32.mrb[122].mxu1 }
 0x569   : > { %v12200_v32 = vadd.f32 %v8592_v44, %v16981_v13  ;;  %v8594_v25 = vpop.f32.mrb[123].mxu1 }
 0x56a   : > { %v11919_v8 = vpack.c.bf16 %v12199_v36, %v12198_v7  ;;  %v12201_v37 = vadd.f32 %v8594_v25, %v16986_v53 }
 0x56b   : > { %9594 = vmatmul.mubr.bf16.gmra.mrb[164].mxu1 %v16207_v12 }
 0x56c   : > { %10601 = vst [vmem:[%s16423_s30 + $0x388] sm:$0xff] %v11919_v8  ;;  %v11928_v43 = vpack.c.bf16 %v12201_v37, %v12200_v32  ;;  %9603 = vmatprep.mubr.bf16.mxu1 %v16224_v14 }
 0x56d   : > { %9554 = vmatmul.mubr.bf16.gmra.mrb[132].mxu0 %v17755_v42  ;;  %v17068_v42 = vld [vmem:[#allocation10 + $0x8] sm:$0xff] }
 0x56e   : > { %10610 = vst [vmem:[%s16423_s30 + $0x3d0] sm:$0xff] %v11928_v43  ;;  %9563 = vmatprep.mubr.bf16.mxu0 %v17756_v20  ;;  %v8598_v10 = vpop.f32.mrb[124].mxu1  ;;  %v17776_v20 = vld [vmem:[#allocation83_spill] sm:$0xff] }
 0x56f   : > { %v12202_v47 = vadd.f32 %v8598_v10, %v16981_v13  ;;  %v8600_v18 = vpop.f32.mrb[125].mxu1  ;;  %v17072_v62 = vrot.slane %v17068_v42, %v17776_v20 }
 0x570   : > { %v12203_v16 = vadd.f32 %v8600_v18, %v16986_v53  ;;  %v8602_v19 = vpop.f32.mrb[126].mxu1 }
 0x571   : > { %v12204_v12 = vadd.f32 %v8602_v19, %v16981_v13  ;;  %v8604_v57 = vpop.f32.mrb[127].mxu1  ;;  %v17777_v13 = vld [vmem:[#allocation82_spill] sm:$0xff] }
 0x572   : > { %v11937_v15 = vpack.c.bf16 %v12203_v16, %v12202_v47  ;;  %v12205_v28 = vadd.f32 %v8604_v57, %v16986_v53 }
 0x573   : > { %9604 = vmatmul.mubr.bf16.gmra.mrb[168].mxu1 %v16233_v56  ;;  %v17078_v56 = vrot.slane %v17068_v42, %v17777_v13 }
 0x574   : > { %10619 = vst [vmem:[%s16423_s30 + $0x418] sm:$0xff] %v11937_v15  ;;  %v11946_v14 = vpack.c.bf16 %v12205_v28, %v12204_v12  ;;  %9613 = vmatprep.mubr.bf16.mxu1 %v16235_v23 }
 0x575   : > { %9564 = vmatmul.mubr.bf16.gmra.mrb[136].mxu0 %v17757_v27 }
 0x576   : > { %10628 = vst [vmem:[%s16423_s30 + $0x460] sm:$0xff] %v11946_v14  ;;  %9573 = vmatprep.mubr.bf16.mxu0 %v17774_v17 }
 0x578   : > { %v8867_v53 = vpop.f32.mrb[96].mxu0 }
 0x579   : > { %v12206_v23 = vadd.f32 %v8867_v53, %v17072_v62  ;;  %v8869_v39 = vpop.f32.mrb[97].mxu0 }
 0x57a   : > { %v12207_v27 = vadd.f32 %v8869_v39, %v17078_v56  ;;  %v8871_v63 = vpop.f32.mrb[98].mxu0 }
 0x57b   : > { %v12208_v35 = vadd.f32 %v8871_v63, %v17072_v62  ;;  %v8873_v6 = vpop.f32.mrb[99].mxu0  ;;  %9614 = vmatmul.mubr.bf16.gmra.mrb[172].mxu1 %v16239_v29 }
 0x57c   : > { %v11812_v5 = vpack.c.bf16 %v12207_v27, %v12206_v23  ;;  %v12209_v17 = vadd.f32 %v8873_v6, %v17078_v56 }
 0x57d   : > { %9574 = vmatmul.mubr.bf16.gmra.mrb[140].mxu0 %v16163_v48 }
 0x57e   : > { %10494 = vst [vmem:[%s16423_s30 + $0x30] sm:$0xff] %v11812_v5  ;;  %v11821_v0 = vpack.c.bf16 %v12209_v17, %v12208_v35 }
 0x580   : > { %10503 = vst [vmem:[%s16423_s30 + $0x78] sm:$0xff] %v11821_v0  ;;  %v8877_v41 = vpop.f32.mrb[100].mxu0 }
 0x581   : > { %v12210_v1 = vadd.f32 %v8877_v41, %v17072_v62  ;;  %v8879_v9 = vpop.f32.mrb[101].mxu0 }
 0x582   : > { %v12211_v49 = vadd.f32 %v8879_v9, %v17078_v56  ;;  %v8881_v51 = vpop.f32.mrb[102].mxu0 }
 0x583   : > { %v12212_v3 = vadd.f32 %v8881_v51, %v17072_v62  ;;  %v8883_v29 = vpop.f32.mrb[103].mxu0 }
 0x584   : > { %v11830_v46 = vpack.c.bf16 %v12211_v49, %v12210_v1  ;;  %v12213_v22 = vadd.f32 %v8883_v29, %v17078_v56 }
 0x586   : > { %10512 = vst [vmem:[%s16423_s30 + $0xc0] sm:$0xff] %v11830_v46  ;;  %v11839_v48 = vpack.c.bf16 %v12213_v22, %v12212_v3 }
 0x588   : > { %10521 = vst [vmem:[%s16423_s30 + $0x108] sm:$0xff] %v11839_v48  ;;  %v8887_v38 = vpop.f32.mrb[104].mxu0  ;;  %v17778_v48 = vld [vmem:[#allocation77_spill] sm:$0xff] }
 0x589   : > { %v12214_v59 = vadd.f32 %v8887_v38, %v17072_v62  ;;  %v8889_v24 = vpop.f32.mrb[105].mxu0  ;;  %v17779_v38 = vsub.s32 6, %v17778_v48 }
 0x58a   : > { %v12215_v11 = vadd.f32 %v8889_v24, %v17078_v56  ;;  %v8891_v2 = vpop.f32.mrb[106].mxu0  ;;  %v17780_v24 = vsub.s32 7, %v17778_v48 }
 0x58b   : > { %v12216_v58 = vadd.f32 %v8891_v2, %v17072_v62  ;;  %v8893_v60 = vpop.f32.mrb[107].mxu0 }
 0x58c   : > { %v11848_v21 = vpack.c.bf16 %v12215_v11, %v12214_v59  ;;  %v12217_v33 = vadd.f32 %v8893_v60, %v17078_v56  ;;  %v17133_v59 = vrot.slane %v17068_v42, %v17779_v38  ;;  %v17138_v11 = vrot.slane %v17068_v42, %v17780_v24 }
 0x58e   : > { %10530 = vst [vmem:[%s16423_s30 + $0x150] sm:$0xff] %v11848_v21  ;;  %v11857_v61 = vpack.c.bf16 %v12217_v33, %v12216_v58 }
 0x590   : > { %10539 = vst [vmem:[%s16423_s30 + $0x198] sm:$0xff] %v11857_v61  ;;  %v8897_v45 = vpop.f32.mrb[108].mxu0 }
 0x591   : > { %v12218_v40 = vadd.f32 %v8897_v45, %v17072_v62  ;;  %v8899_v55 = vpop.f32.mrb[109].mxu0 }
 0x592   : > { %v12219_v31 = vadd.f32 %v8899_v55, %v17078_v56  ;;  %v8901_v4 = vpop.f32.mrb[110].mxu0 }
 0x593   : > { %v12220_v54 = vadd.f32 %v8901_v4, %v17072_v62  ;;  %v8903_v52 = vpop.f32.mrb[111].mxu0 }
 0x594   : > { %v11866_v50 = vpack.c.bf16 %v12219_v31, %v12218_v40  ;;  %v12221_v34 = vadd.f32 %v8903_v52, %v17078_v56 }
 0x596   : > { %10548 = vst [vmem:[%s16423_s30 + $0x1e0] sm:$0xff] %v11866_v50  ;;  %v11875_v26 = vpack.c.bf16 %v12221_v34, %v12220_v54 }
 0x598   : > { %10557 = vst [vmem:[%s16423_s30 + $0x228] sm:$0xff] %v11875_v26  ;;  %v8907_v7 = vpop.f32.mrb[112].mxu0 }
 0x599   : > { %v12222_v30 = vadd.f32 %v8907_v7, %v17072_v62  ;;  %v8909_v36 = vpop.f32.mrb[113].mxu0 }
 0x59a   : > { %v12223_v44 = vadd.f32 %v8909_v36, %v17078_v56  ;;  %v8911_v32 = vpop.f32.mrb[114].mxu0 }
 0x59b   : > { %v12224_v25 = vadd.f32 %v8911_v32, %v17072_v62  ;;  %v8913_v8 = vpop.f32.mrb[115].mxu0 }
 0x59c   : > { %v11884_v37 = vpack.c.bf16 %v12223_v44, %v12222_v30  ;;  %v12225_v43 = vadd.f32 %v8913_v8, %v17078_v56 }
 0x59e   : > { %10566 = vst [vmem:[%s16423_s30 + $0x270] sm:$0xff] %v11884_v37  ;;  %v11893_v10 = vpack.c.bf16 %v12225_v43, %v12224_v25 }
 0x5a0   : > { %10575 = vst [vmem:[%s16423_s30 + $0x2b8] sm:$0xff] %v11893_v10  ;;  %v8917_v47 = vpop.f32.mrb[116].mxu0 }
 0x5a1   : > { %v12226_v18 = vadd.f32 %v8917_v47, %v17072_v62  ;;  %v8919_v16 = vpop.f32.mrb[117].mxu0 }
 0x5a2   : > { %v12227_v19 = vadd.f32 %v8919_v16, %v17078_v56  ;;  %v8921_v12 = vpop.f32.mrb[118].mxu0 }
 0x5a3   : > { %v12228_v57 = vadd.f32 %v8921_v12, %v17072_v62  ;;  %v8923_v15 = vpop.f32.mrb[119].mxu0 }
 0x5a4   : > { %v11902_v28 = vpack.c.bf16 %v12227_v19, %v12226_v18  ;;  %v12229_v14 = vadd.f32 %v8923_v15, %v17078_v56 }
 0x5a6   : > { %10584 = vst [vmem:[%s16423_s30 + $0x300] sm:$0xff] %v11902_v28  ;;  %v11911_v20 = vpack.c.bf16 %v12229_v14, %v12228_v57 }
 0x5a8   : > { %10593 = vst [vmem:[%s16423_s30 + $0x348] sm:$0xff] %v11911_v20  ;;  %v8927_v13 = vpop.f32.mrb[120].mxu0 }
 0x5a9   : > { %v12230_v53 = vadd.f32 %v8927_v13, %v17072_v62  ;;  %v8929_v23 = vpop.f32.mrb[121].mxu0 }
 0x5aa   : > { %v12231_v39 = vadd.f32 %v8929_v23, %v17078_v56  ;;  %v8931_v27 = vpop.f32.mrb[122].mxu0 }
 0x5ab   : > { %v12232_v63 = vadd.f32 %v8931_v27, %v17072_v62  ;;  %v8933_v35 = vpop.f32.mrb[123].mxu0 }
 0x5ac   : > { %v11920_v6 = vpack.c.bf16 %v12231_v39, %v12230_v53  ;;  %v12233_v5 = vadd.f32 %v8933_v35, %v17078_v56 }
 0x5ae   : > { %10602 = vst [vmem:[%s16423_s30 + $0x390] sm:$0xff] %v11920_v6  ;;  %v11929_v17 = vpack.c.bf16 %v12233_v5, %v12232_v63 }
 0x5b0   : > { %10611 = vst [vmem:[%s16423_s30 + $0x3d8] sm:$0xff] %v11929_v17  ;;  %v8937_v0 = vpop.f32.mrb[124].mxu0 }
 0x5b1   : > { %v12234_v41 = vadd.f32 %v8937_v0, %v17072_v62  ;;  %v8939_v1 = vpop.f32.mrb[125].mxu0 }
 0x5b2   : > { %v12235_v9 = vadd.f32 %v8939_v1, %v17078_v56  ;;  %v8941_v49 = vpop.f32.mrb[126].mxu0 }
 0x5b3   : > { %v12236_v51 = vadd.f32 %v8941_v49, %v17072_v62  ;;  %v8943_v3 = vpop.f32.mrb[127].mxu0 }
 0x5b4   : > { %v11938_v29 = vpack.c.bf16 %v12235_v9, %v12234_v41  ;;  %v12237_v46 = vadd.f32 %v8943_v3, %v17078_v56 }
 0x5b6   : > { %10620 = vst [vmem:[%s16423_s30 + $0x420] sm:$0xff] %v11938_v29  ;;  %v11947_v22 = vpack.c.bf16 %v12237_v46, %v12236_v51 }
 0x5b8   : > { %10629 = vst [vmem:[%s16423_s30 + $0x468] sm:$0xff] %v11947_v22 }
 0x5f6   : > { %v9206_v62 = vpop.f32.mrb[128].mxu1 }
 0x5f7   : > { %v12238_v2 = vadd.f32 %v9206_v62, %v17133_v59  ;;  %v9208_v58 = vpop.f32.mrb[129].mxu1 }
 0x5f8   : > { %v12239_v56 = vadd.f32 %v9208_v58, %v17138_v11  ;;  %v9210_v60 = vpop.f32.mrb[130].mxu1 }
 0x5f9   : > { %v12240_v21 = vadd.f32 %v9210_v60, %v17133_v59  ;;  %v9212_v33 = vpop.f32.mrb[131].mxu1 }
 0x5fa   : > { %v11813_v61 = vpack.c.bf16 %v12239_v56, %v12238_v2  ;;  %v12241_v45 = vadd.f32 %v9212_v33, %v17138_v11 }
 0x5fc   : > { %10495 = vst [vmem:[%s16423_s30 + $0x38] sm:$0xff] %v11813_v61  ;;  %v11822_v40 = vpack.c.bf16 %v12241_v45, %v12240_v21 }
 0x5fe   : > { %10504 = vst [vmem:[%s16423_s30 + $0x80] sm:$0xff] %v11822_v40  ;;  %v9216_v42 = vpop.f32.mrb[132].mxu1 }
 0x5ff   : > { %v12242_v55 = vadd.f32 %v9216_v42, %v17133_v59  ;;  %v9218_v31 = vpop.f32.mrb[133].mxu1 }
 0x600   : > { %v12243_v4 = vadd.f32 %v9218_v31, %v17138_v11  ;;  %v9220_v54 = vpop.f32.mrb[134].mxu1 }
 0x601   : > { %v12244_v52 = vadd.f32 %v9220_v54, %v17133_v59  ;;  %v9222_v50 = vpop.f32.mrb[135].mxu1 }
 0x602   : > { %v11831_v34 = vpack.c.bf16 %v12243_v4, %v12242_v55  ;;  %v12245_v26 = vadd.f32 %v9222_v50, %v17138_v11 }
 0x604   : > { %10513 = vst [vmem:[%s16423_s30 + $0xc8] sm:$0xff] %v11831_v34  ;;  %v11840_v7 = vpack.c.bf16 %v12245_v26, %v12244_v52 }
 0x606   : > { %10522 = vst [vmem:[%s16423_s30 + $0x110] sm:$0xff] %v11840_v7  ;;  %v9226_v30 = vpop.f32.mrb[136].mxu1 }
 0x607   : > { %v12246_v36 = vadd.f32 %v9226_v30, %v17133_v59  ;;  %v9228_v44 = vpop.f32.mrb[137].mxu1  ;;  %v2159_v30 = vld [vmem:[#allocation10 + $0x10] sm:$0x3] }
 0x608   : > { %v12247_v32 = vadd.f32 %v9228_v44, %v17138_v11  ;;  %v9230_v25 = vpop.f32.mrb[138].mxu1 }
 0x609   : > { %v12248_v8 = vadd.f32 %v9230_v25, %v17133_v59  ;;  %v9232_v37 = vpop.f32.mrb[139].mxu1 }
 0x60a   : > { %v11849_v43 = vpack.c.bf16 %v12247_v32, %v12246_v36  ;;  %v12249_v10 = vadd.f32 %v9232_v37, %v17138_v11 }
 0x60c   : > { %10531 = vst [vmem:[%s16423_s30 + $0x158] sm:$0xff] %v11849_v43  ;;  %v11858_v47 = vpack.c.bf16 %v12249_v10, %v12248_v8  ;;  %v17781_v43 = vld [vmem:[#allocation80_spill] sm:$0xff] }
 0x60d   : > { %v17205_v10 = vrot.slane %v2159_v30, %v17781_v43 }
 0x60e   : > { %10540 = vst [vmem:[%s16423_s30 + $0x1a0] sm:$0xff] %v11858_v47  ;;  %v9236_v18 = vpop.f32.mrb[140].mxu1 }
 0x60f   : > { %v12250_v16 = vadd.f32 %v9236_v18, %v17133_v59  ;;  %v9238_v19 = vpop.f32.mrb[141].mxu1 }
 0x610   : > { %v12251_v12 = vadd.f32 %v9238_v19, %v17138_v11  ;;  %v9240_v57 = vpop.f32.mrb[142].mxu1  ;;  %v17782_v19 = vld [vmem:[#allocation78_spill] sm:$0xff] }
 0x611   : > { %v12252_v15 = vadd.f32 %v9240_v57, %v17133_v59  ;;  %v9242_v28 = vpop.f32.mrb[143].mxu1 }
 0x612   : > { %v11867_v14 = vpack.c.bf16 %v12251_v12, %v12250_v16  ;;  %v12253_v20 = vadd.f32 %v9242_v28, %v17138_v11  ;;  %v17211_v12 = vrot.slane %v2159_v30, %v17782_v19 }
 0x614   : > { %10549 = vst [vmem:[%s16423_s30 + $0x1e8] sm:$0xff] %v11867_v14  ;;  %v11876_v13 = vpack.c.bf16 %v12253_v20, %v12252_v15 }
 0x616   : > { %10558 = vst [vmem:[%s16423_s30 + $0x230] sm:$0xff] %v11876_v13  ;;  %v9246_v53 = vpop.f32.mrb[144].mxu1 }
 0x617   : > { %v12254_v23 = vadd.f32 %v9246_v53, %v17133_v59  ;;  %v9248_v39 = vpop.f32.mrb[145].mxu1 }
 0x618   : > { %v17165_v27 = vpop.f32.mrb[144].mxu0  ;;  %v12255_v63 = vadd.f32 %v9248_v39, %v17138_v11  ;;  %v9250_v35 = vpop.f32.mrb[146].mxu1 }
 0x619   : > { %v9474_v6 = vpop.f32.mrb[145].mxu0  ;;  %v12256_v5 = vadd.f32 %v9250_v35, %v17133_v59  ;;  %v9252_v17 = vpop.f32.mrb[147].mxu1  ;;  %v12286_v13 = vadd.f32 %v17165_v27, %v17205_v10 }
 0x61a   : > { %v11885_v0 = vpack.c.bf16 %v12255_v63, %v12254_v23  ;;  %v9476_v41 = vpop.f32.mrb[146].mxu0  ;;  %v12257_v1 = vadd.f32 %v9252_v17, %v17138_v11  ;;  %v12288_v53 = vadd.f32 %v9474_v6, %v17211_v12 }
 0x61b   : > { %v9478_v9 = vpop.f32.mrb[147].mxu0  ;;  %v12290_v23 = vadd.f32 %v9476_v41, %v17205_v10 }
 0x61c   : > { %10567 = vst [vmem:[%s16423_s30 + $0x278] sm:$0xff] %v11885_v0  ;;  %v11894_v49 = vpack.c.bf16 %v12257_v1, %v12256_v5  ;;  %v12292_v35 = vadd.f32 %v9478_v9, %v17211_v12 }
 0x61e   : > { %10576 = vst [vmem:[%s16423_s30 + $0x2c0] sm:$0xff] %v11894_v49  ;;  %v9256_v51 = vpop.f32.mrb[148].mxu1 }
 0x61f   : > { %v12258_v3 = vadd.f32 %v9256_v51, %v17133_v59  ;;  %v9258_v29 = vpop.f32.mrb[149].mxu1 }
 0x620   : > { %v17173_v46 = vpop.f32.mrb[148].mxu0  ;;  %v12259_v22 = vadd.f32 %v9258_v29, %v17138_v11  ;;  %v9260_v48 = vpop.f32.mrb[150].mxu1 }
 0x621   : > { %v17176_v38 = vpop.f32.mrb[149].mxu0  ;;  %v12260_v24 = vadd.f32 %v9260_v48, %v17133_v59  ;;  %v9262_v62 = vpop.f32.mrb[151].mxu1 }
 0x622   : > { %v11903_v2 = vpack.c.bf16 %v12259_v22, %v12258_v3  ;;  %v17179_v58 = vpop.f32.mrb[150].mxu0  ;;  %v12261_v56 = vadd.f32 %v9262_v62, %v17138_v11  ;;  %v12294_v62 = vadd.f32 %v17173_v46, %v17205_v10 }
 0x623   : > { %v17182_v60 = vpop.f32.mrb[151].mxu0 }
 0x624   : > { %10585 = vst [vmem:[%s16423_s30 + $0x308] sm:$0xff] %v11903_v2  ;;  %v11912_v21 = vpack.c.bf16 %v12261_v56, %v12260_v24  ;;  %v12296_v2 = vadd.f32 %v17176_v38, %v17211_v12 }
 0x626   : > { %10594 = vst [vmem:[%s16423_s30 + $0x350] sm:$0xff] %v11912_v21  ;;  %v9266_v33 = vpop.f32.mrb[152].mxu1 }
 0x627   : > { %v12262_v61 = vadd.f32 %v9266_v33, %v17133_v59  ;;  %v9268_v45 = vpop.f32.mrb[153].mxu1  ;;  %v12298_v33 = vadd.f32 %v17179_v58, %v17205_v10 }
 0x628   : > { %v17187_v40 = vpop.f32.mrb[152].mxu0  ;;  %v12263_v42 = vadd.f32 %v9268_v45, %v17138_v11  ;;  %v9270_v55 = vpop.f32.mrb[154].mxu1 }
 0x629   : > { %v17190_v31 = vpop.f32.mrb[153].mxu0  ;;  %v12264_v4 = vadd.f32 %v9270_v55, %v17133_v59  ;;  %v9272_v54 = vpop.f32.mrb[155].mxu1  ;;  %v12302_v43 = vadd.f32 %v17187_v40, %v17205_v10 }
 0x62a   : > { %v11921_v52 = vpack.c.bf16 %v12263_v42, %v12262_v61  ;;  %v17193_v50 = vpop.f32.mrb[154].mxu0  ;;  %v12265_v34 = vadd.f32 %v9272_v54, %v17138_v11  ;;  %v12300_v42 = vadd.f32 %v17182_v60, %v17211_v12 }
 0x62b   : > { %v17196_v26 = vpop.f32.mrb[155].mxu0 }
 0x62c   : > { %10603 = vst [vmem:[%s16423_s30 + $0x398] sm:$0xff] %v11921_v52  ;;  %v11930_v7 = vpack.c.bf16 %v12265_v34, %v12264_v4 }
 0x62e   : > { %10612 = vst [vmem:[%s16423_s30 + $0x3e0] sm:$0xff] %v11930_v7  ;;  %v9276_v36 = vpop.f32.mrb[156].mxu1 }
 0x62f   : > { %v12266_v44 = vadd.f32 %v9276_v36, %v17133_v59  ;;  %v9278_v32 = vpop.f32.mrb[157].mxu1 }
 0x630   : > { %v17201_v25 = vpop.f32.mrb[156].mxu0  ;;  %v12267_v8 = vadd.f32 %v9278_v32, %v17138_v11  ;;  %v9280_v37 = vpop.f32.mrb[158].mxu1 }
 0x631   : > { %v17207_v47 = vpop.f32.mrb[157].mxu0  ;;  %v12268_v18 = vadd.f32 %v9280_v37, %v17133_v59  ;;  %v9282_v16 = vpop.f32.mrb[159].mxu1 }
 0x632   : > { %v11939_v57 = vpack.c.bf16 %v12267_v8, %v12266_v44  ;;  %v17213_v15 = vpop.f32.mrb[158].mxu0  ;;  %v12269_v28 = vadd.f32 %v9282_v16, %v17138_v11 }
 0x633   : > { %v17216_v14 = vpop.f32.mrb[159].mxu0 }
 0x634   : > { %10621 = vst [vmem:[%s16423_s30 + $0x428] sm:$0xff] %v11939_v57  ;;  %v11948_v20 = vpack.c.bf16 %v12269_v28, %v12268_v18  ;;  %v12304_v18 = vadd.f32 %v17190_v31, %v17211_v12  ;;  %v12306_v57 = vadd.f32 %v17193_v50, %v17205_v10 }
 0x636   : > { %10630 = vst [vmem:[%s16423_s30 + $0x470] sm:$0xff] %v11948_v20  ;;  %v9585_v59 = vpop.f32.mrb[160].mxu1 }
 0x637   : > { %v12287_v39 = vadd.f32 %v12286_v13, %v9585_v59  ;;  %v9587_v63 = vpop.f32.mrb[161].mxu1  ;;  %v12308_v13 = vadd.f32 %v17196_v26, %v17211_v12 }
 0x638   : > { %v9545_v5 = vpop.f32.mrb[128].mxu0  ;;  %v12289_v11 = vadd.f32 %v12288_v53, %v9587_v63  ;;  %v9589_v17 = vpop.f32.mrb[162].mxu1 }
 0x639   : > { %v12270_v0 = vadd.f32 %v9545_v5, %v17205_v10  ;;  %v9547_v1 = vpop.f32.mrb[129].mxu0  ;;  %v12291_v49 = vadd.f32 %v12290_v23, %v9589_v17  ;;  %v9591_v27 = vpop.f32.mrb[163].mxu1 }
 0x63a   : > { %v12271_v6 = vadd.f32 %v9547_v1, %v17211_v12  ;;  %v11886_v51 = vpack.c.bf16 %v12289_v11, %v12287_v39  ;;  %v9549_v3 = vpop.f32.mrb[130].mxu0  ;;  %v12293_v41 = vadd.f32 %v12292_v35, %v9591_v27  ;;  %v12310_v27 = vadd.f32 %v17201_v25, %v17205_v10 }
 0x63b   : > { %v12272_v29 = vadd.f32 %v9549_v3, %v17205_v10  ;;  %v9551_v22 = vpop.f32.mrb[131].mxu0 }
 0x63c   : > { %v11814_v9 = vpack.c.bf16 %v12271_v6, %v12270_v0  ;;  %10568 = vst [vmem:[%s16423_s30 + $0x280] sm:$0xff] %v11886_v51  ;;  %v12273_v48 = vadd.f32 %v9551_v22, %v17211_v12  ;;  %v11895_v24 = vpack.c.bf16 %v12293_v41, %v12291_v49  ;;  %v12312_v6 = vadd.f32 %v17207_v47, %v17211_v12 }
 0x63d   : > { %v12314_v41 = vadd.f32 %v17213_v15, %v17205_v10 }
 0x63e   : > { %10496 = vst [vmem:[%s16423_s30 + $0x40] sm:$0xff] %v11814_v9  ;;  %v11823_v56 = vpack.c.bf16 %v12273_v48, %v12272_v29  ;;  %10577 = vst [vmem:[%s16423_s30 + $0x2c8] sm:$0xff] %v11895_v24  ;;  %v9595_v21 = vpop.f32.mrb[164].mxu1  ;;  %v12316_v9 = vadd.f32 %v17216_v14, %v17211_v12 }
 0x63f   : > { %v12295_v61 = vadd.f32 %v12294_v62, %v9595_v21  ;;  %v9597_v45 = vpop.f32.mrb[165].mxu1 }
 0x640   : > { %10505 = vst [vmem:[%s16423_s30 + $0x88] sm:$0xff] %v11823_v56  ;;  %v9555_v55 = vpop.f32.mrb[132].mxu0  ;;  %v12297_v4 = vadd.f32 %v12296_v2, %v9597_v45  ;;  %v9599_v46 = vpop.f32.mrb[166].mxu1 }
 0x641   : > { %v12274_v54 = vadd.f32 %v9555_v55, %v17205_v10  ;;  %v9557_v38 = vpop.f32.mrb[133].mxu0  ;;  %v12299_v52 = vadd.f32 %v12298_v33, %v9599_v46  ;;  %v9601_v34 = vpop.f32.mrb[167].mxu1 }
 0x642   : > { %v12275_v7 = vadd.f32 %v9557_v38, %v17211_v12  ;;  %v11904_v58 = vpack.c.bf16 %v12297_v4, %v12295_v61  ;;  %v9559_v30 = vpop.f32.mrb[134].mxu0  ;;  %v12301_v36 = vadd.f32 %v12300_v42, %v9601_v34 }
 0x643   : > { %v12276_v44 = vadd.f32 %v9559_v30, %v17205_v10  ;;  %v9561_v60 = vpop.f32.mrb[135].mxu0 }
 0x644   : > { %v11832_v32 = vpack.c.bf16 %v12275_v7, %v12274_v54  ;;  %10586 = vst [vmem:[%s16423_s30 + $0x310] sm:$0xff] %v11904_v58  ;;  %v12277_v8 = vadd.f32 %v9561_v60, %v17211_v12  ;;  %v11913_v37 = vpack.c.bf16 %v12301_v36, %v12299_v52 }
 0x646   : > { %10514 = vst [vmem:[%s16423_s30 + $0xd0] sm:$0xff] %v11832_v32  ;;  %v11841_v16 = vpack.c.bf16 %v12277_v8, %v12276_v44  ;;  %10595 = vst [vmem:[%s16423_s30 + $0x358] sm:$0xff] %v11913_v37  ;;  %v9605_v19 = vpop.f32.mrb[168].mxu1 }
 0x647   : > { %v12303_v28 = vadd.f32 %v12302_v43, %v9605_v19  ;;  %v9607_v20 = vpop.f32.mrb[169].mxu1 }
 0x648   : > { %10523 = vst [vmem:[%s16423_s30 + $0x118] sm:$0xff] %v11841_v16  ;;  %v9565_v53 = vpop.f32.mrb[136].mxu0  ;;  %v12305_v40 = vadd.f32 %v12304_v18, %v9607_v20  ;;  %v9609_v59 = vpop.f32.mrb[170].mxu1 }
 0x649   : > { %v12278_v31 = vadd.f32 %v9565_v53, %v17205_v10  ;;  %v9567_v23 = vpop.f32.mrb[137].mxu0  ;;  %v12307_v39 = vadd.f32 %v12306_v57, %v9609_v59  ;;  %v9611_v63 = vpop.f32.mrb[171].mxu1 }
 0x64a   : > { %v12279_v50 = vadd.f32 %v9567_v23, %v17211_v12  ;;  %v11922_v35 = vpack.c.bf16 %v12305_v40, %v12303_v28  ;;  %v9569_v5 = vpop.f32.mrb[138].mxu0  ;;  %v12309_v11 = vadd.f32 %v12308_v13, %v9611_v63 }
 0x64b   : > { %v12280_v26 = vadd.f32 %v9569_v5, %v17205_v10  ;;  %v9571_v17 = vpop.f32.mrb[139].mxu0 }
 0x64c   : > { %v11850_v0 = vpack.c.bf16 %v12279_v50, %v12278_v31  ;;  %10604 = vst [vmem:[%s16423_s30 + $0x3a0] sm:$0xff] %v11922_v35  ;;  %v12281_v1 = vadd.f32 %v9571_v17, %v17211_v12  ;;  %v11931_v49 = vpack.c.bf16 %v12309_v11, %v12307_v39 }
 0x64e   : > { %10532 = vst [vmem:[%s16423_s30 + $0x160] sm:$0xff] %v11850_v0  ;;  %v11859_v51 = vpack.c.bf16 %v12281_v1, %v12280_v26  ;;  %10613 = vst [vmem:[%s16423_s30 + $0x3e8] sm:$0xff] %v11931_v49  ;;  %v9615_v3 = vpop.f32.mrb[172].mxu1 }
 0x64f   : > { %v12311_v29 = vadd.f32 %v12310_v27, %v9615_v3  ;;  %v9617_v22 = vpop.f32.mrb[173].mxu1 }
 0x650   : > { %10541 = vst [vmem:[%s16423_s30 + $0x1a8] sm:$0xff] %v11859_v51  ;;  %v9575_v48 = vpop.f32.mrb[140].mxu0  ;;  %v12313_v24 = vadd.f32 %v12312_v6, %v9617_v22  ;;  %v9619_v25 = vpop.f32.mrb[174].mxu1 }
 0x651   : > { %v12282_v47 = vadd.f32 %v9575_v48, %v17205_v10  ;;  %v9577_v62 = vpop.f32.mrb[141].mxu0  ;;  %v12315_v2 = vadd.f32 %v12314_v41, %v9619_v25  ;;  %v9621_v56 = vpop.f32.mrb[175].mxu1 }
 0x652   : > { %v12283_v15 = vadd.f32 %v9577_v62, %v17211_v12  ;;  %v11940_v21 = vpack.c.bf16 %v12313_v24, %v12311_v29  ;;  %v9579_v33 = vpop.f32.mrb[142].mxu0  ;;  %v12317_v14 = vadd.f32 %v12316_v9, %v9621_v56 }
 0x653   : > { %v12284_v61 = vadd.f32 %v9579_v33, %v17205_v10  ;;  %v9581_v45 = vpop.f32.mrb[143].mxu0 }
 0x654   : > { %v11868_v42 = vpack.c.bf16 %v12283_v15, %v12282_v47  ;;  %10622 = vst [vmem:[%s16423_s30 + $0x430] sm:$0xff] %v11940_v21  ;;  %v12285_v55 = vadd.f32 %v9581_v45, %v17211_v12  ;;  %v11949_v4 = vpack.c.bf16 %v12317_v14, %v12315_v2 }
 0x656   : > { %10550 = vst [vmem:[%s16423_s30 + $0x1f0] sm:$0xff] %v11868_v42  ;;  %v11877_v46 = vpack.c.bf16 %v12285_v55, %v12284_v61  ;;  %10631 = vst [vmem:[%s16423_s30 + $0x478] sm:$0xff] %v11949_v4 }
 0x658   : > { %10559 = vst [vmem:[%s16423_s30 + $0x238] sm:$0xff] %v11877_v46 }
 0x659   : > { %14559 = shalt.err (!%p14556_p7)
}
 0x65a   : > { %s14560_s9 = scalar_lea.hbm %s17288_s3, 18432  ;;  %s14564_s12 = scalar_lea.hbm %s17348_s5, 73728 }
 0x65b   : > { %p14561_p12 = scmp.ne.s32.totalorder %s17288_s3, %s14560_s9  ;;  %p14565_p5 = scmp.lt.u32.totalorder %s17288_s3, %s17348_s5 }
 0x65c   : > { %p14566_p9 = scmp.lt.u32.totalorder %s14564_s12, %s14560_s9  ;;  %p14568_p1 = scmp.lt.u32.totalorder %s14560_s9, %s17288_s3 }
 0x65d   : > { %p14562_p11 = pnand %p14561_p12, %p14877_p4 }
 0x65e   : > { %p14567_p0 = por %p14566_p9, %p14565_p5 }
 0x65f   : > { %p14563_p13 = pneg %p14562_p11 }
 0x660   : > { %p14569_p10 = por %p14568_p1, %p14567_p0 }
 0x662   : > { %p14570_p2 = pnand %p14569_p10, %p14563_p13 }
 0x664   : > { %14573 = shalt.err (!%p14570_p2)
}
 0x665   : > { %s14664_s30 = smov 1152   ;;  %s14665_s7 = smov 72  }
 0x666   : > { %12871 = dma.vmem_to_hbm [thread:$0]  (%p14877_p4), %s17281_s22, 18432, %s17288_s3, %s10633_s6, %s14664_s30, %s14664_s30, %s14665_s7  }
 0x667 PF: > { %s17783_s16 = sld [smem:[#allocation16_spill]]  ;;  %s17784_s21 = sld [smem:[#allocation17_spill]] }
 0x668   : > { %p12903_p6 = scmp.ge.s32.totalorder %s14652_s25, 2 }
 0x66d   : > { %s10664_s29 = sand.u32 1, %s17783_s16   ;;  %p17785_p8 = scmp.ne.s32.totalorder %s17784_s21, 0 }
 0x66e   : > { %s10665_s1 = scalar_lea.sflag [#allocation4], %s10664_s29 }
 0x66f   : > { %p12891_p3 = pnand %p12903_p6, %p17785_p8 }
 0x671   : > { %14619 = dma.done.wait (!%p12891_p3), %s10665_s1, 18432  }
 0x672   : > { %14621 = vsyncadd (!%p12891_p3), %s10665_s1, 4294948864  ;;  %s23_s25 = sadd.s32 1, %s14652_s25   ;;  %s17786_s27 = sld [smem:[#allocation18_spill]] }
 0x673   : > { %p20_p7 = scmp.ge.s32.totalorder %s23_s25, 6   ;;  %s17787_s18 = smov %s14628_s19 }
 0x674   : > { %s17788_s19 = smov %s14632_s20  ;;  %s17789_s20 = smov %s14896_s11 }
 0x675   : > { %s17790_s21 = smov %s14644_s23  ;;  %s17791_s22 = smov %s14648_s24 }
 0x676   : > { %s17792_s23 = smov %s17795_s8  ;;  %22 = sbr.rel (!%p20_p7) target bundleno = 14 (0xe), region = 101 }
 0x678   : > { %s17793_s24 = smov %s17786_s27 }
 0x67d   :  { %10670 = vsyncpa [#allocation3], 1 }
 0x67e   :  { %10672 = vsyncpa [#allocation3 + $0x1], 1 }
 0x67f   :  { %10673 = vsyncpa [#allocation6], 1 }
 0x680   :  { %10674 = vsyncpa [#allocation9], 1 }
 0x681   :  { %10675 = vsyncpa [#allocation4], 1 }
 0x682   :  { %10677 = vsyncpa [#allocation4 + $0x1], 1 }

</bundles_post_ra>
